<compile_context>
chip_gen: v5e
topology: v5e:2x2
jax: 0.10.0
libtpu: 0.0.40
codegen_flags: <defaults>
</compile_context>

<pallas_src>
import functools

import jax
import jax.numpy as jnp
from jax.experimental import pallas as pl
from jax.experimental.pallas import tpu as pltpu

LANE = 128       # channel padding granularity (production hidden=256 is already a 256 multiple,
                 # so v6e/v7x MXUs are fully fed; 128 is a perfect fit for v5e).
SUBLANE = 8
DEFAULT_TM = 128  # rows of the flattened-spatial dim per grid step (128-256 per review).


def _round_up(n, m):
    return (n + m - 1) // m * m


_COMPILER_PARAMS = pltpu.CompilerParams(
    dimension_semantics=("parallel", "parallel"),   # (batch, M-tiles) — all steps independent
    vmem_limit_bytes=48 * 1024 * 1024,              # <= v7x physical; raise on v5e/v6e if needed
)


# ------------------------------ Pallas kernels ------------------------------

def _conv3x3_bn_relu_kernel(x_ref, w_ref, scale_ref, shift_ref, o_ref, *, Wp, KH, KW, TM):
    """Valid KHxKW conv + folded-BN affine + ReLU for one M-tile of one image (channels-last).

    x_ref:     [1, HWpad, CP]    whole flattened image (row stride Wp), resident per batch
    w_ref:     [KH, KW, CP, NP]  HWIO weights (resident, zero-padded, bf16 or f32)
    scale_ref / shift_ref: [1, NP]  folded BN affine (zero on padded channels)
    o_ref:     [1, TM, NP]       one M-tile of the flat output (row stride Wp)
    """
    cdt = w_ref.dtype
    n = o_ref.shape[2]
    m0 = pl.multiple_of(pl.program_id(1) * TM, SUBLANE)   # tile base row (aligned)
    acc = jnp.zeros((TM, n), jnp.float32)
    # im2col-free conv: KH*KW accumulated MXU matmuls over shifted row windows of the tile.
    for u in range(KH):
        for v in range(KW):
            off = u * Wp + v
            lhs = x_ref[0, pl.ds(m0 + off, TM), :].astype(cdt)
            acc = acc + jnp.dot(lhs, w_ref[u, v], preferred_element_type=jnp.float32)
    y = jnp.maximum(acc * scale_ref[...] + shift_ref[...], 0.0)
    o_ref[0] = y.astype(o_ref.dtype)


def _fused_corr_head_kernel(z_ref, wk_ref, ksc_ref, ksh_ref, xf_ref,
                            w1_ref, s1_ref, t1_ref, w2_ref, b2_ref, o_ref,
                            *, Wzp, Wxp, KH, KW, Hk, Wk, Rz, TM):
    """Fused template conv (conv_kernel) + depthwise xcorr + head for one M-tile.

    z_ref:  [1, HWZpad, CP]  flattened template image (row stride Wzp), resident per batch
    wk_ref: [KH, KW, CP, NP] template conv weights; ksc/ksh: [1, NP] folded BN
    xf_ref: [1, Ms, NP]      flattened search features (row stride Wxp) from the search conv
    w1_ref: [NP, NP]  s1/t1: [1, NP]  w2_ref: [NP, OP]  b2_ref: [1, OP]   (resident)
    o_ref:  [1, TM, OP]      one M-tile of the flat output (row stride Wxp)
    """
    cdt = wk_ref.dtype
    NP = xf_ref.shape[2]

    # ---- template branch: 3x3 conv + BN + ReLU computed in VMEM (tiny, Rz rows) ----
    accz = jnp.zeros((Rz, NP), jnp.float32)
    for u in range(KH):
        for v in range(KW):
            off = u * Wzp + v
            accz = accz + jnp.dot(z_ref[0, off:off + Rz, :].astype(cdt), wk_ref[u, v],
                                  preferred_element_type=jnp.float32)
    zf = jnp.maximum(accz * ksc_ref[...] + ksh_ref[...], 0.0)   # padded channels stay 0

    # ---- depthwise cross-correlation for this M-tile (lane-dense VPU multiply-adds) ----
    m0 = pl.multiple_of(pl.program_id(1) * TM, SUBLANE)
    acc = jnp.zeros((TM, NP), jnp.float32)
    for u in range(Hk):
        for v in range(Wk):
            xoff = u * Wxp + v
            krow = u * Wzp + v
            acc = acc + xf_ref[0, pl.ds(m0 + xoff, TM), :] * zf[krow:krow + 1, :]

    # ---- head in VMEM: 1x1 conv -> BN affine -> ReLU -> 1x1 conv + bias (MXU, bf16) ----
    h = jnp.dot(acc.astype(cdt), w1_ref[...], preferred_element_type=jnp.float32)
    h = jnp.maximum(h * s1_ref[...] + t1_ref[...], 0.0)
    out = jnp.dot(h.astype(cdt), w2_ref[...], preferred_element_type=jnp.float32) + b2_ref[...]
    o_ref[0] = out.astype(o_ref.dtype)


# ------------------------------ pallas_call wrappers ------------------------------

def _conv3x3_bn_relu_flat(x_flat, w_hwio, scale, shift, *, Wp, n_rows_out, tm):
    """x_flat: [B, HWpad, CP] flat image; writes ALL n_rows_out rows of the flat feature map
    (row stride Wp) so downstream correlation taps never read uninitialized HBM."""
    B, hw_pad, CP = x_flat.shape
    KH, KW, _, NP = w_hwio.shape
    kernel = functools.partial(_conv3x3_bn_relu_kernel, Wp=Wp, KH=KH, KW=KW, TM=tm)
    return pl.pallas_call(
        kernel,
        out_shape=jax.ShapeDtypeStruct((B, n_rows_out, NP), jnp.float32),
        grid=(B, n_rows_out // tm),
        in_specs=[
            pl.BlockSpec((1, hw_pad, CP), lambda b, mi: (b, 0, 0)),      # resident per batch
            pl.BlockSpec((KH, KW, CP, NP), lambda b, mi: (0, 0, 0, 0)),  # resident weights
            pl.BlockSpec((1, NP), lambda b, mi: (0, 0)),
            pl.BlockSpec((1, NP), lambda b, mi: (0, 0)),
        ],
        out_specs=pl.BlockSpec((1, tm, NP), lambda b, mi: (b, mi, 0)),
        compiler_params=_COMPILER_PARAMS,
    )(x_flat, w_hwio, scale, shift)


def _fused_corr_head_call(z_flat, wk, k_scale, k_shift, xf_flat,
                          w1, h_scale, h_shift, w2, b2,
                          *, Wzp, Wxp, Hk, Wk, Rz, n_rows_out, tm):
    B, hwz_pad, CP = z_flat.shape
    _, ms, NP = xf_flat.shape
    KH, KW = wk.shape[0], wk.shape[1]
    OP = w2.shape[1]
    kernel = functools.partial(_fused_corr_head_kernel, Wzp=Wzp, Wxp=Wxp, KH=KH, KW=KW,
                               Hk=Hk, Wk=Wk, Rz=Rz, TM=tm)
    return pl.pallas_call(
        kernel,
        out_shape=jax.ShapeDtypeStruct((B, n_rows_out, OP), jnp.float32),
        grid=(B, n_rows_out // tm),
        in_specs=[
            pl.BlockSpec((1, hwz_pad, CP), lambda b, mi: (b, 0, 0)),      # template image
            pl.BlockSpec((KH, KW, CP, NP), lambda b, mi: (0, 0, 0, 0)),   # template conv weights
            pl.BlockSpec((1, NP), lambda b, mi: (0, 0)),
            pl.BlockSpec((1, NP), lambda b, mi: (0, 0)),
            pl.BlockSpec((1, ms, NP), lambda b, mi: (b, 0, 0)),           # search features (flat)
            pl.BlockSpec((NP, NP), lambda b, mi: (0, 0)),                 # head 1x1 conv #1
            pl.BlockSpec((1, NP), lambda b, mi: (0, 0)),
            pl.BlockSpec((1, NP), lambda b, mi: (0, 0)),
            pl.BlockSpec((NP, OP), lambda b, mi: (0, 0)),                 # head 1x1 conv #2
            pl.BlockSpec((1, OP), lambda b, mi: (0, 0)),
        ],
        out_specs=pl.BlockSpec((1, tm, OP), lambda b, mi: (b, mi, 0)),
        compiler_params=_COMPILER_PARAMS,
    )(z_flat, wk, k_scale, k_shift, xf_flat, w1, h_scale, h_shift, w2, b2)


# ------------------------------ forward ------------------------------

def depthwise_xcorr_forward(z, x, p, *, out_channels):
    """z (template / 'kernel' arg): [B, Cin, Hz, Wz]; x (search): [B, Cin, Hx, Wx]; NCHW.
    Returns [B, out_channels, Ho, Wo] NCHW — same semantics as DepthwiseXCorr.forward."""
    KH, KW, CP, NP = p["wk"].shape
    OP = p["w2"].shape[1]
    B, _, Hz, Wz = z.shape
    _, _, Hx, Wx = x.shape

    Wzp = _round_up(Wz, SUBLANE)      # padded row strides (aligned windows for v==0 taps)
    Wxp = _round_up(Wx, SUBLANE)

    # Geometry (all convs are VALID).
    Hso, Wso = Hx - KH + 1, Wx - KW + 1      # conv_search output
    Hk, Wk = Hz - KH + 1, Wz - KW + 1        # conv_kernel output == xcorr kernel size
    Ho, Wo = Hso - Hk + 1, Wso - Wk + 1      # final spatial output

    # Flat-M geometry.  The xcorr/head output is flattened with row stride Wxp; the search
    # feature map is produced flat with the SAME stride and consumed directly (no relayout).
    m_valid = Ho * Wxp
    tm_x = min(DEFAULT_TM, _round_up(m_valid, SUBLANE))
    m_x = _round_up(m_valid, tm_x)

    ms_needed = m_x + (Hk - 1) * Wxp + (Wk - 1)   # every xf row a correlation tap can read
    tm_s = min(DEFAULT_TM, _round_up(ms_needed, SUBLANE))
    m_s = _round_up(ms_needed, tm_s)              # conv kernel WRITES all these rows (finite)

    rz = (Hk - 1) * Wzp + Wk                      # zf rows the correlation reads

    # NCHW -> NHWC once; pad width to the sublane stride and channels to CP; flatten row-major;
    # zero-pad rows so every shifted window slice inside the kernels stays in bounds.
    def to_flat(img, Wp, rows_needed):
        _, C, H, W = img.shape
        nhwc = jnp.transpose(img, (0, 2, 3, 1))
        nhwc = jnp.pad(nhwc, ((0, 0), (0, 0), (0, Wp - W), (0, CP - C)))
        flat = nhwc.reshape(img.shape[0], H * Wp, CP)
        hw_pad = _round_up(max(H * Wp, rows_needed), SUBLANE)
        return jnp.pad(flat, ((0, 0), (0, hw_pad - H * Wp), (0, 0)))

    x_flat = to_flat(x, Wxp, m_s + (KH - 1) * Wxp + (KW - 1))
    z_flat = to_flat(z, Wzp, rz + (KH - 1) * Wzp + (KW - 1))

    # conv_search branch (its per-xcorr-tile input window is large, so it stays a separate call).
    xf_flat = _conv3x3_bn_relu_flat(x_flat, p["ws"], p["s_scale"], p["s_shift"],
                                    Wp=Wxp, n_rows_out=m_s, tm=tm_s)

    # conv_kernel branch + depthwise xcorr + head, fused in one pallas_call.
    out_flat = _fused_corr_head_call(z_flat, p["wk"], p["k_scale"], p["k_shift"], xf_flat,
                                     p["w1"], p["h_scale"], p["h_shift"], p["w2"], p["b2"],
                                     Wzp=Wzp, Wxp=Wxp, Hk=Hk, Wk=Wk, Rz=rz,
                                     n_rows_out=m_x, tm=tm_x)

    # Single slice/relayout at the very end (padded channels are exactly 0 anyway).
    out = out_flat[:, :m_valid, :].reshape(B, Ho, Wxp, OP)[:, :, :Wo, :out_channels]
    return jnp.transpose(out, (0, 3, 1, 2))


# ------------------------------ reference (plain JAX, f32) ------------------------------

def reference_forward(z, x, p):
    dn = ("NCHW", "OIHW", "NCHW")

    def cbr(inp, w, scale, shift):
        y = jax.lax.conv_general_dilated(inp, w, (1, 1), "VALID", dimension_numbers=dn)
        y = y * scale[None, :, None, None] + shift[None, :, None, None]
        return jnp.maximum(y, 0.0)

    zf = cbr(z, p["wk"], p["k_scale"], p["k_shift"])
    xf = cbr(x, p["ws"], p["s_scale"], p["s_shift"])
    B, C = zf.shape[:2]
    x1 = xf.reshape(1, B * C, xf.shape[2], xf.shape[3])
    k1 = zf.reshape(B * C, 1, zf.shape[2], zf.shape[3])
    feat = jax.lax.conv_general_dilated(x1, k1, (1, 1), "VALID",
                                        dimension_numbers=dn, feature_group_count=B * C)
    feat = feat.reshape(B, C, feat.shape[2], feat.shape[3])
    h = jax.lax.conv_general_dilated(feat, p["w1"], (1, 1), "VALID", dimension_numbers=dn)
    h = jnp.maximum(h * p["h_scale"][None, :, None, None]
                    + p["h_shift"][None, :, None, None], 0.0)
    o = jax.lax.conv_general_dilated(h, p["w2"], (1, 1), "VALID", dimension_numbers=dn)
    return o + p["b2"][None, :, None, None]


# ------------------------------ params ------------------------------

def fold_bn(gamma, beta, mean, var, eps=1e-5):
    scale = gamma / jnp.sqrt(var + eps)
    return scale, beta - mean * scale


def init_raw_params(key, in_channels, hidden, out_channels, kernel_size=3):
    """PyTorch-layout (OIHW) weights + folded inference-mode BN affines."""
    ks = jax.random.split(key, 16)

    def bn(k0, k1, k2, k3, c):
        gamma = 0.5 + jax.random.uniform(k0, (c,), jnp.float32)
        beta = 0.1 * jax.random.normal(k1, (c,), jnp.float32)
        mean = 0.1 * jax.random.normal(k2, (c,), jnp.float32)
        var = 0.5 + jax.random.uniform(k3, (c,), jnp.float32)
        return fold_bn(gamma, beta, mean, var)

    wk = 0.1 * jax.random.normal(ks[0], (hidden, in_channels, kernel_size, kernel_size), jnp.float32)
    ws = 0.1 * jax.random.normal(ks[1], (hidden, in_channels, kernel_size, kernel_size), jnp.float32)
    k_scale, k_shift = bn(ks[2], ks[3], ks[4], ks[5], hidden)
    s_scale, s_shift = bn(ks[6], ks[7], ks[8], ks[9], hidden)
    w1 = 0.1 * jax.random.normal(ks[10], (hidden, hidden, 1, 1), jnp.float32)
    h_scale, h_shift = bn(ks[11], ks[12], ks[13], ks[14], hidden)
    w2 = 0.1 * jax.random.normal(ks[15], (out_channels, hidden, 1, 1), jnp.float32)
    b2 = 0.01 * jnp.arange(out_channels, dtype=jnp.float32)
    return dict(wk=wk, ws=ws, k_scale=k_scale, k_shift=k_shift,
                s_scale=s_scale, s_shift=s_shift,
                w1=w1, h_scale=h_scale, h_shift=h_shift, w2=w2, b2=b2)


def prepare_pallas_params(raw, in_channels, hidden, out_channels, *, mxu_dtype=jnp.bfloat16):
    """Channels-last layouts, zero-padded to lane multiples.  Matmul weights are stored in
    `mxu_dtype` (bf16 for production MXU throughput, f32 for the tight correctness check)."""
    CP = _round_up(in_channels, LANE)
    NP = _round_up(hidden, LANE)
    OP = _round_up(out_channels, LANE)

    def pad2(a, rows, cols):
        return jnp.pad(a, ((0, rows - a.shape[0]), (0, cols - a.shape[1])))

    def pad_row(v, cols):                      # (n,) -> (1, cols), f32 (VPU affine)
        return jnp.pad(v[None, :], ((0, 0), (0, cols - v.shape[0])))

    def conv_w(w):                             # OIHW -> HWIO, zero-padded, MXU dtype
        hwio = jnp.transpose(w, (2, 3, 1, 0))
        hwio = jnp.pad(hwio, ((0, 0), (0, 0),
                              (0, CP - hwio.shape[2]), (0, NP - hwio.shape[3])))
        return hwio.astype(mxu_dtype)

    return dict(
        wk=conv_w(raw["wk"]), ws=conv_w(raw["ws"]),
        k_scale=pad_row(raw["k_scale"], NP), k_shift=pad_row(raw["k_shift"], NP),
        s_scale=pad_row(raw["s_scale"], NP), s_shift=pad_row(raw["s_shift"], NP),
        w1=pad2(raw["w1"][:, :, 0, 0].T, NP, NP).astype(mxu_dtype),
        h_scale=pad_row(raw["h_scale"], NP), h_shift=pad_row(raw["h_shift"], NP),
        w2=pad2(raw["w2"][:, :, 0, 0].T, NP, OP).astype(mxu_dtype),
        b2=pad_row(raw["b2"], OP),
    )


# ------------------------------ main ------------------------------

if __name__ == "__main__":
    B, C_in, hidden, out_c = 2, 4, 16, 8
    Hz = Wz = 8      # template spatial
    Hx = Wx = 16     # search spatial

    key = jax.random.PRNGKey(0)
    kz, kx, kp = jax.random.split(key, 3)
    z = jax.random.normal(kz, (B, C_in, Hz, Wz), jnp.float32)   # "kernel" arg (template)
    x = jax.random.normal(kx, (B, C_in, Hx, Wx), jnp.float32)   # "search" arg
    raw = init_raw_params(kp, C_in, hidden, out_c)
    ref = jax.block_until_ready(reference_forward(z, x, raw))

    fwd = jax.jit(depthwise_xcorr_forward, static_argnames=("out_channels",))

    # 1) f32 MXU path: tight check against the f32 reference (correctness gate).
    p32 = prepare_pallas_params(raw, C_in, hidden, out_c, mxu_dtype=jnp.float32)
    out32 = jax.block_until_ready(fwd(z, x, p32, out_channels=out_c))
    assert out32.shape == ref.shape, (out32.shape, ref.shape)
    assert jnp.allclose(out32, ref, atol=1e-4, rtol=1e-4), float(jnp.max(jnp.abs(out32 - ref)))

    # 2) bf16 MXU path (production): f32 accumulation, looser tolerance (per review).
    pbf = prepare_pallas_params(raw, C_in, hidden, out_c, mxu_dtype=jnp.bfloat16)
    outbf = jax.block_until_ready(fwd(z, x, pbf, out_channels=out_c))
    assert bool(jnp.all(jnp.isfinite(outbf)))
    assert jnp.allclose(outbf, ref, atol=1e-1, rtol=1e-1), float(jnp.max(jnp.abs(outbf - ref)))

    print("KERNEL_OK")
</pallas_src>

<mosaic_0001>
module attributes {stable_mosaic.version = 11 : i64} {
  func.func @_conv3x3_bn_relu_kernel(%arg0: i32, %arg1: i32, %arg2: memref<1x424x128xf32, #tpu.memory_space<vmem>>, %arg3: memref<3x3x128x128xf32, #tpu.memory_space<vmem>>, %arg4: memref<1x128xf32, #tpu.memory_space<vmem>>, %arg5: memref<1x128xf32, #tpu.memory_space<vmem>>, %arg6: memref<1x128x128xf32, #tpu.memory_space<vmem>>) attributes {dimension_semantics = [#tpu.dimension_semantics<parallel>, #tpu.dimension_semantics<parallel>], iteration_bounds = array<i64: 2, 3>, scalar_prefetch = 0 : i64, scratch_operands = 0 : i64, tpu.core_type = #tpu.core_type<tc>, window_params = [{transform_indices = @transform_0, window_bounds = array<i64: 1, 424, 128>}, {pipeline_mode = #tpu.pipeline_mode<synchronous>, transform_indices = @transform_1, window_bounds = array<i64: 3, 3, 128, 128>}, {pipeline_mode = #tpu.pipeline_mode<synchronous>, transform_indices = @transform_2, window_bounds = array<i64: 1, 128>}, {pipeline_mode = #tpu.pipeline_mode<synchronous>, transform_indices = @transform_3, window_bounds = array<i64: 1, 128>}, {transform_indices = @transform_4, window_bounds = array<i64: 1, 128, 128>}]} {
    %c128_i32 = arith.constant 128 : i32
    %0 = arith.muli %arg1, %c128_i32 : i32
    %1 = tpu.assume_multiple %0, 8 : i32
    %cst = arith.constant 0.000000e+00 : f32
    %2 = vector.broadcast %cst : f32 to vector<128x128xf32>
    %c0_i32 = arith.constant 0 : i32
    %3 = arith.addi %1, %c0_i32 : i32
    %c0 = arith.constant 0 : index
    %4 = arith.index_cast %3 : i32 to index
    %c0_0 = arith.constant 0 : index
    %5 = vector.load %arg2[%c0, %4, %c0_0] : memref<1x424x128xf32, #tpu.memory_space<vmem>>, vector<1x128x128xf32>
    %6 = vector.shape_cast %5 : vector<1x128x128xf32> to vector<128x128xf32>
    %c0_1 = arith.constant 0 : index
    %c0_2 = arith.constant 0 : index
    %c0_3 = arith.constant 0 : index
    %c0_4 = arith.constant 0 : index
    %7 = vector.load %arg3[%c0_1, %c0_2, %c0_3, %c0_4] : memref<3x3x128x128xf32, #tpu.memory_space<vmem>>, vector<1x1x128x128xf32>
    %8 = vector.shape_cast %7 : vector<1x1x128x128xf32> to vector<128x128xf32>
    %cst_5 = arith.constant dense<0.000000e+00> : vector<128x128xf32>
    %9 = tpu.matmul %6, %8, %cst_5 {dimension_numbers = #tpu.dot_dimension_numbers<[1], [0], [0], [1], [0, 0, 1, 1], [], []>} : vector<128x128xf32>, vector<128x128xf32>, vector<128x128xf32> -> vector<128x128xf32>
    %10 = arith.addf %2, %9 : vector<128x128xf32>
    %c1_i32 = arith.constant 1 : i32
    %11 = arith.addi %1, %c1_i32 : i32
    %c0_6 = arith.constant 0 : index
    %12 = arith.index_cast %11 : i32 to index
    %c0_7 = arith.constant 0 : index
    %13 = vector.load %arg2[%c0_6, %12, %c0_7] : memref<1x424x128xf32, #tpu.memory_space<vmem>>, vector<1x128x128xf32>
    %14 = vector.shape_cast %13 : vector<1x128x128xf32> to vector<128x128xf32>
    %c0_8 = arith.constant 0 : index
    %c1 = arith.constant 1 : index
    %c0_9 = arith.constant 0 : index
    %c0_10 = arith.constant 0 : index
    %15 = vector.load %arg3[%c0_8, %c1, %c0_9, %c0_10] : memref<3x3x128x128xf32, #tpu.memory_space<vmem>>, vector<1x1x128x128xf32>
    %16 = vector.shape_cast %15 : vector<1x1x128x128xf32> to vector<128x128xf32>
    %cst_11 = arith.constant dense<0.000000e+00> : vector<128x128xf32>
    %17 = tpu.matmul %14, %16, %cst_11 {dimension_numbers = #tpu.dot_dimension_numbers<[1], [0], [0], [1], [0, 0, 1, 1], [], []>} : vector<128x128xf32>, vector<128x128xf32>, vector<128x128xf32> -> vector<128x128xf32>
    %18 = arith.addf %10, %17 : vector<128x128xf32>
    %c2_i32 = arith.constant 2 : i32
    %19 = arith.addi %1, %c2_i32 : i32
    %c0_12 = arith.constant 0 : index
    %20 = arith.index_cast %19 : i32 to index
    %c0_13 = arith.constant 0 : index
    %21 = vector.load %arg2[%c0_12, %20, %c0_13] : memref<1x424x128xf32, #tpu.memory_space<vmem>>, vector<1x128x128xf32>
    %22 = vector.shape_cast %21 : vector<1x128x128xf32> to vector<128x128xf32>
    %c0_14 = arith.constant 0 : index
    %c2 = arith.constant 2 : index
    %c0_15 = arith.constant 0 : index
    %c0_16 = arith.constant 0 : index
    %23 = vector.load %arg3[%c0_14, %c2, %c0_15, %c0_16] : memref<3x3x128x128xf32, #tpu.memory_space<vmem>>, vector<1x1x128x128xf32>
    %24 = vector.shape_cast %23 : vector<1x1x128x128xf32> to vector<128x128xf32>
    %cst_17 = arith.constant dense<0.000000e+00> : vector<128x128xf32>
    %25 = tpu.matmul %22, %24, %cst_17 {dimension_numbers = #tpu.dot_dimension_numbers<[1], [0], [0], [1], [0, 0, 1, 1], [], []>} : vector<128x128xf32>, vector<128x128xf32>, vector<128x128xf32> -> vector<128x128xf32>
    %26 = arith.addf %18, %25 : vector<128x128xf32>
    %c16_i32 = arith.constant 16 : i32
    %27 = arith.addi %1, %c16_i32 : i32
    %c0_18 = arith.constant 0 : index
    %28 = arith.index_cast %27 : i32 to index
    %c0_19 = arith.constant 0 : index
    %29 = vector.load %arg2[%c0_18, %28, %c0_19] : memref<1x424x128xf32, #tpu.memory_space<vmem>>, vector<1x128x128xf32>
    %30 = vector.shape_cast %29 : vector<1x128x128xf32> to vector<128x128xf32>
    %c1_20 = arith.constant 1 : index
    %c0_21 = arith.constant 0 : index
    %c0_22 = arith.constant 0 : index
    %c0_23 = arith.constant 0 : index
    %31 = vector.load %arg3[%c1_20, %c0_21, %c0_22, %c0_23] : memref<3x3x128x128xf32, #tpu.memory_space<vmem>>, vector<1x1x128x128xf32>
    %32 = vector.shape_cast %31 : vector<1x1x128x128xf32> to vector<128x128xf32>
    %cst_24 = arith.constant dense<0.000000e+00> : vector<128x128xf32>
    %33 = tpu.matmul %30, %32, %cst_24 {dimension_numbers = #tpu.dot_dimension_numbers<[1], [0], [0], [1], [0, 0, 1, 1], [], []>} : vector<128x128xf32>, vector<128x128xf32>, vector<128x128xf32> -> vector<128x128xf32>
    %34 = arith.addf %26, %33 : vector<128x128xf32>
    %c17_i32 = arith.constant 17 : i32
    %35 = arith.addi %1, %c17_i32 : i32
    %c0_25 = arith.constant 0 : index
    %36 = arith.index_cast %35 : i32 to index
    %c0_26 = arith.constant 0 : index
    %37 = vector.load %arg2[%c0_25, %36, %c0_26] : memref<1x424x128xf32, #tpu.memory_space<vmem>>, vector<1x128x128xf32>
    %38 = vector.shape_cast %37 : vector<1x128x128xf32> to vector<128x128xf32>
    %c1_27 = arith.constant 1 : index
    %c1_28 = arith.constant 1 : index
    %c0_29 = arith.constant 0 : index
    %c0_30 = arith.constant 0 : index
    %39 = vector.load %arg3[%c1_27, %c1_28, %c0_29, %c0_30] : memref<3x3x128x128xf32, #tpu.memory_space<vmem>>, vector<1x1x128x128xf32>
    %40 = vector.shape_cast %39 : vector<1x1x128x128xf32> to vector<128x128xf32>
    %cst_31 = arith.constant dense<0.000000e+00> : vector<128x128xf32>
    %41 = tpu.matmul %38, %40, %cst_31 {dimension_numbers = #tpu.dot_dimension_numbers<[1], [0], [0], [1], [0, 0, 1, 1], [], []>} : vector<128x128xf32>, vector<128x128xf32>, vector<128x128xf32> -> vector<128x128xf32>
    %42 = arith.addf %34, %41 : vector<128x128xf32>
    %c18_i32 = arith.constant 18 : i32
    %43 = arith.addi %1, %c18_i32 : i32
    %c0_32 = arith.constant 0 : index
    %44 = arith.index_cast %43 : i32 to index
    %c0_33 = arith.constant 0 : index
    %45 = vector.load %arg2[%c0_32, %44, %c0_33] : memref<1x424x128xf32, #tpu.memory_space<vmem>>, vector<1x128x128xf32>
    %46 = vector.shape_cast %45 : vector<1x128x128xf32> to vector<128x128xf32>
    %c1_34 = arith.constant 1 : index
    %c2_35 = arith.constant 2 : index
    %c0_36 = arith.constant 0 : index
    %c0_37 = arith.constant 0 : index
    %47 = vector.load %arg3[%c1_34, %c2_35, %c0_36, %c0_37] : memref<3x3x128x128xf32, #tpu.memory_space<vmem>>, vector<1x1x128x128xf32>
    %48 = vector.shape_cast %47 : vector<1x1x128x128xf32> to vector<128x128xf32>
    %cst_38 = arith.constant dense<0.000000e+00> : vector<128x128xf32>
    %49 = tpu.matmul %46, %48, %cst_38 {dimension_numbers = #tpu.dot_dimension_numbers<[1], [0], [0], [1], [0, 0, 1, 1], [], []>} : vector<128x128xf32>, vector<128x128xf32>, vector<128x128xf32> -> vector<128x128xf32>
    %50 = arith.addf %42, %49 : vector<128x128xf32>
    %c32_i32 = arith.constant 32 : i32
    %51 = arith.addi %1, %c32_i32 : i32
    %c0_39 = arith.constant 0 : index
    %52 = arith.index_cast %51 : i32 to index
    %c0_40 = arith.constant 0 : index
    %53 = vector.load %arg2[%c0_39, %52, %c0_40] : memref<1x424x128xf32, #tpu.memory_space<vmem>>, vector<1x128x128xf32>
    %54 = vector.shape_cast %53 : vector<1x128x128xf32> to vector<128x128xf32>
    %c2_41 = arith.constant 2 : index
    %c0_42 = arith.constant 0 : index
    %c0_43 = arith.constant 0 : index
    %c0_44 = arith.constant 0 : index
    %55 = vector.load %arg3[%c2_41, %c0_42, %c0_43, %c0_44] : memref<3x3x128x128xf32, #tpu.memory_space<vmem>>, vector<1x1x128x128xf32>
    %56 = vector.shape_cast %55 : vector<1x1x128x128xf32> to vector<128x128xf32>
    %cst_45 = arith.constant dense<0.000000e+00> : vector<128x128xf32>
    %57 = tpu.matmul %54, %56, %cst_45 {dimension_numbers = #tpu.dot_dimension_numbers<[1], [0], [0], [1], [0, 0, 1, 1], [], []>} : vector<128x128xf32>, vector<128x128xf32>, vector<128x128xf32> -> vector<128x128xf32>
    %58 = arith.addf %50, %57 : vector<128x128xf32>
    %c33_i32 = arith.constant 33 : i32
    %59 = arith.addi %1, %c33_i32 : i32
    %c0_46 = arith.constant 0 : index
    %60 = arith.index_cast %59 : i32 to index
    %c0_47 = arith.constant 0 : index
    %61 = vector.load %arg2[%c0_46, %60, %c0_47] : memref<1x424x128xf32, #tpu.memory_space<vmem>>, vector<1x128x128xf32>
    %62 = vector.shape_cast %61 : vector<1x128x128xf32> to vector<128x128xf32>
    %c2_48 = arith.constant 2 : index
    %c1_49 = arith.constant 1 : index
    %c0_50 = arith.constant 0 : index
    %c0_51 = arith.constant 0 : index
    %63 = vector.load %arg3[%c2_48, %c1_49, %c0_50, %c0_51] : memref<3x3x128x128xf32, #tpu.memory_space<vmem>>, vector<1x1x128x128xf32>
    %64 = vector.shape_cast %63 : vector<1x1x128x128xf32> to vector<128x128xf32>
    %cst_52 = arith.constant dense<0.000000e+00> : vector<128x128xf32>
    %65 = tpu.matmul %62, %64, %cst_52 {dimension_numbers = #tpu.dot_dimension_numbers<[1], [0], [0], [1], [0, 0, 1, 1], [], []>} : vector<128x128xf32>, vector<128x128xf32>, vector<128x128xf32> -> vector<128x128xf32>
    %66 = arith.addf %58, %65 : vector<128x128xf32>
    %c34_i32 = arith.constant 34 : i32
    %67 = arith.addi %1, %c34_i32 : i32
    %c0_53 = arith.constant 0 : index
    %68 = arith.index_cast %67 : i32 to index
    %c0_54 = arith.constant 0 : index
    %69 = vector.load %arg2[%c0_53, %68, %c0_54] : memref<1x424x128xf32, #tpu.memory_space<vmem>>, vector<1x128x128xf32>
    %70 = vector.shape_cast %69 : vector<1x128x128xf32> to vector<128x128xf32>
    %c2_55 = arith.constant 2 : index
    %c2_56 = arith.constant 2 : index
    %c0_57 = arith.constant 0 : index
    %c0_58 = arith.constant 0 : index
    %71 = vector.load %arg3[%c2_55, %c2_56, %c0_57, %c0_58] : memref<3x3x128x128xf32, #tpu.memory_space<vmem>>, vector<1x1x128x128xf32>
    %72 = vector.shape_cast %71 : vector<1x1x128x128xf32> to vector<128x128xf32>
    %cst_59 = arith.constant dense<0.000000e+00> : vector<128x128xf32>
    %73 = tpu.matmul %70, %72, %cst_59 {dimension_numbers = #tpu.dot_dimension_numbers<[1], [0], [0], [1], [0, 0, 1, 1], [], []>} : vector<128x128xf32>, vector<128x128xf32>, vector<128x128xf32> -> vector<128x128xf32>
    %74 = arith.addf %66, %73 : vector<128x128xf32>
    %c0_60 = arith.constant 0 : index
    %c0_61 = arith.constant 0 : index
    %75 = vector.load %arg4[%c0_60, %c0_61] : memref<1x128xf32, #tpu.memory_space<vmem>>, vector<1x128xf32>
    %76 = vector.broadcast %75 : vector<1x128xf32> to vector<128x128xf32>
    %77 = arith.mulf %74, %76 : vector<128x128xf32>
    %c0_62 = arith.constant 0 : index
    %c0_63 = arith.constant 0 : index
    %78 = vector.load %arg5[%c0_62, %c0_63] : memref<1x128xf32, #tpu.memory_space<vmem>>, vector<1x128xf32>
    %79 = vector.broadcast %78 : vector<1x128xf32> to vector<128x128xf32>
    %80 = arith.addf %77, %79 : vector<128x128xf32>
    %cst_64 = arith.constant 0.000000e+00 : f32
    %81 = vector.broadcast %cst_64 : f32 to vector<128x128xf32>
    %82 = arith.maximumf %80, %81 : vector<128x128xf32>
    %c0_65 = arith.constant 0 : index
    %c0_66 = arith.constant 0 : index
    %c0_67 = arith.constant 0 : index
    %83 = vector.load %arg6[%c0_65, %c0_66, %c0_67] : memref<1x128x128xf32, #tpu.memory_space<vmem>>, vector<1x128x128xf32>
    %84 = vector.shape_cast %83 : vector<1x128x128xf32> to vector<128x128xf32>
    %85 = vector.shape_cast %82 : vector<128x128xf32> to vector<1x128x128xf32>
    tpu.vector_store %arg6[%c0_65, %c0_66, %c0_67], %85 {strides = array<i32>} : memref<1x128x128xf32, #tpu.memory_space<vmem>>, vector<1x128x128xf32>,
    return
  }
  func.func @transform_0(%arg0: i32, %arg1: i32) -> (i32, i32, i32) {
    %c0_i32 = arith.constant 0 : i32
    %c0_i32_0 = arith.constant 0 : i32
    %c0_i32_1 = arith.constant 0 : i32
    return %arg0, %c0_i32, %c0_i32_0 : i32, i32, i32
  }
  func.func @transform_1(%arg0: i32, %arg1: i32) -> (i32, i32, i32, i32) {
    %c0_i32 = arith.constant 0 : i32
    %c0_i32_0 = arith.constant 0 : i32
    %c0_i32_1 = arith.constant 0 : i32
    %c0_i32_2 = arith.constant 0 : i32
    %c0_i32_3 = arith.constant 0 : i32
    return %c0_i32, %c0_i32_0, %c0_i32_1, %c0_i32_2 : i32, i32, i32, i32
  }
  func.func @transform_2(%arg0: i32, %arg1: i32) -> (i32, i32) {
    %c0_i32 = arith.constant 0 : i32
    %c0_i32_0 = arith.constant 0 : i32
    %c0_i32_1 = arith.constant 0 : i32
    return %c0_i32, %c0_i32_0 : i32, i32
  }
  func.func @transform_3(%arg0: i32, %arg1: i32) -> (i32, i32) {
    %c0_i32 = arith.constant 0 : i32
    %c0_i32_0 = arith.constant 0 : i32
    %c0_i32_1 = arith.constant 0 : i32
    return %c0_i32, %c0_i32_0 : i32, i32
  }
  func.func @transform_4(%arg0: i32, %arg1: i32) -> (i32, i32, i32) {
    %c0_i32 = arith.constant 0 : i32
    %c0_i32_0 = arith.constant 0 : i32
    return %arg0, %arg1, %c0_i32 : i32, i32, i32
  }
}

module attributes {stable_mosaic.version = 11 : i64} {
  func.func @_fused_corr_head_kernel(%arg0: i32, %arg1: i32, %arg2: memref<1x64x128xf32, #tpu.memory_space<vmem>>, %arg3: memref<3x3x128x128xf32, #tpu.memory_space<vmem>>, %arg4: memref<1x128xf32, #tpu.memory_space<vmem>>, %arg5: memref<1x128xf32, #tpu.memory_space<vmem>>, %arg6: memref<1x384x128xf32, #tpu.memory_space<vmem>>, %arg7: memref<128x128xf32, #tpu.memory_space<vmem>>, %arg8: memref<1x128xf32, #tpu.memory_space<vmem>>, %arg9: memref<1x128xf32, #tpu.memory_space<vmem>>, %arg10: memref<128x128xf32, #tpu.memory_space<vmem>>, %arg11: memref<1x128xf32, #tpu.memory_space<vmem>>, %arg12: memref<1x128x128xf32, #tpu.memory_space<vmem>>) attributes {dimension_semantics = [#tpu.dimension_semantics<parallel>, #tpu.dimension_semantics<parallel>], iteration_bounds = array<i64: 2, 2>, scalar_prefetch = 0 : i64, scratch_operands = 0 : i64, tpu.core_type = #tpu.core_type<tc>, window_params = [{transform_indices = @transform_0, window_bounds = array<i64: 1, 64, 128>}, {pipeline_mode = #tpu.pipeline_mode<synchronous>, transform_indices = @transform_1, window_bounds = array<i64: 3, 3, 128, 128>}, {pipeline_mode = #tpu.pipeline_mode<synchronous>, transform_indices = @transform_2, window_bounds = array<i64: 1, 128>}, {pipeline_mode = #tpu.pipeline_mode<synchronous>, transform_indices = @transform_3, window_bounds = array<i64: 1, 128>}, {transform_indices = @transform_4, window_bounds = array<i64: 1, 384, 128>}, {pipeline_mode = #tpu.pipeline_mode<synchronous>, transform_indices = @transform_5, window_bounds = array<i64: 128, 128>}, {pipeline_mode = #tpu.pipeline_mode<synchronous>, transform_indices = @transform_6, window_bounds = array<i64: 1, 128>}, {pipeline_mode = #tpu.pipeline_mode<synchronous>, transform_indices = @transform_7, window_bounds = array<i64: 1, 128>}, {pipeline_mode = #tpu.pipeline_mode<synchronous>, transform_indices = @transform_8, window_bounds = array<i64: 128, 128>}, {pipeline_mode = #tpu.pipeline_mode<synchronous>, transform_indices = @transform_9, window_bounds = array<i64: 1, 128>}, {transform_indices = @transform_10, window_bounds = array<i64: 1, 128, 128>}]} {
    %cst = arith.constant 0.000000e+00 : f32
    %0 = vector.broadcast %cst : f32 to vector<46x128xf32>
    %c0 = arith.constant 0 : index
    %c0_0 = arith.constant 0 : index
    %c0_1 = arith.constant 0 : index
    %1 = vector.load %arg2[%c0, %c0_0, %c0_1] : memref<1x64x128xf32, #tpu.memory_space<vmem>>, vector<1x46x128xf32>
    %2 = vector.shape_cast %1 : vector<1x46x128xf32> to vector<46x128xf32>
    %c0_2 = arith.constant 0 : index
    %c0_3 = arith.constant 0 : index
    %c0_4 = arith.constant 0 : index
    %c0_5 = arith.constant 0 : index
    %3 = vector.load %arg3[%c0_2, %c0_3, %c0_4, %c0_5] : memref<3x3x128x128xf32, #tpu.memory_space<vmem>>, vector<1x1x128x128xf32>
    %4 = vector.shape_cast %3 : vector<1x1x128x128xf32> to vector<128x128xf32>
    %cst_6 = arith.constant dense<0.000000e+00> : vector<46x128xf32>
    %5 = tpu.matmul %2, %4, %cst_6 {dimension_numbers = #tpu.dot_dimension_numbers<[1], [0], [0], [1], [0, 0, 1, 1], [], []>} : vector<46x128xf32>, vector<128x128xf32>, vector<46x128xf32> -> vector<46x128xf32>
    %6 = arith.addf %0, %5 : vector<46x128xf32>
    %c0_7 = arith.constant 0 : index
    %c1 = arith.constant 1 : index
    %c0_8 = arith.constant 0 : index
    %7 = vector.load %arg2[%c0_7, %c1, %c0_8] : memref<1x64x128xf32, #tpu.memory_space<vmem>>, vector<1x46x128xf32>
    %8 = vector.shape_cast %7 : vector<1x46x128xf32> to vector<46x128xf32>
    %c0_9 = arith.constant 0 : index
    %c1_10 = arith.constant 1 : index
    %c0_11 = arith.constant 0 : index
    %c0_12 = arith.constant 0 : index
    %9 = vector.load %arg3[%c0_9, %c1_10, %c0_11, %c0_12] : memref<3x3x128x128xf32, #tpu.memory_space<vmem>>, vector<1x1x128x128xf32>
    %10 = vector.shape_cast %9 : vector<1x1x128x128xf32> to vector<128x128xf32>
    %cst_13 = arith.constant dense<0.000000e+00> : vector<46x128xf32>
    %11 = tpu.matmul %8, %10, %cst_13 {dimension_numbers = #tpu.dot_dimension_numbers<[1], [0], [0], [1], [0, 0, 1, 1], [], []>} : vector<46x128xf32>, vector<128x128xf32>, vector<46x128xf32> -> vector<46x128xf32>
    %12 = arith.addf %6, %11 : vector<46x128xf32>
    %c0_14 = arith.constant 0 : index
    %c2 = arith.constant 2 : index
    %c0_15 = arith.constant 0 : index
    %13 = vector.load %arg2[%c0_14, %c2, %c0_15] : memref<1x64x128xf32, #tpu.memory_space<vmem>>, vector<1x46x128xf32>
    %14 = vector.shape_cast %13 : vector<1x46x128xf32> to vector<46x128xf32>
    %c0_16 = arith.constant 0 : index
    %c2_17 = arith.constant 2 : index
    %c0_18 = arith.constant 0 : index
    %c0_19 = arith.constant 0 : index
    %15 = vector.load %arg3[%c0_16, %c2_17, %c0_18, %c0_19] : memref<3x3x128x128xf32, #tpu.memory_space<vmem>>, vector<1x1x128x128xf32>
    %16 = vector.shape_cast %15 : vector<1x1x128x128xf32> to vector<128x128xf32>
    %cst_20 = arith.constant dense<0.000000e+00> : vector<46x128xf32>
    %17 = tpu.matmul %14, %16, %cst_20 {dimension_numbers = #tpu.dot_dimension_numbers<[1], [0], [0], [1], [0, 0, 1, 1], [], []>} : vector<46x128xf32>, vector<128x128xf32>, vector<46x128xf32> -> vector<46x128xf32>
    %18 = arith.addf %12, %17 : vector<46x128xf32>
    %c0_21 = arith.constant 0 : index
    %c8 = arith.constant 8 : index
    %c0_22 = arith.constant 0 : index
    %19 = vector.load %arg2[%c0_21, %c8, %c0_22] : memref<1x64x128xf32, #tpu.memory_space<vmem>>, vector<1x46x128xf32>
    %20 = vector.shape_cast %19 : vector<1x46x128xf32> to vector<46x128xf32>
    %c1_23 = arith.constant 1 : index
    %c0_24 = arith.constant 0 : index
    %c0_25 = arith.constant 0 : index
    %c0_26 = arith.constant 0 : index
    %21 = vector.load %arg3[%c1_23, %c0_24, %c0_25, %c0_26] : memref<3x3x128x128xf32, #tpu.memory_space<vmem>>, vector<1x1x128x128xf32>
    %22 = vector.shape_cast %21 : vector<1x1x128x128xf32> to vector<128x128xf32>
    %cst_27 = arith.constant dense<0.000000e+00> : vector<46x128xf32>
    %23 = tpu.matmul %20, %22, %cst_27 {dimension_numbers = #tpu.dot_dimension_numbers<[1], [0], [0], [1], [0, 0, 1, 1], [], []>} : vector<46x128xf32>, vector<128x128xf32>, vector<46x128xf32> -> vector<46x128xf32>
    %24 = arith.addf %18, %23 : vector<46x128xf32>
    %c0_28 = arith.constant 0 : index
    %c9 = arith.constant 9 : index
    %c0_29 = arith.constant 0 : index
    %25 = vector.load %arg2[%c0_28, %c9, %c0_29] : memref<1x64x128xf32, #tpu.memory_space<vmem>>, vector<1x46x128xf32>
    %26 = vector.shape_cast %25 : vector<1x46x128xf32> to vector<46x128xf32>
    %c1_30 = arith.constant 1 : index
    %c1_31 = arith.constant 1 : index
    %c0_32 = arith.constant 0 : index
    %c0_33 = arith.constant 0 : index
    %27 = vector.load %arg3[%c1_30, %c1_31, %c0_32, %c0_33] : memref<3x3x128x128xf32, #tpu.memory_space<vmem>>, vector<1x1x128x128xf32>
    %28 = vector.shape_cast %27 : vector<1x1x128x128xf32> to vector<128x128xf32>
    %cst_34 = arith.constant dense<0.000000e+00> : vector<46x128xf32>
    %29 = tpu.matmul %26, %28, %cst_34 {dimension_numbers = #tpu.dot_dimension_numbers<[1], [0], [0], [1], [0, 0, 1, 1], [], []>} : vector<46x128xf32>, vector<128x128xf32>, vector<46x128xf32> -> vector<46x128xf32>
    %30 = arith.addf %24, %29 : vector<46x128xf32>
    %c0_35 = arith.constant 0 : index
    %c10 = arith.constant 10 : index
    %c0_36 = arith.constant 0 : index
    %31 = vector.load %arg2[%c0_35, %c10, %c0_36] : memref<1x64x128xf32, #tpu.memory_space<vmem>>, vector<1x46x128xf32>
    %32 = vector.shape_cast %31 : vector<1x46x128xf32> to vector<46x128xf32>
    %c1_37 = arith.constant 1 : index
    %c2_38 = arith.constant 2 : index
    %c0_39 = arith.constant 0 : index
    %c0_40 = arith.constant 0 : index
    %33 = vector.load %arg3[%c1_37, %c2_38, %c0_39, %c0_40] : memref<3x3x128x128xf32, #tpu.memory_space<vmem>>, vector<1x1x128x128xf32>
    %34 = vector.shape_cast %33 : vector<1x1x128x128xf32> to vector<128x128xf32>
    %cst_41 = arith.constant dense<0.000000e+00> : vector<46x128xf32>
    %35 = tpu.matmul %32, %34, %cst_41 {dimension_numbers = #tpu.dot_dimension_numbers<[1], [0], [0], [1], [0, 0, 1, 1], [], []>} : vector<46x128xf32>, vector<128x128xf32>, vector<46x128xf32> -> vector<46x128xf32>
    %36 = arith.addf %30, %35 : vector<46x128xf32>
    %c0_42 = arith.constant 0 : index
    %c16 = arith.constant 16 : index
    %c0_43 = arith.constant 0 : index
    %37 = vector.load %arg2[%c0_42, %c16, %c0_43] : memref<1x64x128xf32, #tpu.memory_space<vmem>>, vector<1x46x128xf32>
    %38 = vector.shape_cast %37 : vector<1x46x128xf32> to vector<46x128xf32>
    %c2_44 = arith.constant 2 : index
    %c0_45 = arith.constant 0 : index
    %c0_46 = arith.constant 0 : index
    %c0_47 = arith.constant 0 : index
    %39 = vector.load %arg3[%c2_44, %c0_45, %c0_46, %c0_47] : memref<3x3x128x128xf32, #tpu.memory_space<vmem>>, vector<1x1x128x128xf32>
    %40 = vector.shape_cast %39 : vector<1x1x128x128xf32> to vector<128x128xf32>
    %cst_48 = arith.constant dense<0.000000e+00> : vector<46x128xf32>
    %41 = tpu.matmul %38, %40, %cst_48 {dimension_numbers = #tpu.dot_dimension_numbers<[1], [0], [0], [1], [0, 0, 1, 1], [], []>} : vector<46x128xf32>, vector<128x128xf32>, vector<46x128xf32> -> vector<46x128xf32>
    %42 = arith.addf %36, %41 : vector<46x128xf32>
    %c0_49 = arith.constant 0 : index
    %c17 = arith.constant 17 : index
    %c0_50 = arith.constant 0 : index
    %43 = vector.load %arg2[%c0_49, %c17, %c0_50] : memref<1x64x128xf32, #tpu.memory_space<vmem>>, vector<1x46x128xf32>
    %44 = vector.shape_cast %43 : vector<1x46x128xf32> to vector<46x128xf32>
    %c2_51 = arith.constant 2 : index
    %c1_52 = arith.constant 1 : index
    %c0_53 = arith.constant 0 : index
    %c0_54 = arith.constant 0 : index
    %45 = vector.load %arg3[%c2_51, %c1_52, %c0_53, %c0_54] : memref<3x3x128x128xf32, #tpu.memory_space<vmem>>, vector<1x1x128x128xf32>
    %46 = vector.shape_cast %45 : vector<1x1x128x128xf32> to vector<128x128xf32>
    %cst_55 = arith.constant dense<0.000000e+00> : vector<46x128xf32>
    %47 = tpu.matmul %44, %46, %cst_55 {dimension_numbers = #tpu.dot_dimension_numbers<[1], [0], [0], [1], [0, 0, 1, 1], [], []>} : vector<46x128xf32>, vector<128x128xf32>, vector<46x128xf32> -> vector<46x128xf32>
    %48 = arith.addf %42, %47 : vector<46x128xf32>
    %c0_56 = arith.constant 0 : index
    %c18 = arith.constant 18 : index
    %c0_57 = arith.constant 0 : index
    %49 = vector.load %arg2[%c0_56, %c18, %c0_57] : memref<1x64x128xf32, #tpu.memory_space<vmem>>, vector<1x46x128xf32>
    %50 = vector.shape_cast %49 : vector<1x46x128xf32> to vector<46x128xf32>
    %c2_58 = arith.constant 2 : index
    %c2_59 = arith.constant 2 : index
    %c0_60 = arith.constant 0 : index
    %c0_61 = arith.constant 0 : index
    %51 = vector.load %arg3[%c2_58, %c2_59, %c0_60, %c0_61] : memref<3x3x128x128xf32, #tpu.memory_space<vmem>>, vector<1x1x128x128xf32>
    %52 = vector.shape_cast %51 : vector<1x1x128x128xf32> to vector<128x128xf32>
    %cst_62 = arith.constant dense<0.000000e+00> : vector<46x128xf32>
    %53 = tpu.matmul %50, %52, %cst_62 {dimension_numbers = #tpu.dot_dimension_numbers<[1], [0], [0], [1], [0, 0, 1, 1], [], []>} : vector<46x128xf32>, vector<128x128xf32>, vector<46x128xf32> -> vector<46x128xf32>
    %54 = arith.addf %48, %53 : vector<46x128xf32>
    %c0_63 = arith.constant 0 : index
    %c0_64 = arith.constant 0 : index
    %55 = vector.load %arg4[%c0_63, %c0_64] : memref<1x128xf32, #tpu.memory_space<vmem>>, vector<1x128xf32>
    %56 = vector.broadcast %55 : vector<1x128xf32> to vector<46x128xf32>
    %57 = arith.mulf %54, %56 : vector<46x128xf32>
    %c0_65 = arith.constant 0 : index
    %c0_66 = arith.constant 0 : index
    %58 = vector.load %arg5[%c0_65, %c0_66] : memref<1x128xf32, #tpu.memory_space<vmem>>, vector<1x128xf32>
    %59 = vector.broadcast %58 : vector<1x128xf32> to vector<46x128xf32>
    %60 = arith.addf %57, %59 : vector<46x128xf32>
    %cst_67 = arith.constant 0.000000e+00 : f32
    %61 = vector.broadcast %cst_67 : f32 to vector<46x128xf32>
    %62 = arith.maximumf %60, %61 : vector<46x128xf32>
    %c128_i32 = arith.constant 128 : i32
    %63 = arith.muli %arg1, %c128_i32 : i32
    %64 = tpu.assume_multiple %63, 8 : i32
    %cst_68 = arith.constant 0.000000e+00 : f32
    %65 = vector.broadcast %cst_68 : f32 to vector<128x128xf32>
    %c0_i32 = arith.constant 0 : i32
    %66 = arith.addi %64, %c0_i32 : i32
    %c0_69 = arith.constant 0 : index
    %67 = arith.index_cast %66 : i32 to index
    %c0_70 = arith.constant 0 : index
    %68 = vector.load %arg6[%c0_69, %67, %c0_70] : memref<1x384x128xf32, #tpu.memory_space<vmem>>, vector<1x128x128xf32>
    %69 = vector.shape_cast %68 : vector<1x128x128xf32> to vector<128x128xf32>
    %70 = vector.extract_strided_slice %62 {offsets = [0, 0], sizes = [1, 128], strides = [1, 1]} : vector<46x128xf32> to vector<1x128xf32>
    %71 = vector.broadcast %70 : vector<1x128xf32> to vector<128x128xf32>
    %72 = arith.mulf %69, %71 : vector<128x128xf32>
    %73 = arith.addf %65, %72 : vector<128x128xf32>
    %c1_i32 = arith.constant 1 : i32
    %74 = arith.addi %64, %c1_i32 : i32
    %c0_71 = arith.constant 0 : index
    %75 = arith.index_cast %74 : i32 to index
    %c0_72 = arith.constant 0 : index
    %76 = vector.load %arg6[%c0_71, %75, %c0_72] : memref<1x384x128xf32, #tpu.memory_space<vmem>>, vector<1x128x128xf32>
    %77 = vector.shape_cast %76 : vector<1x128x128xf32> to vector<128x128xf32>
    %78 = vector.extract_strided_slice %62 {offsets = [1, 0], sizes = [1, 128], strides = [1, 1]} : vector<46x128xf32> to vector<1x128xf32>
    %79 = vector.broadcast %78 : vector<1x128xf32> to vector<128x128xf32>
    %80 = arith.mulf %77, %79 : vector<128x128xf32>
    %81 = arith.addf %73, %80 : vector<128x128xf32>
    %c2_i32 = arith.constant 2 : i32
    %82 = arith.addi %64, %c2_i32 : i32
    %c0_73 = arith.constant 0 : index
    %83 = arith.index_cast %82 : i32 to index
    %c0_74 = arith.constant 0 : index
    %84 = vector.load %arg6[%c0_73, %83, %c0_74] : memref<1x384x128xf32, #tpu.memory_space<vmem>>, vector<1x128x128xf32>
    %85 = vector.shape_cast %84 : vector<1x128x128xf32> to vector<128x128xf32>
    %86 = vector.extract_strided_slice %62 {offsets = [2, 0], sizes = [1, 128], strides = [1, 1]} : vector<46x128xf32> to vector<1x128xf32>
    %87 = vector.broadcast %86 : vector<1x128xf32> to vector<128x128xf32>
    %88 = arith.mulf %85, %87 : vector<128x128xf32>
    %89 = arith.addf %81, %88 : vector<128x128xf32>
    %c3_i32 = arith.constant 3 : i32
    %90 = arith.addi %64, %c3_i32 : i32
    %c0_75 = arith.constant 0 : index
    %91 = arith.index_cast %90 : i32 to index
    %c0_76 = arith.constant 0 : index
    %92 = vector.load %arg6[%c0_75, %91, %c0_76] : memref<1x384x128xf32, #tpu.memory_space<vmem>>, vector<1x128x128xf32>
    %93 = vector.shape_cast %92 : vector<1x128x128xf32> to vector<128x128xf32>
    %94 = vector.extract_strided_slice %62 {offsets = [3, 0], sizes = [1, 128], strides = [1, 1]} : vector<46x128xf32> to vector<1x128xf32>
    %95 = vector.broadcast %94 : vector<1x128xf32> to vector<128x128xf32>
    %96 = arith.mulf %93, %95 : vector<128x128xf32>
    %97 = arith.addf %89, %96 : vector<128x128xf32>
    %c4_i32 = arith.constant 4 : i32
    %98 = arith.addi %64, %c4_i32 : i32
    %c0_77 = arith.constant 0 : index
    %99 = arith.index_cast %98 : i32 to index
    %c0_78 = arith.constant 0 : index
    %100 = vector.load %arg6[%c0_77, %99, %c0_78] : memref<1x384x128xf32, #tpu.memory_space<vmem>>, vector<1x128x128xf32>
    %101 = vector.shape_cast %100 : vector<1x128x128xf32> to vector<128x128xf32>
    %102 = vector.extract_strided_slice %62 {offsets = [4, 0], sizes = [1, 128], strides = [1, 1]} : vector<46x128xf32> to vector<1x128xf32>
    %103 = vector.broadcast %102 : vector<1x128xf32> to vector<128x128xf32>
    %104 = arith.mulf %101, %103 : vector<128x128xf32>
    %105 = arith.addf %97, %104 : vector<128x128xf32>
    %c5_i32 = arith.constant 5 : i32
    %106 = arith.addi %64, %c5_i32 : i32
    %c0_79 = arith.constant 0 : index
    %107 = arith.index_cast %106 : i32 to index
    %c0_80 = arith.constant 0 : index
    %108 = vector.load %arg6[%c0_79, %107, %c0_80] : memref<1x384x128xf32, #tpu.memory_space<vmem>>, vector<1x128x128xf32>
    %109 = vector.shape_cast %108 : vector<1x128x128xf32> to vector<128x128xf32>
    %110 = vector.extract_strided_slice %62 {offsets = [5, 0], sizes = [1, 128], strides = [1, 1]} : vector<46x128xf32> to vector<1x128xf32>
    %111 = vector.broadcast %110 : vector<1x128xf32> to vector<128x128xf32>
    %112 = arith.mulf %109, %111 : vector<128x128xf32>
    %113 = arith.addf %105, %112 : vector<128x128xf32>
    %c16_i32 = arith.constant 16 : i32
    %114 = arith.addi %64, %c16_i32 : i32
    %c0_81 = arith.constant 0 : index
    %115 = arith.index_cast %114 : i32 to index
    %c0_82 = arith.constant 0 : index
    %116 = vector.load %arg6[%c0_81, %115, %c0_82] : memref<1x384x128xf32, #tpu.memory_space<vmem>>, vector<1x128x128xf32>
    %117 = vector.shape_cast %116 : vector<1x128x128xf32> to vector<128x128xf32>
    %118 = vector.extract_strided_slice %62 {offsets = [8, 0], sizes = [1, 128], strides = [1, 1]} : vector<46x128xf32> to vector<1x128xf32>
    %119 = vector.broadcast %118 : vector<1x128xf32> to vector<128x128xf32>
    %120 = arith.mulf %117, %119 : vector<128x128xf32>
    %121 = arith.addf %113, %120 : vector<128x128xf32>
    %c17_i32 = arith.constant 17 : i32
    %122 = arith.addi %64, %c17_i32 : i32
    %c0_83 = arith.constant 0 : index
    %123 = arith.index_cast %122 : i32 to index
    %c0_84 = arith.constant 0 : index
    %124 = vector.load %arg6[%c0_83, %123, %c0_84] : memref<1x384x128xf32, #tpu.memory_space<vmem>>, vector<1x128x128xf32>
    %125 = vector.shape_cast %124 : vector<1x128x128xf32> to vector<128x128xf32>
    %126 = vector.extract_strided_slice %62 {offsets = [9, 0], sizes = [1, 128], strides = [1, 1]} : vector<46x128xf32> to vector<1x128xf32>
    %127 = vector.broadcast %126 : vector<1x128xf32> to vector<128x128xf32>
    %128 = arith.mulf %125, %127 : vector<128x128xf32>
    %129 = arith.addf %121, %128 : vector<128x128xf32>
    %c18_i32 = arith.constant 18 : i32
    %130 = arith.addi %64, %c18_i32 : i32
    %c0_85 = arith.constant 0 : index
    %131 = arith.index_cast %130 : i32 to index
    %c0_86 = arith.constant 0 : index
    %132 = vector.load %arg6[%c0_85, %131, %c0_86] : memref<1x384x128xf32, #tpu.memory_space<vmem>>, vector<1x128x128xf32>
    %133 = vector.shape_cast %132 : vector<1x128x128xf32> to vector<128x128xf32>
    %134 = vector.extract_strided_slice %62 {offsets = [10, 0], sizes = [1, 128], strides = [1, 1]} : vector<46x128xf32> to vector<1x128xf32>
    %135 = vector.broadcast %134 : vector<1x128xf32> to vector<128x128xf32>
    %136 = arith.mulf %133, %135 : vector<128x128xf32>
    %137 = arith.addf %129, %136 : vector<128x128xf32>
    %c19_i32 = arith.constant 19 : i32
    %138 = arith.addi %64, %c19_i32 : i32
    %c0_87 = arith.constant 0 : index
    %139 = arith.index_cast %138 : i32 to index
    %c0_88 = arith.constant 0 : index
    %140 = vector.load %arg6[%c0_87, %139, %c0_88] : memref<1x384x128xf32, #tpu.memory_space<vmem>>, vector<1x128x128xf32>
    %141 = vector.shape_cast %140 : vector<1x128x128xf32> to vector<128x128xf32>
    %142 = vector.extract_strided_slice %62 {offsets = [11, 0], sizes = [1, 128], strides = [1, 1]} : vector<46x128xf32> to vector<1x128xf32>
    %143 = vector.broadcast %142 : vector<1x128xf32> to vector<128x128xf32>
    %144 = arith.mulf %141, %143 : vector<128x128xf32>
    %145 = arith.addf %137, %144 : vector<128x128xf32>
    %c20_i32 = arith.constant 20 : i32
    %146 = arith.addi %64, %c20_i32 : i32
    %c0_89 = arith.constant 0 : index
    %147 = arith.index_cast %146 : i32 to index
    %c0_90 = arith.constant 0 : index
    %148 = vector.load %arg6[%c0_89, %147, %c0_90] : memref<1x384x128xf32, #tpu.memory_space<vmem>>, vector<1x128x128xf32>
    %149 = vector.shape_cast %148 : vector<1x128x128xf32> to vector<128x128xf32>
    %150 = vector.extract_strided_slice %62 {offsets = [12, 0], sizes = [1, 128], strides = [1, 1]} : vector<46x128xf32> to vector<1x128xf32>
    %151 = vector.broadcast %150 : vector<1x128xf32> to vector<128x128xf32>
    %152 = arith.mulf %149, %151 : vector<128x128xf32>
    %153 = arith.addf %145, %152 : vector<128x128xf32>
    %c21_i32 = arith.constant 21 : i32
    %154 = arith.addi %64, %c21_i32 : i32
    %c0_91 = arith.constant 0 : index
    %155 = arith.index_cast %154 : i32 to index
    %c0_92 = arith.constant 0 : index
    %156 = vector.load %arg6[%c0_91, %155, %c0_92] : memref<1x384x128xf32, #tpu.memory_space<vmem>>, vector<1x128x128xf32>
    %157 = vector.shape_cast %156 : vector<1x128x128xf32> to vector<128x128xf32>
    %158 = vector.extract_strided_slice %62 {offsets = [13, 0], sizes = [1, 128], strides = [1, 1]} : vector<46x128xf32> to vector<1x128xf32>
    %159 = vector.broadcast %158 : vector<1x128xf32> to vector<128x128xf32>
    %160 = arith.mulf %157, %159 : vector<128x128xf32>
    %161 = arith.addf %153, %160 : vector<128x128xf32>
    %c32_i32 = arith.constant 32 : i32
    %162 = arith.addi %64, %c32_i32 : i32
    %c0_93 = arith.constant 0 : index
    %163 = arith.index_cast %162 : i32 to index
    %c0_94 = arith.constant 0 : index
    %164 = vector.load %arg6[%c0_93, %163, %c0_94] : memref<1x384x128xf32, #tpu.memory_space<vmem>>, vector<1x128x128xf32>
    %165 = vector.shape_cast %164 : vector<1x128x128xf32> to vector<128x128xf32>
    %166 = vector.extract_strided_slice %62 {offsets = [16, 0], sizes = [1, 128], strides = [1, 1]} : vector<46x128xf32> to vector<1x128xf32>
    %167 = vector.broadcast %166 : vector<1x128xf32> to vector<128x128xf32>
    %168 = arith.mulf %165, %167 : vector<128x128xf32>
    %169 = arith.addf %161, %168 : vector<128x128xf32>
    %c33_i32 = arith.constant 33 : i32
    %170 = arith.addi %64, %c33_i32 : i32
    %c0_95 = arith.constant 0 : index
    %171 = arith.index_cast %170 : i32 to index
    %c0_96 = arith.constant 0 : index
    %172 = vector.load %arg6[%c0_95, %171, %c0_96] : memref<1x384x128xf32, #tpu.memory_space<vmem>>, vector<1x128x128xf32>
    %173 = vector.shape_cast %172 : vector<1x128x128xf32> to vector<128x128xf32>
    %174 = vector.extract_strided_slice %62 {offsets = [17, 0], sizes = [1, 128], strides = [1, 1]} : vector<46x128xf32> to vector<1x128xf32>
    %175 = vector.broadcast %174 : vector<1x128xf32> to vector<128x128xf32>
    %176 = arith.mulf %173, %175 : vector<128x128xf32>
    %177 = arith.addf %169, %176 : vector<128x128xf32>
    %c34_i32 = arith.constant 34 : i32
    %178 = arith.addi %64, %c34_i32 : i32
    %c0_97 = arith.constant 0 : index
    %179 = arith.index_cast %178 : i32 to index
    %c0_98 = arith.constant 0 : index
    %180 = vector.load %arg6[%c0_97, %179, %c0_98] : memref<1x384x128xf32, #tpu.memory_space<vmem>>, vector<1x128x128xf32>
    %181 = vector.shape_cast %180 : vector<1x128x128xf32> to vector<128x128xf32>
    %182 = vector.extract_strided_slice %62 {offsets = [18, 0], sizes = [1, 128], strides = [1, 1]} : vector<46x128xf32> to vector<1x128xf32>
    %183 = vector.broadcast %182 : vector<1x128xf32> to vector<128x128xf32>
    %184 = arith.mulf %181, %183 : vector<128x128xf32>
    %185 = arith.addf %177, %184 : vector<128x128xf32>
    %c35_i32 = arith.constant 35 : i32
    %186 = arith.addi %64, %c35_i32 : i32
    %c0_99 = arith.constant 0 : index
    %187 = arith.index_cast %186 : i32 to index
    %c0_100 = arith.constant 0 : index
    %188 = vector.load %arg6[%c0_99, %187, %c0_100] : memref<1x384x128xf32, #tpu.memory_space<vmem>>, vector<1x128x128xf32>
    %189 = vector.shape_cast %188 : vector<1x128x128xf32> to vector<128x128xf32>
    %190 = vector.extract_strided_slice %62 {offsets = [19, 0], sizes = [1, 128], strides = [1, 1]} : vector<46x128xf32> to vector<1x128xf32>
    %191 = vector.broadcast %190 : vector<1x128xf32> to vector<128x128xf32>
    %192 = arith.mulf %189, %191 : vector<128x128xf32>
    %193 = arith.addf %185, %192 : vector<128x128xf32>
    %c36_i32 = arith.constant 36 : i32
    %194 = arith.addi %64, %c36_i32 : i32
    %c0_101 = arith.constant 0 : index
    %195 = arith.index_cast %194 : i32 to index
    %c0_102 = arith.constant 0 : index
    %196 = vector.load %arg6[%c0_101, %195, %c0_102] : memref<1x384x128xf32, #tpu.memory_space<vmem>>, vector<1x128x128xf32>
    %197 = vector.shape_cast %196 : vector<1x128x128xf32> to vector<128x128xf32>
    %198 = vector.extract_strided_slice %62 {offsets = [20, 0], sizes = [1, 128], strides = [1, 1]} : vector<46x128xf32> to vector<1x128xf32>
    %199 = vector.broadcast %198 : vector<1x128xf32> to vector<128x128xf32>
    %200 = arith.mulf %197, %199 : vector<128x128xf32>
    %201 = arith.addf %193, %200 : vector<128x128xf32>
    %c37_i32 = arith.constant 37 : i32
    %202 = arith.addi %64, %c37_i32 : i32
    %c0_103 = arith.constant 0 : index
    %203 = arith.index_cast %202 : i32 to index
    %c0_104 = arith.constant 0 : index
    %204 = vector.load %arg6[%c0_103, %203, %c0_104] : memref<1x384x128xf32, #tpu.memory_space<vmem>>, vector<1x128x128xf32>
    %205 = vector.shape_cast %204 : vector<1x128x128xf32> to vector<128x128xf32>
    %206 = vector.extract_strided_slice %62 {offsets = [21, 0], sizes = [1, 128], strides = [1, 1]} : vector<46x128xf32> to vector<1x128xf32>
    %207 = vector.broadcast %206 : vector<1x128xf32> to vector<128x128xf32>
    %208 = arith.mulf %205, %207 : vector<128x128xf32>
    %209 = arith.addf %201, %208 : vector<128x128xf32>
    %c48_i32 = arith.constant 48 : i32
    %210 = arith.addi %64, %c48_i32 : i32
    %c0_105 = arith.constant 0 : index
    %211 = arith.index_cast %210 : i32 to index
    %c0_106 = arith.constant 0 : index
    %212 = vector.load %arg6[%c0_105, %211, %c0_106] : memref<1x384x128xf32, #tpu.memory_space<vmem>>, vector<1x128x128xf32>
    %213 = vector.shape_cast %212 : vector<1x128x128xf32> to vector<128x128xf32>
    %214 = vector.extract_strided_slice %62 {offsets = [24, 0], sizes = [1, 128], strides = [1, 1]} : vector<46x128xf32> to vector<1x128xf32>
    %215 = vector.broadcast %214 : vector<1x128xf32> to vector<128x128xf32>
    %216 = arith.mulf %213, %215 : vector<128x128xf32>
    %217 = arith.addf %209, %216 : vector<128x128xf32>
    %c49_i32 = arith.constant 49 : i32
    %218 = arith.addi %64, %c49_i32 : i32
    %c0_107 = arith.constant 0 : index
    %219 = arith.index_cast %218 : i32 to index
    %c0_108 = arith.constant 0 : index
    %220 = vector.load %arg6[%c0_107, %219, %c0_108] : memref<1x384x128xf32, #tpu.memory_space<vmem>>, vector<1x128x128xf32>
    %221 = vector.shape_cast %220 : vector<1x128x128xf32> to vector<128x128xf32>
    %222 = vector.extract_strided_slice %62 {offsets = [25, 0], sizes = [1, 128], strides = [1, 1]} : vector<46x128xf32> to vector<1x128xf32>
    %223 = vector.broadcast %222 : vector<1x128xf32> to vector<128x128xf32>
    %224 = arith.mulf %221, %223 : vector<128x128xf32>
    %225 = arith.addf %217, %224 : vector<128x128xf32>
    %c50_i32 = arith.constant 50 : i32
    %226 = arith.addi %64, %c50_i32 : i32
    %c0_109 = arith.constant 0 : index
    %227 = arith.index_cast %226 : i32 to index
    %c0_110 = arith.constant 0 : index
    %228 = vector.load %arg6[%c0_109, %227, %c0_110] : memref<1x384x128xf32, #tpu.memory_space<vmem>>, vector<1x128x128xf32>
    %229 = vector.shape_cast %228 : vector<1x128x128xf32> to vector<128x128xf32>
    %230 = vector.extract_strided_slice %62 {offsets = [26, 0], sizes = [1, 128], strides = [1, 1]} : vector<46x128xf32> to vector<1x128xf32>
    %231 = vector.broadcast %230 : vector<1x128xf32> to vector<128x128xf32>
    %232 = arith.mulf %229, %231 : vector<128x128xf32>
    %233 = arith.addf %225, %232 : vector<128x128xf32>
    %c51_i32 = arith.constant 51 : i32
    %234 = arith.addi %64, %c51_i32 : i32
    %c0_111 = arith.constant 0 : index
    %235 = arith.index_cast %234 : i32 to index
    %c0_112 = arith.constant 0 : index
    %236 = vector.load %arg6[%c0_111, %235, %c0_112] : memref<1x384x128xf32, #tpu.memory_space<vmem>>, vector<1x128x128xf32>
    %237 = vector.shape_cast %236 : vector<1x128x128xf32> to vector<128x128xf32>
    %238 = vector.extract_strided_slice %62 {offsets = [27, 0], sizes = [1, 128], strides = [1, 1]} : vector<46x128xf32> to vector<1x128xf32>
    %239 = vector.broadcast %238 : vector<1x128xf32> to vector<128x128xf32>
    %240 = arith.mulf %237, %239 : vector<128x128xf32>
    %241 = arith.addf %233, %240 : vector<128x128xf32>
    %c52_i32 = arith.constant 52 : i32
    %242 = arith.addi %64, %c52_i32 : i32
    %c0_113 = arith.constant 0 : index
    %243 = arith.index_cast %242 : i32 to index
    %c0_114 = arith.constant 0 : index
    %244 = vector.load %arg6[%c0_113, %243, %c0_114] : memref<1x384x128xf32, #tpu.memory_space<vmem>>, vector<1x128x128xf32>
    %245 = vector.shape_cast %244 : vector<1x128x128xf32> to vector<128x128xf32>
    %246 = vector.extract_strided_slice %62 {offsets = [28, 0], sizes = [1, 128], strides = [1, 1]} : vector<46x128xf32> to vector<1x128xf32>
    %247 = vector.broadcast %246 : vector<1x128xf32> to vector<128x128xf32>
    %248 = arith.mulf %245, %247 : vector<128x128xf32>
    %249 = arith.addf %241, %248 : vector<128x128xf32>
    %c53_i32 = arith.constant 53 : i32
    %250 = arith.addi %64, %c53_i32 : i32
    %c0_115 = arith.constant 0 : index
    %251 = arith.index_cast %250 : i32 to index
    %c0_116 = arith.constant 0 : index
    %252 = vector.load %arg6[%c0_115, %251, %c0_116] : memref<1x384x128xf32, #tpu.memory_space<vmem>>, vector<1x128x128xf32>
    %253 = vector.shape_cast %252 : vector<1x128x128xf32> to vector<128x128xf32>
    %254 = vector.extract_strided_slice %62 {offsets = [29, 0], sizes = [1, 128], strides = [1, 1]} : vector<46x128xf32> to vector<1x128xf32>
    %255 = vector.broadcast %254 : vector<1x128xf32> to vector<128x128xf32>
    %256 = arith.mulf %253, %255 : vector<128x128xf32>
    %257 = arith.addf %249, %256 : vector<128x128xf32>
    %c64_i32 = arith.constant 64 : i32
    %258 = arith.addi %64, %c64_i32 : i32
    %c0_117 = arith.constant 0 : index
    %259 = arith.index_cast %258 : i32 to index
    %c0_118 = arith.constant 0 : index
    %260 = vector.load %arg6[%c0_117, %259, %c0_118] : memref<1x384x128xf32, #tpu.memory_space<vmem>>, vector<1x128x128xf32>
    %261 = vector.shape_cast %260 : vector<1x128x128xf32> to vector<128x128xf32>
    %262 = vector.extract_strided_slice %62 {offsets = [32, 0], sizes = [1, 128], strides = [1, 1]} : vector<46x128xf32> to vector<1x128xf32>
    %263 = vector.broadcast %262 : vector<1x128xf32> to vector<128x128xf32>
    %264 = arith.mulf %261, %263 : vector<128x128xf32>
    %265 = arith.addf %257, %264 : vector<128x128xf32>
    %c65_i32 = arith.constant 65 : i32
    %266 = arith.addi %64, %c65_i32 : i32
    %c0_119 = arith.constant 0 : index
    %267 = arith.index_cast %266 : i32 to index
    %c0_120 = arith.constant 0 : index
    %268 = vector.load %arg6[%c0_119, %267, %c0_120] : memref<1x384x128xf32, #tpu.memory_space<vmem>>, vector<1x128x128xf32>
    %269 = vector.shape_cast %268 : vector<1x128x128xf32> to vector<128x128xf32>
    %270 = vector.extract_strided_slice %62 {offsets = [33, 0], sizes = [1, 128], strides = [1, 1]} : vector<46x128xf32> to vector<1x128xf32>
    %271 = vector.broadcast %270 : vector<1x128xf32> to vector<128x128xf32>
    %272 = arith.mulf %269, %271 : vector<128x128xf32>
    %273 = arith.addf %265, %272 : vector<128x128xf32>
    %c66_i32 = arith.constant 66 : i32
    %274 = arith.addi %64, %c66_i32 : i32
    %c0_121 = arith.constant 0 : index
    %275 = arith.index_cast %274 : i32 to index
    %c0_122 = arith.constant 0 : index
    %276 = vector.load %arg6[%c0_121, %275, %c0_122] : memref<1x384x128xf32, #tpu.memory_space<vmem>>, vector<1x128x128xf32>
    %277 = vector.shape_cast %276 : vector<1x128x128xf32> to vector<128x128xf32>
    %278 = vector.extract_strided_slice %62 {offsets = [34, 0], sizes = [1, 128], strides = [1, 1]} : vector<46x128xf32> to vector<1x128xf32>
    %279 = vector.broadcast %278 : vector<1x128xf32> to vector<128x128xf32>
    %280 = arith.mulf %277, %279 : vector<128x128xf32>
    %281 = arith.addf %273, %280 : vector<128x128xf32>
    %c67_i32 = arith.constant 67 : i32
    %282 = arith.addi %64, %c67_i32 : i32
    %c0_123 = arith.constant 0 : index
    %283 = arith.index_cast %282 : i32 to index
    %c0_124 = arith.constant 0 : index
    %284 = vector.load %arg6[%c0_123, %283, %c0_124] : memref<1x384x128xf32, #tpu.memory_space<vmem>>, vector<1x128x128xf32>
    %285 = vector.shape_cast %284 : vector<1x128x128xf32> to vector<128x128xf32>
    %286 = vector.extract_strided_slice %62 {offsets = [35, 0], sizes = [1, 128], strides = [1, 1]} : vector<46x128xf32> to vector<1x128xf32>
    %287 = vector.broadcast %286 : vector<1x128xf32> to vector<128x128xf32>
    %288 = arith.mulf %285, %287 : vector<128x128xf32>
    %289 = arith.addf %281, %288 : vector<128x128xf32>
    %c68_i32 = arith.constant 68 : i32
    %290 = arith.addi %64, %c68_i32 : i32
    %c0_125 = arith.constant 0 : index
    %291 = arith.index_cast %290 : i32 to index
    %c0_126 = arith.constant 0 : index
    %292 = vector.load %arg6[%c0_125, %291, %c0_126] : memref<1x384x128xf32, #tpu.memory_space<vmem>>, vector<1x128x128xf32>
    %293 = vector.shape_cast %292 : vector<1x128x128xf32> to vector<128x128xf32>
    %294 = vector.extract_strided_slice %62 {offsets = [36, 0], sizes = [1, 128], strides = [1, 1]} : vector<46x128xf32> to vector<1x128xf32>
    %295 = vector.broadcast %294 : vector<1x128xf32> to vector<128x128xf32>
    %296 = arith.mulf %293, %295 : vector<128x128xf32>
    %297 = arith.addf %289, %296 : vector<128x128xf32>
    %c69_i32 = arith.constant 69 : i32
    %298 = arith.addi %64, %c69_i32 : i32
    %c0_127 = arith.constant 0 : index
    %299 = arith.index_cast %298 : i32 to index
    %c0_128 = arith.constant 0 : index
    %300 = vector.load %arg6[%c0_127, %299, %c0_128] : memref<1x384x128xf32, #tpu.memory_space<vmem>>, vector<1x128x128xf32>
    %301 = vector.shape_cast %300 : vector<1x128x128xf32> to vector<128x128xf32>
    %302 = vector.extract_strided_slice %62 {offsets = [37, 0], sizes = [1, 128], strides = [1, 1]} : vector<46x128xf32> to vector<1x128xf32>
    %303 = vector.broadcast %302 : vector<1x128xf32> to vector<128x128xf32>
    %304 = arith.mulf %301, %303 : vector<128x128xf32>
    %305 = arith.addf %297, %304 : vector<128x128xf32>
    %c80_i32 = arith.constant 80 : i32
    %306 = arith.addi %64, %c80_i32 : i32
    %c0_129 = arith.constant 0 : index
    %307 = arith.index_cast %306 : i32 to index
    %c0_130 = arith.constant 0 : index
    %308 = vector.load %arg6[%c0_129, %307, %c0_130] : memref<1x384x128xf32, #tpu.memory_space<vmem>>, vector<1x128x128xf32>
    %309 = vector.shape_cast %308 : vector<1x128x128xf32> to vector<128x128xf32>
    %310 = vector.extract_strided_slice %62 {offsets = [40, 0], sizes = [1, 128], strides = [1, 1]} : vector<46x128xf32> to vector<1x128xf32>
    %311 = vector.broadcast %310 : vector<1x128xf32> to vector<128x128xf32>
    %312 = arith.mulf %309, %311 : vector<128x128xf32>
    %313 = arith.addf %305, %312 : vector<128x128xf32>
    %c81_i32 = arith.constant 81 : i32
    %314 = arith.addi %64, %c81_i32 : i32
    %c0_131 = arith.constant 0 : index
    %315 = arith.index_cast %314 : i32 to index
    %c0_132 = arith.constant 0 : index
    %316 = vector.load %arg6[%c0_131, %315, %c0_132] : memref<1x384x128xf32, #tpu.memory_space<vmem>>, vector<1x128x128xf32>
    %317 = vector.shape_cast %316 : vector<1x128x128xf32> to vector<128x128xf32>
    %318 = vector.extract_strided_slice %62 {offsets = [41, 0], sizes = [1, 128], strides = [1, 1]} : vector<46x128xf32> to vector<1x128xf32>
    %319 = vector.broadcast %318 : vector<1x128xf32> to vector<128x128xf32>
    %320 = arith.mulf %317, %319 : vector<128x128xf32>
    %321 = arith.addf %313, %320 : vector<128x128xf32>
    %c82_i32 = arith.constant 82 : i32
    %322 = arith.addi %64, %c82_i32 : i32
    %c0_133 = arith.constant 0 : index
    %323 = arith.index_cast %322 : i32 to index
    %c0_134 = arith.constant 0 : index
    %324 = vector.load %arg6[%c0_133, %323, %c0_134] : memref<1x384x128xf32, #tpu.memory_space<vmem>>, vector<1x128x128xf32>
    %325 = vector.shape_cast %324 : vector<1x128x128xf32> to vector<128x128xf32>
    %326 = vector.extract_strided_slice %62 {offsets = [42, 0], sizes = [1, 128], strides = [1, 1]} : vector<46x128xf32> to vector<1x128xf32>
    %327 = vector.broadcast %326 : vector<1x128xf32> to vector<128x128xf32>
    %328 = arith.mulf %325, %327 : vector<128x128xf32>
    %329 = arith.addf %321, %328 : vector<128x128xf32>
    %c83_i32 = arith.constant 83 : i32
    %330 = arith.addi %64, %c83_i32 : i32
    %c0_135 = arith.constant 0 : index
    %331 = arith.index_cast %330 : i32 to index
    %c0_136 = arith.constant 0 : index
    %332 = vector.load %arg6[%c0_135, %331, %c0_136] : memref<1x384x128xf32, #tpu.memory_space<vmem>>, vector<1x128x128xf32>
    %333 = vector.shape_cast %332 : vector<1x128x128xf32> to vector<128x128xf32>
    %334 = vector.extract_strided_slice %62 {offsets = [43, 0], sizes = [1, 128], strides = [1, 1]} : vector<46x128xf32> to vector<1x128xf32>
    %335 = vector.broadcast %334 : vector<1x128xf32> to vector<128x128xf32>
    %336 = arith.mulf %333, %335 : vector<128x128xf32>
    %337 = arith.addf %329, %336 : vector<128x128xf32>
    %c84_i32 = arith.constant 84 : i32
    %338 = arith.addi %64, %c84_i32 : i32
    %c0_137 = arith.constant 0 : index
    %339 = arith.index_cast %338 : i32 to index
    %c0_138 = arith.constant 0 : index
    %340 = vector.load %arg6[%c0_137, %339, %c0_138] : memref<1x384x128xf32, #tpu.memory_space<vmem>>, vector<1x128x128xf32>
    %341 = vector.shape_cast %340 : vector<1x128x128xf32> to vector<128x128xf32>
    %342 = vector.extract_strided_slice %62 {offsets = [44, 0], sizes = [1, 128], strides = [1, 1]} : vector<46x128xf32> to vector<1x128xf32>
    %343 = vector.broadcast %342 : vector<1x128xf32> to vector<128x128xf32>
    %344 = arith.mulf %341, %343 : vector<128x128xf32>
    %345 = arith.addf %337, %344 : vector<128x128xf32>
    %c85_i32 = arith.constant 85 : i32
    %346 = arith.addi %64, %c85_i32 : i32
    %c0_139 = arith.constant 0 : index
    %347 = arith.index_cast %346 : i32 to index
    %c0_140 = arith.constant 0 : index
    %348 = vector.load %arg6[%c0_139, %347, %c0_140] : memref<1x384x128xf32, #tpu.memory_space<vmem>>, vector<1x128x128xf32>
    %349 = vector.shape_cast %348 : vector<1x128x128xf32> to vector<128x128xf32>
    %350 = vector.extract_strided_slice %62 {offsets = [45, 0], sizes = [1, 128], strides = [1, 1]} : vector<46x128xf32> to vector<1x128xf32>
    %351 = vector.broadcast %350 : vector<1x128xf32> to vector<128x128xf32>
    %352 = arith.mulf %349, %351 : vector<128x128xf32>
    %353 = arith.addf %345, %352 : vector<128x128xf32>
    %c0_141 = arith.constant 0 : index
    %c0_142 = arith.constant 0 : index
    %354 = vector.load %arg7[%c0_141, %c0_142] : memref<128x128xf32, #tpu.memory_space<vmem>>, vector<128x128xf32>
    %cst_143 = arith.constant dense<0.000000e+00> : vector<128x128xf32>
    %355 = tpu.matmul %353, %354, %cst_143 {dimension_numbers = #tpu.dot_dimension_numbers<[1], [0], [0], [1], [0, 0, 1, 1], [], []>} : vector<128x128xf32>, vector<128x128xf32>, vector<128x128xf32> -> vector<128x128xf32>
    %c0_144 = arith.constant 0 : index
    %c0_145 = arith.constant 0 : index
    %356 = vector.load %arg8[%c0_144, %c0_145] : memref<1x128xf32, #tpu.memory_space<vmem>>, vector<1x128xf32>
    %357 = vector.broadcast %356 : vector<1x128xf32> to vector<128x128xf32>
    %358 = arith.mulf %355, %357 : vector<128x128xf32>
    %c0_146 = arith.constant 0 : index
    %c0_147 = arith.constant 0 : index
    %359 = vector.load %arg9[%c0_146, %c0_147] : memref<1x128xf32, #tpu.memory_space<vmem>>, vector<1x128xf32>
    %360 = vector.broadcast %359 : vector<1x128xf32> to vector<128x128xf32>
    %361 = arith.addf %358, %360 : vector<128x128xf32>
    %cst_148 = arith.constant 0.000000e+00 : f32
    %362 = vector.broadcast %cst_148 : f32 to vector<128x128xf32>
    %363 = arith.maximumf %361, %362 : vector<128x128xf32>
    %c0_149 = arith.constant 0 : index
    %c0_150 = arith.constant 0 : index
    %364 = vector.load %arg10[%c0_149, %c0_150] : memref<128x128xf32, #tpu.memory_space<vmem>>, vector<128x128xf32>
    %cst_151 = arith.constant dense<0.000000e+00> : vector<128x128xf32>
    %365 = tpu.matmul %363, %364, %cst_151 {dimension_numbers = #tpu.dot_dimension_numbers<[1], [0], [0], [1], [0, 0, 1, 1], [], []>} : vector<128x128xf32>, vector<128x128xf32>, vector<128x128xf32> -> vector<128x128xf32>
    %c0_152 = arith.constant 0 : index
    %c0_153 = arith.constant 0 : index
    %366 = vector.load %arg11[%c0_152, %c0_153] : memref<1x128xf32, #tpu.memory_space<vmem>>, vector<1x128xf32>
    %367 = vector.broadcast %366 : vector<1x128xf32> to vector<128x128xf32>
    %368 = arith.addf %365, %367 : vector<128x128xf32>
    %c0_154 = arith.constant 0 : index
    %c0_155 = arith.constant 0 : index
    %c0_156 = arith.constant 0 : index
    %369 = vector.load %arg12[%c0_154, %c0_155, %c0_156] : memref<1x128x128xf32, #tpu.memory_space<vmem>>, vector<1x128x128xf32>
    %370 = vector.shape_cast %369 : vector<1x128x128xf32> to vector<128x128xf32>
    %371 = vector.shape_cast %368 : vector<128x128xf32> to vector<1x128x128xf32>
    tpu.vector_store %arg12[%c0_154, %c0_155, %c0_156], %371 {strides = array<i32>} : memref<1x128x128xf32, #tpu.memory_space<vmem>>, vector<1x128x128xf32>,
    return
  }
  func.func @transform_0(%arg0: i32, %arg1: i32) -> (i32, i32, i32) {
    %c0_i32 = arith.constant 0 : i32
    %c0_i32_0 = arith.constant 0 : i32
    %c0_i32_1 = arith.constant 0 : i32
    return %arg0, %c0_i32, %c0_i32_0 : i32, i32, i32
  }
  func.func @transform_1(%arg0: i32, %arg1: i32) -> (i32, i32, i32, i32) {
    %c0_i32 = arith.constant 0 : i32
    %c0_i32_0 = arith.constant 0 : i32
    %c0_i32_1 = arith.constant 0 : i32
    %c0_i32_2 = arith.constant 0 : i32
    %c0_i32_3 = arith.constant 0 : i32
    return %c0_i32, %c0_i32_0, %c0_i32_1, %c0_i32_2 : i32, i32, i32, i32
  }
  func.func @transform_2(%arg0: i32, %arg1: i32) -> (i32, i32) {
    %c0_i32 = arith.constant 0 : i32
    %c0_i32_0 = arith.constant 0 : i32
    %c0_i32_1 = arith.constant 0 : i32
    return %c0_i32, %c0_i32_0 : i32, i32
  }
  func.func @transform_3(%arg0: i32, %arg1: i32) -> (i32, i32) {
    %c0_i32 = arith.constant 0 : i32
    %c0_i32_0 = arith.constant 0 : i32
    %c0_i32_1 = arith.constant 0 : i32
    return %c0_i32, %c0_i32_0 : i32, i32
  }
  func.func @transform_4(%arg0: i32, %arg1: i32) -> (i32, i32, i32) {
    %c0_i32 = arith.constant 0 : i32
    %c0_i32_0 = arith.constant 0 : i32
    %c0_i32_1 = arith.constant 0 : i32
    return %arg0, %c0_i32, %c0_i32_0 : i32, i32, i32
  }
  func.func @transform_5(%arg0: i32, %arg1: i32) -> (i32, i32) {
    %c0_i32 = arith.constant 0 : i32
    %c0_i32_0 = arith.constant 0 : i32
    %c0_i32_1 = arith.constant 0 : i32
    return %c0_i32, %c0_i32_0 : i32, i32
  }
  func.func @transform_6(%arg0: i32, %arg1: i32) -> (i32, i32) {
    %c0_i32 = arith.constant 0 : i32
    %c0_i32_0 = arith.constant 0 : i32
    %c0_i32_1 = arith.constant 0 : i32
    return %c0_i32, %c0_i32_0 : i32, i32
  }
  func.func @transform_7(%arg0: i32, %arg1: i32) -> (i32, i32) {
    %c0_i32 = arith.constant 0 : i32
    %c0_i32_0 = arith.constant 0 : i32
    %c0_i32_1 = arith.constant 0 : i32
    return %c0_i32, %c0_i32_0 : i32, i32
  }
  func.func @transform_8(%arg0: i32, %arg1: i32) -> (i32, i32) {
    %c0_i32 = arith.constant 0 : i32
    %c0_i32_0 = arith.constant 0 : i32
    %c0_i32_1 = arith.constant 0 : i32
    return %c0_i32, %c0_i32_0 : i32, i32
  }
  func.func @transform_9(%arg0: i32, %arg1: i32) -> (i32, i32) {
    %c0_i32 = arith.constant 0 : i32
    %c0_i32_0 = arith.constant 0 : i32
    %c0_i32_1 = arith.constant 0 : i32
    return %c0_i32, %c0_i32_0 : i32, i32
  }
  func.func @transform_10(%arg0: i32, %arg1: i32) -> (i32, i32, i32) {
    %c0_i32 = arith.constant 0 : i32
    %c0_i32_0 = arith.constant 0 : i32
    return %arg0, %arg1, %c0_i32 : i32, i32, i32
  }
}

</mosaic_0001>

<bundles_post_ra>
// kernel: depthwise_xcorr_forward.2
= control target key start
LH: loop header
LB: loop body
LE: loop exit
PB: predicated region body
PF: predicated region fallthrough
CT: control target
= control target key end

     0   :  { %s1846_s15 = smov 0   ;;  %s1848_s16 = smov 0   ;;  %s2783_s0 = inlined_call_operand.vmem [shape: f32[2,424,128], index: 0, kind: input, shape index: {}]   ;;  %s2784_s1 = inlined_call_operand.vmem [shape: f32[3,3,128,128], index: 1, kind: input, shape index: {}]   ;;  %s2785_s2 = inlined_call_operand.vmem [shape: f32[1,128], index: 2, kind: input, shape index: {}]   ;;  %s2786_s3 = inlined_call_operand.vmem [shape: f32[1,128], index: 3, kind: input, shape index: {}]   ;;  %s2787_s4 = inlined_call_operand.vmem [shape: f32[2,384,128], index: 4, kind: output, shape index: {}]  }
   0x1   :  { %s1850_s17 = smov 0   ;;  %s1852_s18 = smov 0  }
   0x2   :  { %s1854_s19 = smov 0  }
   0x3 LB: > { %s23_s20 = sadd.s32 1, %s1811_s17  ;;  %s26_s21 = sadd.s32 1, %s1815_s18  ;;  %s1819_s19 = sphi %s1854_s19, %s14_s19   ;;  %s1815_s18 = sphi %s1852_s18, %s2791_s18   ;;  %s1811_s17 = sphi %s1850_s17, %s2790_s17   ;;  %s1807_s16 = sphi %s1848_s16, %s2789_s16   ;;  %s1803_s15 = sphi %s1846_s15, %s2788_s15  }
   0x4   : > { %p24_p0 = scmp.ge.s32.totalorder %s23_s20, 3  ;;  %p1418_p1 = scmp.ge.s32.totalorder %s1819_s19, 1 }
   0x5   : > { %p176_p2 = scmp.lt.s32.totalorder %s1819_s19, 7 }
   0x6   : > { %s2793_s20 = smov (%p24_p0, %s23_s20), 0  ;;  %s2795_s21 = smov (!%p24_p0, %s26_s21), %s1815_s18 }
   0x7   : > { %p177_p3 = pnand %p1418_p1, %p176_p2  ;;  %p28_p4 = scmp.ge.s32.totalorder %s2795_s21, 2 }
   0x8   : > { %p206_p5 = scmp.lt.s32.totalorder (!%p177_p3), %s1807_s16, 1  ;;  %s1422_s7 = sshll.u32 (!%p177_p3), %s1803_s15, 7 }
   0x9   : > { %s2797_s21 = smov (%p28_p4, %s2795_s21), 0  ;;  %180 = sbr.rel (%p177_p3) target bundleno = 477 (0x1dd), region = 36 }
   0xa   : > { %s1420_s26 = sshll.u32 (!%p177_p3), %s1803_s15, 4 }
   0xb   : > { %p214_p6 = scmp.lt.s32.totalorder (!%p177_p3), %s1420_s26, 47 }
   0xe   : > { %v1455_v0 = vld [vmem:[%s2784_s1 + $0xf8] sm:$0xff]  ;;  %v1454_v1 = vld [vmem:[%s2784_s1 + $0xf0] sm:$0xff]  ;;  %v1453_v2 = vld [vmem:[%s2784_s1 + $0xe8] sm:$0xff]  ;;  %s2799_s16 = smov (!%p206_p5, %s1807_s16), 1  ;;  %s2801_s26 = smov (!%p214_p6, %s1420_s26), 47 }
   0xf   : > { %1689 = vmatpush.msra.mxu1 %v1455_v0  ;;  %1690 = vmatpush.msra.mxu2 %v1455_v0  ;;  %v1452_v3 = vld [vmem:[%s2784_s1 + $0xe0] sm:$0xff]  ;;  %v1451_v4 = vld [vmem:[%s2784_s1 + $0xd8] sm:$0xff]  ;;  %v1450_v5 = vld [vmem:[%s2784_s1 + $0xd0] sm:$0xff]  ;;  %s1737_s25 = smul.u32 424, %s2799_s16 }
  0x10   : > { %1691 = vmatpush.msra.mxu3 %v1455_v0  ;;  %290 = vmatpush.msra.mxu0 %v1455_v0  ;;  %v1449_v6 = vld [vmem:[%s2784_s1 + $0xc8] sm:$0xff]  ;;  %v1448_v7 = vld [vmem:[%s2784_s1 + $0xc0] sm:$0xff]  ;;  %v1447_v8 = vld [vmem:[%s2784_s1 + $0xb8] sm:$0xff]  ;;  %s1738_s27 = smul.u32 48, %s2799_s16 }
  0x11   : > { %1692 = vmatpush.msra.mxu1 %v1454_v1  ;;  %1693 = vmatpush.msra.mxu2 %v1454_v1  ;;  %v1446_v9 = vld [vmem:[%s2784_s1 + $0xb0] sm:$0xff]  ;;  %v1445_v10 = vld [vmem:[%s2784_s1 + $0xa8] sm:$0xff]  ;;  %v1444_v11 = vld [vmem:[%s2784_s1 + $0xa0] sm:$0xff]  ;;  %s210_s6 = scalar_lea.vmem %s2783_s0, %s1737_s25 }
  0x12   : > { %1694 = vmatpush.msra.mxu3 %v1454_v1  ;;  %291 = vmatpush.msra.mxu0 %v1454_v1  ;;  %v1443_v12 = vld [vmem:[%s2784_s1 + $0x98] sm:$0xff]  ;;  %v1442_v13 = vld [vmem:[%s2784_s1 + $0x90] sm:$0xff]  ;;  %v1441_v14 = vld [vmem:[%s2784_s1 + $0x88] sm:$0xff]  ;;  %s1934_s12 = scalar_lea.vmem %s210_s6, %s1422_s7 }
  0x13   : > { %1695 = vmatpush.msra.mxu1 %v1453_v2  ;;  %1696 = vmatpush.msra.mxu2 %v1453_v2  ;;  %v1440_v15 = vld [vmem:[%s2784_s1 + $0x80] sm:$0xff]  ;;  %v1488_v18 = vld [vmem:[%s2784_s1 + $0x178] sm:$0xff]  ;;  %v1487_v21 = vld [vmem:[%s2784_s1 + $0x170] sm:$0xff] }
  0x14   : > { %1697 = vmatpush.msra.mxu3 %v1453_v2  ;;  %292 = vmatpush.msra.mxu0 %v1453_v2  ;;  %v1940_v16 = vld [vmem:[%s1934_s12 + $0x21] sm:$0xff]  ;;  %v254_v19 = vld [vmem:[%s2784_s1 + $0x78] sm:$0xff]  ;;  %v253_v23 = vld [vmem:[%s2784_s1 + $0x70] sm:$0xff] }
  0x15   : > { %1698 = vmatpush.msra.mxu1 %v1452_v3  ;;  %1699 = vmatpush.msra.mxu2 %v1452_v3  ;;  %v1943_v17 = vld [vmem:[%s1934_s12 + $0x41] sm:$0xff]  ;;  %v1521_v22 = vld [vmem:[%s2784_s1 + $0x1f8] sm:$0xff]  ;;  %v1520_v25 = vld [vmem:[%s2784_s1 + $0x1f0] sm:$0xff] }
  0x16   : > { %1700 = vmatpush.msra.mxu3 %v1452_v3  ;;  %293 = vmatpush.msra.mxu0 %v1452_v3  ;;  %v1952_v20 = vld [vmem:[%s1934_s12 + $0x61] sm:$0xff]  ;;  %v1986_v31 = vld [vmem:[%s1934_s12 + $0x49] sm:$0xff]  ;;  %v1484_v33 = vld [vmem:[%s2784_s1 + $0x158] sm:$0xff] }
  0x17   : > { %1701 = vmatpush.msra.mxu1 %v1451_v4  ;;  %1702 = vmatpush.msra.mxu2 %v1451_v4  ;;  %v1486_v24 = vld [vmem:[%s2784_s1 + $0x168] sm:$0xff]  ;;  %v1485_v28 = vld [vmem:[%s2784_s1 + $0x160] sm:$0xff]  ;;  %v250_v35 = vld [vmem:[%s2784_s1 + $0x58] sm:$0xff] }
  0x18   : > { %1703 = vmatpush.msra.mxu3 %v1451_v4  ;;  %294 = vmatpush.msra.mxu0 %v1451_v4  ;;  %v252_v26 = vld [vmem:[%s2784_s1 + $0x68] sm:$0xff]  ;;  %v251_v30 = vld [vmem:[%s2784_s1 + $0x60] sm:$0xff]  ;;  %v1483_v37 = vld [vmem:[%s2784_s1 + $0x150] sm:$0xff] }
  0x19   : > { %1704 = vmatpush.msra.mxu1 %v1450_v5  ;;  %1705 = vmatpush.msra.mxu2 %v1450_v5  ;;  %v1424_v27 = vld [vmem:[%s1934_s12 + $0x1] sm:$0xff]  ;;  %v1989_v32 = vld [vmem:[%s1934_s12 + $0x29] sm:$0xff]  ;;  %v1517_v38 = vld [vmem:[%s2784_s1 + $0x1d8] sm:$0xff] }
  0x1a   : > { %1706 = vmatpush.msra.mxu3 %v1450_v5  ;;  %295 = vmatpush.msra.mxu0 %v1450_v5  ;;  %v1519_v29 = vld [vmem:[%s2784_s1 + $0x1e8] sm:$0xff]  ;;  %v1518_v34 = vld [vmem:[%s2784_s1 + $0x1e0] sm:$0xff]  ;;  %v1554_v39 = vld [vmem:[%s2784_s1 + $0x278] sm:$0xff] }
  0x1b   : > { %1707 = vmatpush.msra.mxu1 %v1449_v6  ;;  %1708 = vmatpush.msra.mxu2 %v1449_v6  ;;  %v2002_v36 = vld [vmem:[%s1934_s12 + $0x69] sm:$0xff]  ;;  %v1481_v45 = vld [vmem:[%s2784_s1 + $0x140] sm:$0xff]  ;;  %v2043_v49 = vld [vmem:[%s1934_s12 + $0x51] sm:$0xff] }
  0x1c   : > { %1709 = vmatpush.msra.mxu3 %v1449_v6  ;;  %296 = vmatpush.msra.mxu0 %v1449_v6  ;;  %v249_v40 = vld [vmem:[%s2784_s1 + $0x50] sm:$0xff]  ;;  %v1482_v41 = vld [vmem:[%s2784_s1 + $0x148] sm:$0xff]  ;;  %v247_v48 = vld [vmem:[%s2784_s1 + $0x40] sm:$0xff] }
  0x1d   : > { %1710 = vmatpush.msra.mxu1 %v1448_v7  ;;  %1711 = vmatpush.msra.mxu2 %v1448_v7  ;;  %v1516_v42 = vld [vmem:[%s2784_s1 + $0x1d0] sm:$0xff]  ;;  %v248_v44 = vld [vmem:[%s2784_s1 + $0x48] sm:$0xff]  ;;  %v1480_v51 = vld [vmem:[%s2784_s1 + $0x138] sm:$0xff] }
  0x1e   : > { %1712 = vmatpush.msra.mxu3 %v1448_v7  ;;  %297 = vmatpush.msra.mxu0 %v1448_v7  ;;  %v1553_v43 = vld [vmem:[%s2784_s1 + $0x270] sm:$0xff]  ;;  %v1515_v46 = vld [vmem:[%s2784_s1 + $0x1c8] sm:$0xff]  ;;  %v1514_v52 = vld [vmem:[%s2784_s1 + $0x1c0] sm:$0xff] }
  0x1f   : > { %1713 = vmatpush.msra.mxu1 %v1447_v8  ;;  %1714 = vmatpush.msra.mxu2 %v1447_v8  ;;  %v1552_v47 = vld [vmem:[%s2784_s1 + $0x268] sm:$0xff]  ;;  %v2046_v50 = vld [vmem:[%s1934_s12 + $0x31] sm:$0xff]  ;;  %v1551_v53 = vld [vmem:[%s2784_s1 + $0x260] sm:$0xff] }
  0x20   : > { %1715 = vmatpush.msra.mxu3 %v1447_v8  ;;  %298 = vmatpush.msra.mxu0 %v1447_v8  ;;  %v246_v54 = vld [vmem:[%s2784_s1 + $0x38] sm:$0xff]  ;;  %v1425_v55 = vld [vmem:[%s1934_s12 + $0x9] sm:$0xff]  ;;  %v1477_v1 = vld [vmem:[%s2784_s1 + $0x120] sm:$0xff] }
  0x21   : > { %1716 = vmatpush.msra.mxu1 %v1446_v9  ;;  %1717 = vmatpush.msra.mxu2 %v1446_v9  ;;  %v2064_v56 = vld [vmem:[%s1934_s12 + $0x71] sm:$0xff]  ;;  %v1478_v61 = vld [vmem:[%s2784_s1 + $0x128] sm:$0xff]  ;;  %v243_v4 = vld [vmem:[%s2784_s1 + $0x20] sm:$0xff] }
  0x22   : > { %1718 = vmatpush.msra.mxu3 %v1446_v9  ;;  %299 = vmatpush.msra.mxu0 %v1446_v9  ;;  %v1479_v57 = vld [vmem:[%s2784_s1 + $0x130] sm:$0xff]  ;;  %v1513_v58 = vld [vmem:[%s2784_s1 + $0x1b8] sm:$0xff]  ;;  %v244_v0 = vld [vmem:[%s2784_s1 + $0x28] sm:$0xff] }
  0x23   : > { %1719 = vmatpush.msra.mxu1 %v1445_v10  ;;  %1720 = vmatpush.msra.mxu2 %v1445_v10  ;;  %v1550_v59 = vld [vmem:[%s2784_s1 + $0x258] sm:$0xff]  ;;  %v245_v60 = vld [vmem:[%s2784_s1 + $0x30] sm:$0xff]  ;;  %v1511_v2 = vld [vmem:[%s2784_s1 + $0x1a8] sm:$0xff] }
  0x24   : > { %1721 = vmatpush.msra.mxu3 %v1445_v10  ;;  %300 = vmatpush.msra.mxu0 %v1445_v10  ;;  %v1512_v62 = vld [vmem:[%s2784_s1 + $0x1b0] sm:$0xff]  ;;  %v1548_v3 = vld [vmem:[%s2784_s1 + $0x248] sm:$0xff]  ;;  %v2104_v5 = vld [vmem:[%s1934_s12 + $0x59] sm:$0xff] }
  0x25   : > { %1722 = vmatpush.msra.mxu1 %v1444_v11  ;;  %1723 = vmatpush.msra.mxu2 %v1444_v11  ;;  %v1549_v63 = vld [vmem:[%s2784_s1 + $0x250] sm:$0xff]  ;;  %v2107_v6 = vld [vmem:[%s1934_s12 + $0x39] sm:$0xff] }
  0x26   : > { %1724 = vmatpush.msra.mxu3 %v1444_v11  ;;  %301 = vmatpush.msra.mxu0 %v1444_v11  ;;  %v1476_v7 = vld [vmem:[%s2784_s1 + $0x118] sm:$0xff]  ;;  %v1510_v8 = vld [vmem:[%s2784_s1 + $0x1a0] sm:$0xff] }
  0x27   : > { %1725 = vmatpush.msra.mxu1 %v1443_v12  ;;  %1726 = vmatpush.msra.mxu2 %v1443_v12  ;;  %v1547_v9 = vld [vmem:[%s2784_s1 + $0x240] sm:$0xff]  ;;  %v242_v10 = vld [vmem:[%s2784_s1 + $0x18] sm:$0xff] }
  0x28   : > { %1727 = vmatpush.msra.mxu3 %v1443_v12  ;;  %302 = vmatpush.msra.mxu0 %v1443_v12  ;;  %v2123_v11 = vld [vmem:[%s1934_s12 + $0x11] sm:$0xff]  ;;  %v2127_v12 = vld [vmem:[%s1934_s12 + $0x79] sm:$0xff] }
  0x29   : > { %1728 = vmatpush.msra.mxu1 %v1442_v13  ;;  %1729 = vmatpush.msra.mxu2 %v1442_v13 }
  0x2a   : > { %1730 = vmatpush.msra.mxu3 %v1442_v13  ;;  %303 = vmatpush.msra.mxu0 %v1442_v13  ;;  %v1475_v13 = vld [vmem:[%s2784_s1 + $0x110] sm:$0xff] }
  0x2b   : > { %1731 = vmatpush.msra.mxu1 %v1441_v14  ;;  %1732 = vmatpush.msra.mxu2 %v1441_v14 }
  0x2c   : > { %1733 = vmatpush.msra.mxu3 %v1441_v14  ;;  %304 = vmatpush.msra.mxu0 %v1441_v14  ;;  %v1509_v14 = vld [vmem:[%s2784_s1 + $0x198] sm:$0xff] }
  0x2d   : > { %1734 = vmatpush.msra.mxu1 %v1440_v15  ;;  %1735 = vmatpush.msra.mxu2 %v1440_v15 }
  0x2e   : > { %318 = vmatmul.f32.vlgmr.msra.gmra.mxu1 %v1940_v16  ;;  %330 = vmatmul.f32.vlgmr.msra.gmra.mxu2 %v1943_v17 }
  0x2f   : > { %455 = vmatpush.msrb.mxu2 %v1488_v18  ;;  %1736 = vmatpush.msra.mxu3 %v1440_v15  ;;  %v241_v18 = vld [vmem:[%s2784_s1 + $0x10] sm:$0xff] }
  0x30   : > { %355 = vmatpush.msrb.mxu1 %v254_v19  ;;  %342 = vmatmul.f32.vlgmr.msra.gmra.mxu3 %v1952_v20  ;;  %v1474_v19 = vld [vmem:[%s2784_s1 + $0x108] sm:$0xff] }
  0x31   : > { %456 = vmatpush.msrb.mxu2 %v1487_v21  ;;  %571 = vmatpush.msrb.mxu3 %v1521_v22  ;;  %v1508_v21 = vld [vmem:[%s2784_s1 + $0x190] sm:$0xff] }
  0x32   : > { %356 = vmatpush.msrb.mxu1 %v253_v23  ;;  %305 = vmatpush.msra.mxu0 %v1440_v15  ;;  %v1546_v15 = vld [vmem:[%s2784_s1 + $0x238] sm:$0xff]  ;;  %v1545_v22 = vld [vmem:[%s2784_s1 + $0x230] sm:$0xff]  ;;  %v240_v23 = vld [vmem:[%s2784_s1 + $0x8] sm:$0xff] }
  0x33   : > { %457 = vmatpush.msrb.mxu2 %v1486_v24  ;;  %572 = vmatpush.msrb.mxu3 %v1520_v25  ;;  %v1473_v24 = vld [vmem:[%s2784_s1 + $0x100] sm:$0xff]  ;;  %v1507_v25 = vld [vmem:[%s2784_s1 + $0x188] sm:$0xff] }
  0x34   : > { %357 = vmatpush.msrb.mxu1 %v252_v26  ;;  %306 = vmatmul.f32.vlgmr.msra.gmra.mxu0 %v1424_v27  ;;  %v1544_v26 = vld [vmem:[%s2784_s1 + $0x228] sm:$0xff]  ;;  %v239_v27 = vld [vmem:[%s2784_s1] sm:$0xff] }
  0x35   : > { %458 = vmatpush.msrb.mxu2 %v1485_v28  ;;  %573 = vmatpush.msrb.mxu3 %v1519_v29  ;;  %v1457_v28 = vld [vmem:[%s1934_s12 + $0x2] sm:$0xff] }
  0x36   : > { %358 = vmatpush.msrb.mxu1 %v251_v30  ;;  %333 = vmatmul.f32.gmra.mxu2 %v1986_v31  ;;  %v223_v29 = vld [vmem:[%s1934_s12] sm:$0xff] }
  0x37   : > { %321 = vmatmul.f32.gmra.mxu1 %v1989_v32  ;;  %459 = vmatpush.msrb.mxu2 %v1484_v33  ;;  %v1506_v30 = vld [vmem:[%s2784_s1 + $0x180] sm:$0xff] }
  0x38   : > { %574 = vmatpush.msrb.mxu3 %v1518_v34  ;;  %359 = vmatpush.msrb.mxu1 %v250_v35  ;;  %v1543_v33 = vld [vmem:[%s2784_s1 + $0x220] sm:$0xff]  ;;  %v1620_v34 = vld [vmem:[%s2784_s1 + $0x378] sm:$0xff] }
  0x39   : > { %345 = vmatmul.f32.gmra.mxu3 %v2002_v36  ;;  %460 = vmatpush.msrb.mxu2 %v1483_v37  ;;  %v2179_v35 = vld [vmem:[%s1934_s12 + $0x19] sm:$0xff]  ;;  %v1490_v37 = vld [vmem:[%s1934_s12 + $0x10] sm:$0xff] }
  0x3a   : > { %575 = vmatpush.msrb.mxu3 %v1517_v38  ;;  %687 = vmatpush.msrb.mxu0 %v1554_v39  ;;  %v1542_v38 = vld [vmem:[%s2784_s1 + $0x218] sm:$0xff] }
  0x3b   : > { %360 = vmatpush.msrb.mxu1 %v249_v40  ;;  %461 = vmatpush.msrb.mxu2 %v1482_v41  ;;  %v1653_v39 = vld [vmem:[%s2784_s1 + $0x3f8] sm:$0xff]  ;;  %v1619_v41 = vld [vmem:[%s2784_s1 + $0x370] sm:$0xff] }
  0x3c   : > { %576 = vmatpush.msrb.mxu3 %v1516_v42  ;;  %688 = vmatpush.msrb.mxu0 %v1553_v43  ;;  %v1587_v40 = vld [vmem:[%s2784_s1 + $0x2f8] sm:$0xff]  ;;  %v1541_v42 = vld [vmem:[%s2784_s1 + $0x210] sm:$0xff] }
  0x3d   : > { %361 = vmatpush.msrb.mxu1 %v248_v44  ;;  %462 = vmatpush.msrb.mxu2 %v1481_v45  ;;  %v1652_v43 = vld [vmem:[%s2784_s1 + $0x3f0] sm:$0xff]  ;;  %v1618_v45 = vld [vmem:[%s2784_s1 + $0x368] sm:$0xff] }
  0x3e   : > { %577 = vmatpush.msrb.mxu3 %v1515_v46  ;;  %689 = vmatpush.msrb.mxu0 %v1552_v47  ;;  %v1586_v44 = vld [vmem:[%s2784_s1 + $0x2f0] sm:$0xff]  ;;  %v1540_v46 = vld [vmem:[%s2784_s1 + $0x208] sm:$0xff] }
  0x3f   : > { %362 = vmatpush.msrb.mxu1 %v247_v48  ;;  %336 = vmatmul.f32.gmra.mxu2 %v2043_v49  ;;  %v1458_v47 = vld [vmem:[%s1934_s12 + $0xa] sm:$0xff] }
  0x40   : > { %324 = vmatmul.f32.gmra.mxu1 %v2046_v50  ;;  %463 = vmatpush.msrb.mxu2 %v1480_v51  ;;  %v224_v48 = vld [vmem:[%s1934_s12 + $0x8] sm:$0xff] }
  0x41   : > { %578 = vmatpush.msrb.mxu3 %v1514_v52  ;;  %690 = vmatpush.msrb.mxu0 %v1551_v53  ;;  %v1651_v51 = vld [vmem:[%s2784_s1 + $0x3e8] sm:$0xff]  ;;  %v1539_v52 = vld [vmem:[%s2784_s1 + $0x200] sm:$0xff] }
  0x42   : > { %363 = vmatpush.msrb.mxu1 %v246_v54  ;;  %309 = vmatmul.f32.gmra.mxu0 %v1425_v55  ;;  %v1585_v53 = vld [vmem:[%s2784_s1 + $0x2e8] sm:$0xff]  ;;  %v1491_v54 = vld [vmem:[%s1934_s12 + $0x18] sm:$0xff] }
  0x43   : > { %348 = vmatmul.f32.gmra.mxu3 %v2064_v56  ;;  %464 = vmatpush.msrb.mxu2 %v1479_v57  ;;  %v1686_v55 = vld [vmem:[%s2784_s1 + $0x478] sm:$0xff]  ;;  %v1617_v57 = vld [vmem:[%s2784_s1 + $0x360] sm:$0xff] }
  0x44   : > { %579 = vmatpush.msrb.mxu3 %v1513_v58  ;;  %691 = vmatpush.msrb.mxu0 %v1550_v59  ;;  %v1650_v58 = vld [vmem:[%s2784_s1 + $0x3e0] sm:$0xff] }
  0x45   : > { %364 = vmatpush.msrb.mxu1 %v245_v60  ;;  %465 = vmatpush.msrb.mxu2 %v1478_v61  ;;  %v1584_v59 = vld [vmem:[%s2784_s1 + $0x2e0] sm:$0xff]  ;;  %v1685_v60 = vld [vmem:[%s2784_s1 + $0x470] sm:$0xff]  ;;  %v1616_v61 = vld [vmem:[%s2784_s1 + $0x358] sm:$0xff] }
  0x46   : > { %580 = vmatpush.msrb.mxu3 %v1512_v62  ;;  %692 = vmatpush.msrb.mxu0 %v1549_v63  ;;  %v1649_v62 = vld [vmem:[%s2784_s1 + $0x3d8] sm:$0xff] }
  0x47   : > { %365 = vmatpush.msrb.mxu1 %v244_v0  ;;  %466 = vmatpush.msrb.mxu2 %v1477_v1  ;;  %v1583_v63 = vld [vmem:[%s2784_s1 + $0x2d8] sm:$0xff]  ;;  %v1684_v1 = vld [vmem:[%s2784_s1 + $0x468] sm:$0xff] }
  0x48   : > { %581 = vmatpush.msrb.mxu3 %v1511_v2  ;;  %693 = vmatpush.msrb.mxu0 %v1548_v3  ;;  %v2248_v0 = vld [vmem:[%s1934_s12 + $0x12] sm:$0xff]  ;;  %v1683_v3 = vld [vmem:[%s2784_s1 + $0x460] sm:$0xff] }
  0x49   : > { %366 = vmatpush.msrb.mxu1 %v243_v4  ;;  %339 = vmatmul.f32.gmra.mxu2 %v2104_v5  ;;  %v1615_v2 = vld [vmem:[%s2784_s1 + $0x350] sm:$0xff] }
  0x4a   : > { %327 = vmatmul.f32.gmra.mxu1 %v2107_v6  ;;  %467 = vmatpush.msrb.mxu2 %v1476_v7  ;;  %v1648_v4 = vld [vmem:[%s2784_s1 + $0x3d0] sm:$0xff]  ;;  %v2264_v7 = vld [vmem:[%s1934_s12 + $0x20] sm:$0xff] }
  0x4b   : > { %582 = vmatpush.msrb.mxu3 %v1510_v8  ;;  %694 = vmatpush.msrb.mxu0 %v1547_v9  ;;  %v1682_v8 = vld [vmem:[%s2784_s1 + $0x458] sm:$0xff]  ;;  %v1582_v9 = vld [vmem:[%s2784_s1 + $0x2d0] sm:$0xff] }
  0x4c   : > { %367 = vmatpush.msrb.mxu1 %v242_v10  ;;  %312 = vmatmul.f32.gmra.mxu0 %v2123_v11  ;;  %v1614_v10 = vld [vmem:[%s2784_s1 + $0x348] sm:$0xff] }
  0x4d   : > { %351 = vmatmul.f32.gmra.mxu3 %v2127_v12  ;;  %468 = vmatpush.msrb.mxu2 %v1475_v13  ;;  %v1681_v13 = vld [vmem:[%s2784_s1 + $0x450] sm:$0xff] }
  0x4e   : > { %583 = vmatpush.msrb.mxu3 %v1509_v14  ;;  %695 = vmatpush.msrb.mxu0 %v1546_v15  ;;  %v1581_v14 = vld [vmem:[%s2784_s1 + $0x2c8] sm:$0xff]  ;;  %v2287_v15 = vld [vmem:[%s1934_s12 + $0x1a] sm:$0xff] }
  0x4f   : > { %368 = vmatpush.msrb.mxu1 %v241_v18  ;;  %469 = vmatpush.msrb.mxu2 %v1474_v19  ;;  %v2291_v18 = vld [vmem:[%s1934_s12 + $0x28] sm:$0xff]  ;;  %v1613_v19 = vld [vmem:[%s2784_s1 + $0x340] sm:$0xff] }
  0x50   : > { %584 = vmatpush.msrb.mxu3 %v1508_v21  ;;  %696 = vmatpush.msrb.mxu0 %v1545_v22  ;;  %v1646_v21 = vld [vmem:[%s2784_s1 + $0x3c0] sm:$0xff]  ;;  %v1680_v22 = vld [vmem:[%s2784_s1 + $0x448] sm:$0xff] }
  0x51   : > { %369 = vmatpush.msrb.mxu1 %v240_v23  ;;  %470 = vmatpush.msrb.mxu2 %v1473_v24  ;;  %v1580_v23 = vld [vmem:[%s2784_s1 + $0x2c0] sm:$0xff] }
  0x52   : > { %585 = vmatpush.msrb.mxu3 %v1507_v25  ;;  %697 = vmatpush.msrb.mxu0 %v1544_v26  ;;  %v2308_v24 = vld [vmem:[%s1934_s12 + $0x22] sm:$0xff]  ;;  %v2312_v25 = vld [vmem:[%s1934_s12 + $0x30] sm:$0xff]  ;;  %v1612_v26 = vld [vmem:[%s2784_s1 + $0x338] sm:$0xff] }
  0x53   : > { %370 = vmatpush.msrb.mxu1 %v239_v27  ;;  %471 = vmatmul.f32.vlgmr.msrb.gmra.mxu2 %v1457_v28  ;;  %v1645_v27 = vld [vmem:[%s2784_s1 + $0x3b8] sm:$0xff]  ;;  %v1679_v28 = vld [vmem:[%s2784_s1 + $0x440] sm:$0xff] }
  0x54   : > { %371 = vmatmul.f32.vlgmr.msrb.gmra.mxu1 %v223_v29  ;;  %586 = vmatpush.msrb.mxu3 %v1506_v30  ;;  %v1579_v29 = vld [vmem:[%s2784_s1 + $0x2b8] sm:$0xff]  ;;  %v2330_v30 = vld [vmem:[%s1934_s12 + $0x2a] sm:$0xff] }
  0x55   : > { %698 = vmatpush.msrb.mxu0 %v1543_v33  ;;  %919 = vmatpush.msra.mxu2 %v1620_v34  ;;  %v2334_v33 = vld [vmem:[%s1934_s12 + $0x38] sm:$0xff]  ;;  %v1611_v34 = vld [vmem:[%s2784_s1 + $0x330] sm:$0xff] }
  0x56   : > { %315 = vmatmul.f32.gmra.mxu0 %v2179_v35  ;;  %587 = vmatmul.f32.vlgmr.msrb.gmra.mxu3 %v1490_v37 }
  0x57   : > { %699 = vmatpush.msrb.mxu0 %v1542_v38  ;;  %1035 = vmatpush.msra.mxu3 %v1653_v39  ;;  %v1578_v38 = vld [vmem:[%s2784_s1 + $0x2b0] sm:$0xff] }
  0x58   : > { %803 = vmatpush.msra.mxu1 %v1587_v40  ;;  %920 = vmatpush.msra.mxu2 %v1619_v41  ;;  %v2352_v39 = vld [vmem:[%s1934_s12 + $0x32] sm:$0xff]  ;;  %v2356_v40 = vld [vmem:[%s1934_s12 + $0x40] sm:$0xff]  ;;  %v1610_v41 = vld [vmem:[%s2784_s1 + $0x328] sm:$0xff] }
  0x59   : > { %700 = vmatpush.msrb.mxu0 %v1541_v42  ;;  %1036 = vmatpush.msra.mxu3 %v1652_v43  ;;  %v1643_v42 = vld [vmem:[%s2784_s1 + $0x3a8] sm:$0xff]  ;;  %v1677_v43 = vld [vmem:[%s2784_s1 + $0x430] sm:$0xff] }
  0x5a   : > { %804 = vmatpush.msra.mxu1 %v1586_v44  ;;  %921 = vmatpush.msra.mxu2 %v1618_v45  ;;  %v1577_v44 = vld [vmem:[%s2784_s1 + $0x2a8] sm:$0xff]  ;;  %v2374_v45 = vld [vmem:[%s1934_s12 + $0x3a] sm:$0xff] }
  0x5b   : > { %701 = vmatpush.msrb.mxu0 %v1540_v46  ;;  %474 = vmatmul.f32.gmra.mxu2 %v1458_v47  ;;  %v2378_v46 = vld [vmem:[%s1934_s12 + $0x48] sm:$0xff]  ;;  %v1609_v47 = vld [vmem:[%s2784_s1 + $0x320] sm:$0xff] }
  0x5c   : > { %374 = vmatmul.f32.gmra.mxu1 %v224_v48  ;;  %1037 = vmatpush.msra.mxu3 %v1651_v51  ;;  %v1642_v48 = vld [vmem:[%s2784_s1 + $0x3a0] sm:$0xff]  ;;  %v1676_v51 = vld [vmem:[%s2784_s1 + $0x428] sm:$0xff] }
  0x5d   : > { %702 = vmatpush.msrb.mxu0 %v1539_v52  ;;  %805 = vmatpush.msra.mxu1 %v1585_v53  ;;  %v1576_v52 = vld [vmem:[%s2784_s1 + $0x2a0] sm:$0xff] }
  0x5e   : > { %590 = vmatmul.f32.gmra.mxu3 %v1491_v54  ;;  %703 = vmatmul.f32.vlgmr.msrb.gmra.mxu0 %v2123_v11  ;;  %v1647_v11 = vld [vmem:[%s2784_s1 + $0x3c8] sm:$0xff] }
  0x5f   : > { %1151 = vmatpush.msra.mxu0 %v1686_v55  ;;  %922 = vmatpush.msra.mxu2 %v1617_v57  ;;  %v2396_v53 = vld [vmem:[%s1934_s12 + $0x42] sm:$0xff]  ;;  %v1608_v55 = vld [vmem:[%s2784_s1 + $0x318] sm:$0xff] }
  0x60   : > { %1038 = vmatpush.msra.mxu3 %v1650_v58  ;;  %806 = vmatpush.msra.mxu1 %v1584_v59  ;;  %v1641_v57 = vld [vmem:[%s2784_s1 + $0x398] sm:$0xff]  ;;  %v1675_v58 = vld [vmem:[%s2784_s1 + $0x420] sm:$0xff] }
  0x61   : > { %1152 = vmatpush.msra.mxu0 %v1685_v60  ;;  %923 = vmatpush.msra.mxu2 %v1616_v61  ;;  %v1575_v59 = vld [vmem:[%s2784_s1 + $0x298] sm:$0xff]  ;;  %v2418_v60 = vld [vmem:[%s1934_s12 + $0x4a] sm:$0xff] }
  0x62   : > { %1039 = vmatpush.msra.mxu3 %v1649_v62  ;;  %807 = vmatpush.msra.mxu1 %v1583_v63  ;;  %v2422_v61 = vld [vmem:[%s1934_s12 + $0x58] sm:$0xff]  ;;  %v1607_v62 = vld [vmem:[%s2784_s1 + $0x310] sm:$0xff] }
  0x63   : > { %477 = vmatmul.f32.gmra.mxu2 %v2248_v0  ;;  %1153 = vmatpush.msra.mxu0 %v1684_v1  ;;  %v1640_v63 = vld [vmem:[%s2784_s1 + $0x390] sm:$0xff]  ;;  %v1674_v1 = vld [vmem:[%s2784_s1 + $0x418] sm:$0xff] }
  0x64   : > { %377 = vmatmul.f32.gmra.mxu1 %v1490_v37  ;;  %924 = vmatpush.msra.mxu2 %v1615_v2  ;;  %v1678_v37 = vld [vmem:[%s2784_s1 + $0x438] sm:$0xff]  ;;  %v1574_v2 = vld [vmem:[%s2784_s1 + $0x290] sm:$0xff] }
  0x65   : > { %1154 = vmatpush.msra.mxu0 %v1683_v3  ;;  %1040 = vmatpush.msra.mxu3 %v1648_v4  ;;  %v2440_v3 = vld [vmem:[%s1934_s12 + $0x52] sm:$0xff]  ;;  %v2444_v4 = vld [vmem:[%s1934_s12 + $0x60] sm:$0xff] }
  0x66   : > { %593 = vmatmul.f32.gmra.mxu3 %v2264_v7  ;;  %706 = vmatmul.f32.gmra.mxu0 %v2179_v35  ;;  %v1644_v35 = vld [vmem:[%s2784_s1 + $0x3b0] sm:$0xff] }
  0x67   : > { %1155 = vmatpush.msra.mxu0 %v1682_v8  ;;  %808 = vmatpush.msra.mxu1 %v1582_v9  ;;  %v1606_v8 = vld [vmem:[%s2784_s1 + $0x308] sm:$0xff] }
  0x68   : > { %925 = vmatpush.msra.mxu2 %v1614_v10  ;;  %1041 = vmatpush.msra.mxu3 %v1647_v11  ;;  %v1639_v9 = vld [vmem:[%s2784_s1 + $0x388] sm:$0xff]  ;;  %v1673_v10 = vld [vmem:[%s2784_s1 + $0x410] sm:$0xff] }
  0x69   : > { %1156 = vmatpush.msra.mxu0 %v1681_v13  ;;  %809 = vmatpush.msra.mxu1 %v1581_v14  ;;  %v1573_v11 = vld [vmem:[%s2784_s1 + $0x288] sm:$0xff]  ;;  %v2462_v13 = vld [vmem:[%s1934_s12 + $0x5a] sm:$0xff] }
  0x6a   : > { %926 = vmatpush.msra.mxu2 %v1613_v19  ;;  %1042 = vmatpush.msra.mxu3 %v1646_v21  ;;  %v2466_v14 = vld [vmem:[%s1934_s12 + $0x68] sm:$0xff]  ;;  %v1605_v21 = vld [vmem:[%s2784_s1 + $0x300] sm:$0xff] }
  0x6b   : > { %480 = vmatmul.f32.gmra.mxu2 %v2287_v15  ;;  %1157 = vmatpush.msra.mxu0 %v1680_v22  ;;  %v1638_v22 = vld [vmem:[%s2784_s1 + $0x380] sm:$0xff] }
  0x6c   : > { %380 = vmatmul.f32.gmra.mxu1 %v1491_v54  ;;  %927 = vmatpush.msra.mxu2 %v1612_v26  ;;  %v2400_v54 = vld [vmem:[%s1934_s12 + $0x50] sm:$0xff]  ;;  %v1572_v26 = vld [vmem:[%s2784_s1 + $0x280] sm:$0xff] }
  0x6d   : > { %810 = vmatpush.msra.mxu1 %v1580_v23  ;;  %1043 = vmatpush.msra.mxu3 %v1645_v27  ;;  %v1672_v23 = vld [vmem:[%s2784_s1 + $0x408] sm:$0xff] }
  0x6e   : > { %596 = vmatmul.f32.gmra.mxu3 %v2291_v18  ;;  %709 = vmatmul.f32.gmra.mxu0 %v1940_v16  ;;  %v2486_v27 = vld [vmem:[%s1934_s12 + $0x62] sm:$0xff] }
  0x6f   : > { %1158 = vmatpush.msra.mxu0 %v1679_v28  ;;  %811 = vmatpush.msra.mxu1 %v1579_v29  ;;  %v2492_v28 = vld [vmem:[%s1934_s12 + $0x70] sm:$0xff] }
  0x70   : > { %928 = vmatpush.msra.mxu2 %v1611_v34  ;;  %1044 = vmatpush.msra.mxu3 %v1644_v35 }
  0x71   : > { %1159 = vmatpush.msra.mxu0 %v1678_v37  ;;  %812 = vmatpush.msra.mxu1 %v1578_v38  ;;  %v1671_v37 = vld [vmem:[%s2784_s1 + $0x400] sm:$0xff]  ;;  %v2505_v38 = vld [vmem:[%s1934_s12 + $0x6a] sm:$0xff] }
  0x72   : > { %929 = vmatpush.msra.mxu2 %v1610_v41  ;;  %1045 = vmatpush.msra.mxu3 %v1643_v42  ;;  %v2511_v42 = vld [vmem:[%s1934_s12 + $0x78] sm:$0xff] }
  0x73   : > { %483 = vmatmul.f32.gmra.mxu2 %v2308_v24  ;;  %1160 = vmatpush.msra.mxu0 %v1677_v43 }
  0x74   : > { %383 = vmatmul.f32.gmra.mxu1 %v2264_v7  ;;  %930 = vmatpush.msra.mxu2 %v1609_v47  ;;  %v2521_v47 = vld [vmem:[%s1934_s12 + $0x72] sm:$0xff] }
  0x75   : > { %813 = vmatpush.msra.mxu1 %v1577_v44  ;;  %1046 = vmatpush.msra.mxu3 %v1642_v48 }
  0x76   : > { %599 = vmatmul.f32.gmra.mxu3 %v2312_v25  ;;  %712 = vmatmul.f32.gmra.mxu0 %v1989_v32 }
  0x77   : > { %1161 = vmatpush.msra.mxu0 %v1676_v51  ;;  %814 = vmatpush.msra.mxu1 %v1576_v52  ;;  %v2527_v51 = vld [vmem:[%s1934_s12 + $0x80] sm:$0xff] }
  0x78   : > { %931 = vmatpush.msra.mxu2 %v1608_v55  ;;  %1047 = vmatpush.msra.mxu3 %v1641_v57 }
  0x79   : > { %1162 = vmatpush.msra.mxu0 %v1675_v58  ;;  %815 = vmatpush.msra.mxu1 %v1575_v59  ;;  %v2541_v58 = vld [vmem:[%s1934_s12 + $0x88] sm:$0xff] }
  0x7a   : > { %932 = vmatpush.msra.mxu2 %v1607_v62  ;;  %1048 = vmatpush.msra.mxu3 %v1640_v63  ;;  %v2544_v59 = vld [vmem:[%s1934_s12 + $0x81] sm:$0xff] }
  0x7b   : > { %486 = vmatmul.f32.gmra.mxu2 %v2330_v30  ;;  %1163 = vmatpush.msra.mxu0 %v1674_v1 }
  0x7c   : > { %386 = vmatmul.f32.gmra.mxu1 %v2291_v18  ;;  %933 = vmatpush.msra.mxu2 %v1606_v8  ;;  %v2555_v8 = vld [vmem:[%s1934_s12 + $0x89] sm:$0xff] }
  0x7d   : > { %816 = vmatpush.msra.mxu1 %v1574_v2  ;;  %1049 = vmatpush.msra.mxu3 %v1639_v9 }
  0x7e   : > { %602 = vmatmul.f32.gmra.mxu3 %v2334_v33  ;;  %715 = vmatmul.f32.gmra.mxu0 %v2046_v50 }
  0x7f   : > { %1164 = vmatpush.msra.mxu0 %v1673_v10  ;;  %817 = vmatpush.msra.mxu1 %v1573_v11 }
  0x80   : > { %934 = vmatpush.msra.mxu2 %v1605_v21  ;;  %1050 = vmatpush.msra.mxu3 %v1638_v22 }
  0x81   : > { %1165 = vmatpush.msra.mxu0 %v1672_v23  ;;  %818 = vmatpush.msra.mxu1 %v1572_v26 }
  0x83   : > { %489 = vmatmul.f32.gmra.mxu2 %v2352_v39  ;;  %1166 = vmatpush.msra.mxu0 %v1671_v37 }
  0x84   : > { %389 = vmatmul.f32.gmra.mxu1 %v2312_v25 }
  0x86   : > { %605 = vmatmul.f32.gmra.mxu3 %v2356_v40  ;;  %718 = vmatmul.f32.gmra.mxu0 %v2107_v6 }
  0x8b   : > { %492 = vmatmul.f32.gmra.mxu2 %v2374_v45 }
  0x8c   : > { %392 = vmatmul.f32.gmra.mxu1 %v2334_v33 }
  0x8e   : > { %608 = vmatmul.f32.gmra.mxu3 %v2378_v46  ;;  %721 = vmatmul.f32.gmra.mxu0 %v1943_v17 }
  0x93   : > { %495 = vmatmul.f32.gmra.mxu2 %v2396_v53 }
  0x94   : > { %395 = vmatmul.f32.gmra.mxu1 %v2356_v40 }
  0x96   : > { %611 = vmatmul.f32.gmra.mxu3 %v2400_v54  ;;  %724 = vmatmul.f32.gmra.mxu0 %v1986_v31 }
  0x9b   : > { %498 = vmatmul.f32.gmra.mxu2 %v2418_v60 }
  0x9c   : > { %398 = vmatmul.f32.gmra.mxu1 %v2378_v46 }
  0x9e   : > { %614 = vmatmul.f32.gmra.mxu3 %v2422_v61  ;;  %727 = vmatmul.f32.gmra.mxu0 %v2043_v49 }
  0xa3   : > { %501 = vmatmul.f32.gmra.mxu2 %v2440_v3 }
  0xa4   : > { %401 = vmatmul.f32.gmra.mxu1 %v2400_v54 }
  0xa6   : > { %617 = vmatmul.f32.gmra.mxu3 %v2444_v4  ;;  %730 = vmatmul.f32.gmra.mxu0 %v2104_v5 }
  0xab   : > { %504 = vmatmul.f32.gmra.mxu2 %v2462_v13  ;;  %v2468_v19 = vpop.f32.mrf.mxu1 }
  0xac   : > { %404 = vmatmul.f32.gmra.mxu1 %v2422_v61 }
  0xae   : > { %620 = vmatmul.f32.gmra.mxu3 %v2466_v14  ;;  %733 = vmatmul.f32.gmra.mxu0 %v1952_v20 }
  0xb1   : > { %v2488_v20 = vpop.f32.mrf.mxu2  ;;  %v307_v35 = vpop.f32.mrf.mxu0 }
  0xb3   : > { %507 = vmatmul.f32.gmra.mxu2 %v2486_v27  ;;  %v2494_v29 = vpop.f32.mrf.mxu3 }
  0xb4   : > { %407 = vmatmul.f32.gmra.mxu1 %v2444_v4  ;;  %v2497_v34 = vpop.f32.mrf.mxu1 }
  0xb6   : > { %623 = vmatmul.f32.gmra.mxu3 %v2492_v28  ;;  %736 = vmatmul.f32.gmra.mxu0 %v2002_v36 }
  0xb9   : > { %v2507_v41 = vpop.f32.mrf.mxu2 }
  0xbb   : > { %510 = vmatmul.f32.gmra.mxu2 %v2505_v38 }
  0xbc   : > { %410 = vmatmul.f32.gmra.mxu1 %v2466_v14  ;;  %v2514_v43 = vpop.f32.mrf.mxu3 }
  0xbd   : > { %v2516_v36 = vpop.f32.mrf.mxu1 }
  0xbe   : > { %626 = vmatmul.f32.gmra.mxu3 %v2511_v42  ;;  %739 = vmatmul.f32.gmra.mxu0 %v2064_v56  ;;  %v2537_v56 = vld [vmem:[%s1934_s12 + $0x7a] sm:$0xff] }
  0xbf   : > { %v310_v44 = vpop.f32.mrf.mxu0 }
  0xc2   : > { %v2523_v48 = vpop.f32.mrf.mxu2 }
  0xc3   : > { %513 = vmatmul.f32.gmra.mxu2 %v2521_v47 }
  0xc4   : > { %413 = vmatmul.f32.gmra.mxu1 %v2492_v28 }
  0xc6   : > { %629 = vmatmul.f32.gmra.mxu3 %v2527_v51  ;;  %742 = vmatmul.f32.gmra.mxu0 %v2127_v12  ;;  %v2532_v52 = vpop.f32.mrf.mxu3 }
  0xc7   : > { %v2534_v55 = vpop.f32.mrf.mxu1 }
  0xc9   : > { %v313_v57 = vpop.f32.mrf.mxu0 }
  0xcb   : > { %516 = vmatmul.f32.gmra.mxu2 %v2537_v56 }
  0xcc   : > { %416 = vmatmul.f32.gmra.mxu1 %v2511_v42  ;;  %v2547_v62 = vpop.f32.mrf.mxu2 }
  0xce   : > { %632 = vmatmul.f32.gmra.mxu3 %v2541_v58  ;;  %745 = vmatmul.f32.gmra.mxu0 %v2544_v59 }
  0xd0   : > { %v2551_v63 = vpop.f32.mrf.mxu3 }
  0xd1   : > { %v372_v1 = vpop.f32.mrf.mxu1 }
  0xd2   : > { %v373_v9 = vadd.f32 %v372_v1, %v307_v35 }
  0xd3   : > { %v316_v2 = vpop.f32.mrf.mxu0  ;;  %935 = vmatmul.f32.vlgmr.msra.gmra.mxu2 %v2264_v7 }
  0xd4   : > { %819 = vmatmul.f32.vlgmr.msra.gmra.mxu1 %v2248_v0 }
  0xd6   : > { %748 = vmatmul.f32.gmra.mxu0 %v2555_v8  ;;  %1051 = vmatmul.f32.vlgmr.msra.gmra.mxu3 %v1940_v16  ;;  %v472_v10 = vpop.f32.mrf.mxu2 }
  0xd7   : > { %v520_v11 = vadd.f32 %v472_v10, %v373_v9 }
  0xd9   : > { %v375_v21 = vpop.f32.mrf.mxu1  ;;  %v588_v22 = vpop.f32.mrf.mxu3 }
  0xda   : > { %v2560_v23 = vadd.f32 %v588_v22, %v520_v11  ;;  %v376_v7 = vadd.f32 %v375_v21, %v310_v44 }
  0xdb   : > { %v2562_v26 = vpop.f32.mrf.mxu0  ;;  %938 = vmatmul.f32.gmra.mxu2 %v2291_v18 }
  0xdc   : > { %822 = vmatmul.f32.gmra.mxu1 %v2287_v15 }
  0xde   : > { %1054 = vmatmul.f32.gmra.mxu3 %v1989_v32  ;;  %1167 = vmatmul.f32.vlgmr.msra.gmra.mxu0 %v2308_v24  ;;  %v475_v0 = vpop.f32.mrf.mxu2 }
  0xdf   : > { %v521_v35 = vadd.f32 %v475_v0, %v376_v7 }
  0xe1   : > { %v378_v16 = vpop.f32.mrf.mxu1  ;;  %v591_v37 = vpop.f32.mrf.mxu3 }
  0xe2   : > { %v2568_v1 = vadd.f32 %v591_v37, %v521_v35  ;;  %v379_v18 = vadd.f32 %v378_v16, %v313_v57 }
  0xe3   : > { %v2570_v9 = vpop.f32.mrf.mxu0  ;;  %941 = vmatmul.f32.gmra.mxu2 %v2312_v25 }
  0xe4   : > { %825 = vmatmul.f32.gmra.mxu1 %v2308_v24 }
  0xe6   : > { %1057 = vmatmul.f32.gmra.mxu3 %v2046_v50  ;;  %1170 = vmatmul.f32.gmra.mxu0 %v2330_v30  ;;  %v478_v32 = vpop.f32.mrf.mxu2 }
  0xe7   : > { %v522_v15 = vadd.f32 %v478_v32, %v379_v18 }
  0xe9   : > { %v381_v44 = vpop.f32.mrf.mxu1  ;;  %v594_v10 = vpop.f32.mrf.mxu3 }
  0xea   : > { %v2576_v11 = vadd.f32 %v594_v10, %v522_v15  ;;  %v382_v25 = vadd.f32 %v381_v44, %v316_v2 }
  0xeb   : > { %v2578_v21 = vpop.f32.mrf.mxu0  ;;  %944 = vmatmul.f32.gmra.mxu2 %v2334_v33 }
  0xec   : > { %828 = vmatmul.f32.gmra.mxu1 %v2330_v30 }
  0xee   : > { %1060 = vmatmul.f32.gmra.mxu3 %v2107_v6  ;;  %1173 = vmatmul.f32.gmra.mxu0 %v2352_v39  ;;  %v481_v50 = vpop.f32.mrf.mxu2 }
  0xef   : > { %v523_v24 = vadd.f32 %v481_v50, %v382_v25 }
  0xf1   : > { %v384_v57 = vpop.f32.mrf.mxu1  ;;  %v597_v22 = vpop.f32.mrf.mxu3 }
  0xf2   : > { %v2584_v7 = vadd.f32 %v597_v22, %v523_v24  ;;  %v385_v33 = vadd.f32 %v384_v57, %v2468_v19 }
  0xf3   : > { %v2586_v0 = vpop.f32.mrf.mxu0  ;;  %947 = vmatmul.f32.gmra.mxu2 %v2356_v40 }
  0xf4   : > { %831 = vmatmul.f32.gmra.mxu1 %v2352_v39 }
  0xf6   : > { %1063 = vmatmul.f32.gmra.mxu3 %v1943_v17  ;;  %1176 = vmatmul.f32.gmra.mxu0 %v2374_v45  ;;  %v484_v6 = vpop.f32.mrf.mxu2 }
  0xf7   : > { %v524_v30 = vadd.f32 %v484_v6, %v385_v33 }
  0xf9   : > { %v387_v2 = vpop.f32.mrf.mxu1  ;;  %v600_v35 = vpop.f32.mrf.mxu3 }
  0xfa   : > { %v2593_v16 = vadd.f32 %v600_v35, %v524_v30  ;;  %v388_v39 = vadd.f32 %v387_v2, %v2497_v34  ;;  %v1631_v2 = vld [vmem:[%s1934_s12 + $0x69] sm:$0xff] }
  0xfb   : > { %v2595_v37 = vpop.f32.mrf.mxu0  ;;  %950 = vmatmul.f32.gmra.mxu2 %v2378_v46 }
  0xfc   : > { %834 = vmatmul.f32.gmra.mxu1 %v2374_v45 }
  0xfe   : > { %1066 = vmatmul.f32.gmra.mxu3 %v1986_v31  ;;  %1179 = vmatmul.f32.gmra.mxu0 %v2396_v53  ;;  %v487_v17 = vpop.f32.mrf.mxu2 }
  0xff   : > { %v525_v40 = vadd.f32 %v487_v17, %v388_v39 }
 0x101   : > { %v390_v19 = vpop.f32.mrf.mxu1  ;;  %v603_v18 = vpop.f32.mrf.mxu3 }
 0x102   : > { %v2602_v32 = vadd.f32 %v603_v18, %v525_v40  ;;  %v391_v45 = vadd.f32 %v390_v19, %v2516_v36  ;;  %v1632_v18 = vld [vmem:[%s1934_s12 + $0x71] sm:$0xff] }
 0x103   : > { %v2604_v15 = vpop.f32.mrf.mxu0  ;;  %953 = vmatmul.f32.gmra.mxu2 %v2400_v54 }
 0x104   : > { %837 = vmatmul.f32.gmra.mxu1 %v2396_v53 }
 0x106   : > { %1069 = vmatmul.f32.gmra.mxu3 %v2043_v49  ;;  %1182 = vmatmul.f32.gmra.mxu0 %v2418_v60  ;;  %v490_v31 = vpop.f32.mrf.mxu2 }
 0x107   : > { %v526_v46 = vadd.f32 %v490_v31, %v391_v45 }
 0x109   : > { %v393_v34 = vpop.f32.mrf.mxu1  ;;  %v606_v44 = vpop.f32.mrf.mxu3 }
 0x10a   : > { %v2611_v10 = vadd.f32 %v606_v44, %v526_v46  ;;  %v394_v53 = vadd.f32 %v393_v34, %v2534_v55 }
 0x10b   : > { %v2613_v25 = vpop.f32.mrf.mxu0  ;;  %956 = vmatmul.f32.gmra.mxu2 %v2422_v61  ;;  %v1630_v61 = vld [vmem:[%s1934_s12 + $0x61] sm:$0xff] }
 0x10c   : > { %840 = vmatmul.f32.gmra.mxu1 %v2418_v60 }
 0x10e   : > { %1072 = vmatmul.f32.gmra.mxu3 %v2104_v5  ;;  %1185 = vmatmul.f32.gmra.mxu0 %v2440_v3  ;;  %v493_v49 = vpop.f32.mrf.mxu2 }
 0x10f   : > { %v527_v54 = vadd.f32 %v493_v49, %v394_v53 }
 0x111   : > { %v396_v36 = vpop.f32.mrf.mxu1  ;;  %v609_v50 = vpop.f32.mrf.mxu3 }
 0x112   : > { %v2620_v24 = vadd.f32 %v609_v50, %v527_v54  ;;  %v397_v60 = vadd.f32 %v396_v36, %v2488_v20 }
 0x113   : > { %v2622_v57 = vpop.f32.mrf.mxu0  ;;  %959 = vmatmul.f32.gmra.mxu2 %v2444_v4 }
 0x114   : > { %843 = vmatmul.f32.gmra.mxu1 %v2440_v3 }
 0x116   : > { %1075 = vmatmul.f32.gmra.mxu3 %v1630_v61  ;;  %1188 = vmatmul.f32.gmra.mxu0 %v2462_v13  ;;  %v496_v5 = vpop.f32.mrf.mxu2 }
 0x117   : > { %v528_v55 = vadd.f32 %v496_v5, %v397_v60 }
 0x119   : > { %v399_v22 = vpop.f32.mrf.mxu1  ;;  %v612_v33 = vpop.f32.mrf.mxu3 }
 0x11a   : > { %v644_v6 = vadd.f32 %v612_v33, %v528_v55  ;;  %v400_v3 = vadd.f32 %v399_v22, %v2507_v41  ;;  %v1603_v33 = vld [vmem:[%s1934_s12 + $0x90] sm:$0xff] }
 0x11b   : > { %v728_v30 = vpop.f32.mrf.mxu0  ;;  %962 = vmatmul.f32.gmra.mxu2 %v2466_v14 }
 0x11c   : > { %v2631_v35 = vadd.f32 %v728_v30, %v644_v6  ;;  %846 = vmatmul.f32.gmra.mxu1 %v2462_v13 }
 0x11e   : > { %1078 = vmatmul.f32.gmra.mxu3 %v1631_v2  ;;  %1191 = vmatmul.f32.gmra.mxu0 %v2486_v27  ;;  %v499_v4 = vpop.f32.mrf.mxu2 }
 0x11f   : > { %v529_v20 = vadd.f32 %v499_v4, %v400_v3  ;;  %v1668_v4 = vld [vmem:[%s1934_s12 + $0x8a] sm:$0xff] }
 0x121   : > { %v402_v39 = vpop.f32.mrf.mxu1  ;;  %v615_v17 = vpop.f32.mrf.mxu3 }
 0x122   : > { %v645_v40 = vadd.f32 %v615_v17, %v529_v20  ;;  %v403_v13 = vadd.f32 %v402_v39, %v2523_v48  ;;  %v1604_v39 = vld [vmem:[%s1934_s12 + $0x98] sm:$0xff] }
 0x123   : > { %v731_v19 = vpop.f32.mrf.mxu0  ;;  %965 = vmatmul.f32.gmra.mxu2 %v2492_v28 }
 0x124   : > { %v2638_v14 = vadd.f32 %v731_v19, %v645_v40  ;;  %849 = vmatmul.f32.gmra.mxu1 %v2486_v27 }
 0x126   : > { %1081 = vmatmul.f32.gmra.mxu3 %v1632_v18  ;;  %1194 = vmatmul.f32.gmra.mxu0 %v2505_v38  ;;  %v502_v41 = vpop.f32.mrf.mxu2 }
 0x127   : > { %v530_v45 = vadd.f32 %v502_v41, %v403_v13  ;;  %v1637_v13 = vld [vmem:[%s1934_s12 + $0x99] sm:$0xff] }
 0x128   : > { %v1669_v41 = vld [vmem:[%s1934_s12 + $0x92] sm:$0xff] }
 0x129   : > { %v405_v31 = vpop.f32.mrf.mxu1  ;;  %v618_v46 = vpop.f32.mrf.mxu3 }
 0x12a   : > { %v646_v34 = vadd.f32 %v618_v46, %v530_v45  ;;  %v406_v28 = vadd.f32 %v405_v31, %v2547_v62 }
 0x12b   : > { %v734_v44 = vpop.f32.mrf.mxu0  ;;  %968 = vmatmul.f32.gmra.mxu2 %v2511_v42 }
 0x12c   : > { %v2644_v53 = vadd.f32 %v734_v44, %v646_v34  ;;  %852 = vmatmul.f32.gmra.mxu1 %v2505_v38 }
 0x12e   : > { %1084 = vmatmul.f32.gmra.mxu3 %v2127_v12  ;;  %1197 = vmatmul.f32.gmra.mxu0 %v2521_v47  ;;  %v505_v27 = vpop.f32.mrf.mxu2 }
 0x12f   : > { %v531_v48 = vadd.f32 %v505_v27, %v406_v28  ;;  %v752_v27 = vadd.f32 %v2562_v26, %v2560_v23  ;;  %v753_v23 = vadd.f32 %v2570_v9, %v2568_v1 }
 0x131   : > { %v408_v49 = vpop.f32.mrf.mxu1  ;;  %v621_v54 = vpop.f32.mrf.mxu3 }
 0x132   : > { %v647_v36 = vadd.f32 %v621_v54, %v531_v48  ;;  %v409_v38 = vadd.f32 %v408_v49, %v2494_v29  ;;  %v1670_v49 = vld [vmem:[%s1934_s12 + $0x9a] sm:$0xff] }
 0x133   : > { %v737_v50 = vpop.f32.mrf.mxu0  ;;  %971 = vmatmul.f32.gmra.mxu2 %v2527_v51  ;;  %v1667_v51 = vld [vmem:[%s1934_s12 + $0x82] sm:$0xff] }
 0x134   : > { %v2651_v42 = vadd.f32 %v737_v50, %v647_v36  ;;  %855 = vmatmul.f32.gmra.mxu1 %v2521_v47 }
 0x136   : > { %1087 = vmatmul.f32.gmra.mxu3 %v2544_v59  ;;  %1200 = vmatmul.f32.gmra.mxu0 %v2537_v56  ;;  %v508_v12 = vpop.f32.mrf.mxu2 }
 0x137   : > { %v532_v62 = vadd.f32 %v508_v12, %v409_v38 }
 0x139   : > { %v411_v61 = vpop.f32.mrf.mxu1  ;;  %v624_v60 = vpop.f32.mrf.mxu3 }
 0x13a   : > { %v648_v5 = vadd.f32 %v624_v60, %v532_v62  ;;  %v412_v29 = vadd.f32 %v411_v61, %v2514_v43  ;;  %v2686_v61 = vld [vmem:[%s2785_s2] ss:$0 sm:$0xff] }
 0x13b   : > { %v740_v55 = vpop.f32.mrf.mxu0  ;;  %974 = vmatmul.f32.gmra.mxu2 %v2541_v58  ;;  %v1636_v58 = vld [vmem:[%s1934_s12 + $0x91] sm:$0xff]  ;;  %s217_s12 = sadd.s32 %s1738_s27, %s2801_s26 }
 0x13c   : > { %v2659_v22 = vadd.f32 %v740_v55, %v648_v5  ;;  %858 = vmatmul.f32.gmra.mxu1 %v2537_v56  ;;  %v2693_v5 = vld [vmem:[%s2786_s3] ss:$0 sm:$0xff]  ;;  %s1421_s16 = sshll.u32 %s217_s12, 3 }
 0x13d   : > { %s2700_s7 = scalar_lea.vmem %s2787_s4, %s1421_s16 }
 0x13e   : > { %1090 = vmatmul.f32.gmra.mxu3 %v2555_v8  ;;  %1203 = vmatmul.f32.gmra.mxu0 %v1667_v51  ;;  %v511_v47 = vpop.f32.mrf.mxu2 }
 0x13f   : > { %v533_v59 = vadd.f32 %v511_v47, %v412_v29 }
 0x141   : > { %v414_v6 = vpop.f32.mrf.mxu1  ;;  %v627_v30 = vpop.f32.mrf.mxu3 }
 0x142   : > { %v649_v2 = vadd.f32 %v627_v30, %v533_v59  ;;  %v415_v43 = vadd.f32 %v414_v6, %v2532_v52  ;;  %v754_v30 = vadd.f32 %v2578_v21, %v2576_v11 }
 0x143   : > { %v743_v3 = vpop.f32.mrf.mxu0  ;;  %977 = vmatmul.f32.gmra.mxu2 %v1603_v33 }
 0x144   : > { %v2667_v20 = vadd.f32 %v743_v3, %v649_v2  ;;  %861 = vmatmul.f32.gmra.mxu1 %v1667_v51 }
 0x146   : > { %1093 = vmatmul.f32.gmra.mxu3 %v1636_v58  ;;  %1206 = vmatmul.f32.gmra.mxu0 %v1668_v4  ;;  %v514_v56 = vpop.f32.mrf.mxu2 }
 0x147   : > { %v534_v8 = vadd.f32 %v514_v56, %v415_v43 }
 0x149   : > { %v417_v17 = vpop.f32.mrf.mxu1  ;;  %v630_v40 = vpop.f32.mrf.mxu3 }
 0x14a   : > { %v650_v19 = vadd.f32 %v630_v40, %v534_v8  ;;  %v418_v31 = vadd.f32 %v417_v17, %v2551_v63 }
 0x14b   : > { %v746_v18 = vpop.f32.mrf.mxu0  ;;  %980 = vmatmul.f32.gmra.mxu2 %v1604_v39 }
 0x14c   : > { %v2673_v45 = vadd.f32 %v746_v18, %v650_v19  ;;  %864 = vmatmul.f32.gmra.mxu1 %v1668_v4  ;;  %v755_v18 = vadd.f32 %v2586_v0, %v2584_v7 }
 0x14e   : > { %1096 = vmatmul.f32.gmra.mxu3 %v1637_v13  ;;  %1209 = vmatmul.f32.gmra.mxu0 %v1669_v41  ;;  %v517_v52 = vpop.f32.mrf.mxu2 }
 0x14f   : > { %v535_v46 = vadd.f32 %v517_v52, %v418_v31 }
 0x151   : > { %v633_v34 = vpop.f32.mrf.mxu3  ;;  %v820_v44 = vpop.f32.mrf.mxu1 }
 0x152   : > { %v651_v28 = vadd.f32 %v633_v34, %v535_v46  ;;  %v868_v36 = vadd.f32 %v820_v44, %v752_v27 }
 0x153   : > { %v749_v48 = vpop.f32.mrf.mxu0 }
 0x154   : > { %v2680_v54 = vadd.f32 %v749_v48, %v651_v28  ;;  %v756_v48 = vadd.f32 %v2595_v37, %v2593_v16 }
 0x156   : > { %1212 = vmatmul.f32.gmra.mxu0 %v1670_v49  ;;  %v936_v63 = vpop.f32.mrf.mxu2 }
 0x157   : > { %v984_v50 = vadd.f32 %v936_v63, %v868_v36 }
 0x159   : > { %v823_v38 = vpop.f32.mrf.mxu1  ;;  %v1052_v12 = vpop.f32.mrf.mxu3 }
 0x15a   : > { %v1100_v62 = vadd.f32 %v1052_v12, %v984_v50  ;;  %v869_v55 = vadd.f32 %v823_v38, %v753_v23 }
 0x15b   : > { %v1168_v26 = vpop.f32.mrf.mxu0 }
 0x15c   : > { %v1216_v60 = vadd.f32 %v1168_v26, %v1100_v62 }
 0x15e   : > { %v1236_v51 = vmul.f32 %v2686_v61, %v1216_v60  ;;  %v939_v29 = vpop.f32.mrf.mxu2  ;;  %v757_v60 = vadd.f32 %v2604_v15, %v2602_v32 }
 0x15f   : > { %v985_v47 = vadd.f32 %v939_v29, %v869_v55 }
 0x160   : > { %v1256_v59 = vadd.f32 %v2693_v5, %v1236_v51 }
 0x161   : > { %v826_v1 = vpop.f32.mrf.mxu1  ;;  %v1055_v9 = vpop.f32.mrf.mxu3 }
 0x162   : > { %v1272_v33 = vmax.f32 %v1256_v59, 0.0  ;;  %v1101_v6 = vadd.f32 %v1055_v9, %v985_v47  ;;  %v870_v58 = vadd.f32 %v826_v1, %v754_v30  ;;  %v758_v30 = vadd.f32 %v2613_v25, %v2611_v10 }
 0x163   : > { %v1171_v2 = vpop.f32.mrf.mxu0 }
 0x164   : > { %1288 = vst [vmem:[%s2700_s7] sm:$0xff] %v1272_v33  ;;  %v1217_v3 = vadd.f32 %v1171_v2, %v1101_v6 }
 0x166   : > { %v1237_v4 = vmul.f32 %v2686_v61, %v1217_v3  ;;  %v942_v43 = vpop.f32.mrf.mxu2 }
 0x167   : > { %v986_v56 = vadd.f32 %v942_v43, %v870_v58 }
 0x168   : > { %v1257_v8 = vadd.f32 %v2693_v5, %v1237_v4 }
 0x169   : > { %v829_v39 = vpop.f32.mrf.mxu1  ;;  %v1058_v17 = vpop.f32.mrf.mxu3 }
 0x16a   : > { %v1273_v40 = vmax.f32 %v1257_v8, 0.0  ;;  %v1102_v19 = vadd.f32 %v1058_v17, %v986_v56  ;;  %v871_v21 = vadd.f32 %v829_v39, %v755_v18 }
 0x16b   : > { %v1174_v13 = vpop.f32.mrf.mxu0 }
 0x16c   : > { %1289 = vst [vmem:[%s2700_s7 + $0x8] sm:$0xff] %v1273_v40  ;;  %v1218_v11 = vadd.f32 %v1174_v13, %v1102_v19  ;;  %v759_v40 = vadd.f32 %v2622_v57, %v2620_v24 }
 0x16e   : > { %v1238_v41 = vmul.f32 %v2686_v61, %v1218_v11  ;;  %v945_v31 = vpop.f32.mrf.mxu2 }
 0x16f   : > { %v987_v52 = vadd.f32 %v945_v31, %v871_v21 }
 0x170   : > { %v1258_v46 = vadd.f32 %v2693_v5, %v1238_v41 }
 0x171   : > { %v832_v34 = vpop.f32.mrf.mxu1  ;;  %v1061_v44 = vpop.f32.mrf.mxu3 }
 0x172   : > { %v1274_v28 = vmax.f32 %v1258_v46, 0.0  ;;  %v1103_v27 = vadd.f32 %v1061_v44, %v987_v52  ;;  %v872_v0 = vadd.f32 %v832_v34, %v756_v48 }
 0x173   : > { %v1177_v49 = vpop.f32.mrf.mxu0 }
 0x174   : > { %1290 = vst [vmem:[%s2700_s7 + $0x10] sm:$0xff] %v1274_v28  ;;  %v1219_v7 = vadd.f32 %v1177_v49, %v1103_v27 }
 0x176   : > { %v1239_v36 = vmul.f32 %v2686_v61, %v1219_v7  ;;  %v948_v63 = vpop.f32.mrf.mxu2 }
 0x177   : > { %v988_v50 = vadd.f32 %v948_v63, %v872_v0 }
 0x178   : > { %v1259_v38 = vadd.f32 %v2693_v5, %v1239_v36 }
 0x179   : > { %v835_v12 = vpop.f32.mrf.mxu1  ;;  %v1064_v62 = vpop.f32.mrf.mxu3 }
 0x17a   : > { %v1275_v23 = vmax.f32 %v1259_v38, 0.0  ;;  %v1104_v26 = vadd.f32 %v1064_v62, %v988_v50  ;;  %v873_v37 = vadd.f32 %v835_v12, %v757_v60 }
 0x17b   : > { %v1180_v55 = vpop.f32.mrf.mxu0 }
 0x17c   : > { %1291 = vst [vmem:[%s2700_s7 + $0x18] sm:$0xff] %v1275_v23  ;;  %v1220_v16 = vadd.f32 %v1180_v55, %v1104_v26 }
 0x17e   : > { %v1240_v51 = vmul.f32 %v2686_v61, %v1220_v16  ;;  %v951_v29 = vpop.f32.mrf.mxu2 }
 0x17f   : > { %v989_v47 = vadd.f32 %v951_v29, %v873_v37 }
 0x180   : > { %v1260_v59 = vadd.f32 %v2693_v5, %v1240_v51 }
 0x181   : > { %v838_v1 = vpop.f32.mrf.mxu1  ;;  %v1067_v9 = vpop.f32.mrf.mxu3 }
 0x182   : > { %v1276_v33 = vmax.f32 %v1260_v59, 0.0  ;;  %v1105_v6 = vadd.f32 %v1067_v9, %v989_v47  ;;  %v874_v15 = vadd.f32 %v838_v1, %v758_v30 }
 0x183   : > { %v1183_v2 = vpop.f32.mrf.mxu0 }
 0x184   : > { %1292 = vst [vmem:[%s2700_s7 + $0x20] sm:$0xff] %v1276_v33  ;;  %v1221_v32 = vadd.f32 %v1183_v2, %v1105_v6 }
 0x186   : > { %v1241_v3 = vmul.f32 %v2686_v61, %v1221_v32  ;;  %v954_v58 = vpop.f32.mrf.mxu2 }
 0x187   : > { %v990_v4 = vadd.f32 %v954_v58, %v874_v15 }
 0x188   : > { %v1261_v43 = vadd.f32 %v2693_v5, %v1241_v3 }
 0x189   : > { %v841_v56 = vpop.f32.mrf.mxu1  ;;  %v1070_v8 = vpop.f32.mrf.mxu3 }
 0x18a   : > { %v1277_v39 = vmax.f32 %v1261_v43, 0.0  ;;  %v1106_v17 = vadd.f32 %v1070_v8, %v990_v4  ;;  %v875_v25 = vadd.f32 %v841_v56, %v759_v40 }
 0x18b   : > { %v1186_v19 = vpop.f32.mrf.mxu0 }
 0x18c   : > { %1293 = vst [vmem:[%s2700_s7 + $0x28] sm:$0xff] %v1277_v39  ;;  %v1222_v10 = vadd.f32 %v1186_v19, %v1106_v17 }
 0x18e   : > { %v1242_v18 = vmul.f32 %v2686_v61, %v1222_v10  ;;  %v957_v13 = vpop.f32.mrf.mxu2 }
 0x18f   : > { %v991_v11 = vadd.f32 %v957_v13, %v875_v25 }
 0x190   : > { %v1262_v21 = vadd.f32 %v2693_v5, %v1242_v18 }
 0x191   : > { %v844_v41 = vpop.f32.mrf.mxu1  ;;  %v1073_v31 = vpop.f32.mrf.mxu3 }
 0x192   : > { %v1278_v52 = vmax.f32 %v1262_v21, 0.0  ;;  %v1107_v46 = vadd.f32 %v1073_v31, %v991_v11  ;;  %v876_v24 = vadd.f32 %v844_v41, %v2631_v35 }
 0x193   : > { %v1189_v34 = vpop.f32.mrf.mxu0 }
 0x194   : > { %1294 = vst [vmem:[%s2700_s7 + $0x30] sm:$0xff] %v1278_v52  ;;  %v1223_v44 = vadd.f32 %v1189_v34, %v1107_v46 }
 0x196   : > { %v1243_v57 = vmul.f32 %v2686_v61, %v1223_v44  ;;  %v960_v28 = vpop.f32.mrf.mxu2 }
 0x197   : > { %v992_v27 = vadd.f32 %v960_v28, %v876_v24 }
 0x198   : > { %v1263_v48 = vadd.f32 %v2693_v5, %v1243_v57 }
 0x199   : > { %v847_v49 = vpop.f32.mrf.mxu1  ;;  %v1076_v7 = vpop.f32.mrf.mxu3 }
 0x19a   : > { %v1279_v0 = vmax.f32 %v1263_v48, 0.0  ;;  %v1108_v36 = vadd.f32 %v1076_v7, %v992_v27  ;;  %v877_v38 = vadd.f32 %v847_v49, %v2638_v14 }
 0x19b   : > { %v1192_v63 = vpop.f32.mrf.mxu0 }
 0x19c   : > { %1295 = vst [vmem:[%s2700_s7 + $0x38] sm:$0xff] %v1279_v0  ;;  %v1224_v50 = vadd.f32 %v1192_v63, %v1108_v36 }
 0x19e   : > { %v1244_v12 = vmul.f32 %v2686_v61, %v1224_v50  ;;  %v963_v62 = vpop.f32.mrf.mxu2 }
 0x19f   : > { %v993_v35 = vadd.f32 %v963_v62, %v877_v38 }
 0x1a0   : > { %v1264_v23 = vadd.f32 %v2693_v5, %v1244_v12 }
 0x1a1   : > { %v850_v26 = vpop.f32.mrf.mxu1  ;;  %v1079_v60 = vpop.f32.mrf.mxu3 }
 0x1a2   : > { %v1280_v55 = vmax.f32 %v1264_v23, 0.0  ;;  %v1109_v16 = vadd.f32 %v1079_v60, %v993_v35  ;;  %v878_v29 = vadd.f32 %v850_v26, %v2644_v53 }
 0x1a3   : > { %v1195_v37 = vpop.f32.mrf.mxu0 }
 0x1a4   : > { %1296 = vst [vmem:[%s2700_s7 + $0x40] sm:$0xff] %v1280_v55  ;;  %v1225_v51 = vadd.f32 %v1195_v37, %v1109_v16 }
 0x1a6   : > { %v1245_v47 = vmul.f32 %v2686_v61, %v1225_v51  ;;  %v966_v59 = vpop.f32.mrf.mxu2 }
 0x1a7   : > { %v994_v14 = vadd.f32 %v966_v59, %v878_v29 }
 0x1a8   : > { %v1265_v1 = vadd.f32 %v2693_v5, %v1245_v47 }
 0x1a9   : > { %v853_v9 = vpop.f32.mrf.mxu1  ;;  %v1082_v33 = vpop.f32.mrf.mxu3 }
 0x1aa   : > { %v1281_v6 = vmax.f32 %v1265_v1, 0.0  ;;  %v1110_v30 = vadd.f32 %v1082_v33, %v994_v14  ;;  %v879_v15 = vadd.f32 %v853_v9, %v2651_v42 }
 0x1ab   : > { %v1198_v2 = vpop.f32.mrf.mxu0 }
 0x1ac   : > { %1297 = vst [vmem:[%s2700_s7 + $0x48] sm:$0xff] %v1281_v6  ;;  %v1226_v32 = vadd.f32 %v1198_v2, %v1110_v30 }
 0x1ae   : > { %v1246_v3 = vmul.f32 %v2686_v61, %v1226_v32  ;;  %v969_v58 = vpop.f32.mrf.mxu2 }
 0x1af   : > { %v995_v53 = vadd.f32 %v969_v58, %v879_v15 }
 0x1b0   : > { %v1266_v4 = vadd.f32 %v2693_v5, %v1246_v3 }
 0x1b1   : > { %v856_v43 = vpop.f32.mrf.mxu1  ;;  %v1085_v56 = vpop.f32.mrf.mxu3 }
 0x1b2   : > { %v1282_v8 = vmax.f32 %v1266_v4, 0.0  ;;  %v1111_v39 = vadd.f32 %v1085_v56, %v995_v53  ;;  %v880_v19 = vadd.f32 %v856_v43, %v2659_v22 }
 0x1b3   : > { %v1201_v17 = vpop.f32.mrf.mxu0 }
 0x1b4   : > { %1298 = vst [vmem:[%s2700_s7 + $0x50] sm:$0xff] %v1282_v8  ;;  %v1227_v40 = vadd.f32 %v1201_v17, %v1111_v39 }
 0x1b6   : > { %v1247_v10 = vmul.f32 %v2686_v61, %v1227_v40  ;;  %v972_v25 = vpop.f32.mrf.mxu2 }
 0x1b7   : > { %v996_v42 = vadd.f32 %v972_v25, %v880_v19 }
 0x1b8   : > { %v1267_v18 = vadd.f32 %v2693_v5, %v1247_v10 }
 0x1b9   : > { %v859_v13 = vpop.f32.mrf.mxu1  ;;  %v1088_v11 = vpop.f32.mrf.mxu3 }
 0x1ba   : > { %v1283_v21 = vmax.f32 %v1267_v18, 0.0  ;;  %v1112_v41 = vadd.f32 %v1088_v11, %v996_v42  ;;  %v881_v46 = vadd.f32 %v859_v13, %v2667_v20 }
 0x1bb   : > { %v1204_v31 = vpop.f32.mrf.mxu0 }
 0x1bc   : > { %1299 = vst [vmem:[%s2700_s7 + $0x58] sm:$0xff] %v1283_v21  ;;  %v1228_v52 = vadd.f32 %v1204_v31, %v1112_v41 }
 0x1be   : > { %v1248_v34 = vmul.f32 %v2686_v61, %v1228_v52  ;;  %v975_v44 = vpop.f32.mrf.mxu2 }
 0x1bf   : > { %v997_v22 = vadd.f32 %v975_v44, %v881_v46 }
 0x1c0   : > { %v1268_v24 = vadd.f32 %v2693_v5, %v1248_v34 }
 0x1c1   : > { %v862_v57 = vpop.f32.mrf.mxu1  ;;  %v1091_v28 = vpop.f32.mrf.mxu3 }
 0x1c2   : > { %v1284_v27 = vmax.f32 %v1268_v24, 0.0  ;;  %v1113_v48 = vadd.f32 %v1091_v28, %v997_v22  ;;  %v882_v0 = vadd.f32 %v862_v57, %v2673_v45 }
 0x1c3   : > { %v1207_v49 = vpop.f32.mrf.mxu0 }
 0x1c4   : > { %1300 = vst [vmem:[%s2700_s7 + $0x60] sm:$0xff] %v1284_v27  ;;  %v1229_v7 = vadd.f32 %v1207_v49, %v1113_v48 }
 0x1c6   : > { %v1249_v36 = vmul.f32 %v2686_v61, %v1229_v7  ;;  %v978_v63 = vpop.f32.mrf.mxu2 }
 0x1c7   : > { %v998_v20 = vadd.f32 %v978_v63, %v882_v0 }
 0x1c8   : > { %v1269_v50 = vadd.f32 %v2693_v5, %v1249_v36 }
 0x1c9   : > { %v1094_v38 = vpop.f32.mrf.mxu3  ;;  %v865_v62 = vpop.f32.mrf.mxu1 }
 0x1ca   : > { %v1285_v12 = vmax.f32 %v1269_v50, 0.0  ;;  %v1114_v35 = vadd.f32 %v1094_v38, %v998_v20  ;;  %v883_v60 = vadd.f32 %v865_v62, %v2680_v54 }
 0x1cb   : > { %v1210_v23 = vpop.f32.mrf.mxu0 }
 0x1cc   : > { %1301 = vst [vmem:[%s2700_s7 + $0x68] sm:$0xff] %v1285_v12  ;;  %v1230_v26 = vadd.f32 %v1210_v23, %v1114_v35 }
 0x1ce   : > { %v1250_v55 = vmul.f32 %v2686_v61, %v1230_v26  ;;  %v981_v45 = vpop.f32.mrf.mxu2 }
 0x1cf   : > { %v999_v16 = vadd.f32 %v981_v45, %v883_v60 }
 0x1d0   : > { %v1270_v37 = vadd.f32 %v2693_v5, %v1250_v55 }
 0x1d1   : > { %v1097_v51 = vpop.f32.mrf.mxu3 }
 0x1d2   : > { %v1286_v29 = vmax.f32 %v1270_v37, 0.0  ;;  %v1115_v47 = vadd.f32 %v1097_v51, %v999_v16 }
 0x1d3   : > { %v1213_v59 = vpop.f32.mrf.mxu0 }
 0x1d4   : > { %1302 = vst [vmem:[%s2700_s7 + $0x70] sm:$0xff] %v1286_v29  ;;  %v1231_v14 = vadd.f32 %v1213_v59, %v1115_v47 }
 0x1d6   : > { %v1251_v1 = vmul.f32 %v2686_v61, %v1231_v14 }
 0x1d8   : > { %v1271_v9 = vadd.f32 %v2693_v5, %v1251_v1 }
 0x1da   : > { %v1287_v33 = vmax.f32 %v1271_v9, 0.0 }
 0x1dc   : > { %1303 = vst [vmem:[%s2700_s7 + $0x78] sm:$0xff] %v1287_v33 }
 0x1dd PF: > { %s14_s19 = sadd.s32 1, %s1819_s19   ;;  %s2788_s15 = smov %s1811_s17 }
 0x1de   : > { %p11_p7 = scmp.ge.s32.totalorder %s14_s19, 8   ;;  %s2789_s16 = smov %s1815_s18 }
 0x1df   : > { %s2790_s17 = smov %s2793_s20  ;;  %s2791_s18 = smov %s2797_s21 }
 0x1e0   :  { %13 = sbr.rel (!%p11_p7) target bundleno = 3 (0x3), region = 83 }

// kernel: depthwise_xcorr_forward.3
= control target key start
LH: loop header
LB: loop body
LE: loop exit
PB: predicated region body
PF: predicated region fallthrough
CT: control target
= control target key end

     0   :  { %s4164_s13 = smov 0   ;;  %s4166_s14 = smov 0   ;;  %s6761_s0 = inlined_call_operand.vmem [shape: f32[2,64,128], index: 0, kind: input, shape index: {}]   ;;  %s6762_s1 = inlined_call_operand.vmem [shape: f32[3,3,128,128], index: 1, kind: input, shape index: {}]   ;;  %s6763_s2 = inlined_call_operand.vmem [shape: f32[1,128], index: 2, kind: input, shape index: {}]   ;;  %s6764_s3 = inlined_call_operand.vmem [shape: f32[1,128], index: 3, kind: input, shape index: {}]   ;;  %s6765_s4 = inlined_call_operand.vmem [shape: f32[2,384,128], index: 4, kind: input, shape index: {}]   ;;  %s6766_s5 = inlined_call_operand.vmem [shape: f32[128,128], index: 5, kind: input, shape index: {}]   ;;  %s6767_s6 = inlined_call_operand.vmem [shape: f32[1,128], index: 6, kind: input, shape index: {}]   ;;  %s6768_s7 = inlined_call_operand.vmem [shape: f32[1,128], index: 7, kind: input, shape index: {}]   ;;  %s6769_s8 = inlined_call_operand.vmem [shape: f32[128,128], index: 8, kind: input, shape index: {}]   ;;  %s6770_s9 = inlined_call_operand.vmem [shape: f32[1,128], index: 9, kind: input, shape index: {}]   ;;  %s6771_s10 = inlined_call_operand.vmem [shape: f32[2,256,128], index: 10, kind: output, shape index: {}]  }
   0x1   :  { %s4168_s15 = smov 0   ;;  %s4170_s16 = smov 0  }
   0x2   :  { %s4172_s17 = smov 0  }
   0x3 LB: > { %s29_s18 = sadd.s32 1, %s4099_s15  ;;  %s32_s19 = sadd.s32 1, %s4103_s16  ;;  %s4107_s17 = sphi %s4172_s17, %s20_s17   ;;  %s4103_s16 = sphi %s4170_s16, %s7533_s16   ;;  %s4099_s15 = sphi %s4168_s15, %s7532_s15   ;;  %s4095_s14 = sphi %s4166_s14, %s7531_s14   ;;  %s4091_s13 = sphi %s4164_s13, %s7530_s13  }
   0x4   : > { %p30_p0 = scmp.ge.s32.totalorder %s29_s18, 2  ;;  %p3273_p1 = scmp.ge.s32.totalorder %s4107_s17, 1 }
   0x5   : > { %p336_p2 = scmp.lt.s32.totalorder %s4107_s17, 5 }
   0x6   : > { %s7535_s18 = smov (%p30_p0, %s29_s18), 0  ;;  %s7537_s19 = smov (!%p30_p0, %s32_s19), %s4103_s16 }
   0x7   : > { %p337_p3 = pnand %p3273_p1, %p336_p2  ;;  %p34_p4 = scmp.ge.s32.totalorder %s7537_s19, 2 }
   0x9   : > { %s7539_s19 = smov (%p34_p4, %s7537_s19), 0  ;;  %340 = sbr.rel (%p337_p3) target bundleno = 943 (0x3af), region = 60 }
   0xe   : > { %v3295_v0 = vld [vmem:[%s6762_s1 + $0xf8] sm:$0xff]  ;;  %v3294_v1 = vld [vmem:[%s6762_s1 + $0xf0] sm:$0xff]  ;;  %v3293_v2 = vld [vmem:[%s6762_s1 + $0xe8] sm:$0xff]  ;;  %p383_p5 = scmp.lt.s32.totalorder %s4095_s14, 1  ;;  %s3408_s29 = sshll.u32 %s4091_s13, 7 }
   0xf   : > { %4007 = vmatpush.msra.mxu3 %v3295_v0  ;;  %448 = vmatpush.msra.mxu0 %v3295_v0  ;;  %v3292_v3 = vld [vmem:[%s6762_s1 + $0xe0] sm:$0xff]  ;;  %v3291_v4 = vld [vmem:[%s6762_s1 + $0xd8] sm:$0xff]  ;;  %v3290_v5 = vld [vmem:[%s6762_s1 + $0xd0] sm:$0xff] }
  0x10   : > { %v3289_v6 = vld [vmem:[%s6762_s1 + $0xc8] sm:$0xff]  ;;  %v3288_v7 = vld [vmem:[%s6762_s1 + $0xc0] sm:$0xff]  ;;  %v3287_v8 = vld [vmem:[%s6762_s1 + $0xb8] sm:$0xff]  ;;  %s7541_s14 = smov (!%p383_p5, %s4095_s14), 1 }
  0x11   : > { %4008 = vmatpush.msra.mxu3 %v3294_v1  ;;  %449 = vmatpush.msra.mxu0 %v3294_v1  ;;  %v3286_v9 = vld [vmem:[%s6762_s1 + $0xb0] sm:$0xff]  ;;  %v3285_v10 = vld [vmem:[%s6762_s1 + $0xa8] sm:$0xff]  ;;  %v3284_v11 = vld [vmem:[%s6762_s1 + $0xa0] sm:$0xff]  ;;  %s4006_s20 = sshll.u32 %s7541_s14, 6  ;;  %s3278_s25 = sshll.u32 %s7541_s14, 5 }
  0x12   : > { %v3283_v12 = vld [vmem:[%s6762_s1 + $0x98] sm:$0xff]  ;;  %v3282_v13 = vld [vmem:[%s6762_s1 + $0x90] sm:$0xff]  ;;  %v3281_v14 = vld [vmem:[%s6762_s1 + $0x88] sm:$0xff]  ;;  %s4251_s27 = scalar_lea.vmem %s6761_s0, %s4006_s20 }
  0x13   : > { %4009 = vmatpush.msra.mxu3 %v3293_v2  ;;  %450 = vmatpush.msra.mxu0 %v3293_v2  ;;  %v3280_v15 = vld [vmem:[%s6762_s1 + $0x80] sm:$0xff]  ;;  %v424_v16 = vld [vmem:[%s6762_s1 + $0x78] sm:$0xff]  ;;  %v423_v20 = vld [vmem:[%s6762_s1 + $0x70] sm:$0xff] }
  0x14   : > { %v425_v17 = vld [vmem:[%s4251_s27 + $0x1] sm:$0xff]  ;;  %v3311_v18 = vld [vmem:[%s6762_s1 + $0x178] sm:$0xff]  ;;  %v3310_v21 = vld [vmem:[%s6762_s1 + $0x170] sm:$0xff] }
  0x15   : > { %4010 = vmatpush.msra.mxu3 %v3292_v3  ;;  %451 = vmatpush.msra.mxu0 %v3292_v3  ;;  %v4264_v19 = vld [vmem:[%s4251_s27 + $0x21] sm:$0xff]  ;;  %v420_v26 = vld [vmem:[%s6762_s1 + $0x58] sm:$0xff]  ;;  %v4289_v27 = vld [vmem:[%s4251_s27 + $0x9] sm:$0xff] }
  0x16   : > { %v422_v22 = vld [vmem:[%s6762_s1 + $0x68] sm:$0xff]  ;;  %v421_v24 = vld [vmem:[%s6762_s1 + $0x60] sm:$0xff]  ;;  %v3307_v28 = vld [vmem:[%s6762_s1 + $0x158] sm:$0xff] }
  0x17   : > { %4011 = vmatpush.msra.mxu3 %v3291_v4  ;;  %452 = vmatpush.msra.mxu0 %v3291_v4  ;;  %v3309_v23 = vld [vmem:[%s6762_s1 + $0x168] sm:$0xff]  ;;  %v3308_v25 = vld [vmem:[%s6762_s1 + $0x160] sm:$0xff]  ;;  %v419_v30 = vld [vmem:[%s6762_s1 + $0x50] sm:$0xff] }
  0x18   : > { %v430_v29 = vld [vmem:[%s4251_s27 + $0x29] sm:$0x3f]  ;;  %v3306_v31 = vld [vmem:[%s6762_s1 + $0x150] sm:$0xff]  ;;  %v417_v34 = vld [vmem:[%s6762_s1 + $0x40] sm:$0xff] }
  0x19   : > { %4012 = vmatpush.msra.mxu3 %v3290_v5  ;;  %453 = vmatpush.msra.mxu0 %v3290_v5  ;;  %v418_v32 = vld [vmem:[%s6762_s1 + $0x48] sm:$0xff]  ;;  %v3304_v35 = vld [vmem:[%s6762_s1 + $0x140] sm:$0xff]  ;;  %v416_v36 = vld [vmem:[%s6762_s1 + $0x38] sm:$0xff] }
  0x1a   : > { %v3305_v33 = vld [vmem:[%s6762_s1 + $0x148] sm:$0xff]  ;;  %v4318_v37 = vld [vmem:[%s4251_s27 + $0x11] sm:$0xff]  ;;  %v413_v44 = vld [vmem:[%s6762_s1 + $0x20] sm:$0xff] }
  0x1b   : > { %4013 = vmatpush.msra.mxu3 %v3289_v6  ;;  %454 = vmatpush.msra.mxu0 %v3289_v6  ;;  %v3303_v38 = vld [vmem:[%s6762_s1 + $0x138] sm:$0xff]  ;;  %v415_v39 = vld [vmem:[%s6762_s1 + $0x30] sm:$0xff]  ;;  %v414_v42 = vld [vmem:[%s6762_s1 + $0x28] sm:$0xff] }
  0x1c   : > { %v3302_v40 = vld [vmem:[%s6762_s1 + $0x130] sm:$0xff]  ;;  %v3375_v41 = vld [vmem:[%s6762_s1 + $0x378] sm:$0xff]  ;;  %v3301_v43 = vld [vmem:[%s6762_s1 + $0x128] sm:$0xff] }
  0x1d   : > { %4014 = vmatpush.msra.mxu3 %v3288_v7  ;;  %455 = vmatpush.msra.mxu0 %v3288_v7  ;;  %v3300_v45 = vld [vmem:[%s6762_s1 + $0x120] sm:$0xff]  ;;  %v412_v46 = vld [vmem:[%s6762_s1 + $0x18] sm:$0xff]  ;;  %v411_v49 = vld [vmem:[%s6762_s1 + $0x10] sm:$0xff] }
  0x1e   : > { %797 = vmatpush.msra.mxu2 %v3375_v41  ;;  %v4349_v47 = vld [vmem:[%s4251_s27 + $0x19] sm:$0xff]  ;;  %v3374_v50 = vld [vmem:[%s6762_s1 + $0x370] sm:$0xff]  ;;  %v3373_v53 = vld [vmem:[%s6762_s1 + $0x368] sm:$0xff] }
  0x1f   : > { %4015 = vmatpush.msra.mxu3 %v3287_v8  ;;  %456 = vmatpush.msra.mxu0 %v3287_v8  ;;  %v3299_v48 = vld [vmem:[%s6762_s1 + $0x118] sm:$0xff]  ;;  %v3298_v51 = vld [vmem:[%s6762_s1 + $0x110] sm:$0xff]  ;;  %v410_v54 = vld [vmem:[%s6762_s1 + $0x8] sm:$0xff] }
  0x20   : > { %v3359_v52 = vld [vmem:[%s6762_s1 + $0x2f8] sm:$0xff]  ;;  %798 = vmatpush.msra.mxu2 %v3374_v50  ;;  %v3358_v55 = vld [vmem:[%s6762_s1 + $0x2f0] sm:$0xff]  ;;  %v3297_v56 = vld [vmem:[%s6762_s1 + $0x108] sm:$0xff] }
  0x21   : > { %4016 = vmatpush.msra.mxu3 %v3286_v9  ;;  %457 = vmatpush.msra.mxu0 %v3286_v9  ;;  %v3372_v57 = vld [vmem:[%s6762_s1 + $0x360] sm:$0xff]  ;;  %v3357_v59 = vld [vmem:[%s6762_s1 + $0x2e8] sm:$0xff]  ;;  %v3327_v62 = vld [vmem:[%s6762_s1 + $0x1f8] sm:$0xff] }
  0x22   : > { %733 = vmatpush.msra.mxu1 %v3359_v52  ;;  %v409_v58 = vld [vmem:[%s6762_s1] sm:$0xff]  ;;  %799 = vmatpush.msra.mxu2 %v3373_v53  ;;  %v3343_v0 = vld [vmem:[%s6762_s1 + $0x278] sm:$0xff]  ;;  %v3326_v2 = vld [vmem:[%s6762_s1 + $0x1f0] sm:$0xff] }
  0x23   : > { %4017 = vmatpush.msra.mxu3 %v3285_v10  ;;  %458 = vmatpush.msra.mxu0 %v3285_v10  ;;  %v403_v60 = vld [vmem:[%s4251_s27] sm:$0xff]  ;;  %v3371_v1 = vld [vmem:[%s6762_s1 + $0x358] sm:$0xff]  ;;  %v3342_v4 = vld [vmem:[%s6762_s1 + $0x270] sm:$0xff] }
  0x24   : > { %v3296_v61 = vld [vmem:[%s6762_s1 + $0x100] sm:$0xff]  ;;  %734 = vmatpush.msra.mxu1 %v3358_v55  ;;  %800 = vmatpush.msra.mxu2 %v3372_v57  ;;  %v3370_v5 = vld [vmem:[%s6762_s1 + $0x350] sm:$0xff]  ;;  %v3325_v6 = vld [vmem:[%s6762_s1 + $0x1e8] sm:$0xff] }
  0x25   : > { %4018 = vmatpush.msra.mxu3 %v3284_v11  ;;  %459 = vmatpush.msra.mxu0 %v3284_v11  ;;  %v518_v63 = vld [vmem:[%s4251_s27 + $0x2] sm:$0xff]  ;;  %v3355_v7 = vld [vmem:[%s6762_s1 + $0x2d8] sm:$0xff]  ;;  %v3354_v11 = vld [vmem:[%s6762_s1 + $0x2d0] sm:$0xff] }
  0x26   : > { %735 = vmatpush.msra.mxu1 %v3357_v59  ;;  %v3356_v3 = vld [vmem:[%s6762_s1 + $0x2e0] sm:$0xff]  ;;  %801 = vmatpush.msra.mxu2 %v3371_v1  ;;  %v3341_v8 = vld [vmem:[%s6762_s1 + $0x268] sm:$0xff]  ;;  %v3331_v52 = vld [vmem:[%s6762_s1 + $0x218] sm:$0xff] }
  0x27   : > { %4019 = vmatpush.msra.mxu3 %v3283_v12  ;;  %460 = vmatpush.msra.mxu0 %v3283_v12  ;;  %v3369_v9 = vld [vmem:[%s6762_s1 + $0x348] sm:$0xff]  ;;  %v3324_v10 = vld [vmem:[%s6762_s1 + $0x1e0] sm:$0xff]  ;;  %v3362_v53 = vld [vmem:[%s6762_s1 + $0x310] sm:$0xff] }
  0x28   : > { %736 = vmatpush.msra.mxu1 %v3356_v3  ;;  %802 = vmatpush.msra.mxu2 %v3370_v5  ;;  %v4433_v12 = vld [vmem:[%s4251_s27 + $0x8] sm:$0xff]  ;;  %v4539_v50 = vld [vmem:[%s4251_s27 + $0x1a] sm:$0xff]  ;;  %v3346_v59 = vld [vmem:[%s6762_s1 + $0x290] sm:$0xff] }
  0x29   : > { %4020 = vmatpush.msra.mxu3 %v3282_v13  ;;  %461 = vmatpush.msra.mxu0 %v3282_v13  ;;  %v3340_v13 = vld [vmem:[%s6762_s1 + $0x260] sm:$0xff]  ;;  %v3317_v41 = vld [vmem:[%s6762_s1 + $0x1a8] sm:$0xff]  ;;  %v3347_v55 = vld [vmem:[%s6762_s1 + $0x298] sm:$0xff] }
  0x2a   : > { %737 = vmatpush.msra.mxu1 %v3355_v7  ;;  %803 = vmatpush.msra.mxu2 %v3369_v9  ;;  %v3361_v57 = vld [vmem:[%s6762_s1 + $0x308] sm:$0xff]  ;;  %v3390_v5 = vld [vmem:[%s6762_s1 + $0x3f0] sm:$0xff] }
  0x2b   : > { %4021 = vmatpush.msra.mxu3 %v3281_v14  ;;  %462 = vmatpush.msra.mxu0 %v3281_v14  ;;  %v3323_v14 = vld [vmem:[%s6762_s1 + $0x1d8] sm:$0xff]  ;;  %v4586_v1 = vld [vmem:[%s4251_s27 + $0x22] sm:$0xff]  ;;  %v3406_v7 = vld [vmem:[%s6762_s1 + $0x470] sm:$0xff] }
  0x2c   : > { %738 = vmatpush.msra.mxu1 %v3354_v11  ;;  %v3345_v3 = vld [vmem:[%s6762_s1 + $0x288] sm:$0xff] }
  0x2d   : > { %4022 = vmatpush.msra.mxu3 %v3280_v15  ;;  %463 = vmatpush.msra.mxu0 %v3280_v15  ;;  %v4442_v15 = vld [vmem:[%s4251_s27 + $0xa] sm:$0xff] }
  0x2e   : > { %464 = vmatmul.f32.vlgmr.msra.gmra.mxu0 %v425_v17  ;;  %476 = vmatmul.f32.vlgmr.msra.gmra.mxu3 %v4264_v19  ;;  %v3368_v17 = vld [vmem:[%s6762_s1 + $0x340] sm:$0xff]  ;;  %v3405_v9 = vld [vmem:[%s6762_s1 + $0x468] sm:$0xff] }
  0x2f   : > { %483 = vmatpush.msrb.mxu3 %v424_v16  ;;  %541 = vmatpush.msrb.mxu0 %v3311_v18  ;;  %v3339_v16 = vld [vmem:[%s6762_s1 + $0x258] sm:$0xff]  ;;  %v3322_v18 = vld [vmem:[%s6762_s1 + $0x1d0] sm:$0xff]  ;;  %v408_v11 = vld [vmem:[%s4251_s27 + $0x28] sm:$0x3f] }
  0x30   : > { %804 = vmatpush.msra.mxu2 %v3368_v17  ;;  %v3403_v17 = vld [vmem:[%s6762_s1 + $0x458] sm:$0xff] }
  0x31   : > { %484 = vmatpush.msrb.mxu3 %v423_v20  ;;  %542 = vmatpush.msrb.mxu0 %v3310_v21  ;;  %v3353_v20 = vld [vmem:[%s6762_s1 + $0x2c8] sm:$0xff]  ;;  %v3338_v21 = vld [vmem:[%s6762_s1 + $0x250] sm:$0xff] }
  0x32   : > { %739 = vmatpush.msra.mxu1 %v3353_v20  ;;  %v3385_v20 = vld [vmem:[%s6762_s1 + $0x3c8] sm:$0xff] }
  0x33   : > { %485 = vmatpush.msrb.mxu3 %v422_v22  ;;  %543 = vmatpush.msrb.mxu0 %v3309_v23  ;;  %v3367_v22 = vld [vmem:[%s6762_s1 + $0x338] sm:$0xff]  ;;  %v3321_v23 = vld [vmem:[%s6762_s1 + $0x1c8] sm:$0xff] }
  0x34   : > { %805 = vmatpush.msra.mxu2 %v3367_v22  ;;  %v3384_v22 = vld [vmem:[%s6762_s1 + $0x3c0] sm:$0xff] }
  0x35   : > { %486 = vmatpush.msrb.mxu3 %v421_v24  ;;  %544 = vmatpush.msrb.mxu0 %v3308_v25  ;;  %v3352_v24 = vld [vmem:[%s6762_s1 + $0x2c0] sm:$0xff]  ;;  %v3337_v25 = vld [vmem:[%s6762_s1 + $0x248] sm:$0xff] }
  0x36   : > { %467 = vmatmul.f32.gmra.mxu0 %v4289_v27  ;;  %479 = vmatmul.f32.gmra.mxu3 %v430_v29  ;;  %v3351_v29 = vld [vmem:[%s6762_s1 + $0x2b8] sm:$0xff] }
  0x37   : > { %487 = vmatpush.msrb.mxu3 %v420_v26  ;;  %545 = vmatpush.msrb.mxu0 %v3307_v28  ;;  %v3366_v26 = vld [vmem:[%s6762_s1 + $0x330] sm:$0xff]  ;;  %v3320_v28 = vld [vmem:[%s6762_s1 + $0x1c0] sm:$0xff] }
  0x38   : > { %740 = vmatpush.msra.mxu1 %v3352_v24  ;;  %806 = vmatpush.msra.mxu2 %v3366_v26  ;;  %v3383_v24 = vld [vmem:[%s6762_s1 + $0x3b8] sm:$0xff] }
  0x39   : > { %488 = vmatpush.msrb.mxu3 %v419_v30  ;;  %546 = vmatpush.msrb.mxu0 %v3306_v31  ;;  %v4483_v30 = vld [vmem:[%s4251_s27 + $0x10] sm:$0xff]  ;;  %v3336_v31 = vld [vmem:[%s6762_s1 + $0x240] sm:$0xff]  ;;  %v3399_v26 = vld [vmem:[%s6762_s1 + $0x438] sm:$0xff] }
  0x3a   : > { %741 = vmatpush.msra.mxu1 %v3351_v29  ;;  %v3397_v29 = vld [vmem:[%s6762_s1 + $0x428] sm:$0xff] }
  0x3b   : > { %489 = vmatpush.msrb.mxu3 %v418_v32  ;;  %547 = vmatpush.msrb.mxu0 %v3305_v33  ;;  %v4489_v32 = vld [vmem:[%s4251_s27 + $0x12] sm:$0xff] }
  0x3c   : > { %v3319_v33 = vld [vmem:[%s6762_s1 + $0x1b8] sm:$0xff] }
  0x3d   : > { %490 = vmatpush.msrb.mxu3 %v417_v34  ;;  %548 = vmatpush.msrb.mxu0 %v3304_v35  ;;  %v3335_v34 = vld [vmem:[%s6762_s1 + $0x238] sm:$0xff]  ;;  %v3365_v35 = vld [vmem:[%s6762_s1 + $0x328] sm:$0xff] }
  0x3e   : > { %470 = vmatmul.f32.gmra.mxu0 %v4318_v37  ;;  %807 = vmatpush.msra.mxu2 %v3365_v35  ;;  %v3396_v35 = vld [vmem:[%s6762_s1 + $0x420] sm:$0xff] }
  0x3f   : > { %491 = vmatpush.msrb.mxu3 %v416_v36  ;;  %549 = vmatpush.msrb.mxu0 %v3303_v38  ;;  %v3318_v36 = vld [vmem:[%s6762_s1 + $0x1b0] sm:$0xff] }
  0x40   : > { %v3350_v38 = vld [vmem:[%s6762_s1 + $0x2b0] sm:$0xff] }
  0x41   : > { %492 = vmatpush.msrb.mxu3 %v415_v39  ;;  %550 = vmatpush.msrb.mxu0 %v3302_v40  ;;  %v3334_v39 = vld [vmem:[%s6762_s1 + $0x230] sm:$0xff]  ;;  %v3364_v40 = vld [vmem:[%s6762_s1 + $0x320] sm:$0xff] }
  0x42   : > { %742 = vmatpush.msra.mxu1 %v3350_v38  ;;  %808 = vmatpush.msra.mxu2 %v3364_v40  ;;  %v3394_v38 = vld [vmem:[%s6762_s1 + $0x410] sm:$0xff]  ;;  %v3376_v40 = vld [vmem:[%s6762_s1 + $0x380] sm:$0xff] }
  0x43   : > { %493 = vmatpush.msrb.mxu3 %v414_v42  ;;  %551 = vmatpush.msrb.mxu0 %v3301_v43  ;;  %v3349_v42 = vld [vmem:[%s6762_s1 + $0x2a8] sm:$0xff] }
  0x44   : > { %v3333_v43 = vld [vmem:[%s6762_s1 + $0x228] sm:$0xff]  ;;  %743 = vmatpush.msra.mxu1 %v3349_v42  ;;  %v3392_v42 = vld [vmem:[%s6762_s1 + $0x400] sm:$0xff] }
  0x45   : > { %494 = vmatpush.msrb.mxu3 %v413_v44  ;;  %552 = vmatpush.msrb.mxu0 %v3300_v45  ;;  %v3363_v44 = vld [vmem:[%s6762_s1 + $0x318] sm:$0xff]  ;;  %v3316_v45 = vld [vmem:[%s6762_s1 + $0x1a0] sm:$0xff] }
  0x46   : > { %473 = vmatmul.f32.gmra.mxu0 %v4349_v47  ;;  %809 = vmatpush.msra.mxu2 %v3363_v44  ;;  %v779_v44 = vld [vmem:[%s4251_s27 + $0x38] sm:$0x3f] }
  0x47   : > { %495 = vmatpush.msrb.mxu3 %v412_v46  ;;  %553 = vmatpush.msrb.mxu0 %v3299_v48  ;;  %v3348_v46 = vld [vmem:[%s6762_s1 + $0x2a0] sm:$0xff]  ;;  %v4533_v48 = vld [vmem:[%s4251_s27 + $0x18] sm:$0xff] }
  0x48   : > { %744 = vmatpush.msra.mxu1 %v3348_v46  ;;  %810 = vmatpush.msra.mxu2 %v3362_v53  ;;  %v650_v46 = vld [vmem:[%s4251_s27 + $0x29] sm:$0xff] }
  0x49   : > { %496 = vmatpush.msrb.mxu3 %v411_v49  ;;  %554 = vmatpush.msrb.mxu0 %v3298_v51  ;;  %v3332_v49 = vld [vmem:[%s6762_s1 + $0x220] sm:$0xff]  ;;  %v3315_v51 = vld [vmem:[%s6762_s1 + $0x198] sm:$0xff] }
  0x4a   : > { %745 = vmatpush.msra.mxu1 %v3347_v55  ;;  %811 = vmatpush.msra.mxu2 %v3361_v57 }
  0x4b   : > { %497 = vmatpush.msrb.mxu3 %v410_v54  ;;  %555 = vmatpush.msrb.mxu0 %v3297_v56  ;;  %v3314_v54 = vld [vmem:[%s6762_s1 + $0x190] sm:$0xff] }
  0x4c   : > { %v3330_v56 = vld [vmem:[%s6762_s1 + $0x210] sm:$0xff]  ;;  %746 = vmatpush.msra.mxu1 %v3346_v59 }
  0x4d   : > { %498 = vmatpush.msrb.mxu3 %v409_v58  ;;  %556 = vmatpush.msrb.mxu0 %v3296_v61  ;;  %v3313_v58 = vld [vmem:[%s6762_s1 + $0x188] sm:$0xff]  ;;  %v3360_v61 = vld [vmem:[%s6762_s1 + $0x300] sm:$0xff] }
  0x4e   : > { %499 = vmatmul.f32.vlgmr.msrb.gmra.mxu3 %v403_v60  ;;  %557 = vmatmul.f32.vlgmr.msrb.gmra.mxu0 %v518_v63  ;;  %v3329_v60 = vld [vmem:[%s6762_s1 + $0x208] sm:$0xff]  ;;  %v4580_v63 = vld [vmem:[%s4251_s27 + $0x20] sm:$0xff] }
  0x4f   : > { %605 = vmatpush.msra.mxu3 %v3327_v62  ;;  %669 = vmatpush.msra.mxu0 %v3343_v0  ;;  %v3312_v62 = vld [vmem:[%s6762_s1 + $0x180] sm:$0xff] }
  0x50   : > { %v3328_v0 = vld [vmem:[%s6762_s1 + $0x200] sm:$0xff]  ;;  %812 = vmatpush.msra.mxu2 %v3360_v61  ;;  %747 = vmatpush.msra.mxu1 %v3345_v3  ;;  %v907_v61 = vld [vmem:[%s4251_s27 + $0x3a] sm:$0x3f] }
  0x51   : > { %606 = vmatpush.msra.mxu3 %v3326_v2  ;;  %670 = vmatpush.msra.mxu0 %v3342_v4  ;;  %v3391_v2 = vld [vmem:[%s6762_s1 + $0x3f8] sm:$0xff] }
  0x52   : > { %813 = vmatmul.f32.vlgmr.msra.gmra.mxu2 %v4483_v30  ;;  %v3407_v4 = vld [vmem:[%s6762_s1 + $0x478] sm:$0xff] }
  0x53   : > { %607 = vmatpush.msra.mxu3 %v3325_v6  ;;  %671 = vmatpush.msra.mxu0 %v3341_v8  ;;  %v3344_v6 = vld [vmem:[%s6762_s1 + $0x280] sm:$0xff]  ;;  %v3389_v8 = vld [vmem:[%s6762_s1 + $0x3e8] sm:$0xff] }
  0x54   : > { %748 = vmatpush.msra.mxu1 %v3344_v6 }
  0x55   : > { %608 = vmatpush.msra.mxu3 %v3324_v10  ;;  %672 = vmatpush.msra.mxu0 %v3340_v13  ;;  %v3388_v10 = vld [vmem:[%s6762_s1 + $0x3e0] sm:$0xff] }
  0x56   : > { %502 = vmatmul.f32.gmra.mxu3 %v4433_v12  ;;  %560 = vmatmul.f32.gmra.mxu0 %v4442_v15  ;;  %v3404_v13 = vld [vmem:[%s6762_s1 + $0x460] sm:$0xff] }
  0x57   : > { %609 = vmatpush.msra.mxu3 %v3323_v14  ;;  %673 = vmatpush.msra.mxu0 %v3339_v16  ;;  %v523_v14 = vld [vmem:[%s4251_s27 + $0x2a] sm:$0x3f]  ;;  %v3387_v16 = vld [vmem:[%s6762_s1 + $0x3d8] sm:$0xff] }
  0x58   : > { %749 = vmatmul.f32.vlgmr.msra.gmra.mxu1 %v4442_v15  ;;  %v3386_v15 = vld [vmem:[%s6762_s1 + $0x3d0] sm:$0xff] }
  0x59   : > { %610 = vmatpush.msra.mxu3 %v3322_v18  ;;  %674 = vmatpush.msra.mxu0 %v3338_v21  ;;  %v3402_v18 = vld [vmem:[%s6762_s1 + $0x450] sm:$0xff]  ;;  %v3401_v21 = vld [vmem:[%s6762_s1 + $0x448] sm:$0xff] }
  0x5a   : > { %816 = vmatmul.f32.gmra.mxu2 %v4533_v48 }
  0x5b   : > { %611 = vmatpush.msra.mxu3 %v3321_v23  ;;  %675 = vmatpush.msra.mxu0 %v3337_v25  ;;  %v3400_v23 = vld [vmem:[%s6762_s1 + $0x440] sm:$0xff]  ;;  %v3382_v25 = vld [vmem:[%s6762_s1 + $0x3b0] sm:$0xff] }
  0x5d   : > { %612 = vmatpush.msra.mxu3 %v3320_v28  ;;  %676 = vmatpush.msra.mxu0 %v3336_v31  ;;  %v3398_v28 = vld [vmem:[%s6762_s1 + $0x430] sm:$0xff]  ;;  %v777_v31 = vld [vmem:[%s4251_s27 + $0x28] sm:$0xff] }
  0x5e   : > { %505 = vmatmul.f32.gmra.mxu3 %v4483_v30  ;;  %563 = vmatmul.f32.gmra.mxu0 %v4489_v32 }
  0x5f   : > { %613 = vmatpush.msra.mxu3 %v3319_v33  ;;  %677 = vmatpush.msra.mxu0 %v3335_v34  ;;  %v3379_v33 = vld [vmem:[%s6762_s1 + $0x398] sm:$0xff]  ;;  %v3378_v34 = vld [vmem:[%s6762_s1 + $0x390] sm:$0xff] }
  0x60   : > { %752 = vmatmul.f32.gmra.mxu1 %v4489_v32 }
  0x61   : > { %614 = vmatpush.msra.mxu3 %v3318_v36  ;;  %678 = vmatpush.msra.mxu0 %v3334_v39  ;;  %v3395_v36 = vld [vmem:[%s6762_s1 + $0x418] sm:$0xff]  ;;  %v778_v39 = vld [vmem:[%s4251_s27 + $0x30] sm:$0xff] }
  0x62   : > { %819 = vmatmul.f32.gmra.mxu2 %v4580_v63 }
  0x63   : > { %615 = vmatpush.msra.mxu3 %v3317_v41  ;;  %679 = vmatpush.msra.mxu0 %v3333_v43  ;;  %v3393_v41 = vld [vmem:[%s6762_s1 + $0x408] sm:$0xff] }
  0x64   : > { %v714_v43 = vld [vmem:[%s4251_s27 + $0x2a] sm:$0xff] }
  0x65   : > { %616 = vmatpush.msra.mxu3 %v3316_v45  ;;  %680 = vmatpush.msra.mxu0 %v3332_v49  ;;  %v715_v45 = vld [vmem:[%s4251_s27 + $0x32] sm:$0x3f] }
  0x66   : > { %508 = vmatmul.f32.gmra.mxu3 %v4533_v48  ;;  %566 = vmatmul.f32.gmra.mxu0 %v4539_v50  ;;  %v651_v49 = vld [vmem:[%s4251_s27 + $0x31] sm:$0x3f] }
  0x67   : > { %617 = vmatpush.msra.mxu3 %v3315_v51  ;;  %681 = vmatpush.msra.mxu0 %v3331_v52 }
  0x68   : > { %755 = vmatmul.f32.gmra.mxu1 %v4539_v50 }
  0x69   : > { %618 = vmatpush.msra.mxu3 %v3314_v54  ;;  %682 = vmatpush.msra.mxu0 %v3330_v56 }
  0x6a   : > { %822 = vmatmul.f32.gmra.mxu2 %v777_v31 }
  0x6b   : > { %619 = vmatpush.msra.mxu3 %v3313_v58  ;;  %683 = vmatpush.msra.mxu0 %v3329_v60 }
  0x6d   : > { %620 = vmatpush.msra.mxu3 %v3312_v62  ;;  %684 = vmatpush.msra.mxu0 %v3328_v0 }
  0x6e   : > { %511 = vmatmul.f32.gmra.mxu3 %v4580_v63  ;;  %569 = vmatmul.f32.gmra.mxu0 %v4586_v1 }
  0x6f   : > { %861 = vmatpush.msrb.mxu3 %v3391_v2  ;;  %925 = vmatpush.msrb.mxu0 %v3407_v4 }
  0x70   : > { %758 = vmatmul.f32.gmra.mxu1 %v4586_v1 }
  0x71   : > { %862 = vmatpush.msrb.mxu3 %v3390_v5  ;;  %926 = vmatpush.msrb.mxu0 %v3406_v7 }
  0x72   : > { %825 = vmatmul.f32.gmra.mxu2 %v778_v39 }
  0x73   : > { %863 = vmatpush.msrb.mxu3 %v3389_v8  ;;  %927 = vmatpush.msrb.mxu0 %v3405_v9 }
  0x75   : > { %864 = vmatpush.msrb.mxu3 %v3388_v10  ;;  %928 = vmatpush.msrb.mxu0 %v3404_v13 }
  0x76   : > { %514 = vmatmul.f32.gmra.mxu3 %v408_v11  ;;  %572 = vmatmul.f32.gmra.mxu0 %v523_v14 }
  0x77   : > { %865 = vmatpush.msrb.mxu3 %v3387_v16  ;;  %929 = vmatpush.msrb.mxu0 %v3403_v17 }
  0x78   : > { %761 = vmatmul.f32.gmra.mxu1 %v714_v43 }
  0x79   : > { %866 = vmatpush.msrb.mxu3 %v3386_v15  ;;  %930 = vmatpush.msrb.mxu0 %v3402_v18 }
  0x7a   : > { %828 = vmatmul.f32.gmra.mxu2 %v779_v44  ;;  %v4745_v44 = vld [vmem:[%s6763_s2] ss:$0 sm:$0xff] }
  0x7b   : > { %867 = vmatpush.msrb.mxu3 %v3385_v20  ;;  %931 = vmatpush.msrb.mxu0 %v3401_v21 }
  0x7d   : > { %868 = vmatpush.msrb.mxu3 %v3384_v22  ;;  %932 = vmatpush.msrb.mxu0 %v3400_v23 }
  0x7e   : > { %621 = vmatmul.f32.vlgmr.msra.gmra.mxu3 %v4433_v12  ;;  %685 = vmatmul.f32.vlgmr.msra.gmra.mxu0 %v4289_v27  ;;  %v3381_v12 = vld [vmem:[%s6762_s1 + $0x3a8] sm:$0xff]  ;;  %v3380_v27 = vld [vmem:[%s6762_s1 + $0x3a0] sm:$0xff] }
  0x7f   : > { %869 = vmatpush.msrb.mxu3 %v3383_v24  ;;  %933 = vmatpush.msrb.mxu0 %v3399_v26 }
  0x80   : > { %764 = vmatmul.f32.gmra.mxu1 %v715_v45 }
  0x81   : > { %870 = vmatpush.msrb.mxu3 %v3382_v25  ;;  %934 = vmatpush.msrb.mxu0 %v3398_v28 }
  0x83   : > { %871 = vmatpush.msrb.mxu3 %v3381_v12  ;;  %935 = vmatpush.msrb.mxu0 %v3397_v29 }
  0x85   : > { %872 = vmatpush.msrb.mxu3 %v3380_v27  ;;  %936 = vmatpush.msrb.mxu0 %v3396_v35 }
  0x86   : > { %624 = vmatmul.f32.gmra.mxu3 %v4483_v30  ;;  %688 = vmatmul.f32.gmra.mxu0 %v4318_v37  ;;  %v3377_v30 = vld [vmem:[%s6762_s1 + $0x388] sm:$0xff] }
  0x87   : > { %873 = vmatpush.msrb.mxu3 %v3379_v33  ;;  %937 = vmatpush.msrb.mxu0 %v3395_v36 }
  0x89   : > { %874 = vmatpush.msrb.mxu3 %v3378_v34  ;;  %938 = vmatpush.msrb.mxu0 %v3394_v38 }
  0x8b   : > { %875 = vmatpush.msrb.mxu3 %v3377_v30  ;;  %939 = vmatpush.msrb.mxu0 %v3393_v41 }
  0x8d   : > { %876 = vmatpush.msrb.mxu3 %v3376_v40  ;;  %940 = vmatpush.msrb.mxu0 %v3392_v42 }
  0x8e   : > { %627 = vmatmul.f32.gmra.mxu3 %v4533_v48  ;;  %691 = vmatmul.f32.gmra.mxu0 %v4349_v47  ;;  %v587_v48 = vld [vmem:[%s4251_s27 + $0x30] sm:$0x3f] }
  0x96   : > { %630 = vmatmul.f32.gmra.mxu3 %v4580_v63  ;;  %694 = vmatmul.f32.gmra.mxu0 %v4264_v19 }
  0x9e   : > { %633 = vmatmul.f32.gmra.mxu3 %v777_v31  ;;  %697 = vmatmul.f32.gmra.mxu0 %v650_v46 }
  0xa6   : > { %636 = vmatmul.f32.gmra.mxu3 %v587_v48  ;;  %700 = vmatmul.f32.gmra.mxu0 %v651_v49  ;;  %v4750_v49 = vld [vmem:[%s6764_s3] ss:$0 sm:$0xff] }
  0xab   : > { %v465_v51 = vpop.f32.mrf.mxu0 }
  0xae   : > { %877 = vmatmul.f32.vlgmr.msrb.gmra.mxu3 %v4318_v37  ;;  %941 = vmatmul.f32.vlgmr.msrb.gmra.mxu0 %v4489_v32  ;;  %v842_v37 = vld [vmem:[%s4251_s27 + $0x31] sm:$0xff] }
  0xaf   : > { %v906_v32 = vld [vmem:[%s4251_s27 + $0x32] sm:$0xff] }
  0xb1   : > { %v477_v54 = vpop.f32.mrf.mxu3 }
  0xb3   : > { %v468_v52 = vpop.f32.mrf.mxu0 }
  0xb6   : > { %880 = vmatmul.f32.gmra.mxu3 %v4349_v47  ;;  %944 = vmatmul.f32.gmra.mxu0 %v4539_v50  ;;  %v843_v50 = vld [vmem:[%s4251_s27 + $0x39] sm:$0x3f]  ;;  %s4023_s27 = smul.u32 384, %s7541_s14 }
  0xb8   : > { %s392_s28 = scalar_lea.vmem %s6765_s4, %s4023_s27 }
  0xb9   : > { %v480_v56 = vpop.f32.mrf.mxu3  ;;  %s4757_s30 = scalar_lea.vmem %s392_s28, %s3408_s29 }
  0xbb   : > { %v471_v53 = vpop.f32.mrf.mxu0 }
  0xbe   : > { %883 = vmatmul.f32.gmra.mxu3 %v4264_v19  ;;  %947 = vmatmul.f32.gmra.mxu0 %v4586_v1 }
  0xc3   : > { %v474_v55 = vpop.f32.mrf.mxu0 }
  0xc6   : > { %886 = vmatmul.f32.gmra.mxu3 %v650_v46  ;;  %950 = vmatmul.f32.gmra.mxu0 %v714_v43 }
  0xcb   : > { %v558_v57 = vpop.f32.mrf.mxu0 }
  0xce   : > { %889 = vmatmul.f32.gmra.mxu3 %v842_v37  ;;  %953 = vmatmul.f32.gmra.mxu0 %v906_v32 }
  0xd1   : > { %v500_v47 = vpop.f32.mrf.mxu3 }
  0xd2   : > { %v501_v58 = vadd.f32 %v500_v47, %v465_v51 }
  0xd3   : > { %v561_v60 = vpop.f32.mrf.mxu0 }
  0xd4   : > { %v576_v59 = vadd.f32 %v558_v57, %v501_v58  ;;  %v994_v58 = vld [vmem:[%s4757_s30] sm:$0xff] }
  0xd5   : > { %v750_v29 = vpop.f32.mrf.mxu1  ;;  %v814_v33 = vpop.f32.mrf.mxu2 }
  0xd6   : > { %892 = vmatmul.f32.gmra.mxu3 %v843_v50  ;;  %956 = vmatmul.f32.gmra.mxu0 %v907_v61  ;;  %v3410_v50 = vld [vmem:[%s4757_s30 + $0x1] sm:$0xff] }
  0xd9   : > { %v503_v19 = vpop.f32.mrf.mxu3 }
  0xda   : > { %v504_v62 = vadd.f32 %v503_v19, %v468_v52 }
  0xdb   : > { %v564_v0 = vpop.f32.mrf.mxu0 }
  0xdc   : > { %v577_v63 = vadd.f32 %v561_v60, %v504_v62  ;;  %v3427_v62 = vld [vmem:[%s4757_s30 + $0x2] sm:$0xff] }
  0xdd   : > { %v753_v38 = vpop.f32.mrf.mxu1  ;;  %v817_v42 = vpop.f32.mrf.mxu2 }
  0xe1   : > { %v506_v1 = vpop.f32.mrf.mxu3 }
  0xe2   : > { %v507_v2 = vadd.f32 %v506_v1, %v471_v53 }
  0xe3   : > { %v567_v4 = vpop.f32.mrf.mxu0 }
  0xe4   : > { %v578_v3 = vadd.f32 %v564_v0, %v507_v2  ;;  %v2843_v2 = vld [vmem:[%s6766_s5 + $0x78] sm:$0xff] }
  0xe5   : > { %2844 = vmatpush.msrb.mxu1 %v2843_v2 }
  0xe9   : > { %v509_v5 = vpop.f32.mrf.mxu3 }
  0xea   : > { %v510_v6 = vadd.f32 %v509_v5, %v474_v55  ;;  %v756_v55 = vpop.f32.mrf.mxu1 }
  0xeb   : > { %v570_v8 = vpop.f32.mrf.mxu0 }
  0xec   : > { %v579_v7 = vadd.f32 %v567_v4, %v510_v6  ;;  %v3411_v4 = vld [vmem:[%s4757_s30 + $0x9] sm:$0xff] }
  0xf1   : > { %v512_v9 = vpop.f32.mrf.mxu3 }
  0xf2   : > { %v513_v10 = vadd.f32 %v512_v9, %v477_v54 }
  0xf3   : > { %v573_v13 = vpop.f32.mrf.mxu0 }
  0xf4   : > { %v4727_v11 = vadd.f32 %v570_v8, %v513_v10  ;;  %v3444_v10 = vld [vmem:[%s4757_s30 + $0x3] sm:$0xff] }
  0xf9   : > { %v515_v14 = vpop.f32.mrf.mxu3 }
  0xfa   : > { %v516_v16 = vadd.f32 %v515_v14, %v480_v56 }
  0xfb   : > { %v686_v15 = vpop.f32.mrf.mxu0 }
  0xfc   : > { %v4729_v17 = vadd.f32 %v573_v13, %v516_v16 }
 0x101   : > { %v622_v18 = vpop.f32.mrf.mxu3 }
 0x102   : > { %v640_v12 = vadd.f32 %v622_v18, %v576_v59  ;;  %v820_v59 = vpop.f32.mrf.mxu2 }
 0x103   : > { %v689_v20 = vpop.f32.mrf.mxu0 }
 0x104   : > { %v704_v27 = vadd.f32 %v686_v15, %v640_v12 }
 0x106   : > { %v768_v35 = vadd.f32 %v750_v29, %v704_v27  ;;  %v3461_v29 = vld [vmem:[%s4757_s30 + $0x4] sm:$0xff]  ;;  %v759_v27 = vpop.f32.mrf.mxu1 }
 0x108   : > { %v832_v39 = vadd.f32 %v814_v33, %v768_v35 }
 0x109   : > { %v625_v21 = vpop.f32.mrf.mxu3 }
 0x10a   : > { %v641_v36 = vadd.f32 %v625_v21, %v577_v63  ;;  %v995_v63 = vld [vmem:[%s4757_s30 + $0x8] sm:$0xff] }
 0x10b   : > { %v692_v22 = vpop.f32.mrf.mxu0 }
 0x10c   : > { %v705_v40 = vadd.f32 %v689_v20, %v641_v36  ;;  %v3428_v20 = vld [vmem:[%s4757_s30 + $0xa] sm:$0xff] }
 0x10e   : > { %v769_v46 = vadd.f32 %v753_v38, %v705_v40 }
 0x110   : > { %v833_v54 = vadd.f32 %v817_v42, %v769_v46 }
 0x111   : > { %v628_v23 = vpop.f32.mrf.mxu3 }
 0x112   : > { %v642_v45 = vadd.f32 %v628_v23, %v578_v3  ;;  %v2842_v3 = vld [vmem:[%s6766_s5 + $0x70] sm:$0xff] }
 0x113   : > { %v4731_v24 = vpop.f32.mrf.mxu0  ;;  %2845 = vmatpush.msrb.mxu1 %v2842_v3 }
 0x114   : > { %v706_v52 = vadd.f32 %v692_v22, %v642_v45 }
 0x116   : > { %v770_v47 = vadd.f32 %v756_v55, %v706_v52  ;;  %v2840_v55 = vld [vmem:[%s6766_s5 + $0x60] sm:$0xff] }
 0x119   : > { %v631_v25 = vpop.f32.mrf.mxu3 }
 0x11a   : > { %v643_v0 = vadd.f32 %v631_v25, %v579_v7  ;;  %v834_v7 = vadd.f32 %v820_v59, %v770_v47  ;;  %v3512_v59 = vld [vmem:[%s4757_s30 + $0x11] sm:$0xff] }
 0x11b   : > { %v4733_v26 = vpop.f32.mrf.mxu0 }
 0x11c   : > { %v707_v21 = vadd.f32 %v4731_v24, %v643_v0 }
 0x11e   : > { %v771_v45 = vadd.f32 %v759_v27, %v707_v21 }
 0x121   : > { %v4735_v28 = vpop.f32.mrf.mxu3 }
 0x122   : > { %v644_v52 = vadd.f32 %v4735_v28, %v4727_v11  ;;  %v3462_v11 = vld [vmem:[%s4757_s30 + $0xc] sm:$0xff]  ;;  %v2839_v28 = vld [vmem:[%s6766_s5 + $0x58] sm:$0xff] }
 0x123   : > { %v4737_v31 = vpop.f32.mrf.mxu0 }
 0x124   : > { %v708_v2 = vadd.f32 %v4733_v26, %v644_v52 }
 0x129   : > { %v4739_v34 = vpop.f32.mrf.mxu3 }
 0x12b   : > { %v942_v30 = vpop.f32.mrf.mxu0 }
 0x131   : > { %v878_v41 = vpop.f32.mrf.mxu3 }
 0x132   : > { %v896_v43 = vadd.f32 %v878_v41, %v832_v39  ;;  %v3478_v39 = vld [vmem:[%s4757_s30 + $0x5] sm:$0xff] }
 0x133   : > { %v945_v53 = vpop.f32.mrf.mxu0 }
 0x134   : > { %v960_v48 = vadd.f32 %v942_v30, %v896_v43  ;;  %v3445_v43 = vld [vmem:[%s4757_s30 + $0xb] sm:$0xff] }
 0x136   : > { %v970_v51 = vmul.f32 %v4745_v44, %v960_v48 }
 0x138   : > { %v980_v56 = vadd.f32 %v4750_v49, %v970_v51  ;;  %v823_v51 = vpop.f32.mrf.mxu2 }
 0x139   : > { %v881_v37 = vpop.f32.mrf.mxu3 }
 0x13a   : > { %v986_v57 = vmax.f32 %v980_v56, 0.0  ;;  %v897_v32 = vadd.f32 %v881_v37, %v833_v54  ;;  %v2841_v54 = vld [vmem:[%s6766_s5 + $0x68] sm:$0xff] }
 0x13b   : > { %v948_v12 = vpop.f32.mrf.mxu0  ;;  %2846 = vmatpush.msrb.mxu1 %v2841_v54  ;;  %v645_v54 = vadd.f32 %v4739_v34, %v4729_v17  ;;  %v3580_v34 = vld [vmem:[%s4757_s30 + $0x15] sm:$0xff] }
 0x13c   : > { %v4762_v60 = vperm.slane %v986_v57, 0  ;;  %v4764_v61 = vperm.slane %v986_v57, 1  ;;  %v4766_v19 = vperm.slane %v986_v57, 2  ;;  %v961_v1 = vadd.f32 %v945_v53, %v897_v32  ;;  %v3495_v32 = vld [vmem:[%s4757_s30 + $0x10] sm:$0xff] }
 0x13d   : > { %v4777_v5 = vperm.slane %v986_v57, 3  ;;  %v4784_v14 = vperm.slane %v986_v57, 4  ;;  %v4790_v22 = vperm.slane %v986_v57, 5  ;;  %2847 = vmatpush.msrb.mxu1 %v2840_v55 }
 0x13e   : > { %v1011_v6 = vmul.f32 %v4762_v60, %v994_v58  ;;  %v1062_v8 = vmul.f32 %v3410_v50, %v4764_v61  ;;  %v971_v9 = vmul.f32 %v4745_v44, %v961_v1  ;;  %v1012_v13 = vmul.f32 %v4762_v60, %v995_v63 }
 0x13f   : > { %v1113_v15 = vmul.f32 %v3427_v62, %v4766_v19  ;;  %v1063_v18 = vmul.f32 %v3411_v4, %v4764_v61  ;;  %7086 = vst [vmem:[#allocation2_spill] sm:$0xff] %v4790_v22  ;;  %v1164_v36 = vmul.f32 %v3444_v10, %v4777_v5  ;;  %v1114_v40 = vmul.f32 %v3428_v20, %v4766_v19  ;;  %v2838_v4 = vld [vmem:[%s6766_s5 + $0x50] sm:$0xff] }
 0x140   : > { %v1078_v16 = vadd.f32 %v1062_v8, %v1011_v6  ;;  %v981_v23 = vadd.f32 %v4750_v49, %v971_v9  ;;  %v1215_v42 = vmul.f32 %v3461_v29, %v4784_v14  ;;  %v1266_v37 = vmul.f32 %v3478_v39, %v4790_v22  ;;  %2848 = vmatpush.msrb.mxu1 %v2839_v28  ;;  %v3479_v10 = vld [vmem:[%s4757_s30 + $0xd] sm:$0xff] }
 0x141   : > { %v884_v25 = vpop.f32.mrf.mxu3  ;;  %v1079_v30 = vadd.f32 %v1063_v18, %v1012_v13  ;;  %v1165_v47 = vmul.f32 %v3445_v43, %v4777_v5  ;;  %v835_v62 = vadd.f32 %v823_v51, %v771_v45  ;;  %v1216_v8 = vmul.f32 %v3462_v11, %v4784_v14  ;;  %v2837_v18 = vld [vmem:[%s6766_s5 + $0x48] sm:$0xff]  ;;  %v3529_v20 = vld [vmem:[%s4757_s30 + $0x12] sm:$0xff] }
 0x142   : > { %v898_v33 = vadd.f32 %v884_v25, %v834_v7  ;;  %v1129_v35 = vadd.f32 %v1113_v15, %v1078_v16  ;;  %v987_v38 = vmax.f32 %v981_v23, 0.0  ;;  %v1013_v13 = vmul.f32 %v3495_v32, %v4762_v60  ;;  %v762_v16 = vpop.f32.mrf.mxu1  ;;  %2849 = vmatpush.msrb.mxu1 %v2838_v4  ;;  %v3563_v51 = vld [vmem:[%s4757_s30 + $0x14] sm:$0xff]  ;;  %v4887_v4 = vld [vmem:[%s4757_s30 + $0x20] sm:$0xff] }
 0x143   : > { %v1130_v48 = vadd.f32 %v1114_v40, %v1079_v30  ;;  %v1064_v26 = vmul.f32 %v3512_v59, %v4764_v61  ;;  %v951_v25 = vpop.f32.mrf.mxu0  ;;  %v772_v30 = vadd.f32 %v762_v16, %v708_v2  ;;  %v4872_v11 = vld [vmem:[%s4757_s30 + $0x19] sm:$0xff]  ;;  %7091 = vst [vmem:[#allocation7_spill] sm:$0xff] %v4887_v4 }
 0x144   : > { %v962_v41 = vadd.f32 %v948_v12, %v898_v33  ;;  %v1180_v24 = vadd.f32 %v1164_v36, %v1129_v35  ;;  %v4799_v46 = vperm.slane %v987_v38, 0  ;;  %v4811_v57 = vperm.slane %v987_v38, 1  ;;  %v2836_v33 = vld [vmem:[%s6766_s5 + $0x40] sm:$0xff]  ;;  %v3546_v35 = vld [vmem:[%s4757_s30 + $0x13] sm:$0xff]  ;;  %2850 = vmatpush.msrb.mxu1 %v2837_v18 }
 0x145   : > { %v4821_v63 = vperm.slane %v987_v38, 2  ;;  %v1181_v1 = vadd.f32 %v1165_v47, %v1130_v48  ;;  %v4829_v7 = vperm.slane %v987_v38, 3  ;;  %v4839_v23 = vperm.slane %v987_v38, 4  ;;  %v2835_v48 = vld [vmem:[%s6766_s5 + $0x38] sm:$0xff] }
 0x146   : > { %7087 = vst [vmem:[#allocation3_spill] sm:$0xff] %v4799_v46  ;;  %v972_v53 = vmul.f32 %v4745_v44, %v962_v41  ;;  %v1231_v56 = vadd.f32 %v1215_v42, %v1180_v24  ;;  %v1317_v50 = vmul.f32 %v3495_v32, %v4799_v46  ;;  %v1368_v9 = vmul.f32 %v3512_v59, %v4811_v57  ;;  %v4851_v41 = vld [vmem:[%s4757_s30 + $0x18] sm:$0xff]  ;;  %v826_v42 = vpop.f32.mrf.mxu2  ;;  %v2834_v32 = vld [vmem:[%s6766_s5 + $0x30] sm:$0xff] }
 0x147   : > { %7088 = vst [vmem:[#allocation4_spill] sm:$0xff] %v4811_v57  ;;  %v1232_v21 = vadd.f32 %v1216_v8, %v1181_v1  ;;  %v1419_v29 = vmul.f32 %v3529_v20, %v4821_v63  ;;  %v1267_v36 = vmul.f32 %v3479_v10, %v4790_v22  ;;  %v1470_v40 = vmul.f32 %v3546_v35, %v4829_v7  ;;  %v2833_v1 = vld [vmem:[%s6766_s5 + $0x28] sm:$0xff] }
 0x148   : > { %v1282_v58 = vadd.f32 %v1266_v37, %v1231_v56  ;;  %7089 = vst [vmem:[#allocation5_spill] sm:$0xff] %v4821_v63  ;;  %v982_v3 = vadd.f32 %v4750_v49, %v972_v53  ;;  %v1080_v24 = vadd.f32 %v1064_v26, %v1013_v13  ;;  %v4853_v43 = vperm.slane %v987_v38, 5  ;;  %2851 = vmatpush.msrb.mxu1 %v2836_v33  ;;  %v2832_v13 = vld [vmem:[%s6766_s5 + $0x20] sm:$0xff] }
 0x149   : > { %v887_v0 = vpop.f32.mrf.mxu3  ;;  %v1283_v52 = vadd.f32 %v1267_v36, %v1232_v21  ;;  %v1318_v53 = vmul.f32 %v4851_v41, %v4799_v46  ;;  %v1521_v56 = vmul.f32 %v3563_v51, %v4839_v23  ;;  %v1115_v38 = vmul.f32 %v3529_v20, %v4766_v19  ;;  %v4902_v20 = vld [vmem:[%s4757_s30 + $0x21] sm:$0xff] }
 0x14a   : > { %v1333_v6 = vadd.f32 %v1317_v50, %v1282_v58  ;;  %v899_v15 = vadd.f32 %v887_v0, %v835_v62  ;;  %v4842_v27 = vmax.f32 %v982_v3, 0.0  ;;  %7090 = vst [vmem:[#allocation6_spill] sm:$0xff] %v4853_v43  ;;  %2852 = vmatpush.msrb.mxu1 %v2835_v48  ;;  %v1369_v58 = vmul.f32 %v4872_v11, %v4811_v57 }
 0x14b   : > { %v1334_v47 = vadd.f32 %v1318_v53, %v1283_v52  ;;  %v1131_v50 = vadd.f32 %v1115_v38, %v1080_v24  ;;  %v836_v59 = vadd.f32 %v826_v42, %v772_v30  ;;  %v1572_v2 = vmul.f32 %v3580_v34, %v4853_v43  ;;  %v954_v18 = vpop.f32.mrf.mxu0  ;;  %7092 = vst [vmem:[#allocation8_spill] sm:$0xff] %v4902_v20  ;;  %v2830_v52 = vld [vmem:[%s6766_s5 + $0x10] sm:$0xff] }
 0x14c   : > { %v1384_v12 = vadd.f32 %v1368_v9, %v1333_v6  ;;  %v963_v45 = vadd.f32 %v951_v25, %v899_v15  ;;  %v4866_v37 = vperm.slane %v4842_v27, 0  ;;  %v4878_v62 = vperm.slane %v4842_v27, 1  ;;  %2853 = vmatpush.msrb.mxu1 %v2834_v32  ;;  %v765_v9 = vpop.f32.mrf.mxu1  ;;  %v4896_v15 = vld [vmem:[%s4757_s30 + $0x1a] sm:$0xff] }
 0x14d   : > { %v709_v3 = vadd.f32 %v4737_v31, %v645_v54  ;;  %v1385_v6 = vadd.f32 %v1369_v58, %v1334_v47  ;;  %v1166_v8 = vmul.f32 %v3546_v35, %v4777_v5  ;;  %v4899_v31 = vperm.slane %v4842_v27, 2  ;;  %v4926_v54 = vld [vmem:[%s4757_s30 + $0x22] sm:$0xff] }
 0x14e   : > { %v1435_v39 = vadd.f32 %v1419_v29, %v1384_v12  ;;  %v973_v0 = vmul.f32 %v4745_v44, %v963_v45  ;;  %v1623_v16 = vmul.f32 %v4887_v4, %v4866_v37  ;;  %2854 = vmatpush.msrb.mxu1 %v2833_v1  ;;  %v1420_v21 = vmul.f32 %v4896_v15, %v4821_v63  ;;  %v2831_v29 = vld [vmem:[%s6766_s5 + $0x18] sm:$0xff]  ;;  %v829_v42 = vpop.f32.mrf.mxu2  ;;  %v2829_v47 = vld [vmem:[%s6766_s5 + $0x8] sm:$0xff] }
 0x14f   : > { %v1182_v25 = vadd.f32 %v1166_v8, %v1131_v50  ;;  %v1674_v35 = vmul.f32 %v4902_v20, %v4878_v62  ;;  %v773_v36 = vadd.f32 %v765_v9, %v709_v3  ;;  %v4913_v30 = vperm.slane %v4842_v27, 3  ;;  %7095 = vst [vmem:[#allocation11_spill] sm:$0xff] %v4926_v54  ;;  %v4950_v1 = vld [vmem:[%s4757_s30 + $0x1d] sm:$0xff]  ;;  %v4960_v9 = vld [vmem:[%s4757_s30 + $0x25] sm:$0xff] }
 0x150   : > { %v1486_v55 = vadd.f32 %v1470_v40, %v1435_v39  ;;  %v983_v12 = vadd.f32 %v4750_v49, %v973_v0  ;;  %2855 = vmatpush.msrb.mxu1 %v2832_v13  ;;  %v1436_v39 = vadd.f32 %v1420_v21, %v1385_v6  ;;  %v4916_v40 = vld [vmem:[%s4757_s30 + $0x1b] sm:$0xff]  ;;  %v1217_v24 = vmul.f32 %v3563_v51, %v4784_v14  ;;  %v4974_v21 = vld [vmem:[%s4757_s30 + $0x29] sm:$0xff] }
 0x151   : > { %v890_v28 = vpop.f32.mrf.mxu3  ;;  %7093 = vst [vmem:[#allocation9_spill] sm:$0xff] %v4913_v30  ;;  %v4920_v45 = vperm.slane %v4842_v27, 4  ;;  %v4931_v51 = vperm.slane %v4842_v27, 5  ;;  %v837_v58 = vadd.f32 %v829_v42, %v773_v36  ;;  %v4947_v0 = vld [vmem:[%s4757_s30 + $0x1c] sm:$0xff]  ;;  %v1573_v13 = vmul.f32 %v4950_v1, %v4853_v43 }
 0x152   : > { %v1537_v17 = vadd.f32 %v1521_v56, %v1486_v55  ;;  %v900_v10 = vadd.f32 %v890_v28, %v836_v59  ;;  %v1471_v55 = vmul.f32 %v4916_v40, %v4829_v7  ;;  %2856 = vmatpush.msrb.mxu1 %v2831_v29  ;;  %v1725_v56 = vmul.f32 %v4926_v54, %v4899_v31  ;;  %v4939_v28 = vld [vmem:[%s4757_s30 + $0x23] sm:$0xff] }
 0x153   : > { %7094 = vst [vmem:[#allocation10_spill] sm:$0xff] %v4920_v45  ;;  %v1233_v38 = vadd.f32 %v1217_v24, %v1182_v25  ;;  %v989_v32 = vmax.f32 %v983_v12, 0.0  ;;  %v1776_v27 = vmul.f32 %v4939_v28, %v4913_v30  ;;  %v4944_v59 = vld [vmem:[%s4757_s30 + $0x24] sm:$0xff]  ;;  %v1675_v36 = vmul.f32 %v4974_v21, %v4878_v62 }
 0x154   : > { %v1588_v26 = vadd.f32 %v1572_v2, %v1537_v17  ;;  %v964_v48 = vadd.f32 %v954_v18, %v900_v10  ;;  %7096 = vst [vmem:[#allocation12_spill] sm:$0xff] %v4931_v51  ;;  %v1487_v17 = vadd.f32 %v1471_v55, %v1436_v39  ;;  %2857 = vmatpush.msrb.mxu1 %v2830_v52  ;;  %v2828_v6 = vld [vmem:[%s6766_s5] sm:$0xff]  ;;  %v4977_v25 = vld [vmem:[%s4757_s30 + $0x2a] sm:$0xff] }
 0x155   : > { %7097 = vst [vmem:[#allocation13_spill] sm:$0xff] %v4939_v28  ;;  %v1268_v2 = vmul.f32 %v3580_v34, %v4790_v22  ;;  %v1827_v8 = vmul.f32 %v4944_v59, %v4920_v45  ;;  %v1522_v10 = vmul.f32 %v4947_v0, %v4839_v23  ;;  %v4979_v29 = vperm.slane %v989_v32, 0 }
 0x156   : > { %v1639_v33 = vadd.f32 %v1623_v16, %v1588_v26  ;;  %7098 = vst [vmem:[#allocation14_spill] sm:$0xff] %v4944_v59  ;;  %v974_v3 = vmul.f32 %v4745_v44, %v964_v48  ;;  %v4967_v26 = vld [vmem:[%s4757_s30 + $0x28] sm:$0xff]  ;;  %2858 = vmatpush.msrb.mxu1 %v2829_v47  ;;  %v1878_v16 = vmul.f32 %v4960_v9, %v4931_v51  ;;  %v4985_v24 = vperm.slane %v989_v32, 1 }
 0x157   : > { %7099 = vst [vmem:[#allocation15_spill] sm:$0xff] %v4950_v1  ;;  %v1624_v18 = vmul.f32 %v4967_v26, %v4866_v37  ;;  %v1284_v12 = vadd.f32 %v1268_v2, %v1233_v38  ;;  %v1726_v39 = vmul.f32 %v4977_v25, %v4899_v31  ;;  %v4987_v42 = vperm.slane %v989_v32, 2  ;;  %v5002_v2 = vld [vmem:[%s4757_s30 + $0x2b] sm:$0xff] }
 0x158   : > { %v1690_v53 = vadd.f32 %v1674_v35, %v1639_v33  ;;  %7100 = vst [vmem:[#allocation16_spill] sm:$0xff] %v4960_v9  ;;  %v1538_v35 = vadd.f32 %v1522_v10, %v1487_v17  ;;  %2859 = vmatpush.msrb.mxu1 %v2828_v6  ;;  %v1319_v52 = vmul.f32 %v4887_v4, %v4799_v46  ;;  %v4993_v55 = vperm.slane %v989_v32, 4  ;;  %v5005_v6 = vld [vmem:[%s4757_s30 + $0x2c] sm:$0xff]  ;;  %v957_v10 = vpop.f32.mrf.mxu0 }
 0x159   : > { %7101 = vst [vmem:[#allocation17_spill] sm:$0xff] %v4967_v26  ;;  %v893_v33 = vpop.f32.mrf.mxu3  ;;  %v4996_v47 = vperm.slane %v989_v32, 5 }
 0x15a   : > { %v1741_v50 = vadd.f32 %v1725_v56, %v1690_v53  ;;  %7102 = vst [vmem:[#allocation18_spill] sm:$0xff] %v4974_v21  ;;  %v4991_v53 = vperm.slane %v989_v32, 3  ;;  %v984_v56 = vadd.f32 %v4750_v49, %v974_v3  ;;  %v1589_v38 = vadd.f32 %v1573_v13, %v1538_v35  ;;  %v5010_v3 = vld [vmem:[%s4757_s30 + $0x31] sm:$0xff] }
 0x15b   : > { %7103 = vst [vmem:[#allocation19_spill] sm:$0xff] %v4977_v25  ;;  %v901_v17 = vadd.f32 %v893_v33, %v837_v58  ;;  %v5013_v32 = vld [vmem:[%s4757_s30 + $0x32] sm:$0xff]  ;;  %v1777_v13 = vmul.f32 %v5002_v2, %v4913_v30 }
 0x15c   : > { %v1792_v34 = vadd.f32 %v1776_v27, %v1741_v50  ;;  %7104 = vst [vmem:[#allocation20_spill] sm:$0xff] %v4979_v29  ;;  %v4999_v27 = vld [vmem:[%s4757_s30 + $0x30] sm:$0xff]  ;;  %v1640_v58 = vadd.f32 %v1624_v18, %v1589_v38  ;;  %v2031_v35 = vmul.f32 %v5013_v32, %v4987_v42  ;;  %v990_v38 = vmax.f32 %v984_v56, 0.0  ;;  %v5046_v56 = vld [vmem:[%s4757_s30 + $0x38] sm:$0xff] }
 0x15d   : > { %7105 = vst [vmem:[#allocation21_spill] sm:$0xff] %v4985_v24  ;;  %v5020_v33 = vld [vmem:[%s4757_s30 + $0x2d] sm:$0xff]  ;;  %v5039_v25 = vld [vmem:[%s4757_s30 + $0x35] sm:$0xff]  ;;  %v965_v26 = vadd.f32 %v957_v10, %v901_v17  ;;  %v1930_v1 = vmul.f32 %v5046_v56, %v4979_v29 }
 0x15e   : > { %7106 = vst [vmem:[#allocation22_spill] sm:$0xff] %v4987_v42  ;;  %v1843_v48 = vadd.f32 %v1827_v8, %v1792_v34  ;;  %v1335_v8 = vadd.f32 %v1319_v52, %v1284_v12  ;;  %v1929_v34 = vmul.f32 %v4999_v27, %v4979_v29  ;;  %v1980_v12 = vmul.f32 %v5010_v3, %v4985_v24  ;;  %v5056_v17 = vld [vmem:[%s4757_s30 + $0x3a] sm:$0xff] }
 0x15f   : > { %7107 = vst [vmem:[#allocation23_spill] sm:$0xff] %v4991_v53  ;;  %v1879_v18 = vmul.f32 %v5020_v33, %v4931_v51  ;;  %v1370_v52 = vmul.f32 %v4902_v20, %v4811_v57  ;;  %v1691_v21 = vadd.f32 %v1675_v36, %v1640_v58  ;;  %v2184_v20 = vmul.f32 %v5039_v25, %v4996_v47  ;;  %v5059_v10 = vld [vmem:[%s4757_s30 + $0x3b] sm:$0xff] }
 0x160   : > { %7108 = vst [vmem:[#allocation24_spill] sm:$0xff] %v4993_v55  ;;  %v1894_v50 = vadd.f32 %v1878_v16, %v1843_v48  ;;  %v1828_v16 = vmul.f32 %v5005_v6, %v4920_v45  ;;  %v5027_v48 = vld [vmem:[%s4757_s30 + $0x33] sm:$0xff]  ;;  %v5062_v58 = vld [vmem:[%s4757_s30 + $0x3c] sm:$0xff]  ;;  %v2032_v22 = vmul.f32 %v5056_v17, %v4987_v42 }
 0x161   : > { %7109 = vst [vmem:[#allocation25_spill] sm:$0xff] %v4996_v47  ;;  %v1742_v46 = vadd.f32 %v1726_v39, %v1691_v21  ;;  %v5072_v21 = vmul.f32 %v5062_v58, %v4993_v55  ;;  %v1421_v39 = vmul.f32 %v4926_v54, %v4821_v63  ;;  %v5090_v42 = vld [vmem:[%s4757_s30 + $0x3d] sm:$0xff] }
 0x162   : > { %7110 = vst [vmem:[#allocation26_spill] sm:$0xff] %v5002_v2  ;;  %v1945_v4 = vadd.f32 %v1929_v34, %v1894_v50  ;;  %v5036_v2 = vld [vmem:[%s4757_s30 + $0x34] sm:$0xff]  ;;  %v1386_v34 = vadd.f32 %v1370_v52, %v1335_v8  ;;  %v5076_v8 = vperm.slane %v990_v38, 0 }
 0x163   : > { %7111 = vst [vmem:[#allocation27_spill] sm:$0xff] %v5005_v6  ;;  %v2082_v6 = vmul.f32 %v5027_v48, %v4991_v53  ;;  %v5049_v50 = vld [vmem:[%s4757_s30 + $0x39] sm:$0xff] }
 0x164   : > { %7112 = vst [vmem:[#allocation28_spill] sm:$0xff] %v5013_v32  ;;  %v1996_v57 = vadd.f32 %v1980_v12, %v1945_v4  ;;  %v1981_v36 = vmul.f32 %v5049_v50, %v4985_v24  ;;  %v5068_v4 = vmul.f32 %v5059_v10, %v4991_v53  ;;  %v5078_v12 = vperm.slane %v990_v38, 1 }
 0x165   : > { %7113 = vst [vmem:[#allocation29_spill] sm:$0xff] %v5020_v33  ;;  %v2133_v33 = vmul.f32 %v5036_v2, %v4993_v55  ;;  %v5085_v55 = vperm.slane %v990_v38, 3  ;;  %v5087_v53 = vperm.slane %v990_v38, 4 }
 0x166   : > { %7114 = vst [vmem:[#allocation30_spill] sm:$0xff] %v5027_v48  ;;  %v2047_v52 = vadd.f32 %v2031_v35, %v1996_v57  ;;  %v5095_v57 = vld [vmem:[%s4757_s30 + $0x40] sm:$0xff] }
 0x167   : > { %7115 = vst [vmem:[#allocation31_spill] sm:$0xff] %v5036_v2 }
 0x168   : > { %7116 = vst [vmem:[#allocation32_spill] sm:$0xff] %v5039_v25  ;;  %v2098_v54 = vadd.f32 %v2082_v6, %v2047_v52  ;;  %v1523_v6 = vmul.f32 %v4944_v59, %v4839_v23  ;;  %v1574_v52 = vmul.f32 %v4960_v9, %v4853_v43  ;;  %v1625_v9 = vmul.f32 %v4999_v27, %v4866_v37 }
 0x169   : > { %7117 = vst [vmem:[#allocation33_spill] sm:$0xff] %v5046_v56  ;;  %v1437_v56 = vadd.f32 %v1421_v39, %v1386_v34  ;;  %v5111_v34 = vld [vmem:[%s4757_s30 + $0x42] sm:$0xff] }
 0x16a   : > { %7118 = vst [vmem:[#allocation34_spill] sm:$0xff] %v5049_v50  ;;  %v5080_v50 = vperm.slane %v990_v38, 2  ;;  %v2149_v35 = vadd.f32 %v2133_v33, %v2098_v54  ;;  %v5120_v54 = vld [vmem:[%s4757_s30 + $0x44] sm:$0xff] }
 0x16b   : > { %7119 = vst [vmem:[#allocation35_spill] sm:$0xff] %v5056_v17  ;;  %v1793_v17 = vadd.f32 %v1777_v13, %v1742_v46  ;;  %v5092_v46 = vperm.slane %v990_v38, 5 }
 0x16c   : > { %7120 = vst [vmem:[#allocation36_spill] sm:$0xff] %v5059_v10  ;;  %v975_v10 = vmul.f32 %v4745_v44, %v965_v26  ;;  %v5098_v44 = vld [vmem:[%s4757_s30 + $0x41] sm:$0xff]  ;;  %v5102_v26 = vmul.f32 %v5090_v42, %v4996_v47 }
 0x16d   : > { %7121 = vst [vmem:[#allocation37_spill] sm:$0xff] %v5062_v58  ;;  %v1472_v58 = vmul.f32 %v4939_v28, %v4829_v7  ;;  %v1844_v63 = vadd.f32 %v1828_v16, %v1793_v17  ;;  %v2235_v16 = vmul.f32 %v5095_v57, %v5076_v8  ;;  %v2286_v38 = vmul.f32 %v5098_v44, %v5078_v12 }
 0x16e   : > { %7122 = vst [vmem:[#allocation38_spill] sm:$0xff] %v5076_v8  ;;  %v985_v39 = vadd.f32 %v4750_v49, %v975_v10  ;;  %v5129_v49 = vld [vmem:[%s4757_s30 + $0x45] sm:$0xff] }
 0x16f   : > { %7123 = vst [vmem:[#allocation39_spill] sm:$0xff] %v5078_v12  ;;  %v1488_v13 = vadd.f32 %v1472_v58, %v1437_v56  ;;  %v1895_v17 = vadd.f32 %v1879_v18, %v1844_v63  ;;  %v2337_v56 = vmul.f32 %v5111_v34, %v5080_v50  ;;  %v5117_v58 = vld [vmem:[%s4757_s30 + $0x43] sm:$0xff]  ;;  %v2439_v63 = vmul.f32 %v5120_v54, %v5087_v53 }
 0x170   : > { %7124 = vst [vmem:[#allocation40_spill] sm:$0xff] %v5080_v50  ;;  %v2388_v59 = vmul.f32 %v5117_v58, %v5085_v55  ;;  %v5132_v10 = vld [vmem:[%s4757_s30 + $0x48] sm:$0xff]  ;;  %v2490_v28 = vmul.f32 %v5129_v49, %v5092_v46 }
 0x171   : > { %7125 = vst [vmem:[#allocation41_spill] sm:$0xff] %v5090_v42  ;;  %v1539_v33 = vadd.f32 %v1523_v6, %v1488_v13  ;;  %v2200_v42 = vadd.f32 %v2184_v20, %v2149_v35  ;;  %v1946_v18 = vadd.f32 %v1930_v1, %v1895_v17  ;;  %v2236_v13 = vmul.f32 %v5132_v10, %v5076_v8  ;;  %v5139_v20 = vld [vmem:[%s4757_s30 + $0x49] sm:$0xff] }
 0x172   : > { %7126 = vst [vmem:[#allocation42_spill] sm:$0xff] %v5095_v57  ;;  %v5142_v6 = vld [vmem:[%s4757_s30 + $0x4a] sm:$0xff]  ;;  %v2287_v17 = vmul.f32 %v5139_v20, %v5078_v12  ;;  %v991_v8 = vmax.f32 %v985_v39, 0.0  ;;  %v1065_v39 = vmul.f32 %v4872_v11, %v4764_v61  ;;  %v1116_v11 = vmul.f32 %v4896_v15, %v4766_v19 }
 0x173   : > { %7127 = vst [vmem:[#allocation43_spill] sm:$0xff] %v5098_v44  ;;  %v1590_v35 = vadd.f32 %v1574_v52, %v1539_v33  ;;  %v2251_v43 = vadd.f32 %v2235_v16, %v2200_v42  ;;  %v1997_v1 = vadd.f32 %v1981_v36, %v1946_v18  ;;  %v1676_v52 = vmul.f32 %v5010_v3, %v4878_v62  ;;  %v5162_v16 = vld [vmem:[%s4757_s30 + $0x4c] sm:$0xff] }
 0x174   : > { %7128 = vst [vmem:[#allocation44_spill] sm:$0xff] %v5111_v34  ;;  %v5165_v18 = vld [vmem:[%s4757_s30 + $0x4d] sm:$0xff] }
 0x175   : > { %7129 = vst [vmem:[#allocation45_spill] sm:$0xff] %v5117_v58  ;;  %v1641_v33 = vadd.f32 %v1625_v9, %v1590_v35  ;;  %v2302_v42 = vadd.f32 %v2286_v38, %v2251_v43  ;;  %v2048_v36 = vadd.f32 %v2032_v22, %v1997_v1  ;;  %v5177_v9 = vmul.f32 %v5165_v18, %v5092_v46 }
 0x176   : > { %7130 = vst [vmem:[#allocation46_spill] sm:$0xff] %v5120_v54  ;;  %v1727_v22 = vmul.f32 %v5013_v32, %v4899_v31  ;;  %v5184_v1 = vperm.slane %v991_v8, 0 }
 0x177   : > { %7131 = vst [vmem:[#allocation47_spill] sm:$0xff] %v5129_v49  ;;  %v5150_v49 = vmul.f32 %v5142_v6, %v5080_v50  ;;  %v1692_v43 = vadd.f32 %v1676_v52, %v1641_v33  ;;  %v2353_v38 = vadd.f32 %v2337_v56, %v2302_v42  ;;  %v2099_v35 = vadd.f32 %v5068_v4, %v2048_v36 }
 0x178   : > { %7132 = vst [vmem:[#allocation48_spill] sm:$0xff] %v5132_v10  ;;  %v5153_v10 = vld [vmem:[%s4757_s30 + $0x4b] sm:$0xff]  ;;  %v1167_v4 = vmul.f32 %v4916_v40, %v4777_v5  ;;  %v5193_v56 = vperm.slane %v991_v8, 2  ;;  %v1829_v42 = vmul.f32 %v5036_v2, %v4920_v45  ;;  %v5205_v40 = vperm.slane %v991_v8, 4 }
 0x179   : > { %7133 = vst [vmem:[#allocation49_spill] sm:$0xff] %v5139_v20  ;;  %v5157_v47 = vmul.f32 %v5153_v10, %v5085_v55  ;;  %v1743_v20 = vadd.f32 %v1727_v22, %v1692_v43  ;;  %v2404_v33 = vadd.f32 %v2388_v59, %v2353_v38  ;;  %v2150_v52 = vadd.f32 %v5072_v21, %v2099_v35  ;;  %v5212_v38 = vld [vmem:[%s4757_s30 + $0x51] sm:$0xff] }
 0x17a   : > { %7134 = vst [vmem:[#allocation50_spill] sm:$0xff] %v5142_v6  ;;  %v1014_v6 = vmul.f32 %v4851_v41, %v4762_v60  ;;  %v1218_v21 = vmul.f32 %v4947_v0, %v4784_v14  ;;  %v5216_v0 = vperm.slane %v991_v8, 5 }
 0x17b   : > { %7135 = vst [vmem:[#allocation51_spill] sm:$0xff] %v5153_v10  ;;  %v5173_v10 = vmul.f32 %v5162_v16, %v5087_v53  ;;  %v2455_v36 = vadd.f32 %v2439_v63, %v2404_v33  ;;  %v2201_v59 = vadd.f32 %v5102_v26, %v2150_v52 }
 0x17c   : > { %7136 = vst [vmem:[#allocation52_spill] sm:$0xff] %v5162_v16  ;;  %v1081_v41 = vadd.f32 %v1065_v39, %v1014_v6  ;;  %v5186_v16 = vperm.slane %v991_v8, 1  ;;  %v5195_v6 = vperm.slane %v991_v8, 3  ;;  %v5200_v39 = vld [vmem:[%s4757_s30 + $0x50] sm:$0xff] }
 0x17d   : > { %7137 = vst [vmem:[#allocation53_spill] sm:$0xff] %v5165_v18  ;;  %v1778_v18 = vmul.f32 %v5027_v48, %v4913_v30  ;;  %v2541_v22 = vmul.f32 %v5200_v39, %v5184_v1  ;;  %v2506_v63 = vadd.f32 %v2490_v28, %v2455_v36  ;;  %v2252_v35 = vadd.f32 %v2236_v13, %v2201_v59  ;;  %v5223_v28 = vld [vmem:[%s4757_s30 + $0x52] sm:$0xff]  ;;  %v7149_v59 = vld [vmem:[#allocation3_spill] sm:$0xff] }
 0x17e   : > { %7138 = vst [vmem:[#allocation54_spill] sm:$0xff] %v5184_v1  ;;  %v1132_v32 = vadd.f32 %v1116_v11, %v1081_v41  ;;  %v7145_v41 = vld [vmem:[#allocation15_spill] sm:$0xff]  ;;  %v2592_v33 = vmul.f32 %v5212_v38, %v5186_v16  ;;  %v2643_v8 = vmul.f32 %v5223_v28, %v5193_v56 }
 0x17f   : > { %7139 = vst [vmem:[#allocation55_spill] sm:$0xff] %v5186_v16  ;;  %v1794_v15 = vadd.f32 %v1778_v18, %v1743_v20  ;;  %v1880_v18 = vmul.f32 %v5039_v25, %v4931_v51  ;;  %v2303_v13 = vadd.f32 %v2287_v17, %v2252_v35  ;;  %v5240_v17 = vld [vmem:[%s4757_s30 + $0x55] sm:$0xff] }
 0x180   : > { %7140 = vst [vmem:[#allocation56_spill] sm:$0xff] %v5193_v56  ;;  %v1183_v43 = vadd.f32 %v1167_v4, %v1132_v32  ;;  %v7144_v32 = vld [vmem:[#allocation2_spill] sm:$0xff]  ;;  %v1931_v4 = vmul.f32 %v5095_v57, %v4979_v29  ;;  %v7160_v29 = vld [vmem:[#allocation23_spill] sm:$0xff] }
 0x181   : > { %7141 = vst [vmem:[#allocation57_spill] sm:$0xff] %v5195_v6  ;;  %v1845_v20 = vadd.f32 %v1829_v42, %v1794_v15  ;;  %v1269_v11 = vmul.f32 %v7145_v41, %v7144_v32  ;;  %v2557_v15 = vadd.f32 %v2541_v22, %v2506_v63  ;;  %v5226_v42 = vld [vmem:[%s4757_s30 + $0x53] sm:$0xff]  ;;  %v1982_v22 = vmul.f32 %v5098_v44, %v4985_v24  ;;  %v7154_v57 = vld [vmem:[#allocation18_spill] sm:$0xff] }
 0x182   : > { %7142 = vst [vmem:[#allocation58_spill] sm:$0xff] %v5200_v39  ;;  %v1234_v26 = vadd.f32 %v1218_v21, %v1183_v43  ;;  %v7150_v43 = vld [vmem:[#allocation17_spill] sm:$0xff]  ;;  %v2354_v35 = vadd.f32 %v5150_v49, %v2303_v13 }
 0x183   : > { %7143 = vst [vmem:[#allocation59_spill] sm:$0xff] %v5212_v38  ;;  %v1896_v52 = vadd.f32 %v1880_v18, %v1845_v20  ;;  %v1320_v21 = vmul.f32 %v7150_v43, %v7149_v59  ;;  %v2694_v20 = vmul.f32 %v5226_v42, %v5195_v6  ;;  %v2608_v63 = vadd.f32 %v2592_v33, %v2557_v15  ;;  %v5237_v41 = vld [vmem:[%s4757_s30 + $0x54] sm:$0xff]  ;;  %v7155_v43 = vld [vmem:[#allocation22_spill] sm:$0xff] }
 0x184   : > { %7146 = vst [vmem:[#allocation2_spill] sm:$0xff] %v5216_v0  ;;  %v1285_v36 = vadd.f32 %v1269_v11, %v1234_v26  ;;  %v7153_v11 = vld [vmem:[#allocation4_spill] sm:$0xff]  ;;  %v2745_v2 = vmul.f32 %v5237_v41, %v5205_v40  ;;  %v2033_v33 = vmul.f32 %v5111_v34, %v7155_v43  ;;  %v2405_v44 = vadd.f32 %v5157_v47, %v2354_v35  ;;  %v5253_v24 = vld [vmem:[%s4757_s30 + $0x58] sm:$0xff]  ;;  %v7161_v34 = vld [vmem:[#allocation26_spill] sm:$0xff] }
 0x185   : > { %7147 = vst [vmem:[#allocation15_spill] sm:$0xff] %v5223_v28  ;;  %v1947_v18 = vadd.f32 %v1931_v4, %v1896_v52  ;;  %v1371_v25 = vmul.f32 %v7154_v57, %v7153_v11  ;;  %v2796_v52 = vmul.f32 %v5240_v17, %v5216_v0  ;;  %v2659_v15 = vadd.f32 %v2643_v8, %v2608_v63  ;;  %v5256_v49 = vld [vmem:[%s4757_s30 + $0x59] sm:$0xff]  ;;  %v7162_v43 = vld [vmem:[#allocation24_spill] sm:$0xff] }
 0x186   : > { %7148 = vst [vmem:[#allocation60_spill] sm:$0xff] %v5226_v42  ;;  %v1336_v26 = vadd.f32 %v1320_v21, %v1285_v36  ;;  %v7158_v36 = vld [vmem:[#allocation5_spill] sm:$0xff]  ;;  %v7159_v21 = vld [vmem:[#allocation19_spill] sm:$0xff]  ;;  %v2542_v48 = vmul.f32 %v5253_v24, %v5184_v1  ;;  %v2084_v8 = vmul.f32 %v5117_v58, %v7160_v29  ;;  %v2456_v47 = vadd.f32 %v5173_v10, %v2405_v44  ;;  %v7168_v58 = vld [vmem:[#allocation6_spill] sm:$0xff] }
 0x187   : > { %7151 = vst [vmem:[#allocation3_spill] sm:$0xff] %v5237_v41  ;;  %v1998_v4 = vadd.f32 %v1982_v22, %v1947_v18  ;;  %v1422_v57 = vmul.f32 %v7159_v21, %v7158_v36  ;;  %v2593_v18 = vmul.f32 %v5256_v49, %v5186_v16  ;;  %v2710_v63 = vadd.f32 %v2694_v20, %v2659_v15 }
 0x188   : > { %7152 = vst [vmem:[#allocation61_spill] sm:$0xff] %v5240_v17  ;;  %v1387_v13 = vadd.f32 %v1371_v25, %v1336_v26  ;;  %v1473_v25 = vmul.f32 %v7161_v34, %v4829_v7  ;;  %v2135_v21 = vmul.f32 %v5120_v54, %v7162_v43  ;;  %v2507_v20 = vadd.f32 %v5177_v9, %v2456_v47  ;;  %v7169_v54 = vld [vmem:[#allocation29_spill] sm:$0xff] }
 0x189   : > { %7156 = vst [vmem:[#allocation4_spill] sm:$0xff] %v5253_v24  ;;  %v2049_v22 = vadd.f32 %v2033_v33, %v1998_v4  ;;  %v7163_v24 = vld [vmem:[#allocation27_spill] sm:$0xff]  ;;  %v1575_v43 = vmul.f32 %v7169_v54, %v7168_v58 }
 0x18a   : > { %7157 = vst [vmem:[#allocation62_spill] sm:$0xff] %v5256_v49  ;;  %v1438_v35 = vadd.f32 %v1422_v57, %v1387_v13  ;;  %v1524_v1 = vmul.f32 %v7163_v24, %v4839_v23  ;;  %v7164_v4 = vld [vmem:[#allocation7_spill] sm:$0xff]  ;;  %v2761_v49 = vadd.f32 %v2745_v2, %v2710_v63  ;;  %v7165_v57 = vld [vmem:[#allocation8_spill] sm:$0xff]  ;;  %v7166_v13 = vld [vmem:[#allocation25_spill] sm:$0xff] }
 0x18b   : > { %v2100_v26 = vadd.f32 %v2084_v8, %v2049_v22  ;;  %v1015_v33 = vmul.f32 %v7164_v4, %v4762_v60  ;;  %v1066_v44 = vmul.f32 %v7165_v57, %v4764_v61  ;;  %v7167_v22 = vld [vmem:[#allocation47_spill] sm:$0xff]  ;;  %v2558_v4 = vadd.f32 %v2542_v48, %v2507_v20  ;;  %v5285_v2 = vld [vmem:[%s4757_s30 + $0x5a] sm:$0xff] }
 0x18c   : > { %v1489_v15 = vadd.f32 %v1473_v25, %v1438_v35  ;;  %v2186_v8 = vmul.f32 %v7167_v22, %v7166_v13  ;;  %v7170_v24 = vld [vmem:[#allocation11_spill] sm:$0xff]  ;;  %v2812_v34 = vadd.f32 %v2796_v52, %v2761_v49  ;;  %7171 = vst [vmem:[#allocation5_spill] sm:$0xff] %v5285_v2  ;;  %v2644_v47 = vmul.f32 %v5285_v2, %v5193_v56  ;;  %v7172_v35 = vld [vmem:[#allocation38_spill] sm:$0xff] }
 0x18d   : > { %v2151_v10 = vadd.f32 %v2135_v21, %v2100_v26  ;;  %v1117_v29 = vmul.f32 %v7170_v24, %v4766_v19  ;;  %v1082_v63 = vadd.f32 %v1066_v44, %v1015_v33  ;;  %v2237_v25 = vmul.f32 %v5200_v39, %v7172_v35  ;;  %v7173_v26 = vld [vmem:[#allocation33_spill] sm:$0xff]  ;;  %v7176_v44 = vld [vmem:[#allocation34_spill] sm:$0xff] }
 0x18e   : > { %v1540_v9 = vadd.f32 %v1524_v1, %v1489_v15  ;;  %v1626_v57 = vmul.f32 %v7173_v26, %v4866_v37  ;;  %2860 = vmatmul.f32.vlgmr.msrb.gmra.mxu1 %v2812_v34  ;;  %v2609_v22 = vadd.f32 %v2593_v18, %v2558_v4  ;;  %v5294_v24 = vld [vmem:[%s4757_s30 + $0x5b] sm:$0xff]  ;;  %v2288_v15 = vmul.f32 %v5212_v38, %v5078_v12 }
 0x18f   : > { %v2202_v21 = vadd.f32 %v2186_v8, %v2151_v10  ;;  %7174 = vst [vmem:[#allocation7_spill] sm:$0xff] %v5294_v24  ;;  %v1133_v52 = vadd.f32 %v1117_v29, %v1082_v63  ;;  %v7175_v1 = vld [vmem:[#allocation13_spill] sm:$0xff]  ;;  %v2695_v33 = vmul.f32 %v5294_v24, %v5195_v6  ;;  %v1677_v10 = vmul.f32 %v7176_v44, %v4878_v62  ;;  %v7178_v29 = vld [vmem:[#allocation14_spill] sm:$0xff] }
 0x190   : > { %v1591_v48 = vadd.f32 %v1575_v43, %v1540_v9  ;;  %v1168_v49 = vmul.f32 %v7175_v1, %v4777_v5  ;;  %v2660_v34 = vadd.f32 %v2644_v47, %v2609_v22  ;;  %v5305_v18 = vld [vmem:[%s4757_s30 + $0x5c] sm:$0xff]  ;;  %v1219_v4 = vmul.f32 %v7178_v29, %v4784_v14 }
 0x191   : > { %v2253_v20 = vadd.f32 %v2237_v25, %v2202_v21  ;;  %7177 = vst [vmem:[#allocation8_spill] sm:$0xff] %v5305_v18  ;;  %v2746_v9 = vmul.f32 %v5305_v18, %v5205_v40  ;;  %v2339_v21 = vmul.f32 %v5223_v28, %v5080_v50  ;;  %v7179_v25 = vld [vmem:[#allocation35_spill] sm:$0xff]  ;;  %v5316_v39 = vld [vmem:[%s4757_s30 + $0x5d] sm:$0xff] }
 0x192   : > { %v1642_v8 = vadd.f32 %v1626_v57, %v1591_v48  ;;  %v1184_v43 = vadd.f32 %v1168_v49, %v1133_v52  ;;  %v1728_v1 = vmul.f32 %v7179_v25, %v4899_v31  ;;  %v2711_v38 = vadd.f32 %v2695_v33, %v2660_v34  ;;  %7180 = vst [vmem:[#allocation25_spill] sm:$0xff] %v5316_v39  ;;  %v7181_v57 = vld [vmem:[#allocation16_spill] sm:$0xff] }
 0x193   : > { %v2304_v63 = vadd.f32 %v2288_v15, %v2253_v20  ;;  %v1270_v48 = vmul.f32 %v7181_v57, %v7144_v32  ;;  %v2797_v52 = vmul.f32 %v5316_v39, %v5216_v0  ;;  %v2390_v20 = vmul.f32 %v5226_v42, %v5085_v55  ;;  %v7182_v15 = vld [vmem:[#allocation36_spill] sm:$0xff] }
 0x194   : > { %v1693_v22 = vadd.f32 %v1677_v10, %v1642_v8  ;;  %v1235_v47 = vadd.f32 %v1219_v4, %v1184_v43  ;;  %v1779_v29 = vmul.f32 %v7182_v15, %v4913_v30  ;;  %v2762_v28 = vadd.f32 %v2746_v9, %v2711_v38  ;;  %v7183_v4 = vld [vmem:[#allocation37_spill] sm:$0xff] }
 0x195   : > { %v2355_v49 = vadd.f32 %v2339_v21, %v2304_v63  ;;  %v1321_v10 = vmul.f32 %v4999_v27, %v7149_v59  ;;  %v2441_v43 = vmul.f32 %v5237_v41, %v5087_v53  ;;  %v1830_v63 = vmul.f32 %v7183_v4, %v4920_v45  ;;  %v5337_v27 = vld [vmem:[%s4757_s30 + $0x60] sm:$0xff] }
 0x196   : > { %v1744_v33 = vadd.f32 %v1728_v1, %v1693_v22  ;;  %v1286_v34 = vadd.f32 %v1270_v48, %v1235_v47  ;;  %v2813_v21 = vadd.f32 %v2797_v52, %v2762_v28  ;;  %v1372_v15 = vmul.f32 %v5010_v3, %v7153_v11  ;;  %7184 = vst [vmem:[#allocation6_spill] sm:$0xff] %v5337_v27  ;;  %v7185_v22 = vld [vmem:[#allocation41_spill] sm:$0xff]  ;;  %v7186_v28 = vld [vmem:[#allocation28_spill] sm:$0xff] }
 0x197   : > { %v2406_v8 = vadd.f32 %v2390_v20, %v2355_v49  ;;  %v2492_v9 = vmul.f32 %v5240_v17, %v5092_v46  ;;  %v1881_v47 = vmul.f32 %v7185_v22, %v4931_v51  ;;  %v1423_v52 = vmul.f32 %v7186_v28, %v7158_v36  ;;  %v7187_v20 = vld [vmem:[#allocation54_spill] sm:$0xff]  ;;  %v7196_v17 = vld [vmem:[#allocation49_spill] sm:$0xff] }
 0x198   : > { %v1795_v57 = vadd.f32 %v1779_v29, %v1744_v33  ;;  %v1337_v42 = vadd.f32 %v1321_v10, %v1286_v34  ;;  %2863 = vmatmul.f32.gmra.mxu1 %v2813_v21  ;;  %v2543_v3 = vmul.f32 %v5337_v27, %v7187_v20  ;;  %v5346_v29 = vld [vmem:[%s4757_s30 + $0x61] sm:$0xff]  ;;  %v7189_v34 = vld [vmem:[#allocation20_spill] sm:$0xff] }
 0x199   : > { %v2457_v38 = vadd.f32 %v2441_v43, %v2406_v8  ;;  %7188 = vst [vmem:[#allocation29_spill] sm:$0xff] %v5346_v29  ;;  %v7190_v10 = vld [vmem:[#allocation48_spill] sm:$0xff]  ;;  %v5359_v27 = vld [vmem:[%s4757_s30 + $0x62] sm:$0xff] }
 0x19a   : > { %v1846_v1 = vadd.f32 %v1830_v63, %v1795_v57  ;;  %v1388_v48 = vadd.f32 %v1372_v15, %v1337_v42  ;;  %v1932_v8 = vmul.f32 %v7190_v10, %v7189_v34  ;;  %v7191_v63 = vld [vmem:[#allocation30_spill] sm:$0xff]  ;;  %v2594_v42 = vmul.f32 %v5346_v29, %v5186_v16  ;;  %v7192_v15 = vld [vmem:[#allocation17_spill] sm:$0xff]  ;;  %7194 = vst [vmem:[#allocation11_spill] sm:$0xff] %v5359_v27 }
 0x19b   : > { %v2508_v49 = vadd.f32 %v2492_v9, %v2457_v38  ;;  %v1474_v21 = vmul.f32 %v7191_v63, %v4829_v7  ;;  %v1016_v38 = vmul.f32 %v7192_v15, %v4762_v60  ;;  %v7193_v9 = vld [vmem:[#allocation18_spill] sm:$0xff]  ;;  %v2645_v63 = vmul.f32 %v5359_v27, %v5193_v56  ;;  %v7198_v15 = vld [vmem:[#allocation19_spill] sm:$0xff] }
 0x19c   : > { %v1897_v33 = vadd.f32 %v1881_v47, %v1846_v1  ;;  %v1439_v43 = vadd.f32 %v1423_v52, %v1388_v48  ;;  %v1067_v28 = vmul.f32 %v7193_v9, %v4764_v61  ;;  %v7195_v47 = vld [vmem:[#allocation21_spill] sm:$0xff]  ;;  %v7197_v52 = vld [vmem:[#allocation31_spill] sm:$0xff]  ;;  %v1118_v10 = vmul.f32 %v7198_v15, %v4766_v19 }
 0x19d   : > { %v2559_v57 = vadd.f32 %v2543_v3, %v2508_v49  ;;  %v1983_v41 = vmul.f32 %v7196_v17, %v7195_v47  ;;  %v1525_v49 = vmul.f32 %v7197_v52, %v4839_v23  ;;  %v5370_v9 = vld [vmem:[%s4757_s30 + $0x63] sm:$0xff] }
 0x19e   : > { %v1948_v1 = vadd.f32 %v1932_v8, %v1897_v33  ;;  %v1490_v48 = vadd.f32 %v1474_v21, %v1439_v43  ;;  %v1083_v29 = vadd.f32 %v1067_v28, %v1016_v38  ;;  %7199 = vst [vmem:[#allocation33_spill] sm:$0xff] %v5370_v9  ;;  %v7200_v33 = vld [vmem:[#allocation22_spill] sm:$0xff]  ;;  %v7202_v43 = vld [vmem:[#allocation32_spill] sm:$0xff] }
 0x19f   : > { %v2610_v3 = vadd.f32 %v2594_v42, %v2559_v57  ;;  %v7201_v8 = vld [vmem:[#allocation50_spill] sm:$0xff]  ;;  %v1576_v21 = vmul.f32 %v7202_v43, %v7168_v58  ;;  %v2696_v57 = vmul.f32 %v5370_v9, %v5195_v6  ;;  %v7210_v9 = vld [vmem:[#allocation24_spill] sm:$0xff] }
 0x1a0   : > { %v1999_v22 = vadd.f32 %v1983_v41, %v1948_v1  ;;  %v2034_v4 = vmul.f32 %v7201_v8, %v7200_v33  ;;  %v1541_v17 = vadd.f32 %v1525_v49, %v1490_v48  ;;  %v1134_v42 = vadd.f32 %v1118_v10, %v1083_v29  ;;  %v7203_v38 = vld [vmem:[#allocation26_spill] sm:$0xff]  ;;  %v7205_v41 = vld [vmem:[#allocation23_spill] sm:$0xff] }
 0x1a1   : > { %v2661_v52 = vadd.f32 %v2645_v63, %v2610_v3  ;;  %v1169_v28 = vmul.f32 %v7203_v38, %v4777_v5  ;;  %v5381_v15 = vld [vmem:[%s4757_s30 + $0x64] sm:$0xff] }
 0x1a2   : > { %7204 = vst [vmem:[#allocation13_spill] sm:$0xff] %v5381_v15  ;;  %v2050_v27 = vadd.f32 %v2034_v4, %v1999_v22  ;;  %v7206_v1 = vld [vmem:[#allocation51_spill] sm:$0xff]  ;;  %v1592_v8 = vadd.f32 %v1576_v21, %v1541_v17  ;;  %v7207_v48 = vld [vmem:[#allocation42_spill] sm:$0xff]  ;;  %v2747_v3 = vmul.f32 %v5381_v15, %v5205_v40  ;;  %v7211_v4 = vld [vmem:[#allocation52_spill] sm:$0xff] }
 0x1a3   : > { %v2085_v56 = vmul.f32 %v7206_v1, %v7205_v41  ;;  %v1627_v49 = vmul.f32 %v7207_v48, %v4866_v37  ;;  %v2712_v33 = vadd.f32 %v2696_v57, %v2661_v52  ;;  %v1185_v63 = vadd.f32 %v1169_v28, %v1134_v42  ;;  %v7208_v29 = vld [vmem:[#allocation27_spill] sm:$0xff]  ;;  %v7213_v48 = vld [vmem:[#allocation53_spill] sm:$0xff] }
 0x1a4   : > { %v1220_v10 = vmul.f32 %v7208_v29, %v4784_v14  ;;  %v5392_v43 = vld [vmem:[%s4757_s30 + $0x65] sm:$0xff]  ;;  %v2136_v22 = vmul.f32 %v7211_v4, %v7210_v9  ;;  %v1271_v42 = vmul.f32 %v7169_v54, %v7144_v32  ;;  %v2187_v29 = vmul.f32 %v7213_v48, %v7166_v13 }
 0x1a5   : > { %7209 = vst [vmem:[#allocation34_spill] sm:$0xff] %v5392_v43  ;;  %v2101_v38 = vadd.f32 %v2085_v56, %v2050_v27  ;;  %v1643_v6 = vadd.f32 %v1627_v49, %v1592_v8  ;;  %v7212_v17 = vld [vmem:[#allocation43_spill] sm:$0xff]  ;;  %v2763_v1 = vadd.f32 %v2747_v3, %v2712_v33  ;;  %v2798_v52 = vmul.f32 %v5392_v43, %v5216_v0  ;;  %v7214_v27 = vld [vmem:[#allocation44_spill] sm:$0xff] }
 0x1a6   : > { %v1678_v21 = vmul.f32 %v7212_v17, %v4878_v62  ;;  %v1236_v57 = vadd.f32 %v1220_v10, %v1185_v63  ;;  %v1729_v15 = vmul.f32 %v7214_v27, %v4899_v31  ;;  %v1322_v33 = vmul.f32 %v7173_v26, %v7149_v59  ;;  %v7215_v63 = vld [vmem:[#allocation4_spill] sm:$0xff] }
 0x1a7   : > { %v2152_v28 = vadd.f32 %v2136_v22, %v2101_v38  ;;  %v2814_v8 = vadd.f32 %v2798_v52, %v2763_v1  ;;  %v2238_v10 = vmul.f32 %v7215_v63, %v7172_v35  ;;  %v7216_v38 = vld [vmem:[#allocation45_spill] sm:$0xff]  ;;  %v1373_v1 = vmul.f32 %v7176_v44, %v7153_v11 }
 0x1a8   : > { %v1694_v56 = vadd.f32 %v1678_v21, %v1643_v6  ;;  %v1287_v49 = vadd.f32 %v1271_v42, %v1236_v57  ;;  %v1780_v22 = vmul.f32 %v7216_v38, %v4913_v30  ;;  %v7217_v6 = vld [vmem:[#allocation62_spill] sm:$0xff]  ;;  %v2340_v26 = vmul.f32 %v5285_v2, %v5080_v50  ;;  %v7227_v2 = vld [vmem:[#allocation56_spill] sm:$0xff] }
 0x1a9   : > { %v2203_v3 = vadd.f32 %v2187_v29, %v2152_v28  ;;  %2866 = vmatmul.f32.gmra.mxu1 %v2814_v8  ;;  %v2289_v17 = vmul.f32 %v7217_v6, %v5078_v12  ;;  %v7218_v42 = vld [vmem:[#allocation46_spill] sm:$0xff]  ;;  %v1000_v28 = vld [vmem:[%s4757_s30 + $0x30] sm:$0xff]  ;;  %v2391_v29 = vmul.f32 %v5294_v24, %v5085_v55  ;;  %v1424_v44 = vmul.f32 %v7179_v25, %v7158_v36 }
 0x1aa   : > { %v1745_v54 = vadd.f32 %v1729_v15, %v1694_v56  ;;  %v1338_v21 = vadd.f32 %v1322_v33, %v1287_v49  ;;  %v1831_v15 = vmul.f32 %v7218_v42, %v4920_v45  ;;  %v2442_v56 = vmul.f32 %v5305_v18, %v5087_v53  ;;  %v3416_v8 = vld [vmem:[%s4757_s30 + $0x31] sm:$0xff] }
 0x1ab   : > { %v2254_v52 = vadd.f32 %v2238_v10, %v2203_v3  ;;  %v2493_v33 = vmul.f32 %v5316_v39, %v5092_v46  ;;  %v5431_v3 = vld [vmem:[%s4757_s30 + $0x68] sm:$0xff]  ;;  %v3467_v6 = vld [vmem:[%s4757_s30 + $0x34] sm:$0xff] }
 0x1ac   : > { %v1796_v57 = vadd.f32 %v1780_v22, %v1745_v54  ;;  %v1389_v27 = vadd.f32 %v1373_v1, %v1338_v21  ;;  %7219 = vst [vmem:[#allocation14_spill] sm:$0xff] %v5431_v3  ;;  %v7220_v54 = vld [vmem:[#allocation47_spill] sm:$0xff]  ;;  %v2544_v22 = vmul.f32 %v5431_v3, %v7187_v20  ;;  %v7221_v1 = vld [vmem:[#allocation36_spill] sm:$0xff] }
 0x1ad   : > { %v2305_v49 = vadd.f32 %v2289_v17, %v2254_v52  ;;  %v1882_v38 = vmul.f32 %v7220_v54, %v4931_v51  ;;  %v1475_v25 = vmul.f32 %v7221_v1, %v4829_v7  ;;  %v1017_v17 = vmul.f32 %v4762_v60, %v1000_v28  ;;  %v3433_v52 = vld [vmem:[%s4757_s30 + $0x32] sm:$0xff]  ;;  %v5442_v39 = vld [vmem:[%s4757_s30 + $0x69] sm:$0xff] }
 0x1ae   : > { %v1847_v10 = vadd.f32 %v1831_v15, %v1796_v57  ;;  %v1440_v21 = vadd.f32 %v1424_v44, %v1389_v27  ;;  %7222 = vst [vmem:[#allocation35_spill] sm:$0xff] %v5442_v39  ;;  %v7223_v57 = vld [vmem:[#allocation58_spill] sm:$0xff]  ;;  %v1068_v54 = vmul.f32 %v3416_v8, %v4764_v61  ;;  %v2595_v3 = vmul.f32 %v5442_v39, %v5186_v16  ;;  %v7224_v27 = vld [vmem:[#allocation59_spill] sm:$0xff]  ;;  %v7225_v28 = vld [vmem:[#allocation37_spill] sm:$0xff] }
 0x1af   : > { %v2356_v42 = vadd.f32 %v2340_v26, %v2305_v49  ;;  %v1933_v15 = vmul.f32 %v7223_v57, %v7189_v34  ;;  %v1984_v44 = vmul.f32 %v7224_v27, %v7195_v47  ;;  %v1526_v26 = vmul.f32 %v7225_v28, %v4839_v23  ;;  %v3450_v49 = vld [vmem:[%s4757_s30 + $0x33] sm:$0xff]  ;;  %v7228_v16 = vld [vmem:[#allocation22_spill] sm:$0xff]  ;;  %v7229_v20 = vld [vmem:[#allocation15_spill] sm:$0xff] }
 0x1b0   : > { %v1898_v18 = vadd.f32 %v1882_v38, %v1847_v10  ;;  %v1491_v1 = vadd.f32 %v1475_v25, %v1440_v21  ;;  %v5455_v10 = vld [vmem:[%s4757_s30 + $0x6a] sm:$0xff]  ;;  %v1084_v57 = vadd.f32 %v1068_v54, %v1017_v17  ;;  %v1119_v8 = vmul.f32 %v3433_v52, %v4766_v19  ;;  %v7230_v25 = vld [vmem:[#allocation41_spill] sm:$0xff] }
 0x1b1   : > { %v2407_v24 = vadd.f32 %v2391_v29, %v2356_v42  ;;  %7226 = vst [vmem:[#allocation16_spill] sm:$0xff] %v5455_v10  ;;  %v2646_v39 = vmul.f32 %v5455_v10, %v7227_v2  ;;  %v2035_v27 = vmul.f32 %v7229_v20, %v7228_v16  ;;  %v1577_v28 = vmul.f32 %v7230_v25, %v7168_v58  ;;  %v5466_v42 = vld [vmem:[%s4757_s30 + $0x6b] sm:$0xff]  ;;  %v7232_v52 = vld [vmem:[#allocation57_spill] sm:$0xff] }
 0x1b2   : > { %v1949_v38 = vadd.f32 %v1933_v15, %v1898_v18  ;;  %v1542_v21 = vadd.f32 %v1526_v26, %v1491_v1  ;;  %7231 = vst [vmem:[#allocation28_spill] sm:$0xff] %v5466_v42  ;;  %v1135_v17 = vadd.f32 %v1119_v8, %v1084_v57  ;;  %v1170_v15 = vmul.f32 %v3450_v49, %v4777_v5  ;;  %v7233_v10 = vld [vmem:[#allocation60_spill] sm:$0xff]  ;;  %v7236_v57 = vld [vmem:[#allocation3_spill] sm:$0xff] }
 0x1b3   : > { %v2458_v29 = vadd.f32 %v2442_v56, %v2407_v24  ;;  %v2697_v54 = vmul.f32 %v5466_v42, %v7232_v52  ;;  %v2086_v2 = vmul.f32 %v7233_v10, %v7205_v41  ;;  %v7234_v1 = vld [vmem:[#allocation48_spill] sm:$0xff]  ;;  %v1221_v49 = vmul.f32 %v3467_v6, %v4784_v14 }
 0x1b4   : > { %v2000_v18 = vadd.f32 %v1984_v44, %v1949_v38  ;;  %v1593_v20 = vadd.f32 %v1577_v28, %v1542_v21  ;;  %v1628_v26 = vmul.f32 %v7234_v1, %v4866_v37  ;;  %v3484_v25 = vld [vmem:[%s4757_s30 + $0x35] sm:$0xff]  ;;  %v5477_v24 = vld [vmem:[%s4757_s30 + $0x6c] sm:$0xff]  ;;  %v1186_v44 = vadd.f32 %v1170_v15, %v1135_v17 }
 0x1b5   : > { %v2509_v16 = vadd.f32 %v2493_v33, %v2458_v29  ;;  %7235 = vst [vmem:[#allocation20_spill] sm:$0xff] %v5477_v24  ;;  %v2748_v38 = vmul.f32 %v5477_v24, %v5205_v40  ;;  %v2137_v8 = vmul.f32 %v7236_v57, %v7210_v9  ;;  %v7237_v21 = vld [vmem:[#allocation49_spill] sm:$0xff]  ;;  %v5487_v42 = vld [vmem:[%s4757_s30 + $0x6d] sm:$0xff]  ;;  %v1272_v29 = vmul.f32 %v3484_v25, %v7144_v32  ;;  %v5497_v57 = vld [vmem:[%s4757_s30 + $0x40] sm:$0xff] }
 0x1b6   : > { %v2051_v56 = vadd.f32 %v2035_v27, %v2000_v18  ;;  %v1644_v10 = vadd.f32 %v1628_v26, %v1593_v20  ;;  %v1679_v28 = vmul.f32 %v7237_v21, %v4878_v62  ;;  %7238 = vst [vmem:[#allocation30_spill] sm:$0xff] %v5487_v42  ;;  %v1237_v27 = vadd.f32 %v1221_v49, %v1186_v44  ;;  %v7239_v18 = vld [vmem:[#allocation61_spill] sm:$0xff]  ;;  %v7240_v20 = vld [vmem:[#allocation50_spill] sm:$0xff] }
 0x1b7   : > { %v2560_v1 = vadd.f32 %v2544_v22, %v2509_v16  ;;  %v2799_v6 = vmul.f32 %v5487_v42, %v5216_v0  ;;  %v2188_v17 = vmul.f32 %v7239_v18, %v7166_v13  ;;  %v1730_v26 = vmul.f32 %v7240_v20, %v4899_v31  ;;  %v7241_v25 = vld [vmem:[#allocation6_spill] sm:$0xff]  ;;  %v7242_v49 = vld [vmem:[#allocation29_spill] sm:$0xff] }
 0x1b8   : > { %v2102_v33 = vadd.f32 %v2086_v2, %v2051_v56  ;;  %v1695_v15 = vadd.f32 %v1679_v28, %v1644_v10  ;;  %v1288_v2 = vadd.f32 %v1272_v29, %v1237_v27  ;;  %v1323_v56 = vmul.f32 %v5497_v57, %v7149_v59  ;;  %v7243_v10 = vld [vmem:[#allocation51_spill] sm:$0xff]  ;;  %v7246_v42 = vld [vmem:[#allocation33_spill] sm:$0xff] }
 0x1b9   : > { %v2611_v16 = vadd.f32 %v2595_v3, %v2560_v1  ;;  %v2239_v44 = vmul.f32 %v7241_v25, %v7172_v35  ;;  %v2290_v21 = vmul.f32 %v7242_v49, %v5078_v12  ;;  %v1781_v28 = vmul.f32 %v7243_v10, %v4913_v30  ;;  %v5508_v20 = vld [vmem:[%s4757_s30 + $0x41] sm:$0xff] }
 0x1ba   : > { %v2153_v22 = vadd.f32 %v2137_v8, %v2102_v33  ;;  %v1746_v18 = vadd.f32 %v1730_v26, %v1695_v15  ;;  %7244 = vst [vmem:[#allocation17_spill] sm:$0xff] %v5508_v20  ;;  %v1339_v1 = vadd.f32 %v1323_v56, %v1288_v2  ;;  %v1374_v33 = vmul.f32 %v5508_v20, %v7153_v11  ;;  %v7245_v27 = vld [vmem:[#allocation11_spill] sm:$0xff]  ;;  %v1001_v2 = vld [vmem:[%s4757_s30 + $0x38] sm:$0xff] }
 0x1bb   : > { %v2662_v3 = vadd.f32 %v2646_v39, %v2611_v16  ;;  %v2341_v29 = vmul.f32 %v7245_v27, %v5080_v50  ;;  %v2392_v15 = vmul.f32 %v7246_v42, %v5085_v55  ;;  %v1832_v10 = vmul.f32 %v7211_v4, %v4920_v45  ;;  %v5519_v49 = vld [vmem:[%s4757_s30 + $0x42] sm:$0xff]  ;;  %v3417_v56 = vld [vmem:[%s4757_s30 + $0x39] sm:$0xff] }
 0x1bc   : > { %v2204_v8 = vadd.f32 %v2188_v17, %v2153_v22  ;;  %v1797_v26 = vadd.f32 %v1781_v28, %v1746_v18  ;;  %v1390_v16 = vadd.f32 %v1374_v33, %v1339_v1  ;;  %v1425_v22 = vmul.f32 %v5519_v49, %v7158_v36  ;;  %v7247_v27 = vld [vmem:[#allocation13_spill] sm:$0xff] }
 0x1bd   : > { %v2713_v39 = vadd.f32 %v2697_v54, %v2662_v3  ;;  %v2443_v20 = vmul.f32 %v7247_v27, %v5087_v53  ;;  %v2494_v18 = vmul.f32 %v5392_v43, %v5092_v46  ;;  %v1883_v4 = vmul.f32 %v7213_v48, %v4931_v51  ;;  %v5532_v54 = vld [vmem:[%s4757_s30 + $0x43] sm:$0xff]  ;;  %v3434_v33 = vld [vmem:[%s4757_s30 + $0x3a] sm:$0xff] }
 0x1be   : > { %v2255_v17 = vadd.f32 %v2239_v44, %v2204_v8  ;;  %v1848_v28 = vadd.f32 %v1832_v10, %v1797_v26  ;;  %7248 = vst [vmem:[#allocation18_spill] sm:$0xff] %v5532_v54  ;;  %v1441_v8 = vadd.f32 %v1425_v22, %v1390_v16  ;;  %v1476_v1 = vmul.f32 %v5532_v54, %v4829_v7  ;;  %v5540_v26 = vld [vmem:[%s4757_s30 + $0x44] sm:$0xff]  ;;  %v5548_v16 = vld [vmem:[%s4757_s30 + $0x70] sm:$0xff] }
 0x1bf   : > { %v2764_v44 = vadd.f32 %v2748_v38, %v2713_v39  ;;  %v1934_v43 = vmul.f32 %v7215_v63, %v7189_v34  ;;  %7249 = vst [vmem:[#allocation21_spill] sm:$0xff] %v5540_v26  ;;  %v1018_v48 = vmul.f32 %v4762_v60, %v1001_v2  ;;  %v1069_v10 = vmul.f32 %v3417_v56, %v4764_v61  ;;  %v7251_v63 = vld [vmem:[#allocation62_spill] sm:$0xff] }
 0x1c0   : > { %v2306_v3 = vadd.f32 %v2290_v21, %v2255_v17  ;;  %v1899_v27 = vadd.f32 %v1883_v4, %v1848_v28  ;;  %v1492_v21 = vadd.f32 %v1476_v1, %v1441_v8  ;;  %v1527_v39 = vmul.f32 %v5540_v26, %v4839_v23  ;;  %v3451_v17 = vld [vmem:[%s4757_s30 + $0x3b] sm:$0xff]  ;;  %7250 = vst [vmem:[#allocation31_spill] sm:$0xff] %v5548_v16  ;;  %v5553_v4 = vld [vmem:[%s4757_s30 + $0x45] sm:$0xff] }
 0x1c1   : > { %v2815_v42 = vadd.f32 %v2799_v6, %v2764_v44  ;;  %v1985_v28 = vmul.f32 %v7251_v63, %v7195_v47  ;;  %7252 = vst [vmem:[#allocation19_spill] sm:$0xff] %v5553_v4  ;;  %v1085_v2 = vadd.f32 %v1069_v10, %v1018_v48  ;;  %v1120_v6 = vmul.f32 %v3434_v33, %v4766_v19  ;;  %v7253_v56 = vld [vmem:[#allocation54_spill] sm:$0xff]  ;;  %v7256_v48 = vld [vmem:[#allocation5_spill] sm:$0xff]  ;;  %v5567_v33 = vld [vmem:[%s4757_s30 + $0x50] sm:$0xff] }
 0x1c2   : > { %v2357_v38 = vadd.f32 %v2341_v29, %v2306_v3  ;;  %v1950_v22 = vadd.f32 %v1934_v43, %v1899_v27  ;;  %v2545_v44 = vmul.f32 %v5548_v16, %v7253_v56  ;;  %v1543_v3 = vadd.f32 %v1527_v39, %v1492_v21  ;;  %v3468_v43 = vld [vmem:[%s4757_s30 + $0x3c] sm:$0xff]  ;;  %v5562_v27 = vld [vmem:[%s4757_s30 + $0x71] sm:$0xff]  ;;  %7257 = vst [vmem:[#allocation26_spill] sm:$0xff] %v5567_v33  ;;  %v7258_v16 = vld [vmem:[#allocation55_spill] sm:$0xff] }
 0x1c3   : > { %2869 = vmatmul.f32.gmra.mxu1 %v2815_v42  ;;  %v1578_v8 = vmul.f32 %v5553_v4, %v7168_v58  ;;  %7254 = vst [vmem:[#allocation32_spill] sm:$0xff] %v5562_v27  ;;  %v7255_v63 = vld [vmem:[#allocation22_spill] sm:$0xff]  ;;  %v1136_v42 = vadd.f32 %v1120_v6, %v1085_v2  ;;  %v2596_v21 = vmul.f32 %v5562_v27, %v7258_v16  ;;  %v5581_v2 = vld [vmem:[%s4757_s30 + $0x51] sm:$0xff] }
 0x1c4   : > { %v2408_v29 = vadd.f32 %v2392_v15, %v2357_v38  ;;  %v2001_v1 = vadd.f32 %v1985_v28, %v1950_v22  ;;  %v2036_v10 = vmul.f32 %v7256_v48, %v7255_v63  ;;  %v1171_v15 = vmul.f32 %v3451_v17, %v4777_v5  ;;  %v3485_v26 = vld [vmem:[%s4757_s30 + $0x3d] sm:$0xff]  ;;  %v5576_v22 = vld [vmem:[%s4757_s30 + $0x72] sm:$0xff]  ;;  %v7260_v48 = vld [vmem:[#allocation7_spill] sm:$0xff]  ;;  %7261 = vst [vmem:[#allocation42_spill] sm:$0xff] %v5581_v2 }
 0x1c5   : > { %v1594_v39 = vadd.f32 %v1578_v8, %v1543_v3  ;;  %v1629_v4 = vmul.f32 %v5567_v33, %v4866_v37  ;;  %7259 = vst [vmem:[#allocation23_spill] sm:$0xff] %v5576_v22  ;;  %v2087_v54 = vmul.f32 %v7260_v48, %v7205_v41  ;;  %v1680_v27 = vmul.f32 %v5581_v2, %v4878_v62  ;;  %v7264_v48 = vld [vmem:[#allocation8_spill] sm:$0xff] }
 0x1c6   : > { %v2459_v38 = vadd.f32 %v2443_v20, %v2408_v29  ;;  %v2052_v28 = vadd.f32 %v2036_v10, %v2001_v1  ;;  %v1187_v17 = vadd.f32 %v1171_v15, %v1136_v42  ;;  %v1222_v20 = vmul.f32 %v3468_v43, %v4784_v14  ;;  %v7262_v29 = vld [vmem:[#allocation56_spill] sm:$0xff] }
 0x1c7   : > { %v2647_v3 = vmul.f32 %v5576_v22, %v7262_v29  ;;  %v1645_v8 = vadd.f32 %v1629_v4, %v1594_v39  ;;  %v5589_v1 = vld [vmem:[%s4757_s30 + $0x73] sm:$0xff]  ;;  %v2138_v33 = vmul.f32 %v7264_v48, %v7210_v9  ;;  %v1273_v43 = vmul.f32 %v3485_v26, %v7144_v32 }
 0x1c8   : > { %v2510_v6 = vadd.f32 %v2494_v18, %v2459_v38  ;;  %7263 = vst [vmem:[#allocation27_spill] sm:$0xff] %v5589_v1  ;;  %v2103_v10 = vadd.f32 %v2087_v54, %v2052_v28  ;;  %v5594_v42 = vld [vmem:[%s4757_s30 + $0x52] sm:$0xff]  ;;  %v1238_v15 = vadd.f32 %v1222_v20, %v1187_v17  ;;  %v2698_v4 = vmul.f32 %v5589_v1, %v7232_v52  ;;  %v5602_v54 = vld [vmem:[%s4757_s30 + $0x48] sm:$0xff] }
 0x1c9   : > { %7265 = vst [vmem:[#allocation52_spill] sm:$0xff] %v5594_v42  ;;  %v1696_v38 = vadd.f32 %v1680_v27, %v1645_v8  ;;  %v1731_v39 = vmul.f32 %v5594_v42, %v4899_v31  ;;  %v5605_v28 = vld [vmem:[%s4757_s30 + $0x74] sm:$0xff] }
 0x1ca   : > { %v2561_v18 = vadd.f32 %v2545_v44, %v2510_v6  ;;  %7266 = vst [vmem:[#allocation43_spill] sm:$0xff] %v5602_v54  ;;  %v2154_v48 = vadd.f32 %v2138_v33, %v2103_v10  ;;  %v7268_v17 = vld [vmem:[#allocation25_spill] sm:$0xff]  ;;  %v1289_v44 = vadd.f32 %v1273_v43, %v1238_v15  ;;  %v1324_v6 = vmul.f32 %v5602_v54, %v7149_v59  ;;  %v5619_v33 = vld [vmem:[%s4757_s30 + $0x49] sm:$0xff]  ;;  %v7272_v15 = vld [vmem:[#allocation14_spill] sm:$0xff] }
 0x1cb   : > { %7267 = vst [vmem:[#allocation53_spill] sm:$0xff] %v5605_v28  ;;  %v2189_v20 = vmul.f32 %v7268_v17, %v7166_v13  ;;  %v5610_v26 = vld [vmem:[%s4757_s30 + $0x53] sm:$0xff]  ;;  %v2749_v8 = vmul.f32 %v5605_v28, %v5205_v40  ;;  %v1747_v1 = vadd.f32 %v1731_v39, %v1696_v38  ;;  %v2240_v43 = vmul.f32 %v7272_v15, %v7172_v35  ;;  %v5636_v28 = vld [vmem:[%s4757_s30 + $0x4a] sm:$0xff] }
 0x1cc   : > { %7269 = vst [vmem:[#allocation44_spill] sm:$0xff] %v5610_v26  ;;  %v2612_v27 = vadd.f32 %v2596_v21, %v2561_v18  ;;  %v1782_v42 = vmul.f32 %v5610_v26, %v4913_v30  ;;  %v5622_v10 = vld [vmem:[%s4757_s30 + $0x75] sm:$0xff]  ;;  %v1340_v54 = vadd.f32 %v1324_v6, %v1289_v44  ;;  %v1375_v21 = vmul.f32 %v5619_v33, %v7153_v11 }
 0x1cd   : > { %7270 = vst [vmem:[#allocation4_spill] sm:$0xff] %v5619_v33  ;;  %v2205_v17 = vadd.f32 %v2189_v20, %v2154_v48  ;;  %v5627_v22 = vld [vmem:[%s4757_s30 + $0x54] sm:$0xff]  ;;  %v2800_v38 = vmul.f32 %v5622_v10, %v5216_v0  ;;  %v7274_v20 = vld [vmem:[#allocation35_spill] sm:$0xff] }
 0x1ce   : > { %7271 = vst [vmem:[#allocation45_spill] sm:$0xff] %v5622_v10  ;;  %v2663_v18 = vadd.f32 %v2647_v3, %v2612_v27  ;;  %v1798_v39 = vadd.f32 %v1782_v42, %v1747_v1  ;;  %v1833_v26 = vmul.f32 %v5627_v22, %v4920_v45  ;;  %v2291_v15 = vmul.f32 %v7274_v20, %v5078_v12  ;;  %v5641_v2 = vld [vmem:[%s4757_s30 + $0x55] sm:$0xff]  ;;  %v5650_v33 = vld [vmem:[%s4757_s30 + $0x4b] sm:$0xff] }
 0x1cf   : > { %7273 = vst [vmem:[#allocation46_spill] sm:$0xff] %v5627_v22  ;;  %v2256_v48 = vadd.f32 %v2240_v43, %v2205_v17  ;;  %v1391_v44 = vadd.f32 %v1375_v21, %v1340_v54  ;;  %v1426_v3 = vmul.f32 %v5636_v28, %v7158_v36  ;;  %v7275_v27 = vld [vmem:[#allocation16_spill] sm:$0xff]  ;;  %v1884_v10 = vmul.f32 %v5641_v2, %v4931_v51 }
 0x1d0   : > { %v2714_v6 = vadd.f32 %v2698_v4, %v2663_v18  ;;  %v2342_v1 = vmul.f32 %v7275_v27, %v5080_v50  ;;  %v1849_v42 = vadd.f32 %v1833_v26, %v1798_v39  ;;  %7276 = vst [vmem:[#allocation47_spill] sm:$0xff] %v5650_v33  ;;  %v7277_v43 = vld [vmem:[#allocation28_spill] sm:$0xff]  ;;  %v1477_v54 = vmul.f32 %v5650_v33, %v4829_v7 }
 0x1d1   : > { %v2307_v17 = vadd.f32 %v2291_v15, %v2256_v48  ;;  %v2393_v22 = vmul.f32 %v7277_v43, %v5085_v55  ;;  %v1442_v20 = vadd.f32 %v1426_v3, %v1391_v44  ;;  %v2444_v4 = vmul.f32 %v5477_v24, %v5087_v53  ;;  %v5661_v39 = vld [vmem:[%s4757_s30 + $0x4c] sm:$0xff]  ;;  %v7278_v24 = vld [vmem:[#allocation29_spill] sm:$0xff] }
 0x1d2   : > { %v2765_v21 = vadd.f32 %v2749_v8, %v2714_v6  ;;  %v1900_v18 = vadd.f32 %v1884_v10, %v1849_v42  ;;  %v1935_v26 = vmul.f32 %v7241_v25, %v7189_v34  ;;  %v1528_v44 = vmul.f32 %v5661_v39, %v4839_v23  ;;  %v5670_v42 = vld [vmem:[%s4757_s30 + $0x4d] sm:$0xff]  ;;  %v7280_v25 = vld [vmem:[#allocation17_spill] sm:$0xff] }
 0x1d3   : > { %v2358_v15 = vadd.f32 %v2342_v1, %v2307_v17  ;;  %v1493_v48 = vadd.f32 %v1477_v54, %v1442_v20  ;;  %v1019_v3 = vmul.f32 %v5497_v57, %v4762_v60  ;;  %v1986_v10 = vmul.f32 %v7278_v24, %v7195_v47  ;;  %7279 = vst [vmem:[#allocation36_spill] sm:$0xff] %v5670_v42  ;;  %v7281_v20 = vld [vmem:[#allocation30_spill] sm:$0xff]  ;;  %v7283_v24 = vld [vmem:[#allocation11_spill] sm:$0xff] }
 0x1d4   : > { %v2816_v8 = vadd.f32 %v2800_v38, %v2765_v21  ;;  %v1951_v6 = vadd.f32 %v1935_v26, %v1900_v18  ;;  %v1070_v33 = vmul.f32 %v7280_v25, %v4764_v61  ;;  %v2495_v17 = vmul.f32 %v7281_v20, %v5092_v46  ;;  %v5679_v38 = vld [vmem:[%s4757_s30 + $0x78] sm:$0xff] }
 0x1d5   : > { %v2409_v1 = vadd.f32 %v2393_v22, %v2358_v15  ;;  %v1544_v54 = vadd.f32 %v1528_v44, %v1493_v48  ;;  %v1579_v57 = vmul.f32 %v5670_v42, %v7168_v58  ;;  %7282 = vst [vmem:[#allocation58_spill] sm:$0xff] %v5679_v38  ;;  %v2037_v18 = vmul.f32 %v7283_v24, %v7255_v63  ;;  %v5684_v26 = vld [vmem:[%s4757_s30 + $0x58] sm:$0xff] }
 0x1d6   : > { %2872 = vmatmul.f32.gmra.mxu1 %v2816_v8  ;;  %v2002_v21 = vadd.f32 %v1986_v10, %v1951_v6  ;;  %7284 = vst [vmem:[#allocation59_spill] sm:$0xff] %v5684_v26  ;;  %v1086_v25 = vadd.f32 %v1070_v33, %v1019_v3  ;;  %v1121_v22 = vmul.f32 %v5519_v49, %v4766_v19  ;;  %v5693_v6 = vld [vmem:[%s4757_s30 + $0x79] sm:$0xff] }
 0x1d7   : > { %v2460_v15 = vadd.f32 %v2444_v4, %v2409_v1  ;;  %v2546_v48 = vmul.f32 %v5679_v38, %v7253_v56  ;;  %v1595_v44 = vadd.f32 %v1579_v57, %v1544_v54  ;;  %v1630_v8 = vmul.f32 %v5684_v26, %v4866_v37  ;;  %7285 = vst [vmem:[#allocation37_spill] sm:$0xff] %v5693_v6  ;;  %v7286_v24 = vld [vmem:[#allocation33_spill] sm:$0xff]  ;;  %v7288_v49 = vld [vmem:[#allocation18_spill] sm:$0xff] }
 0x1d8   : > { %v2053_v10 = vadd.f32 %v2037_v18, %v2002_v21  ;;  %v2088_v42 = vmul.f32 %v7286_v24, %v7205_v41  ;;  %v5698_v33 = vld [vmem:[%s4757_s30 + $0x59] sm:$0xff]  ;;  %v1137_v3 = vadd.f32 %v1121_v22, %v1086_v25  ;;  %v1172_v4 = vmul.f32 %v7288_v49, %v4777_v5 }
 0x1d9   : > { %7287 = vst [vmem:[#allocation15_spill] sm:$0xff] %v5698_v33  ;;  %v2511_v1 = vadd.f32 %v2495_v17, %v2460_v15  ;;  %v2597_v54 = vmul.f32 %v5693_v6, %v7258_v16  ;;  %v1646_v57 = vadd.f32 %v1630_v8, %v1595_v44  ;;  %v1681_v26 = vmul.f32 %v5698_v33, %v4878_v62  ;;  %v5707_v21 = vld [vmem:[%s4757_s30 + $0x7a] sm:$0xff] }
 0x1da   : > { %7289 = vst [vmem:[#allocation41_spill] sm:$0xff] %v5707_v21  ;;  %v2104_v18 = vadd.f32 %v2088_v42, %v2053_v10  ;;  %v7290_v24 = vld [vmem:[#allocation13_spill] sm:$0xff]  ;;  %v1188_v22 = vadd.f32 %v1172_v4, %v1137_v3  ;;  %v2648_v44 = vmul.f32 %v5707_v21, %v7262_v29 }
 0x1db   : > { %v2139_v38 = vmul.f32 %v7290_v24, %v7210_v9  ;;  %v5712_v25 = vld [vmem:[%s4757_s30 + $0x5a] sm:$0xff]  ;;  %v2562_v15 = vadd.f32 %v2546_v48, %v2511_v1  ;;  %v1697_v8 = vadd.f32 %v1681_v26, %v1646_v57 }
 0x1dc   : > { %7291 = vst [vmem:[#allocation57_spill] sm:$0xff] %v5712_v25  ;;  %v7292_v49 = vld [vmem:[#allocation21_spill] sm:$0xff]  ;;  %v1732_v33 = vmul.f32 %v5712_v25, %v4899_v31  ;;  %v7294_v24 = vld [vmem:[#allocation34_spill] sm:$0xff] }
 0x1dd   : > { %v1223_v17 = vmul.f32 %v7292_v49, %v4784_v14  ;;  %v5721_v42 = vld [vmem:[%s4757_s30 + $0x7b] sm:$0xff]  ;;  %v2155_v10 = vadd.f32 %v2139_v38, %v2104_v18  ;;  %v2190_v6 = vmul.f32 %v7294_v24, %v7166_v13  ;;  %v7296_v49 = vld [vmem:[#allocation19_spill] sm:$0xff]  ;;  %v2613_v1 = vadd.f32 %v2597_v54, %v2562_v15 }
 0x1de   : > { %7293 = vst [vmem:[#allocation60_spill] sm:$0xff] %v5721_v42  ;;  %v5726_v3 = vld [vmem:[%s4757_s30 + $0x5b] sm:$0xff]  ;;  %v1274_v48 = vmul.f32 %v7296_v49, %v7144_v32  ;;  %v2699_v26 = vmul.f32 %v5721_v42, %v7232_v52  ;;  %v1748_v57 = vadd.f32 %v1732_v33, %v1697_v8  ;;  %v7298_v24 = vld [vmem:[#allocation31_spill] sm:$0xff] }
 0x1df   : > { %7295 = vst [vmem:[#allocation48_spill] sm:$0xff] %v5726_v3  ;;  %v1239_v4 = vadd.f32 %v1223_v17, %v1188_v22  ;;  %v1783_v25 = vmul.f32 %v5726_v3, %v4913_v30  ;;  %v5735_v38 = vld [vmem:[%s4757_s30 + $0x7c] sm:$0xff]  ;;  %v2206_v18 = vadd.f32 %v2190_v6, %v2155_v10  ;;  %v2241_v21 = vmul.f32 %v7298_v24, %v7172_v35  ;;  %v7302_v10 = vld [vmem:[#allocation32_spill] sm:$0xff] }
 0x1e0   : > { %7297 = vst [vmem:[#allocation3_spill] sm:$0xff] %v5735_v38  ;;  %v5740_v22 = vld [vmem:[%s4757_s30 + $0x5c] sm:$0xff]  ;;  %v2664_v15 = vadd.f32 %v2648_v44, %v2613_v1  ;;  %v2750_v42 = vmul.f32 %v5735_v38, %v5205_v40  ;;  %v2292_v24 = vmul.f32 %v7302_v10, %v5078_v12  ;;  %v7306_v10 = vld [vmem:[#allocation52_spill] sm:$0xff] }
 0x1e1   : > { %7299 = vst [vmem:[#allocation49_spill] sm:$0xff] %v5740_v22  ;;  %v1290_v17 = vadd.f32 %v1274_v48, %v1239_v4  ;;  %v7300_v49 = vld [vmem:[#allocation26_spill] sm:$0xff]  ;;  %v1799_v33 = vadd.f32 %v1783_v25, %v1748_v57  ;;  %v1834_v8 = vmul.f32 %v5740_v22, %v4920_v45  ;;  %v2257_v6 = vadd.f32 %v2241_v21, %v2206_v18  ;;  %v7305_v21 = vld [vmem:[#allocation23_spill] sm:$0xff] }
 0x1e2   : > { %v1325_v54 = vmul.f32 %v7300_v49, %v7149_v59  ;;  %v5749_v3 = vld [vmem:[%s4757_s30 + $0x7d] sm:$0xff]  ;;  %v2715_v44 = vadd.f32 %v2699_v26, %v2664_v15  ;;  %v2343_v18 = vmul.f32 %v7305_v21, %v5080_v50  ;;  %v1427_v45 = vmul.f32 %v7306_v10, %v7158_v36 }
 0x1e3   : > { %7301 = vst [vmem:[#allocation61_spill] sm:$0xff] %v5749_v3  ;;  %v5754_v30 = vld [vmem:[%s4757_s30 + $0x5d] sm:$0xff]  ;;  %v2801_v1 = vmul.f32 %v5749_v3, %v5216_v0  ;;  %v1850_v25 = vadd.f32 %v1834_v8, %v1799_v33  ;;  %v2308_v22 = vadd.f32 %v2292_v24, %v2257_v6  ;;  %v7310_v6 = vld [vmem:[#allocation44_spill] sm:$0xff] }
 0x1e4   : > { %7303 = vst [vmem:[#allocation50_spill] sm:$0xff] %v5754_v30  ;;  %v1341_v4 = vadd.f32 %v1325_v54, %v1290_v17  ;;  %v7304_v48 = vld [vmem:[#allocation42_spill] sm:$0xff]  ;;  %v1885_v57 = vmul.f32 %v5754_v30, %v4931_v51  ;;  %v2766_v17 = vadd.f32 %v2750_v42, %v2715_v44  ;;  %v7307_v54 = vld [vmem:[#allocation27_spill] sm:$0xff]  ;;  %v7309_v8 = vld [vmem:[#allocation53_spill] sm:$0xff] }
 0x1e5   : > { %v1376_v49 = vmul.f32 %v7304_v48, %v7153_v11  ;;  %v2394_v48 = vmul.f32 %v7307_v54, %v5085_v55  ;;  %v7308_v15 = vld [vmem:[#allocation14_spill] sm:$0xff]  ;;  %v2359_v33 = vadd.f32 %v2343_v18, %v2308_v22  ;;  %v2445_v30 = vmul.f32 %v7309_v8, %v5087_v53  ;;  %v7311_v42 = vld [vmem:[#allocation35_spill] sm:$0xff]  ;;  %v7315_v8 = vld [vmem:[#allocation45_spill] sm:$0xff] }
 0x1e6   : > { %v1901_v26 = vadd.f32 %v1885_v57, %v1850_v25  ;;  %v1936_v3 = vmul.f32 %v7308_v15, %v7189_v34  ;;  %v1987_v44 = vmul.f32 %v7311_v42, %v7195_v47  ;;  %v7312_v25 = vld [vmem:[#allocation43_spill] sm:$0xff]  ;;  %v7313_v22 = vld [vmem:[#allocation46_spill] sm:$0xff] }
 0x1e7   : > { %v1392_v38 = vadd.f32 %v1376_v49, %v1341_v4  ;;  %v1478_v49 = vmul.f32 %v7310_v6, %v4829_v7  ;;  %v2817_v4 = vadd.f32 %v2801_v1, %v2766_v17  ;;  %v1020_v57 = vmul.f32 %v7312_v25, %v4762_v60  ;;  %v5803_v25 = vld [vmem:[%s4757_s30 + $0x81] sm:$0xff] }
 0x1e8   : > { %v1952_v21 = vadd.f32 %v1936_v3, %v1901_v26  ;;  %v2410_v54 = vadd.f32 %v2394_v48, %v2359_v33  ;;  %v1529_v18 = vmul.f32 %v7313_v22, %v4839_v23  ;;  %v2496_v1 = vmul.f32 %v7315_v8, %v5092_v46  ;;  %v5789_v33 = vld [vmem:[%s4757_s30 + $0x80] sm:$0xff]  ;;  %7318 = vst [vmem:[#allocation62_spill] sm:$0xff] %v5803_v25 }
 0x1e9   : > { %v1443_v24 = vadd.f32 %v1427_v45, %v1392_v38  ;;  %v7314_v45 = vld [vmem:[#allocation4_spill] sm:$0xff]  ;;  %2875 = vmatmul.f32.gmra.mxu1 %v2817_v4  ;;  %v2038_v17 = vmul.f32 %v7275_v27, %v7255_v63  ;;  %v1580_v48 = vmul.f32 %v5641_v2, %v7168_v58  ;;  %7316 = vst [vmem:[#allocation6_spill] sm:$0xff] %v5789_v33 }
 0x1ea   : > { %v1071_v38 = vmul.f32 %v7314_v45, %v4764_v61  ;;  %v2003_v3 = vadd.f32 %v1987_v44, %v1952_v21  ;;  %v2461_v26 = vadd.f32 %v2445_v30, %v2410_v54  ;;  %v1122_v4 = vmul.f32 %v5636_v28, %v4766_v19  ;;  %v7320_v28 = vld [vmem:[#allocation47_spill] sm:$0xff] }
 0x1eb   : > { %v1494_v15 = vadd.f32 %v1478_v49, %v1443_v24  ;;  %v5792_v49 = vld [vmem:[%s4757_s30 + $0x60] sm:$0xff]  ;;  %v2547_v21 = vmul.f32 %v5789_v33, %v7253_v56  ;;  %v2089_v27 = vmul.f32 %v7277_v43, %v7205_v41  ;;  %v1173_v45 = vmul.f32 %v7320_v28, %v4777_v5  ;;  %v7321_v43 = vld [vmem:[#allocation20_spill] sm:$0xff] }
 0x1ec   : > { %7317 = vst [vmem:[#allocation51_spill] sm:$0xff] %v5792_v49  ;;  %v1087_v42 = vadd.f32 %v1071_v38, %v1020_v57  ;;  %v2054_v44 = vadd.f32 %v2038_v17, %v2003_v3  ;;  %v1631_v30 = vmul.f32 %v5792_v49, %v4866_v37  ;;  %v2512_v54 = vadd.f32 %v2496_v1, %v2461_v26  ;;  %v5806_v57 = vld [vmem:[%s4757_s30 + $0x61] sm:$0xff] }
 0x1ed   : > { %v1545_v24 = vadd.f32 %v1529_v18, %v1494_v15  ;;  %7319 = vst [vmem:[#allocation54_spill] sm:$0xff] %v5806_v57  ;;  %v2598_v38 = vmul.f32 %v5803_v25, %v7258_v16  ;;  %v2140_v17 = vmul.f32 %v7321_v43, %v7210_v9  ;;  %v1682_v1 = vmul.f32 %v5806_v57, %v4878_v62  ;;  %v7333_v33 = vld [vmem:[#allocation10_spill] sm:$0xff] }
 0x1ee   : > { %v1138_v18 = vadd.f32 %v1122_v4, %v1087_v42  ;;  %v2105_v3 = vadd.f32 %v2089_v27, %v2054_v44  ;;  %v2563_v26 = vadd.f32 %v2547_v21, %v2512_v54  ;;  %v5820_v42 = vld [vmem:[%s4757_s30 + $0x62] sm:$0xff]  ;;  %v1224_v28 = vmul.f32 %v5661_v39, %v4784_v14  ;;  %v7326_v39 = vld [vmem:[#allocation36_spill] sm:$0xff] }
 0x1ef   : > { %v1596_v15 = vadd.f32 %v1580_v48, %v1545_v24  ;;  %v5817_v48 = vld [vmem:[%s4757_s30 + $0x82] sm:$0xff]  ;;  %7323 = vst [vmem:[#allocation5_spill] sm:$0xff] %v5820_v42  ;;  %v2191_v43 = vmul.f32 %v7281_v20, %v7166_v13  ;;  %v1733_v21 = vmul.f32 %v5820_v42, %v4899_v31  ;;  %v1275_v25 = vmul.f32 %v7326_v39, %v7144_v32  ;;  %v7328_v42 = vld [vmem:[#allocation9_spill] sm:$0xff] }
 0x1f0   : > { %7322 = vst [vmem:[#allocation22_spill] sm:$0xff] %v5817_v48  ;;  %v1189_v4 = vadd.f32 %v1173_v45, %v1138_v18  ;;  %v2649_v44 = vmul.f32 %v5817_v48, %v7262_v29  ;;  %v2156_v27 = vadd.f32 %v2140_v17, %v2105_v3  ;;  %v2614_v54 = vadd.f32 %v2598_v38, %v2563_v26  ;;  %v5834_v18 = vld [vmem:[%s4757_s30 + $0x63] sm:$0xff] }
 0x1f1   : > { %v1647_v24 = vadd.f32 %v1631_v30, %v1596_v15  ;;  %v5831_v30 = vld [vmem:[%s4757_s30 + $0x83] sm:$0xff]  ;;  %7325 = vst [vmem:[#allocation7_spill] sm:$0xff] %v5834_v18  ;;  %v1784_v38 = vmul.f32 %v5834_v18, %v7328_v42 }
 0x1f2   : > { %7324 = vst [vmem:[#allocation55_spill] sm:$0xff] %v5831_v30  ;;  %v1240_v45 = vadd.f32 %v1224_v28, %v1189_v4  ;;  %v2700_v3 = vmul.f32 %v5831_v30, %v7232_v52  ;;  %v2207_v17 = vadd.f32 %v2191_v43, %v2156_v27  ;;  %v7327_v20 = vld [vmem:[#allocation58_spill] sm:$0xff]  ;;  %v2665_v26 = vadd.f32 %v2649_v44, %v2614_v54  ;;  %v7331_v39 = vld [vmem:[#allocation59_spill] sm:$0xff]  ;;  %v7332_v30 = vld [vmem:[#allocation37_spill] sm:$0xff] }
 0x1f3   : > { %v1698_v15 = vadd.f32 %v1682_v1, %v1647_v24  ;;  %v2242_v48 = vmul.f32 %v7327_v20, %v7172_v35  ;;  %v5845_v1 = vld [vmem:[%s4757_s30 + $0x84] sm:$0xff]  ;;  %v1326_v57 = vmul.f32 %v7331_v39, %v7149_v59  ;;  %v2293_v20 = vmul.f32 %v7332_v30, %v5078_v12 }
 0x1f4   : > { %7329 = vst [vmem:[#allocation56_spill] sm:$0xff] %v5845_v1  ;;  %v5848_v4 = vld [vmem:[%s4757_s30 + $0x64] sm:$0xff]  ;;  %v1291_v28 = vadd.f32 %v1275_v25, %v1240_v45  ;;  %v2751_v27 = vmul.f32 %v5845_v1, %v5205_v40  ;;  %v2716_v44 = vadd.f32 %v2700_v3, %v2665_v26 }
 0x1f5   : > { %v1749_v24 = vadd.f32 %v1733_v21, %v1698_v15  ;;  %7330 = vst [vmem:[#allocation8_spill] sm:$0xff] %v5848_v4  ;;  %v2258_v43 = vadd.f32 %v2242_v48, %v2207_v17  ;;  %v1835_v18 = vmul.f32 %v5848_v4, %v7333_v33  ;;  %v5859_v54 = vld [vmem:[%s4757_s30 + $0x85] sm:$0xff]  ;;  %v7337_v17 = vld [vmem:[#allocation41_spill] sm:$0xff] }
 0x1f6   : > { %7334 = vst [vmem:[#allocation25_spill] sm:$0xff] %v5859_v54  ;;  %v5862_v15 = vld [vmem:[%s4757_s30 + $0x65] sm:$0xff]  ;;  %v1342_v25 = vadd.f32 %v1326_v57, %v1291_v28  ;;  %v2802_v1 = vmul.f32 %v5859_v54, %v5216_v0  ;;  %v2344_v30 = vmul.f32 %v7337_v17, %v5080_v50  ;;  %v2767_v3 = vadd.f32 %v2751_v27, %v2716_v44  ;;  %v7343_v44 = vld [vmem:[#allocation61_spill] sm:$0xff] }
 0x1f7   : > { %v1800_v21 = vadd.f32 %v1784_v38, %v1749_v24  ;;  %7335 = vst [vmem:[#allocation16_spill] sm:$0xff] %v5862_v15  ;;  %v7336_v45 = vld [vmem:[#allocation15_spill] sm:$0xff]  ;;  %v2309_v48 = vadd.f32 %v2293_v20, %v2258_v43  ;;  %v1886_v4 = vmul.f32 %v5862_v15, %v4931_v51  ;;  %v7338_v24 = vld [vmem:[#allocation57_spill] sm:$0xff] }
 0x1f8   : > { %v1377_v39 = vmul.f32 %v7336_v45, %v7153_v11  ;;  %v1428_v57 = vmul.f32 %v7338_v24, %v7158_v36  ;;  %v7339_v45 = vld [vmem:[#allocation60_spill] sm:$0xff]  ;;  %v7340_v54 = vld [vmem:[#allocation3_spill] sm:$0xff]  ;;  %v2818_v50 = vadd.f32 %v2802_v1, %v2767_v3 }
 0x1f9   : > { %v1851_v26 = vadd.f32 %v1835_v18, %v1800_v21  ;;  %v2360_v28 = vadd.f32 %v2344_v30, %v2309_v48  ;;  %v2395_v33 = vmul.f32 %v7339_v45, %v5085_v55  ;;  %v2446_v20 = vmul.f32 %v7340_v54, %v5087_v53  ;;  %v7341_v43 = vld [vmem:[#allocation31_spill] sm:$0xff]  ;;  %v7342_v18 = vld [vmem:[#allocation48_spill] sm:$0xff]  ;;  %v7344_v21 = vld [vmem:[#allocation26_spill] sm:$0xff] }
 0x1fa   : > { %v1393_v38 = vadd.f32 %v1377_v39, %v1342_v25  ;;  %v1937_v17 = vmul.f32 %v7341_v43, %v7189_v34  ;;  %v1479_v39 = vmul.f32 %v7342_v18, %v4829_v7  ;;  %v2497_v30 = vmul.f32 %v7343_v44, %v5092_v46  ;;  %v7345_v48 = vld [vmem:[#allocation42_spill] sm:$0xff]  ;;  %2878 = vmatmul.f32.gmra.mxu1 %v2818_v50  ;;  %v5889_v45 = vld [vmem:[%s4757_s30 + $0x88] sm:$0xff] }
 0x1fb   : > { %v1902_v12 = vadd.f32 %v1886_v4, %v1851_v26  ;;  %v2411_v27 = vadd.f32 %v2395_v33, %v2360_v28  ;;  %v1021_v25 = vmul.f32 %v7344_v21, %v4762_v60  ;;  %v1072_v54 = vmul.f32 %v7345_v48, %v4764_v61  ;;  %7346 = vst [vmem:[#allocation28_spill] sm:$0xff] %v5889_v45  ;;  %v7347_v4 = vld [vmem:[#allocation32_spill] sm:$0xff]  ;;  %v7348_v33 = vld [vmem:[#allocation49_spill] sm:$0xff] }
 0x1fc   : > { %v1444_v15 = vadd.f32 %v1428_v57, %v1393_v38  ;;  %v1988_v3 = vmul.f32 %v7347_v4, %v7195_v47  ;;  %v1530_v38 = vmul.f32 %v7348_v33, %v4839_v23  ;;  %v2548_v28 = vmul.f32 %v5889_v45, %v7253_v56  ;;  %v5900_v21 = vld [vmem:[%s4757_s30 + $0x89] sm:$0xff] }
 0x1fd   : > { %v1953_v1 = vadd.f32 %v1937_v17, %v1902_v12  ;;  %v2462_v57 = vadd.f32 %v2446_v20, %v2411_v27  ;;  %v1088_v43 = vadd.f32 %v1072_v54, %v1021_v25  ;;  %v1123_v50 = vmul.f32 %v7306_v10, %v4766_v19  ;;  %7349 = vst [vmem:[#allocation29_spill] sm:$0xff] %v5900_v21  ;;  %v7350_v12 = vld [vmem:[#allocation23_spill] sm:$0xff] }
 0x1fe   : > { %v1495_v26 = vadd.f32 %v1479_v39, %v1444_v15  ;;  %v2039_v17 = vmul.f32 %v7350_v12, %v7255_v63  ;;  %v7351_v39 = vld [vmem:[#allocation50_spill] sm:$0xff]  ;;  %v2599_v27 = vmul.f32 %v5900_v21, %v7258_v16  ;;  %v5909_v54 = vld [vmem:[%s4757_s30 + $0x68] sm:$0xff]  ;;  %v1174_v10 = vmul.f32 %v7310_v6, %v4777_v5 }
 0x1ff   : > { %v2004_v48 = vadd.f32 %v1988_v3, %v1953_v1  ;;  %v1581_v4 = vmul.f32 %v7351_v39, %v7168_v58  ;;  %v2513_v20 = vadd.f32 %v2497_v30, %v2462_v57  ;;  %7352 = vst [vmem:[#allocation17_spill] sm:$0xff] %v5909_v54  ;;  %v1139_v25 = vadd.f32 %v1123_v50, %v1088_v43  ;;  %v5914_v1 = vld [vmem:[%s4757_s30 + $0x8a] sm:$0xff] }
 0x200   : > { %v1546_v15 = vadd.f32 %v1530_v38, %v1495_v26  ;;  %7353 = vst [vmem:[#allocation30_spill] sm:$0xff] %v5914_v1  ;;  %v7354_v12 = vld [vmem:[#allocation27_spill] sm:$0xff]  ;;  %v1632_v30 = vmul.f32 %v5909_v54, %v4866_v37  ;;  %v2650_v21 = vmul.f32 %v5914_v1, %v7262_v29  ;;  %v1225_v6 = vmul.f32 %v7313_v22, %v4784_v14 }
 0x201   : > { %v2055_v3 = vadd.f32 %v2039_v17, %v2004_v48  ;;  %v2090_v26 = vmul.f32 %v7354_v12, %v7205_v41  ;;  %v2564_v57 = vadd.f32 %v2548_v28, %v2513_v20  ;;  %v5923_v43 = vld [vmem:[%s4757_s30 + $0x69] sm:$0xff]  ;;  %v1190_v50 = vadd.f32 %v1174_v10, %v1139_v25  ;;  %v7357_v12 = vld [vmem:[#allocation53_spill] sm:$0xff] }
 0x202   : > { %v1597_v38 = vadd.f32 %v1581_v4, %v1546_v15  ;;  %7355 = vst [vmem:[#allocation11_spill] sm:$0xff] %v5923_v43  ;;  %v5928_v48 = vld [vmem:[%s4757_s30 + $0x8b] sm:$0xff]  ;;  %v2141_v15 = vmul.f32 %v7357_v12, %v7210_v9  ;;  %v1683_v28 = vmul.f32 %v5923_v43, %v4878_v62  ;;  %v1276_v22 = vmul.f32 %v5641_v2, %v7144_v32 }
 0x203   : > { %7356 = vst [vmem:[#allocation33_spill] sm:$0xff] %v5928_v48  ;;  %v2106_v17 = vadd.f32 %v2090_v26, %v2055_v3  ;;  %v2615_v20 = vadd.f32 %v2599_v27, %v2564_v57  ;;  %v2701_v1 = vmul.f32 %v5928_v48, %v7232_v52  ;;  %v5937_v25 = vld [vmem:[%s4757_s30 + $0x6a] sm:$0xff]  ;;  %v1241_v10 = vadd.f32 %v1225_v6, %v1190_v50 }
 0x204   : > { %v1648_v4 = vadd.f32 %v1632_v30, %v1597_v38  ;;  %7358 = vst [vmem:[#allocation18_spill] sm:$0xff] %v5937_v25  ;;  %v5942_v3 = vld [vmem:[%s4757_s30 + $0x8c] sm:$0xff]  ;;  %v2192_v38 = vmul.f32 %v7315_v8, %v7166_v13  ;;  %v1734_v27 = vmul.f32 %v5937_v25, %v4899_v31  ;;  %v1327_v2 = vmul.f32 %v5792_v49, %v7149_v59  ;;  %v7362_v8 = vld [vmem:[#allocation6_spill] sm:$0xff] }
 0x205   : > { %7359 = vst [vmem:[#allocation13_spill] sm:$0xff] %v5942_v3  ;;  %v2157_v26 = vadd.f32 %v2141_v15, %v2106_v17  ;;  %v2666_v57 = vadd.f32 %v2650_v21, %v2615_v20  ;;  %v2752_v12 = vmul.f32 %v5942_v3, %v5205_v40  ;;  %v5951_v48 = vld [vmem:[%s4757_s30 + $0x6b] sm:$0xff]  ;;  %v1292_v50 = vadd.f32 %v1276_v22, %v1241_v10  ;;  %v7364_v22 = vld [vmem:[#allocation54_spill] sm:$0xff] }
 0x206   : > { %v1699_v30 = vadd.f32 %v1683_v28, %v1648_v4  ;;  %7360 = vst [vmem:[#allocation21_spill] sm:$0xff] %v5951_v48  ;;  %v5956_v6 = vld [vmem:[%s4757_s30 + $0x8d] sm:$0xff]  ;;  %v2243_v15 = vmul.f32 %v7362_v8, %v7172_v35  ;;  %v1785_v21 = vmul.f32 %v5951_v48, %v7328_v42  ;;  %v1378_v49 = vmul.f32 %v7364_v22, %v7153_v11  ;;  %v7367_v8 = vld [vmem:[#allocation10_spill] sm:$0xff] }
 0x207   : > { %7361 = vst [vmem:[#allocation34_spill] sm:$0xff] %v5956_v6  ;;  %v2208_v17 = vadd.f32 %v2192_v38, %v2157_v26  ;;  %v2717_v28 = vadd.f32 %v2701_v1, %v2666_v57  ;;  %v2803_v20 = vmul.f32 %v5956_v6, %v5216_v0  ;;  %v5965_v3 = vld [vmem:[%s4757_s30 + $0x6c] sm:$0xff]  ;;  %v1343_v10 = vadd.f32 %v1327_v2, %v1292_v50  ;;  %v7366_v26 = vld [vmem:[#allocation62_spill] sm:$0xff]  ;;  %v7371_v50 = vld [vmem:[#allocation5_spill] sm:$0xff] }
 0x208   : > { %v1750_v4 = vadd.f32 %v1734_v27, %v1699_v30  ;;  %7363 = vst [vmem:[#allocation19_spill] sm:$0xff] %v5965_v3  ;;  %v7365_v43 = vld [vmem:[#allocation39_spill] sm:$0xff]  ;;  %v1836_v30 = vmul.f32 %v5965_v3, %v7367_v8  ;;  %v7368_v48 = vld [vmem:[#allocation40_spill] sm:$0xff]  ;;  %v7369_v1 = vld [vmem:[#allocation22_spill] sm:$0xff]  ;;  %v1429_v2 = vmul.f32 %v7371_v50, %v7158_v36 }
 0x209   : > { %v2259_v25 = vadd.f32 %v2243_v15, %v2208_v17  ;;  %v2294_v38 = vmul.f32 %v7366_v26, %v7365_v43  ;;  %v2768_v27 = vadd.f32 %v2752_v12, %v2717_v28  ;;  %v2345_v57 = vmul.f32 %v7369_v1, %v7368_v48  ;;  %v5976_v35 = vld [vmem:[%s4757_s30 + $0x6d] sm:$0xff]  ;;  %v7375_v50 = vld [vmem:[#allocation25_spill] sm:$0xff] }
 0x20a   : > { %v1801_v45 = vadd.f32 %v1785_v21, %v1750_v4  ;;  %7370 = vst [vmem:[#allocation52_spill] sm:$0xff] %v5976_v35  ;;  %v1394_v6 = vadd.f32 %v1378_v49, %v1343_v10  ;;  %v7372_v17 = vld [vmem:[#allocation55_spill] sm:$0xff]  ;;  %v1887_v4 = vmul.f32 %v5976_v35, %v4931_v51  ;;  %v7373_v12 = vld [vmem:[#allocation56_spill] sm:$0xff] }
 0x20b   : > { %v2310_v22 = vadd.f32 %v2294_v38, %v2259_v25  ;;  %v2396_v15 = vmul.f32 %v7372_v17, %v5085_v55  ;;  %v2819_v21 = vadd.f32 %v2803_v20, %v2768_v27  ;;  %v2447_v28 = vmul.f32 %v7373_v12, %v5087_v53  ;;  %v7374_v3 = vld [vmem:[#allocation7_spill] sm:$0xff]  ;;  %v7376_v17 = vld [vmem:[#allocation58_spill] sm:$0xff]  ;;  %v7378_v27 = vld [vmem:[#allocation8_spill] sm:$0xff] }
 0x20c   : > { %v1852_v26 = vadd.f32 %v1836_v30, %v1801_v45  ;;  %v1445_v1 = vadd.f32 %v1429_v2, %v1394_v6  ;;  %v1480_v49 = vmul.f32 %v7374_v3, %v4829_v7  ;;  %v2498_v25 = vmul.f32 %v7375_v50, %v5092_v46  ;;  %v5993_v30 = vld [vmem:[%s4757_s30 + $0x90] sm:$0xff]  ;;  %v7379_v6 = vld [vmem:[#allocation59_spill] sm:$0xff] }
 0x20d   : > { %v2361_v10 = vadd.f32 %v2345_v57, %v2310_v22  ;;  %v1938_v45 = vmul.f32 %v7376_v17, %v7189_v34  ;;  %2881 = vmatmul.f32.gmra.mxu1 %v2819_v21  ;;  %7377 = vst [vmem:[#allocation14_spill] sm:$0xff] %v5993_v30  ;;  %v1531_v12 = vmul.f32 %v7378_v27, %v4839_v23  ;;  %v7380_v22 = vld [vmem:[#allocation15_spill] sm:$0xff]  ;;  %v7383_v27 = vld [vmem:[#allocation16_spill] sm:$0xff] }
 0x20e   : > { %v1903_v38 = vadd.f32 %v1887_v4, %v1852_v26  ;;  %v1496_v20 = vadd.f32 %v1480_v49, %v1445_v1  ;;  %v1022_v2 = vmul.f32 %v7379_v6, %v4762_v60  ;;  %v1073_v57 = vmul.f32 %v7380_v22, %v4764_v61  ;;  %v7381_v4 = vld [vmem:[#allocation37_spill] sm:$0xff] }
 0x20f   : > { %v2412_v50 = vadd.f32 %v2396_v15, %v2361_v10  ;;  %v2549_v26 = vmul.f32 %v5993_v30, %v7253_v56  ;;  %v1989_v21 = vmul.f32 %v7381_v4, %v7195_v47  ;;  %v6006_v1 = vld [vmem:[%s4757_s30 + $0x91] sm:$0xff]  ;;  %v1582_v3 = vmul.f32 %v7383_v27, %v7168_v58 }
 0x210   : > { %v1954_v17 = vadd.f32 %v1938_v45, %v1903_v38  ;;  %7382 = vst [vmem:[#allocation44_spill] sm:$0xff] %v6006_v1  ;;  %v1547_v49 = vadd.f32 %v1531_v12, %v1496_v20  ;;  %v1089_v35 = vadd.f32 %v1073_v57, %v1022_v2  ;;  %v1124_v6 = vmul.f32 %v7338_v24, %v4766_v19  ;;  %v7384_v45 = vld [vmem:[#allocation41_spill] sm:$0xff]  ;;  %v6017_v4 = vld [vmem:[%s4757_s30 + $0x70] sm:$0xff] }
 0x211   : > { %v2463_v15 = vadd.f32 %v2447_v28, %v2412_v50  ;;  %v2600_v10 = vmul.f32 %v6006_v1, %v7258_v16  ;;  %v2040_v22 = vmul.f32 %v7384_v45, %v7255_v63  ;;  %7385 = vst [vmem:[#allocation35_spill] sm:$0xff] %v6017_v4  ;;  %v6020_v12 = vld [vmem:[%s4757_s30 + $0x92] sm:$0xff]  ;;  %v1633_v2 = vmul.f32 %v6017_v4, %v4866_v37 }
 0x212   : > { %v2005_v38 = vadd.f32 %v1989_v21, %v1954_v17  ;;  %7386 = vst [vmem:[#allocation43_spill] sm:$0xff] %v6020_v12  ;;  %v1598_v20 = vadd.f32 %v1582_v3, %v1547_v49  ;;  %v1140_v57 = vadd.f32 %v1124_v6, %v1089_v35  ;;  %v1175_v24 = vmul.f32 %v7342_v18, %v4777_v5  ;;  %v7387_v21 = vld [vmem:[#allocation60_spill] sm:$0xff] }
 0x213   : > { %v2514_v50 = vadd.f32 %v2498_v25, %v2463_v15  ;;  %v2651_v28 = vmul.f32 %v6020_v12, %v7262_v29  ;;  %v2091_v45 = vmul.f32 %v7387_v21, %v7205_v41  ;;  %v6031_v1 = vld [vmem:[%s4757_s30 + $0x71] sm:$0xff]  ;;  %v1226_v18 = vmul.f32 %v7348_v33, %v4784_v14 }
 0x214   : > { %v2056_v17 = vadd.f32 %v2040_v22, %v2005_v38  ;;  %7388 = vst [vmem:[#allocation46_spill] sm:$0xff] %v6031_v1  ;;  %v6034_v3 = vld [vmem:[%s4757_s30 + $0x93] sm:$0xff]  ;;  %v1649_v49 = vadd.f32 %v1633_v2, %v1598_v20  ;;  %v1684_v35 = vmul.f32 %v6031_v1, %v4878_v62  ;;  %v1191_v6 = vadd.f32 %v1175_v24, %v1140_v57  ;;  %v7390_v22 = vld [vmem:[#allocation3_spill] sm:$0xff] }
 0x215   : > { %7389 = vst [vmem:[#allocation4_spill] sm:$0xff] %v6034_v3  ;;  %v2565_v25 = vadd.f32 %v2549_v26, %v2514_v50  ;;  %v2702_v15 = vmul.f32 %v6034_v3, %v7232_v52  ;;  %v2142_v21 = vmul.f32 %v7390_v22, %v7210_v9  ;;  %v6045_v12 = vld [vmem:[%s4757_s30 + $0x72] sm:$0xff]  ;;  %v1277_v33 = vmul.f32 %v7351_v39, %v7144_v32 }
 0x216   : > { %v2107_v38 = vadd.f32 %v2091_v45, %v2056_v17  ;;  %7391 = vst [vmem:[#allocation45_spill] sm:$0xff] %v6045_v12  ;;  %v6048_v20 = vld [vmem:[%s4757_s30 + $0x94] sm:$0xff]  ;;  %v1700_v2 = vadd.f32 %v1684_v35, %v1649_v49  ;;  %v1735_v57 = vmul.f32 %v6045_v12, %v4899_v31  ;;  %v1242_v24 = vadd.f32 %v1226_v18, %v1191_v6 }
 0x217   : > { %7392 = vst [vmem:[#allocation47_spill] sm:$0xff] %v6048_v20  ;;  %v2616_v26 = vadd.f32 %v2600_v10, %v2565_v25  ;;  %v2753_v50 = vmul.f32 %v6048_v20, %v5205_v40  ;;  %v2193_v45 = vmul.f32 %v7343_v44, %v7166_v13  ;;  %v6059_v22 = vld [vmem:[%s4757_s30 + $0x73] sm:$0xff]  ;;  %v1328_v39 = vmul.f32 %v5909_v54, %v7149_v59 }
 0x218   : > { %v2158_v17 = vadd.f32 %v2142_v21, %v2107_v38  ;;  %7393 = vst [vmem:[#allocation20_spill] sm:$0xff] %v6059_v22  ;;  %v6062_v3 = vld [vmem:[%s4757_s30 + $0x95] sm:$0xff]  ;;  %v1751_v49 = vadd.f32 %v1735_v57, %v1700_v2  ;;  %v1786_v35 = vmul.f32 %v6059_v22, %v7328_v42  ;;  %v1293_v6 = vadd.f32 %v1277_v33, %v1242_v24  ;;  %v7395_v38 = vld [vmem:[#allocation38_spill] sm:$0xff]  ;;  %v7398_v24 = vld [vmem:[#allocation11_spill] sm:$0xff] }
 0x219   : > { %7394 = vst [vmem:[#allocation36_spill] sm:$0xff] %v6062_v3  ;;  %v2667_v10 = vadd.f32 %v2651_v28, %v2616_v26  ;;  %v2804_v18 = vmul.f32 %v6062_v3, %v5216_v0  ;;  %v7396_v44 = vld [vmem:[#allocation28_spill] sm:$0xff]  ;;  %v1379_v33 = vmul.f32 %v7398_v24, %v7153_v11  ;;  %v7399_v28 = vld [vmem:[#allocation29_spill] sm:$0xff] }
 0x21a   : > { %v2209_v25 = vadd.f32 %v2193_v45, %v2158_v17  ;;  %v2244_v21 = vmul.f32 %v7396_v44, %v7395_v38  ;;  %v6073_v20 = vld [vmem:[%s4757_s30 + $0x74] sm:$0xff]  ;;  %v1802_v12 = vadd.f32 %v1786_v35, %v1751_v49  ;;  %v1344_v57 = vadd.f32 %v1328_v39, %v1293_v6  ;;  %v7400_v17 = vld [vmem:[#allocation30_spill] sm:$0xff] }
 0x21b   : > { %7397 = vst [vmem:[#allocation9_spill] sm:$0xff] %v6073_v20  ;;  %v1837_v2 = vmul.f32 %v6073_v20, %v7367_v8  ;;  %v2718_v22 = vadd.f32 %v2702_v15, %v2667_v10  ;;  %v2295_v26 = vmul.f32 %v7399_v28, %v7365_v43  ;;  %v2346_v45 = vmul.f32 %v7400_v17, %v7368_v48  ;;  %v6084_v3 = vld [vmem:[%s4757_s30 + $0x75] sm:$0xff]  ;;  %v7402_v6 = vld [vmem:[#allocation18_spill] sm:$0xff] }
 0x21c   : > { %v2260_v54 = vadd.f32 %v2244_v21, %v2209_v25  ;;  %7401 = vst [vmem:[#allocation57_spill] sm:$0xff] %v6084_v3  ;;  %v1888_v49 = vmul.f32 %v6084_v3, %v4931_v51  ;;  %v1395_v35 = vadd.f32 %v1379_v33, %v1344_v57  ;;  %v1430_v39 = vmul.f32 %v7402_v6, %v7158_v36  ;;  %v7403_v15 = vld [vmem:[#allocation33_spill] sm:$0xff]  ;;  %v7405_v17 = vld [vmem:[#allocation6_spill] sm:$0xff] }
 0x21d   : > { %v1853_v44 = vadd.f32 %v1837_v2, %v1802_v12  ;;  %v2769_v20 = vadd.f32 %v2753_v50, %v2718_v22  ;;  %v2397_v10 = vmul.f32 %v7403_v15, %v5085_v55  ;;  %v7404_v25 = vld [vmem:[#allocation13_spill] sm:$0xff]  ;;  %v1939_v48 = vmul.f32 %v7405_v17, %v7189_v34  ;;  %v7408_v22 = vld [vmem:[#allocation51_spill] sm:$0xff] }
 0x21e   : > { %v2311_v24 = vadd.f32 %v2295_v26, %v2260_v54  ;;  %v2448_v21 = vmul.f32 %v7404_v25, %v5087_v53  ;;  %v1446_v12 = vadd.f32 %v1430_v39, %v1395_v35  ;;  %v7406_v2 = vld [vmem:[#allocation21_spill] sm:$0xff]  ;;  %v7407_v54 = vld [vmem:[#allocation62_spill] sm:$0xff]  ;;  %v1023_v26 = vmul.f32 %v7408_v22, %v4762_v60 }
 0x21f   : > { %v1904_v28 = vadd.f32 %v1888_v49, %v1853_v44  ;;  %v1481_v57 = vmul.f32 %v7406_v2, %v4829_v7  ;;  %v2820_v33 = vadd.f32 %v2804_v18, %v2769_v20  ;;  %v1990_v50 = vmul.f32 %v7407_v54, %v7195_v47  ;;  %v7409_v44 = vld [vmem:[#allocation19_spill] sm:$0xff]  ;;  %v7410_v49 = vld [vmem:[#allocation54_spill] sm:$0xff]  ;;  %v7413_v54 = vld [vmem:[#allocation52_spill] sm:$0xff] }
 0x220   : > { %v2362_v3 = vadd.f32 %v2346_v45, %v2311_v24  ;;  %v1532_v17 = vmul.f32 %v7409_v44, %v4839_v23  ;;  %v1074_v35 = vmul.f32 %v7410_v49, %v4764_v61  ;;  %v7411_v20 = vld [vmem:[#allocation34_spill] sm:$0xff]  ;;  %v1583_v22 = vmul.f32 %v7413_v54, %v7168_v58  ;;  %v7418_v54 = vld [vmem:[#allocation55_spill] sm:$0xff] }
 0x221   : > { %v1955_v15 = vadd.f32 %v1939_v48, %v1904_v28  ;;  %v1497_v25 = vadd.f32 %v1481_v57, %v1446_v12  ;;  %2884 = vmatmul.f32.gmra.mxu1 %v2820_v33  ;;  %v2499_v18 = vmul.f32 %v7411_v20, %v5092_v46  ;;  %v7412_v24 = vld [vmem:[#allocation22_spill] sm:$0xff]  ;;  %v6113_v48 = vld [vmem:[%s4757_s30 + $0x98] sm:$0xff]  ;;  %v2092_v20 = vmul.f32 %v7418_v54, %v7205_v41 }
 0x222   : > { %v2413_v39 = vadd.f32 %v2397_v10, %v2362_v3  ;;  %v2041_v45 = vmul.f32 %v7412_v24, %v7255_v63  ;;  %7414 = vst [vmem:[#allocation31_spill] sm:$0xff] %v6113_v48  ;;  %v6116_v57 = vld [vmem:[%s4757_s30 + $0x78] sm:$0xff]  ;;  %v1090_v44 = vadd.f32 %v1074_v35, %v1023_v26  ;;  %v2550_v49 = vmul.f32 %v6113_v48, %v7253_v56 }
 0x223   : > { %v2006_v28 = vadd.f32 %v1990_v50, %v1955_v15  ;;  %v1548_v12 = vadd.f32 %v1532_v17, %v1497_v25  ;;  %7415 = vst [vmem:[#allocation48_spill] sm:$0xff] %v6116_v57  ;;  %v7416_v33 = vld [vmem:[#allocation5_spill] sm:$0xff]  ;;  %v1634_v15 = vmul.f32 %v6116_v57, %v4866_v37 }
 0x224   : > { %v1125_v3 = vmul.f32 %v7416_v33, %v4766_v19  ;;  %v2464_v10 = vadd.f32 %v2448_v21, %v2413_v39  ;;  %v6123_v24 = vld [vmem:[%s4757_s30 + $0x99] sm:$0xff]  ;;  %v2979_v21 = vld [vmem:[%s6769_s8 + $0x70] sm:$0xff]  ;;  %v7420_v39 = vld [vmem:[#allocation7_spill] sm:$0xff] }
 0x225   : > { %7417 = vst [vmem:[#allocation61_spill] sm:$0xff] %v6123_v24  ;;  %v2057_v25 = vadd.f32 %v2041_v45, %v2006_v28  ;;  %v2980_v50 = vld [vmem:[%s6769_s8 + $0x78] sm:$0xff]  ;;  %v1599_v26 = vadd.f32 %v1583_v22, %v1548_v12  ;;  %v1176_v54 = vmul.f32 %v7420_v39, %v4777_v5  ;;  %v2601_v45 = vmul.f32 %v6123_v24, %v7258_v16  ;;  %v7421_v28 = vld [vmem:[#allocation56_spill] sm:$0xff] }
 0x226   : > { %v6136_v17 = vld [vmem:[%s4757_s30 + $0x79] sm:$0xff]  ;;  %v1141_v35 = vadd.f32 %v1125_v3, %v1090_v44  ;;  %v2515_v33 = vadd.f32 %v2499_v18, %v2464_v10  ;;  %v2143_v57 = vmul.f32 %v7421_v28, %v7210_v9  ;;  %2985 = vmatpush.msrb.mxu2 %v2980_v50  ;;  %v7424_v18 = vld [vmem:[#allocation8_spill] sm:$0xff] }
 0x227   : > { %7419 = vst [vmem:[#allocation26_spill] sm:$0xff] %v6136_v17  ;;  %v1685_v48 = vmul.f32 %v6136_v17, %v4878_v62  ;;  %v6147_v22 = vld [vmem:[%s4757_s30 + $0x9a] sm:$0xff]  ;;  %v2108_v12 = vadd.f32 %v2092_v20, %v2057_v25  ;;  %v1650_v44 = vadd.f32 %v1634_v15, %v1599_v26  ;;  %v1227_v10 = vmul.f32 %v7424_v18, %v4784_v14 }
 0x228   : > { %7422 = vst [vmem:[#allocation42_spill] sm:$0xff] %v6147_v22  ;;  %v6150_v3 = vld [vmem:[%s4757_s30 + $0x7a] sm:$0xff]  ;;  %v1192_v39 = vadd.f32 %v1176_v54, %v1141_v35  ;;  %v2566_v24 = vadd.f32 %v2550_v49, %v2515_v33  ;;  %v2652_v28 = vmul.f32 %v6147_v22, %v7262_v29  ;;  %2986 = vmatpush.msrb.mxu2 %v2979_v21 }
 0x229   : > { %7423 = vst [vmem:[#allocation32_spill] sm:$0xff] %v6150_v3  ;;  %v7425_v50 = vld [vmem:[#allocation25_spill] sm:$0xff]  ;;  %v1736_v20 = vmul.f32 %v6150_v3, %v4899_v31  ;;  %v2159_v25 = vadd.f32 %v2143_v57, %v2108_v12  ;;  %v1701_v26 = vadd.f32 %v1685_v48, %v1650_v44  ;;  %v1278_v49 = vmul.f32 %v7383_v27, %v7144_v32 }
 0x22a   : > { %v2194_v9 = vmul.f32 %v7425_v50, %v7166_v13  ;;  %v6161_v15 = vld [vmem:[%s4757_s30 + $0x9b] sm:$0xff]  ;;  %v1243_v54 = vadd.f32 %v1227_v10, %v1192_v39  ;;  %v2617_v33 = vadd.f32 %v2601_v45, %v2566_v24  ;;  %v2245_v21 = vmul.f32 %v5993_v30, %v7395_v38  ;;  %v7430_v10 = vld [vmem:[#allocation44_spill] sm:$0xff] }
 0x22b   : > { %7426 = vst [vmem:[#allocation49_spill] sm:$0xff] %v6161_v15  ;;  %v6164_v35 = vld [vmem:[%s4757_s30 + $0x7b] sm:$0xff]  ;;  %v2703_v18 = vmul.f32 %v6161_v15, %v7232_v52  ;;  %v1752_v12 = vadd.f32 %v1736_v20, %v1701_v26  ;;  %v1329_v27 = vmul.f32 %v6017_v4, %v7149_v59  ;;  %v2296_v30 = vmul.f32 %v7430_v10, %v7365_v43  ;;  %v7433_v4 = vld [vmem:[#allocation43_spill] sm:$0xff] }
 0x22c   : > { %7427 = vst [vmem:[#allocation23_spill] sm:$0xff] %v6164_v35  ;;  %v1787_v50 = vmul.f32 %v6164_v35, %v7328_v42  ;;  %v6175_v57 = vld [vmem:[%s4757_s30 + $0x9c] sm:$0xff]  ;;  %v2210_v48 = vadd.f32 %v2194_v9, %v2159_v25  ;;  %v1294_v39 = vadd.f32 %v1278_v49, %v1243_v54  ;;  %v2668_v24 = vadd.f32 %v2652_v28, %v2617_v33  ;;  %v7432_v33 = vld [vmem:[#allocation40_spill] sm:$0xff] }
 0x22d   : > { %7428 = vst [vmem:[#allocation50_spill] sm:$0xff] %v6175_v57  ;;  %v6178_v44 = vld [vmem:[%s4757_s30 + $0x7c] sm:$0xff]  ;;  %v2754_v45 = vmul.f32 %v6175_v57, %v5205_v40  ;;  %v1380_v54 = vmul.f32 %v6031_v1, %v7153_v11  ;;  %v2347_v10 = vmul.f32 %v7433_v4, %v7432_v33 }
 0x22e   : > { %7429 = vst [vmem:[#allocation27_spill] sm:$0xff] %v6178_v44  ;;  %v1838_v35 = vmul.f32 %v6178_v44, %v7367_v8  ;;  %v6189_v15 = vld [vmem:[%s4757_s30 + $0x9d] sm:$0xff]  ;;  %v2261_v9 = vadd.f32 %v2245_v21, %v2210_v48  ;;  %v1803_v20 = vadd.f32 %v1787_v50, %v1752_v12  ;;  %v1345_v26 = vadd.f32 %v1329_v27, %v1294_v39  ;;  %v7435_v39 = vld [vmem:[#allocation4_spill] sm:$0xff] }
 0x22f   : > { %7431 = vst [vmem:[#allocation53_spill] sm:$0xff] %v6189_v15  ;;  %v6192_v25 = vld [vmem:[%s4757_s30 + $0x7d] sm:$0xff]  ;;  %v2719_v28 = vadd.f32 %v2703_v18, %v2668_v24  ;;  %v2805_v49 = vmul.f32 %v6189_v15, %v5216_v0  ;;  %v2398_v27 = vmul.f32 %v7435_v39, %v5085_v55  ;;  %v7436_v18 = vld [vmem:[#allocation47_spill] sm:$0xff]  ;;  %v7437_v15 = vld [vmem:[#allocation28_spill] sm:$0xff] }
 0x230   : > { %v1889_v44 = vmul.f32 %v6192_v25, %v4931_v51  ;;  %v2312_v57 = vadd.f32 %v2296_v30, %v2261_v9  ;;  %v1854_v3 = vadd.f32 %v1838_v35, %v1803_v20  ;;  %v1396_v21 = vadd.f32 %v1380_v54, %v1345_v26  ;;  %v7434_v50 = vld [vmem:[#allocation45_spill] sm:$0xff]  ;;  %v7438_v30 = vld [vmem:[#allocation20_spill] sm:$0xff] }
 0x231   : > { %v1431_v48 = vmul.f32 %v7434_v50, %v7158_v36  ;;  %v2770_v12 = vadd.f32 %v2754_v45, %v2719_v28  ;;  %v2449_v24 = vmul.f32 %v7436_v18, %v5087_v53  ;;  %v1940_v1 = vmul.f32 %v7437_v15, %v7189_v34  ;;  %v7439_v20 = vld [vmem:[#allocation29_spill] sm:$0xff]  ;;  %v7441_v28 = vld [vmem:[#allocation11_spill] sm:$0xff] }
 0x232   : > { %v2363_v4 = vadd.f32 %v2347_v10, %v2312_v57  ;;  %v1905_v22 = vadd.f32 %v1889_v44, %v1854_v3  ;;  %v1482_v35 = vmul.f32 %v7438_v30, %v4829_v7  ;;  %v1991_v45 = vmul.f32 %v7439_v20, %v7195_v47  ;;  %v7440_v26 = vld [vmem:[#allocation17_spill] sm:$0xff]  ;;  %v7443_v10 = vld [vmem:[#allocation36_spill] sm:$0xff] }
 0x233   : > { %v1447_v33 = vadd.f32 %v1431_v48, %v1396_v21  ;;  %v2821_v9 = vadd.f32 %v2805_v49, %v2770_v12  ;;  %v1024_v54 = vmul.f32 %v7440_v26, %v4762_v60  ;;  %v1075_v18 = vmul.f32 %v7441_v28, %v4764_v61  ;;  %v7442_v3 = vld [vmem:[#allocation9_spill] sm:$0xff]  ;;  %v7444_v21 = vld [vmem:[#allocation30_spill] sm:$0xff] }
 0x234   : > { %v2414_v39 = vadd.f32 %v2398_v27, %v2363_v4  ;;  %v1956_v15 = vadd.f32 %v1940_v1, %v1905_v22  ;;  %v1533_v44 = vmul.f32 %v7442_v3, %v4839_v23  ;;  %v2500_v49 = vmul.f32 %v7443_v10, %v5092_v46  ;;  %v6227_v4 = vld [vmem:[%s4757_s30 + $0xa0] sm:$0xff] }
 0x235   : > { %v1498_v57 = vadd.f32 %v1482_v35, %v1447_v33  ;;  %2887 = vmatmul.f32.gmra.mxu1 %v2821_v9  ;;  %v2042_v48 = vmul.f32 %v7444_v21, %v7255_v63  ;;  %v1091_v12 = vadd.f32 %v1075_v18, %v1024_v54  ;;  %v1126_v20 = vmul.f32 %v7402_v6, %v4766_v19  ;;  %v7446_v33 = vld [vmem:[#allocation57_spill] sm:$0xff]  ;;  %v6236_v21 = vld [vmem:[%s4757_s30 + $0x80] sm:$0xff]  ;;  %v2978_v54 = vld [vmem:[%s6769_s8 + $0x68] sm:$0xff] }
 0x236   : > { %v2465_v26 = vadd.f32 %v2449_v24, %v2414_v39  ;;  %7445 = vst [vmem:[#allocation10_spill] sm:$0xff] %v6227_v4  ;;  %v2007_v1 = vadd.f32 %v1991_v45, %v1956_v15  ;;  %v1584_v27 = vmul.f32 %v7446_v33, %v7168_v58  ;;  %v2551_v35 = vmul.f32 %v6227_v4, %v7253_v56  ;;  %v7447_v9 = vld [vmem:[#allocation33_spill] sm:$0xff]  ;;  %v6241_v24 = vld [vmem:[%s4757_s30 + $0xa1] sm:$0xff] }
 0x237   : > { %v1549_v22 = vadd.f32 %v1533_v44, %v1498_v57  ;;  %v2093_v28 = vmul.f32 %v7447_v9, %v7205_v41  ;;  %7448 = vst [vmem:[#allocation58_spill] sm:$0xff] %v6236_v21  ;;  %v1142_v18 = vadd.f32 %v1126_v20, %v1091_v12  ;;  %v1177_v6 = vmul.f32 %v7406_v2, %v4777_v5  ;;  %v2977_v15 = vld [vmem:[%s6769_s8 + $0x60] sm:$0xff]  ;;  %v7451_v12 = vld [vmem:[#allocation13_spill] sm:$0xff] }
 0x238   : > { %v2516_v39 = vadd.f32 %v2500_v49, %v2465_v26  ;;  %7449 = vst [vmem:[#allocation59_spill] sm:$0xff] %v6241_v24  ;;  %v2058_v45 = vadd.f32 %v2042_v48, %v2007_v1  ;;  %v1635_v44 = vmul.f32 %v6236_v21, %v4866_v37  ;;  %v2602_v2 = vmul.f32 %v6241_v24, %v7258_v16  ;;  %v7450_v49 = vld [vmem:[#allocation24_spill] sm:$0xff]  ;;  %v6256_v48 = vld [vmem:[%s4757_s30 + $0x81] sm:$0xff] }
 0x239   : > { %v1600_v57 = vadd.f32 %v1584_v27, %v1549_v22  ;;  %v2144_v20 = vmul.f32 %v7451_v12, %v7450_v49  ;;  %2987 = vmatpush.msrb.mxu2 %v2978_v54  ;;  %7452 = vst [vmem:[#allocation15_spill] sm:$0xff] %v6256_v48  ;;  %v1193_v26 = vadd.f32 %v1177_v6, %v1142_v18  ;;  %v7453_v1 = vld [vmem:[#allocation19_spill] sm:$0xff]  ;;  %v7455_v54 = vld [vmem:[#allocation34_spill] sm:$0xff] }
 0x23a   : > { %v1228_v9 = vmul.f32 %v7453_v1, %v4784_v14  ;;  %v2567_v4 = vadd.f32 %v2551_v35, %v2516_v39  ;;  %v6261_v22 = vld [vmem:[%s4757_s30 + $0xa2] sm:$0xff]  ;;  %v2109_v27 = vadd.f32 %v2093_v28, %v2058_v45  ;;  %v1686_v24 = vmul.f32 %v6256_v48, %v4878_v62  ;;  %v7457_v35 = vld [vmem:[#allocation52_spill] sm:$0xff] }
 0x23b   : > { %7454 = vst [vmem:[#allocation37_spill] sm:$0xff] %v6261_v22  ;;  %v1651_v21 = vadd.f32 %v1635_v44, %v1600_v57  ;;  %v2653_v12 = vmul.f32 %v6261_v22, %v7262_v29  ;;  %v2195_v10 = vmul.f32 %v7455_v54, %v7166_v13  ;;  %2988 = vmatpush.msrb.mxu2 %v2977_v15  ;;  %v6270_v18 = vld [vmem:[%s4757_s30 + $0x82] sm:$0xff] }
 0x23c   : > { %7456 = vst [vmem:[#allocation16_spill] sm:$0xff] %v6270_v18  ;;  %v1244_v6 = vadd.f32 %v1228_v9, %v1193_v26  ;;  %v1279_v39 = vmul.f32 %v7457_v35, %v7144_v32  ;;  %v2618_v28 = vadd.f32 %v2602_v2, %v2567_v4  ;;  %v6275_v45 = vld [vmem:[%s4757_s30 + $0xa3] sm:$0xff]  ;;  %v2160_v57 = vadd.f32 %v2144_v20, %v2109_v27  ;;  %v7461_v4 = vld [vmem:[#allocation48_spill] sm:$0xff] }
 0x23d   : > { %7458 = vst [vmem:[#allocation41_spill] sm:$0xff] %v6275_v45  ;;  %v1702_v44 = vadd.f32 %v1686_v24, %v1651_v21  ;;  %v1737_v1 = vmul.f32 %v6270_v18, %v4899_v31  ;;  %v2704_v54 = vmul.f32 %v6275_v45, %v7232_v52  ;;  %v7459_v15 = vld [vmem:[#allocation31_spill] sm:$0xff]  ;;  %v1330_v2 = vmul.f32 %v7461_v4, %v7149_v59  ;;  %v7467_v4 = vld [vmem:[#allocation42_spill] sm:$0xff] }
 0x23e   : > { %v2246_v22 = vmul.f32 %v7459_v15, %v7395_v38  ;;  %v6284_v26 = vld [vmem:[%s4757_s30 + $0x83] sm:$0xff]  ;;  %v1295_v9 = vadd.f32 %v1279_v39, %v1244_v6  ;;  %v2669_v35 = vadd.f32 %v2653_v12, %v2618_v28  ;;  %v2211_v21 = vadd.f32 %v2195_v10, %v2160_v57  ;;  %v7463_v15 = vld [vmem:[#allocation61_spill] sm:$0xff] }
 0x23f   : > { %7460 = vst [vmem:[#allocation60_spill] sm:$0xff] %v6284_v26  ;;  %v6289_v48 = vld [vmem:[%s4757_s30 + $0xa4] sm:$0xff]  ;;  %v1753_v24 = vadd.f32 %v1737_v1, %v1702_v44  ;;  %v1788_v20 = vmul.f32 %v6284_v26, %v7328_v42  ;;  %v2297_v45 = vmul.f32 %v7463_v15, %v7365_v43  ;;  %v1381_v12 = vmul.f32 %v6136_v17, %v7153_v11 }
 0x240   : > { %7462 = vst [vmem:[#allocation3_spill] sm:$0xff] %v6289_v48  ;;  %v2755_v27 = vmul.f32 %v6289_v48, %v5205_v40  ;;  %v6298_v18 = vld [vmem:[%s4757_s30 + $0x84] sm:$0xff]  ;;  %v1346_v6 = vadd.f32 %v1330_v2, %v1295_v9  ;;  %v2720_v39 = vadd.f32 %v2704_v54, %v2669_v35  ;;  %v2262_v10 = vadd.f32 %v2246_v22, %v2211_v21  ;;  %v7466_v48 = vld [vmem:[#allocation40_spill] sm:$0xff]  ;;  %v7469_v21 = vld [vmem:[#allocation49_spill] sm:$0xff] }
 0x241   : > { %7464 = vst [vmem:[#allocation38_spill] sm:$0xff] %v6298_v18  ;;  %v6303_v28 = vld [vmem:[%s4757_s30 + $0xa5] sm:$0xff]  ;;  %v1804_v57 = vadd.f32 %v1788_v20, %v1753_v24  ;;  %v1839_v44 = vmul.f32 %v6298_v18, %v7367_v8  ;;  %v2348_v15 = vmul.f32 %v7467_v4, %v7466_v48  ;;  %v7468_v2 = vld [vmem:[#allocation32_spill] sm:$0xff]  ;;  %v2399_v24 = vmul.f32 %v7469_v21, %v5085_v55 }
 0x242   : > { %7465 = vst [vmem:[#allocation18_spill] sm:$0xff] %v6303_v28  ;;  %v2806_v1 = vmul.f32 %v6303_v28, %v5216_v0  ;;  %v6312_v26 = vld [vmem:[%s4757_s30 + $0x85] sm:$0xff]  ;;  %v1397_v9 = vadd.f32 %v1381_v12, %v1346_v6  ;;  %v1432_v17 = vmul.f32 %v7468_v2, %v7158_v36  ;;  %v2771_v54 = vadd.f32 %v2755_v27, %v2720_v39 }
 0x243   : > { %v2313_v35 = vadd.f32 %v2297_v45, %v2262_v10  ;;  %v1855_v43 = vadd.f32 %v1839_v44, %v1804_v57  ;;  %v1890_v22 = vmul.f32 %v6312_v26, %v4931_v51  ;;  %v7470_v20 = vld [vmem:[#allocation50_spill] sm:$0xff]  ;;  %v7471_v18 = vld [vmem:[#allocation23_spill] sm:$0xff] }
 0x244   : > { %v2450_v28 = vmul.f32 %v7470_v20, %v5087_v53  ;;  %v1448_v4 = vadd.f32 %v1432_v17, %v1397_v9  ;;  %v1483_v6 = vmul.f32 %v7471_v18, %v4829_v7  ;;  %v2822_v12 = vadd.f32 %v2806_v1, %v2771_v54  ;;  %v7472_v45 = vld [vmem:[#allocation14_spill] sm:$0xff]  ;;  %v7473_v10 = vld [vmem:[#allocation27_spill] sm:$0xff]  ;;  %v7477_v54 = vld [vmem:[#allocation44_spill] sm:$0xff] }
 0x245   : > { %v2364_v48 = vadd.f32 %v2348_v15, %v2313_v35  ;;  %v1906_v2 = vadd.f32 %v1890_v22, %v1855_v43  ;;  %v1941_v27 = vmul.f32 %v7472_v45, %v7189_v34  ;;  %v1534_v57 = vmul.f32 %v7473_v10, %v4839_v23  ;;  %v7474_v44 = vld [vmem:[#allocation35_spill] sm:$0xff]  ;;  %v7475_v20 = vld [vmem:[#allocation46_spill] sm:$0xff]  ;;  %v7476_v15 = vld [vmem:[#allocation53_spill] sm:$0xff] }
 0x246   : > { %v1499_v39 = vadd.f32 %v1483_v6, %v1448_v4  ;;  %v1025_v21 = vmul.f32 %v7474_v44, %v4762_v60  ;;  %v1076_v17 = vmul.f32 %v7475_v20, %v4764_v61  ;;  %2890 = vmatmul.f32.gmra.mxu1 %v2822_v12  ;;  %v2501_v43 = vmul.f32 %v7476_v15, %v5092_v46  ;;  %v6337_v35 = vld [vmem:[%s4757_s30 + $0xa8] sm:$0xff] }
 0x247   : > { %v2415_v9 = vadd.f32 %v2399_v24, %v2364_v48  ;;  %v1957_v1 = vadd.f32 %v1941_v27, %v1906_v2  ;;  %v1992_v4 = vmul.f32 %v7477_v54, %v7195_v47  ;;  %v1585_v6 = vmul.f32 %v6192_v25, %v7168_v58  ;;  %v7478_v24 = vld [vmem:[#allocation43_spill] sm:$0xff]  ;;  %v7481_v54 = vld [vmem:[#allocation4_spill] sm:$0xff] }
 0x248   : > { %v1550_v22 = vadd.f32 %v1534_v57, %v1499_v39  ;;  %v1092_v45 = vadd.f32 %v1076_v17, %v1025_v21  ;;  %v1127_v20 = vmul.f32 %v7434_v50, %v4766_v19  ;;  %v2552_v48 = vmul.f32 %v6337_v35, %v7253_v56  ;;  %v6348_v27 = vld [vmem:[%s4757_s30 + $0x88] sm:$0xff] }
 0x249   : > { %v2466_v44 = vadd.f32 %v2450_v28, %v2415_v9  ;;  %v2008_v2 = vadd.f32 %v1992_v4, %v1957_v1  ;;  %v2043_v12 = vmul.f32 %v7478_v24, %v7255_v63  ;;  %7479 = vst [vmem:[#allocation6_spill] sm:$0xff] %v6348_v27  ;;  %v6351_v39 = vld [vmem:[%s4757_s30 + $0xa9] sm:$0xff]  ;;  %v1636_v21 = vmul.f32 %v6348_v27, %v4866_v37 }
 0x24a   : > { %7480 = vst [vmem:[#allocation21_spill] sm:$0xff] %v6351_v39  ;;  %v1601_v57 = vadd.f32 %v1585_v6, %v1550_v22  ;;  %v1143_v17 = vadd.f32 %v1127_v20, %v1092_v45  ;;  %v1178_v50 = vmul.f32 %v7438_v30, %v4777_v5  ;;  %v2603_v9 = vmul.f32 %v6351_v39, %v7258_v16  ;;  %v2976_v22 = vld [vmem:[%s6769_s8 + $0x58] sm:$0xff]  ;;  %v2975_v6 = vld [vmem:[%s6769_s8 + $0x50] sm:$0xff]  ;;  %v7484_v39 = vld [vmem:[#allocation47_spill] sm:$0xff] }
 0x24b   : > { %v2517_v28 = vadd.f32 %v2501_v43, %v2466_v44  ;;  %v2059_v1 = vadd.f32 %v2043_v12, %v2008_v2  ;;  %v2094_v4 = vmul.f32 %v7481_v54, %v7205_v41  ;;  %v6368_v45 = vld [vmem:[%s4757_s30 + $0x89] sm:$0xff]  ;;  %2989 = vmatpush.msrb.mxu2 %v2976_v22  ;;  %v1229_v2 = vmul.f32 %v7442_v3, %v4784_v14 }
 0x24c   : > { %7482 = vst [vmem:[#allocation62_spill] sm:$0xff] %v6368_v45  ;;  %v6371_v30 = vld [vmem:[%s4757_s30 + $0xaa] sm:$0xff]  ;;  %v1652_v43 = vadd.f32 %v1636_v21, %v1601_v57  ;;  %v1687_v20 = vmul.f32 %v6368_v45, %v4878_v62  ;;  %v1194_v44 = vadd.f32 %v1178_v50, %v1143_v17  ;;  %v2145_v27 = vmul.f32 %v7484_v39, %v7450_v49 }
 0x24d   : > { %7483 = vst [vmem:[#allocation51_spill] sm:$0xff] %v6371_v30  ;;  %v2568_v24 = vadd.f32 %v2552_v48, %v2517_v28  ;;  %v2654_v12 = vmul.f32 %v6371_v30, %v7262_v29  ;;  %v2110_v54 = vadd.f32 %v2094_v4, %v2059_v1  ;;  %v2974_v57 = vld [vmem:[%s6769_s8 + $0x48] sm:$0xff]  ;;  %2990 = vmatpush.msrb.mxu2 %v2975_v6  ;;  %v7487_v22 = vld [vmem:[#allocation36_spill] sm:$0xff] }
 0x24e   : > { %v6385_v21 = vld [vmem:[%s4757_s30 + $0x8a] sm:$0xff]  ;;  %v1703_v3 = vadd.f32 %v1687_v20, %v1652_v43  ;;  %v1245_v50 = vadd.f32 %v1229_v2, %v1194_v44  ;;  %v1280_v28 = vmul.f32 %v7446_v33, %v7144_v32  ;;  %v2196_v30 = vmul.f32 %v7487_v22, %v7166_v13 }
 0x24f   : > { %7485 = vst [vmem:[#allocation54_spill] sm:$0xff] %v6385_v21  ;;  %v6388_v17 = vld [vmem:[%s4757_s30 + $0xab] sm:$0xff]  ;;  %v1738_v48 = vmul.f32 %v6385_v21, %v4899_v31  ;;  %v2619_v1 = vadd.f32 %v2603_v9, %v2568_v24  ;;  %v2161_v4 = vadd.f32 %v2145_v27, %v2110_v54  ;;  %2991 = vmatpush.msrb.mxu2 %v2974_v57  ;;  %v7490_v9 = vld [vmem:[#allocation58_spill] sm:$0xff] }
 0x250   : > { %7486 = vst [vmem:[#allocation22_spill] sm:$0xff] %v6388_v17  ;;  %v2705_v39 = vmul.f32 %v6388_v17, %v7232_v52  ;;  %v6399_v45 = vld [vmem:[%s4757_s30 + $0x8b] sm:$0xff]  ;;  %v1296_v33 = vadd.f32 %v1280_v28, %v1245_v50  ;;  %v1331_v44 = vmul.f32 %v7490_v9, %v7149_v59  ;;  %v7491_v54 = vld [vmem:[#allocation10_spill] sm:$0xff] }
 0x251   : > { %7488 = vst [vmem:[#allocation5_spill] sm:$0xff] %v6399_v45  ;;  %v6402_v6 = vld [vmem:[%s4757_s30 + $0xac] sm:$0xff]  ;;  %v1754_v43 = vadd.f32 %v1738_v48, %v1703_v3  ;;  %v1789_v20 = vmul.f32 %v6399_v45, %v7328_v42  ;;  %v2670_v2 = vadd.f32 %v2654_v12, %v2619_v1  ;;  %v2212_v24 = vadd.f32 %v2196_v30, %v2161_v4 }
 0x252   : > { %7489 = vst [vmem:[#allocation55_spill] sm:$0xff] %v6402_v6  ;;  %v2756_v27 = vmul.f32 %v6402_v6, %v5205_v40  ;;  %v2247_v22 = vmul.f32 %v7491_v54, %v7395_v38  ;;  %v6413_v17 = vld [vmem:[%s4757_s30 + $0x8c] sm:$0xff]  ;;  %v1347_v50 = vadd.f32 %v1331_v44, %v1296_v33 }
 0x253   : > { %7492 = vst [vmem:[#allocation7_spill] sm:$0xff] %v6413_v17  ;;  %v6416_v57 = vld [vmem:[%s4757_s30 + $0xad] sm:$0xff]  ;;  %v1805_v3 = vadd.f32 %v1789_v20, %v1754_v43  ;;  %v1840_v48 = vmul.f32 %v6413_v17, %v7367_v8  ;;  %v2721_v12 = vadd.f32 %v2705_v39, %v2670_v2  ;;  %v7500_v17 = vld [vmem:[#allocation37_spill] sm:$0xff] }
 0x254   : > { %7493 = vst [vmem:[#allocation56_spill] sm:$0xff] %v6416_v57  ;;  %v7494_v28 = vld [vmem:[#allocation15_spill] sm:$0xff]  ;;  %v2807_v1 = vmul.f32 %v6416_v57, %v5216_v0  ;;  %v2263_v30 = vadd.f32 %v2247_v22, %v2212_v24  ;;  %v7498_v33 = vld [vmem:[#allocation16_spill] sm:$0xff]  ;;  %v7501_v24 = vld [vmem:[#allocation41_spill] sm:$0xff] }
 0x255   : > { %v1382_v9 = vmul.f32 %v7494_v28, %v7153_v11  ;;  %v7495_v4 = vld [vmem:[#allocation39_spill] sm:$0xff]  ;;  %v1856_v21 = vadd.f32 %v1840_v48, %v1805_v3  ;;  %v1433_v44 = vmul.f32 %v7498_v33, %v7158_v36  ;;  %v2772_v28 = vadd.f32 %v2756_v27, %v2721_v12  ;;  %v7499_v2 = vld [vmem:[#allocation40_spill] sm:$0xff]  ;;  %v7504_v27 = vld [vmem:[#allocation61_spill] sm:$0xff] }
 0x256   : > { %v7496_v6 = vld [vmem:[#allocation59_spill] sm:$0xff]  ;;  %v2349_v57 = vmul.f32 %v7500_v17, %v7499_v2  ;;  %v2400_v22 = vmul.f32 %v7501_v24, %v5085_v55  ;;  %v7505_v12 = vld [vmem:[#allocation38_spill] sm:$0xff] }
 0x257   : > { %v2298_v45 = vmul.f32 %v7496_v6, %v7495_v4  ;;  %v6427_v54 = vld [vmem:[%s4757_s30 + $0x8d] sm:$0xff]  ;;  %v1398_v20 = vadd.f32 %v1382_v9, %v1347_v50  ;;  %v2823_v9 = vadd.f32 %v2807_v1, %v2772_v28  ;;  %v7509_v28 = vld [vmem:[#allocation42_spill] sm:$0xff] }
 0x258   : > { %7497 = vst [vmem:[#allocation8_spill] sm:$0xff] %v6427_v54  ;;  %v1891_v43 = vmul.f32 %v6427_v54, %v4931_v51  ;;  %v7502_v0 = vld [vmem:[#allocation31_spill] sm:$0xff]  ;;  %v7503_v54 = vld [vmem:[#allocation60_spill] sm:$0xff] }
 0x259   : > { %v2314_v39 = vadd.f32 %v2298_v45, %v2263_v30  ;;  %v1942_v3 = vmul.f32 %v7502_v0, %v7189_v34  ;;  %v1449_v48 = vadd.f32 %v1433_v44, %v1398_v20  ;;  %v1484_v50 = vmul.f32 %v7503_v54, %v4829_v7  ;;  %v7507_v20 = vld [vmem:[#allocation26_spill] sm:$0xff]  ;;  %2893 = vmatmul.f32.gmra.mxu1 %v2823_v9  ;;  %v6462_v9 = vld [vmem:[%s4757_s30 + $0xb0] sm:$0xff] }
 0x25a   : > { %v1907_v6 = vadd.f32 %v1891_v43, %v1856_v21  ;;  %v1993_v45 = vmul.f32 %v7504_v27, %v7195_v47  ;;  %v1535_v30 = vmul.f32 %v7505_v12, %v4839_v23  ;;  %v3611_v21 = vld [vmem:[%s4757_s30 + $0x90] sm:$0xff]  ;;  %v1077_v44 = vmul.f32 %v7507_v20, %v4764_v61 }
 0x25b   : > { %v2365_v51 = vadd.f32 %v2349_v57, %v2314_v39  ;;  %v1500_v17 = vadd.f32 %v1484_v50, %v1449_v48  ;;  %v7506_v43 = vld [vmem:[#allocation48_spill] sm:$0xff]  ;;  %v7508_v57 = vld [vmem:[#allocation3_spill] sm:$0xff]  ;;  %v2044_v39 = vmul.f32 %v7509_v28, %v7255_v63  ;;  %v1637_v28 = vmul.f32 %v3611_v21, %v4866_v37 }
 0x25c   : > { %v1958_v33 = vadd.f32 %v1942_v3, %v1907_v6  ;;  %v1026_v0 = vmul.f32 %v7506_v43, %v4762_v60  ;;  %v2451_v1 = vmul.f32 %v7508_v57, %v5087_v53  ;;  %v1586_v6 = vmul.f32 %v6312_v26, %v7168_v58  ;;  %v3628_v50 = vld [vmem:[%s4757_s30 + $0x91] sm:$0xff] }
 0x25d   : > { %v2416_v54 = vadd.f32 %v2400_v22, %v2365_v51  ;;  %v1551_v48 = vadd.f32 %v1535_v30, %v1500_v17  ;;  %v7510_v60 = vld [vmem:[#allocation32_spill] sm:$0xff]  ;;  %v7511_v51 = vld [vmem:[#allocation18_spill] sm:$0xff]  ;;  %v7512_v43 = vld [vmem:[#allocation49_spill] sm:$0xff]  ;;  %v2553_v21 = vmul.f32 %v6462_v9, %v7253_v56 }
 0x25e   : > { %v2009_v3 = vadd.f32 %v1993_v45, %v1958_v33  ;;  %v1093_v27 = vadd.f32 %v1077_v44, %v1026_v0  ;;  %v1128_v12 = vmul.f32 %v7510_v60, %v4766_v19  ;;  %v2502_v22 = vmul.f32 %v7511_v51, %v5092_v46  ;;  %v2973_v17 = vld [vmem:[%s6769_s8 + $0x40] sm:$0xff]  ;;  %v2972_v19 = vld [vmem:[%s6769_s8 + $0x38] sm:$0xff] }
 0x25f   : > { %v2467_v61 = vadd.f32 %v2451_v1, %v2416_v54  ;;  %v2095_v20 = vmul.f32 %v7512_v43, %v7205_v41  ;;  %v1602_v45 = vadd.f32 %v1586_v6, %v1551_v48  ;;  %v3645_v30 = vld [vmem:[%s4757_s30 + $0x92] sm:$0xff]  ;;  %v1179_v0 = vmul.f32 %v7471_v18, %v4777_v5  ;;  %v7513_v54 = vld [vmem:[#allocation50_spill] sm:$0xff]  ;;  %2992 = vmatpush.msrb.mxu2 %v2973_v17 }
 0x260   : > { %v2060_v26 = vadd.f32 %v2044_v39, %v2009_v3  ;;  %v1144_v33 = vadd.f32 %v1128_v12, %v1093_v27  ;;  %v2146_v1 = vmul.f32 %v7513_v54, %v7450_v49  ;;  %v1688_v39 = vmul.f32 %v3628_v50, %v4878_v62  ;;  %v6482_v3 = vld [vmem:[%s4757_s30 + $0xb1] sm:$0xff] }
 0x261   : > { %v2518_v44 = vadd.f32 %v2502_v22, %v2467_v61  ;;  %v2971_v48 = vld [vmem:[%s6769_s8 + $0x30] sm:$0xff]  ;;  %v1653_v5 = vadd.f32 %v1637_v28, %v1602_v45  ;;  %v1230_v60 = vmul.f32 %v7473_v10, %v4784_v14  ;;  %v2604_v61 = vmul.f32 %v6482_v3, %v7258_v16  ;;  %2993 = vmatpush.msrb.mxu2 %v2972_v19 }
 0x262   : > { %v2111_v6 = vadd.f32 %v2095_v20, %v2060_v26  ;;  %v3662_v18 = vld [vmem:[%s4757_s30 + $0x93] sm:$0xff]  ;;  %v1195_v27 = vadd.f32 %v1179_v0, %v1144_v33  ;;  %v2197_v50 = vmul.f32 %v7476_v15, %v7166_v13  ;;  %v1739_v22 = vmul.f32 %v3645_v30, %v4899_v31 }
 0x263   : > { %v2569_v12 = vadd.f32 %v2553_v21, %v2518_v44  ;;  %v6496_v43 = vld [vmem:[%s4757_s30 + $0xb2] sm:$0xff]  ;;  %v1704_v28 = vadd.f32 %v1688_v39, %v1653_v5  ;;  %v1281_v14 = vmul.f32 %v6192_v25, %v7144_v32  ;;  %v2248_v15 = vmul.f32 %v6337_v35, %v7395_v38  ;;  %2994 = vmatpush.msrb.mxu2 %v2971_v48  ;;  %v7514_v32 = vld [vmem:[#allocation6_spill] sm:$0xff] }
 0x264   : > { %v2162_v20 = vadd.f32 %v2146_v1, %v2111_v6  ;;  %v3679_v26 = vld [vmem:[%s4757_s30 + $0x94] sm:$0xff]  ;;  %v1246_v17 = vadd.f32 %v1230_v60, %v1195_v27  ;;  %v2655_v45 = vmul.f32 %v6496_v43, %v7262_v29  ;;  %v1790_v19 = vmul.f32 %v3662_v18, %v7328_v42 }
 0x265   : > { %v2620_v10 = vadd.f32 %v2604_v61, %v2569_v12  ;;  %v6507_v30 = vld [vmem:[%s4757_s30 + $0xb3] sm:$0xff]  ;;  %v1755_v0 = vadd.f32 %v1739_v22, %v1704_v28  ;;  %v1332_v25 = vmul.f32 %v7514_v32, %v7149_v59  ;;  %v1841_v48 = vmul.f32 %v3679_v26, %v7367_v8  ;;  %v7516_v12 = vld [vmem:[#allocation62_spill] sm:$0xff]  ;;  %v7517_v22 = vld [vmem:[#allocation51_spill] sm:$0xff] }
 0x266   : > { %v2213_v33 = vadd.f32 %v2197_v50, %v2162_v20  ;;  %v3696_v44 = vld [vmem:[%s4757_s30 + $0x95] sm:$0xff]  ;;  %v1297_v21 = vadd.f32 %v1281_v14, %v1246_v17  ;;  %v2706_v1 = vmul.f32 %v6507_v30, %v7232_v52  ;;  %v1383_v61 = vmul.f32 %v7516_v12, %v7153_v11  ;;  %v7525_v12 = vld [vmem:[#allocation59_spill] sm:$0xff] }
 0x267   : > { %v2671_v54 = vadd.f32 %v2655_v45, %v2620_v10  ;;  %v7515_v39 = vld [vmem:[#allocation21_spill] sm:$0xff]  ;;  %v1806_v27 = vadd.f32 %v1790_v19, %v1755_v0  ;;  %v2350_v20 = vmul.f32 %v7517_v22, %v7499_v2  ;;  %v7518_v28 = vld [vmem:[#allocation12_spill] sm:$0xff]  ;;  %v7520_v0 = vld [vmem:[#allocation2_spill] sm:$0xff] }
 0x268   : > { %v2299_v6 = vmul.f32 %v7515_v39, %v7495_v4  ;;  %v6518_v5 = vld [vmem:[%s4757_s30 + $0xb4] sm:$0xff]  ;;  %v2264_v18 = vadd.f32 %v2248_v15, %v2213_v33  ;;  %v1348_v60 = vadd.f32 %v1332_v25, %v1297_v21  ;;  %v1892_v17 = vmul.f32 %v3696_v44, %v7518_v28  ;;  %v7519_v15 = vld [vmem:[#allocation54_spill] sm:$0xff] }
 0x269   : > { %v2722_v50 = vadd.f32 %v2706_v1, %v2671_v54  ;;  %v2757_v59 = vmul.f32 %v6518_v5, %v5205_v40  ;;  %v6528_v14 = vld [vmem:[%s4757_s30 + $0xb5] sm:$0xff]  ;;  %v1857_v10 = vadd.f32 %v1841_v48, %v1806_v27  ;;  %v1434_v19 = vmul.f32 %v7519_v15, %v7158_v36  ;;  %v7521_v21 = vld [vmem:[#allocation22_spill] sm:$0xff]  ;;  %v7524_v36 = vld [vmem:[#allocation55_spill] sm:$0xff] }
 0x26a   : > { %v2315_v26 = vadd.f32 %v2299_v6, %v2264_v18  ;;  %v1399_v45 = vadd.f32 %v1383_v61, %v1348_v60  ;;  %v2808_v11 = vmul.f32 %v6528_v14, %v7520_v0  ;;  %v2401_v32 = vmul.f32 %v7521_v21, %v5085_v55  ;;  %v7522_v25 = vld [vmem:[#allocation10_spill] sm:$0xff]  ;;  %v7523_v48 = vld [vmem:[#allocation5_spill] sm:$0xff] }
 0x26b   : > { %v2773_v33 = vadd.f32 %v2757_v59, %v2722_v50  ;;  %v1943_v54 = vmul.f32 %v7522_v25, %v7189_v34  ;;  %v1908_v1 = vadd.f32 %v1892_v17, %v1857_v10  ;;  %v1485_v18 = vmul.f32 %v7523_v48, %v4829_v7  ;;  %v7527_v17 = vld [vmem:[#allocation56_spill] sm:$0xff]  ;;  %v7528_v7 = vld [vmem:[#allocation37_spill] sm:$0xff] }
 0x26c   : > { %v2366_v44 = vadd.f32 %v2350_v20, %v2315_v26  ;;  %v1450_v6 = vadd.f32 %v1434_v19, %v1399_v45  ;;  %v2452_v60 = vmul.f32 %v7524_v36, %v5087_v53  ;;  %v1994_v61 = vmul.f32 %v7525_v12, %v7195_v47  ;;  %v7526_v20 = vld [vmem:[#allocation7_spill] sm:$0xff]  ;;  %v3612_v19 = vld [vmem:[%s4757_s30 + $0x98] sm:$0xff] }
 0x26d   : > { %v2824_v27 = vadd.f32 %v2808_v11, %v2773_v33  ;;  %v1959_v59 = vadd.f32 %v1943_v54, %v1908_v1  ;;  %v1536_v26 = vmul.f32 %v7526_v20, %v4839_v23  ;;  %v2503_v10 = vmul.f32 %v7527_v17, %v5092_v46  ;;  %v6552_v11 = vld [vmem:[%s4757_s30 + $0xb8] sm:$0xff]  ;;  %v7529_v54 = vld [vmem:[#allocation8_spill] sm:$0xff] }
 0x26e   : > { %v2417_v50 = vadd.f32 %v2401_v32, %v2366_v44  ;;  %v1501_v15 = vadd.f32 %v1485_v18, %v1450_v6  ;;  %v2045_v45 = vmul.f32 %v7528_v7, %v7255_v63  ;;  %v1587_v44 = vmul.f32 %v7529_v54, %v7168_v58  ;;  %v3629_v6 = vld [vmem:[%s4757_s30 + $0x99] sm:$0xff] }
 0x26f   : > { %2896 = vmatmul.f32.gmra.mxu1 %v2824_v27  ;;  %v2010_v25 = vadd.f32 %v1994_v61, %v1959_v59  ;;  %v2554_v23 = vmul.f32 %v6552_v11, %v7253_v56  ;;  %v2096_v1 = vmul.f32 %v7501_v24, %v7205_v41  ;;  %v6562_v18 = vld [vmem:[%s4757_s30 + $0xb9] sm:$0xff]  ;;  %v1638_v61 = vmul.f32 %v3612_v19, %v4866_v37 }
 0x270   : > { %v2468_v33 = vadd.f32 %v2452_v60, %v2417_v50  ;;  %v1552_v32 = vadd.f32 %v1536_v26, %v1501_v15  ;;  %v2970_v60 = vld [vmem:[%s6769_s8 + $0x28] sm:$0xff]  ;;  %v2969_v58 = vld [vmem:[%s6769_s8 + $0x20] sm:$0xff]  ;;  %v2605_v24 = vmul.f32 %v6562_v18, %v7258_v16  ;;  %v2147_v50 = vmul.f32 %v7508_v57, %v7450_v49 }
 0x271   : > { %v2061_v27 = vadd.f32 %v2045_v45, %v2010_v25  ;;  %2995 = vmatpush.msrb.mxu2 %v2970_v60  ;;  %v3646_v59 = vld [vmem:[%s4757_s30 + $0x9a] sm:$0xff]  ;;  %v1689_v7 = vmul.f32 %v3629_v6, %v4878_v62  ;;  %v2198_v45 = vmul.f32 %v7511_v51, %v7166_v13 }
 0x272   : > { %v2519_v48 = vadd.f32 %v2503_v10, %v2468_v33  ;;  %v1603_v12 = vadd.f32 %v1587_v44, %v1552_v32  ;;  %v6577_v20 = vld [vmem:[%s4757_s30 + $0xba] sm:$0xff]  ;;  %v1740_v54 = vmul.f32 %v3646_v59, %v4899_v31  ;;  %v2249_v44 = vmul.f32 %v6462_v9, %v7395_v38 }
 0x273   : > { %v2112_v26 = vadd.f32 %v2096_v1, %v2061_v27  ;;  %v2656_v37 = vmul.f32 %v6577_v20, %v7262_v29  ;;  %2996 = vmatpush.msrb.mxu2 %v2969_v58  ;;  %v3663_v19 = vld [vmem:[%s4757_s30 + $0x9b] sm:$0xff]  ;;  %v2300_v31 = vmul.f32 %v6482_v3, %v7495_v4 }
 0x274   : > { %v2570_v15 = vadd.f32 %v2554_v23, %v2519_v48  ;;  %v1654_v10 = vadd.f32 %v1638_v61, %v1603_v12  ;;  %v6586_v33 = vld [vmem:[%s4757_s30 + $0xbb] sm:$0xff]  ;;  %v1791_v27 = vmul.f32 %v3663_v19, %v7328_v42  ;;  %v2351_v42 = vmul.f32 %v6496_v43, %v7499_v2 }
 0x275   : > { %v2163_v25 = vadd.f32 %v2147_v50, %v2112_v26  ;;  %v2707_v62 = vmul.f32 %v6586_v33, %v7232_v52  ;;  %v3680_v23 = vld [vmem:[%s4757_s30 + $0x9c] sm:$0xff]  ;;  %v1944_v19 = vmul.f32 %v6337_v35, %v7189_v34  ;;  %v2453_v43 = vmul.f32 %v6518_v5, %v5087_v53 }
 0x276   : > { %v2621_v57 = vadd.f32 %v2605_v24, %v2570_v15  ;;  %v1705_v32 = vadd.f32 %v1689_v7, %v1654_v10  ;;  %v6595_v51 = vld [vmem:[%s4757_s30 + $0xbc] sm:$0xff]  ;;  %v1842_v50 = vmul.f32 %v3680_v23, %v7367_v8  ;;  %v2402_v7 = vmul.f32 %v6507_v30, %v5085_v55 }
 0x277   : > { %v2214_v6 = vadd.f32 %v2198_v45, %v2163_v25  ;;  %v2758_v60 = vmul.f32 %v6595_v51, %v5205_v40  ;;  %v3697_v58 = vld [vmem:[%s4757_s30 + $0x9d] sm:$0xff]  ;;  %v2504_v30 = vmul.f32 %v6528_v14, %v5092_v46  ;;  %v2046_v34 = vmul.f32 %v7517_v22, %v7255_v63  ;;  %v2861_v14 = vpop.f32.mrf.mxu1 }
 0x278   : > { %v2672_v1 = vadd.f32 %v2656_v37, %v2621_v57  ;;  %v1756_v48 = vadd.f32 %v1740_v54, %v1705_v32  ;;  %v6604_v61 = vld [vmem:[%s4757_s30 + $0xbd] sm:$0xff]  ;;  %v1893_v3 = vmul.f32 %v3697_v58, %v7518_v28  ;;  %v1995_v32 = vmul.f32 %v7515_v39, %v7195_v47  ;;  %v2967_v39 = vld [vmem:[%s6769_s8 + $0x10] sm:$0xff]  ;;  %v2966_v58 = vld [vmem:[%s6769_s8 + $0x8] sm:$0xff] }
 0x279   : > { %v2265_v24 = vadd.f32 %v2249_v44, %v2214_v6  ;;  %v2809_v59 = vmul.f32 %v6604_v61, %v7520_v0  ;;  %v3917_v28 = vld [vmem:[%s4757_s30 + $0xc0] sm:$0xff]  ;;  %v2097_v6 = vmul.f32 %v7521_v21, %v7205_v41  ;;  %v2968_v47 = vld [vmem:[%s6769_s8 + $0x18] sm:$0xff] }
 0x27a   : > { %v2723_v12 = vadd.f32 %v2707_v62, %v2672_v1  ;;  %v1807_v9 = vadd.f32 %v1791_v27, %v1756_v48  ;;  %v3934_v62 = vld [vmem:[%s4757_s30 + $0xc1] sm:$0xff]  ;;  %v2555_v1 = vmul.f32 %v3917_v28, %v7253_v56  ;;  %v6639_v63 = vld [vmem:[%s6767_s6] ss:$0 sm:$0xff]  ;;  %2997 = vmatpush.msrb.mxu2 %v2968_v47 }
 0x27b   : > { %v2316_v26 = vadd.f32 %v2300_v31, %v2265_v24  ;;  %v3951_v35 = vld [vmem:[%s4757_s30 + $0xc2] sm:$0xff]  ;;  %v2606_v22 = vmul.f32 %v3934_v62, %v7258_v16  ;;  %v6645_v41 = vld [vmem:[%s6768_s7] ss:$0 sm:$0xff]  ;;  %v2913_v31 = vmul.f32 %v6639_v63, %v2861_v14 }
 0x27c   : > { %v2774_v15 = vadd.f32 %v2758_v60, %v2723_v12  ;;  %v1858_v10 = vadd.f32 %v1842_v50, %v1807_v9  ;;  %v3968_v48 = vld [vmem:[%s4757_s30 + $0xc3] sm:$0xff]  ;;  %v2148_v60 = vmul.f32 %v7524_v36, %v7450_v49  ;;  %v2657_v12 = vmul.f32 %v3951_v35, %v7262_v29  ;;  %2998 = vmatpush.msrb.mxu2 %v2967_v39 }
 0x27d   : > { %v2367_v45 = vadd.f32 %v2351_v42, %v2316_v26  ;;  %v2199_v50 = vmul.f32 %v7527_v17, %v7166_v13  ;;  %v2965_v49 = vld [vmem:[%s6769_s8] sm:$0xff]  ;;  %v2708_v36 = vmul.f32 %v3968_v48, %v7232_v52  ;;  %v3918_v62 = vld [vmem:[%s4757_s30 + $0xc8] sm:$0xff] }
 0x27e   : > { %v2825_v37 = vadd.f32 %v2809_v59, %v2774_v15  ;;  %v1909_v8 = vadd.f32 %v1893_v3, %v1858_v10  ;;  %v2933_v59 = vadd.f32 %v6645_v41, %v2913_v31  ;;  %v3985_v42 = vld [vmem:[%s4757_s30 + $0xc4] sm:$0xff]  ;;  %2999 = vmatpush.msrb.mxu2 %v2966_v58  ;;  %v2250_v10 = vmul.f32 %v6552_v11, %v7395_v38 }
 0x27f   : > { %v2418_v57 = vadd.f32 %v2402_v7, %v2367_v45  ;;  %v4002_v7 = vld [vmem:[%s4757_s30 + $0xc5] sm:$0xff]  ;;  %v2759_v13 = vmul.f32 %v3985_v42, %v5205_v40  ;;  %v2301_v45 = vmul.f32 %v6562_v18, %v7495_v4  ;;  %v2352_v11 = vmul.f32 %v6577_v20, %v7499_v2 }
 0x280   : > { %2899 = vmatmul.f32.gmra.mxu1 %v2825_v37  ;;  %v1960_v25 = vadd.f32 %v1944_v19, %v1909_v8  ;;  %v2949_v3 = vmax.f32 %v2933_v59, 0.0  ;;  %3000 = vmatpush.msrb.mxu2 %v2965_v49  ;;  %v2864_v8 = vpop.f32.mrf.mxu1  ;;  %v2403_v4 = vmul.f32 %v6586_v33, %v5085_v55  ;;  %v2505_v2 = vmul.f32 %v6604_v61, %v5092_v46  ;;  %v3986_v61 = vld [vmem:[%s4757_s30 + $0xcc] sm:$0xff] }
 0x281   : > { %v2469_v54 = vadd.f32 %v2453_v43, %v2418_v57  ;;  %v2914_v19 = vmul.f32 %v6639_v63, %v2864_v8  ;;  %v2810_v43 = vmul.f32 %v4002_v7, %v7520_v0  ;;  %v2556_v33 = vmul.f32 %v3918_v62, %v7253_v56 }
 0x282   : > { %v2011_v44 = vadd.f32 %v1995_v32, %v1960_v25  ;;  %3001 = vmatmul.f32.vlgmr.msrb.gmra.mxu2 %v2949_v3 }
 0x283   : > { %v2520_v23 = vadd.f32 %v2504_v30, %v2469_v54  ;;  %v2934_v25 = vadd.f32 %v6645_v41, %v2914_v19  ;;  %v2454_v30 = vmul.f32 %v6595_v51, %v5087_v53  ;;  %v3969_v51 = vld [vmem:[%s4757_s30 + $0xcb] sm:$0xff] }
 0x284   : > { %v2062_v5 = vadd.f32 %v2046_v34, %v2011_v44  ;;  %v3935_v34 = vld [vmem:[%s4757_s30 + $0xc9] sm:$0xff]  ;;  %v2709_v14 = vmul.f32 %v3969_v51, %v7232_v52 }
 0x285   : > { %v2571_v21 = vadd.f32 %v2555_v1, %v2520_v23  ;;  %v2950_v18 = vmax.f32 %v2934_v25, 0.0  ;;  %v3952_v23 = vld [vmem:[%s4757_s30 + $0xca] sm:$0xff]  ;;  %v2607_v53 = vmul.f32 %v3935_v34, %v7258_v16 }
 0x286   : > { %v2113_v27 = vadd.f32 %v2097_v6, %v2062_v5  ;;  %v2658_v46 = vmul.f32 %v3952_v23, %v7262_v29 }
 0x287   : > { %v2622_v24 = vadd.f32 %v2606_v22, %v2571_v21  ;;  %v4003_v21 = vld [vmem:[%s4757_s30 + $0xcd] sm:$0xff]  ;;  %s3277_s30 = sshll.u32 %s4091_s13, 4 }
 0x288   : > { %v2164_v9 = vadd.f32 %v2148_v60, %v2113_v27  ;;  %v2867_v20 = vpop.f32.mrf.mxu1  ;;  %v2760_v27 = vmul.f32 %v3986_v61, %v5205_v40  ;;  %v2811_v31 = vmul.f32 %v4003_v21, %v7520_v0  ;;  %p396_p6 = scmp.lt.s32.totalorder %s3277_s30, 31 }
 0x289   : > { %v2673_v15 = vadd.f32 %v2657_v12, %v2622_v24  ;;  %v2915_v35 = vmul.f32 %v6639_v63, %v2867_v20 }
 0x28a   : > { %v2215_v26 = vadd.f32 %v2199_v50, %v2164_v9  ;;  %3004 = vmatmul.f32.gmra.mxu2 %v2950_v18  ;;  %s7543_s30 = smov (!%p396_p6, %s3277_s30), 31 }
 0x28b   : > { %v2724_v37 = vadd.f32 %v2708_v36, %v2673_v15  ;;  %v2935_v1 = vadd.f32 %v6645_v41, %v2915_v35  ;;  %s399_s26 = sadd.s32 %s3278_s25, %s7543_s30 }
 0x28c   : > { %v2266_v17 = vadd.f32 %v2250_v10, %v2215_v26  ;;  %s3279_s28 = sshll.u32 %s399_s26, 3 }
 0x28d   : > { %v2775_v57 = vadd.f32 %v2759_v13, %v2724_v37  ;;  %v2951_v6 = vmax.f32 %v2935_v1, 0.0  ;;  %s6724_s27 = scalar_lea.vmem %s6771_s10, %s3279_s28 }
 0x28e   : > { %v2317_v38 = vadd.f32 %v2301_v45, %v2266_v17 }
 0x28f   : > { %v2826_v32 = vadd.f32 %v2810_v43, %v2775_v57 }
 0x290   : > { %v2368_v28 = vadd.f32 %v2352_v11, %v2317_v38  ;;  %v2870_v22 = vpop.f32.mrf.mxu1 }
 0x291   : > { %2902 = vmatmul.f32.gmra.mxu1 %v2826_v32  ;;  %v2916_v56 = vmul.f32 %v6639_v63, %v2870_v22 }
 0x292   : > { %v2419_v54 = vadd.f32 %v2403_v4, %v2368_v28  ;;  %3007 = vmatmul.f32.gmra.mxu2 %v2951_v6 }
 0x293   : > { %v2936_v60 = vadd.f32 %v6645_v41, %v2916_v56 }
 0x294   : > { %v2470_v44 = vadd.f32 %v2454_v30, %v2419_v54 }
 0x295   : > { %v2952_v58 = vmax.f32 %v2936_v60, 0.0 }
 0x296   : > { %v2521_v55 = vadd.f32 %v2505_v2, %v2470_v44 }
 0x298   : > { %v2572_v5 = vadd.f32 %v2556_v33, %v2521_v55  ;;  %v2873_v29 = vpop.f32.mrf.mxu1  ;;  %v4068_v33 = vld [vmem:[%s6770_s9] ss:$0 sm:$0xff] }
 0x299   : > { %v2917_v52 = vmul.f32 %v6639_v63, %v2873_v29 }
 0x29a   : > { %v2623_v47 = vadd.f32 %v2607_v53, %v2572_v5  ;;  %3010 = vmatmul.f32.gmra.mxu2 %v2952_v58 }
 0x29b   : > { %v2937_v24 = vadd.f32 %v6645_v41, %v2917_v52 }
 0x29c   : > { %v2674_v39 = vadd.f32 %v2658_v46, %v2623_v47 }
 0x29d   : > { %v2953_v9 = vmax.f32 %v2937_v24, 0.0 }
 0x29e   : > { %v2725_v48 = vadd.f32 %v2709_v14, %v2674_v39 }
 0x2a0   : > { %v2776_v16 = vadd.f32 %v2760_v27, %v2725_v48  ;;  %v2876_v50 = vpop.f32.mrf.mxu1 }
 0x2a1   : > { %v2918_v59 = vmul.f32 %v6639_v63, %v2876_v50 }
 0x2a2   : > { %v2827_v12 = vadd.f32 %v2811_v31, %v2776_v16  ;;  %3013 = vmatmul.f32.gmra.mxu2 %v2953_v9 }
 0x2a3   : > { %v2938_v40 = vadd.f32 %v6645_v41, %v2918_v59 }
 0x2a4   : > { %2905 = vmatmul.f32.gmra.mxu1 %v2827_v12 }
 0x2a5   : > { %v2954_v49 = vmax.f32 %v2938_v40, 0.0 }
 0x2a8   : > { %v2879_v36 = vpop.f32.mrf.mxu1 }
 0x2a9   : > { %v2919_v0 = vmul.f32 %v6639_v63, %v2879_v36 }
 0x2aa   : > { %3016 = vmatmul.f32.gmra.mxu2 %v2954_v49 }
 0x2ab   : > { %v2939_v42 = vadd.f32 %v6645_v41, %v2919_v0 }
 0x2ad   : > { %v2955_v15 = vmax.f32 %v2939_v42, 0.0 }
 0x2b0   : > { %v2882_v26 = vpop.f32.mrf.mxu1 }
 0x2b1   : > { %v2920_v10 = vmul.f32 %v6639_v63, %v2882_v26 }
 0x2b2   : > { %3019 = vmatmul.f32.gmra.mxu2 %v2955_v15 }
 0x2b3   : > { %v2940_v3 = vadd.f32 %v6645_v41, %v2920_v10 }
 0x2b5   : > { %v2956_v7 = vmax.f32 %v2940_v3, 0.0 }
 0x2b8   : > { %v2885_v37 = vpop.f32.mrf.mxu1 }
 0x2b9   : > { %v2921_v13 = vmul.f32 %v6639_v63, %v2885_v37 }
 0x2ba   : > { %3022 = vmatmul.f32.gmra.mxu2 %v2956_v7 }
 0x2bb   : > { %v2941_v17 = vadd.f32 %v6645_v41, %v2921_v13 }
 0x2bd   : > { %v2957_v45 = vmax.f32 %v2941_v17, 0.0 }
 0x2c0   : > { %v2888_v8 = vpop.f32.mrf.mxu1 }
 0x2c1   : > { %v2922_v19 = vmul.f32 %v6639_v63, %v2888_v8 }
 0x2c2   : > { %3025 = vmatmul.f32.gmra.mxu2 %v2957_v45 }
 0x2c3   : > { %v2942_v57 = vadd.f32 %v6645_v41, %v2922_v19 }
 0x2c5   : > { %v2958_v43 = vmax.f32 %v2942_v57, 0.0 }
 0x2c8   : > { %v2891_v38 = vpop.f32.mrf.mxu1 }
 0x2c9   : > { %v2923_v11 = vmul.f32 %v6639_v63, %v2891_v38 }
 0x2ca   : > { %3028 = vmatmul.f32.gmra.mxu2 %v2958_v43 }
 0x2cb   : > { %v2943_v25 = vadd.f32 %v6645_v41, %v2923_v11 }
 0x2cd   : > { %v2959_v32 = vmax.f32 %v2943_v25, 0.0 }
 0x2d2   : > { %3031 = vmatmul.f32.gmra.mxu2 %v2959_v32 }
 0x2d6   : > { %v2894_v28 = vpop.f32.mrf.mxu1 }
 0x2d7   : > { %v2924_v4 = vmul.f32 %v6639_v63, %v2894_v28 }
 0x2d9   : > { %v2944_v18 = vadd.f32 %v6645_v41, %v2924_v4 }
 0x2db   : > { %v2960_v54 = vmax.f32 %v2944_v18, 0.0 }
 0x2dd   : > { %3034 = vmatmul.f32.gmra.mxu2 %v2960_v54 }
 0x2ec   : > { %v2897_v30 = vpop.f32.mrf.mxu1 }
 0x2ed   : > { %v2925_v62 = vmul.f32 %v6639_v63, %v2897_v30 }
 0x2ef   : > { %v2945_v44 = vadd.f32 %v6645_v41, %v2925_v62 }
 0x2f1   : > { %v2961_v2 = vmax.f32 %v2945_v44, 0.0 }
 0x2f3   : > { %3037 = vmatmul.f32.gmra.mxu2 %v2961_v2 }
 0x2fd   : > { %v2900_v20 = vpop.f32.mrf.mxu1 }
 0x2fe   : > { %v2926_v34 = vmul.f32 %v6639_v63, %v2900_v20 }
 0x300   : > { %v2946_v35 = vadd.f32 %v6645_v41, %v2926_v34 }
 0x302   : > { %v2962_v55 = vmax.f32 %v2946_v35, 0.0 }
 0x304   : > { %3040 = vmatmul.f32.gmra.mxu2 %v2962_v55 }
 0x305   : > { %v3002_v1 = vpop.f32.mrf.mxu2 }
 0x306   : > { %v3003_v53 = vadd.f32 %v4068_v33, %v3002_v1 }
 0x308   : > { %3050 = vst [vmem:[%s6724_s27] sm:$0xff] %v3003_v53 }
 0x30d   : > { %v3005_v47 = vpop.f32.mrf.mxu2 }
 0x30e   : > { %v2903_v23 = vpop.f32.mrf.mxu1  ;;  %v3006_v46 = vadd.f32 %v4068_v33, %v3005_v47 }
 0x30f   : > { %v2927_v5 = vmul.f32 %v6639_v63, %v2903_v23 }
 0x310   : > { %3051 = vst [vmem:[%s6724_s27 + $0x8] sm:$0xff] %v3006_v46 }
 0x311   : > { %v2947_v51 = vadd.f32 %v6645_v41, %v2927_v5 }
 0x313   : > { %v2963_v6 = vmax.f32 %v2947_v51, 0.0 }
 0x315   : > { %3043 = vmatmul.f32.gmra.mxu2 %v2963_v6  ;;  %v3008_v61 = vpop.f32.mrf.mxu2 }
 0x316   : > { %v3009_v39 = vadd.f32 %v4068_v33, %v3008_v61 }
 0x318   : > { %3052 = vst [vmem:[%s6724_s27 + $0x10] sm:$0xff] %v3009_v39 }
 0x31d   : > { %v3011_v48 = vpop.f32.mrf.mxu2 }
 0x31e   : > { %v3012_v27 = vadd.f32 %v4068_v33, %v3011_v48 }
 0x320   : > { %3053 = vst [vmem:[%s6724_s27 + $0x18] sm:$0xff] %v3012_v27 }
 0x321   : > { %v2906_v14 = vpop.f32.mrf.mxu1 }
 0x322   : > { %v2928_v22 = vmul.f32 %v6639_v63, %v2906_v14 }
 0x324   : > { %v2948_v21 = vadd.f32 %v6645_v41, %v2928_v22 }
 0x325   : > { %v3014_v60 = vpop.f32.mrf.mxu2 }
 0x326   : > { %v2964_v56 = vmax.f32 %v2948_v21, 0.0  ;;  %v3015_v16 = vadd.f32 %v4068_v33, %v3014_v60 }
 0x328   : > { %3046 = vmatmul.f32.gmra.mxu2 %v2964_v56  ;;  %3054 = vst [vmem:[%s6724_s27 + $0x20] sm:$0xff] %v3015_v16 }
 0x32d   : > { %v3017_v31 = vpop.f32.mrf.mxu2 }
 0x32e   : > { %v3018_v58 = vadd.f32 %v4068_v33, %v3017_v31 }
 0x330   : > { %3055 = vst [vmem:[%s6724_s27 + $0x28] sm:$0xff] %v3018_v58 }
 0x335   : > { %v3020_v63 = vpop.f32.mrf.mxu2 }
 0x336   : > { %v3021_v12 = vadd.f32 %v4068_v33, %v3020_v63 }
 0x338   : > { %3056 = vst [vmem:[%s6724_s27 + $0x30] sm:$0xff] %v3021_v12 }
 0x33d   : > { %v3023_v41 = vpop.f32.mrf.mxu2 }
 0x33e   : > { %v3024_v29 = vadd.f32 %v4068_v33, %v3023_v41 }
 0x340   : > { %3057 = vst [vmem:[%s6724_s27 + $0x38] sm:$0xff] %v3024_v29 }
 0x345   : > { %v3026_v52 = vpop.f32.mrf.mxu2 }
 0x346   : > { %v3027_v24 = vadd.f32 %v4068_v33, %v3026_v52 }
 0x348   : > { %3058 = vst [vmem:[%s6724_s27 + $0x40] sm:$0xff] %v3027_v24 }
 0x34d   : > { %v3029_v9 = vpop.f32.mrf.mxu2 }
 0x34e   : > { %v3030_v50 = vadd.f32 %v4068_v33, %v3029_v9 }
 0x350   : > { %3059 = vst [vmem:[%s6724_s27 + $0x48] sm:$0xff] %v3030_v50 }
 0x355   : > { %v3032_v59 = vpop.f32.mrf.mxu2 }
 0x356   : > { %v3033_v40 = vadd.f32 %v4068_v33, %v3032_v59 }
 0x358   : > { %3060 = vst [vmem:[%s6724_s27 + $0x50] sm:$0xff] %v3033_v40 }
 0x360   : > { %v3035_v49 = vpop.f32.mrf.mxu2 }
 0x361   : > { %v3036_v36 = vadd.f32 %v4068_v33, %v3035_v49 }
 0x363   : > { %3061 = vst [vmem:[%s6724_s27 + $0x58] sm:$0xff] %v3036_v36 }
 0x376   : > { %v3038_v0 = vpop.f32.mrf.mxu2 }
 0x377   : > { %v3039_v42 = vadd.f32 %v4068_v33, %v3038_v0 }
 0x379   : > { %3062 = vst [vmem:[%s6724_s27 + $0x60] sm:$0xff] %v3039_v42 }
 0x387   : > { %v3041_v15 = vpop.f32.mrf.mxu2 }
 0x388   : > { %v3042_v26 = vadd.f32 %v4068_v33, %v3041_v15 }
 0x38a   : > { %3063 = vst [vmem:[%s6724_s27 + $0x68] sm:$0xff] %v3042_v26 }
 0x398   : > { %v3044_v10 = vpop.f32.mrf.mxu2 }
 0x399   : > { %v3045_v3 = vadd.f32 %v4068_v33, %v3044_v10 }
 0x39b   : > { %3064 = vst [vmem:[%s6724_s27 + $0x70] sm:$0xff] %v3045_v3 }
 0x3ab   : > { %v3047_v7 = vpop.f32.mrf.mxu2 }
 0x3ac   : > { %v3048_v37 = vadd.f32 %v4068_v33, %v3047_v7 }
 0x3ae   : > { %3065 = vst [vmem:[%s6724_s27 + $0x78] sm:$0xff] %v3048_v37 }
 0x3af PF: > { %s20_s17 = sadd.s32 1, %s4107_s17   ;;  %s7530_s13 = smov %s4099_s15 }
 0x3b0   : > { %p17_p7 = scmp.ge.s32.totalorder %s20_s17, 6   ;;  %s7531_s14 = smov %s4103_s16 }
 0x3b1   : > { %s7532_s15 = smov %s7535_s18  ;;  %s7533_s16 = smov %s7539_s19 }
 0x3b2   :  { %19 = sbr.rel (!%p17_p7) target bundleno = 3 (0x3), region = 137 }

</bundles_post_ra>
